<compile_context>
chip_gen: v5e
topology: v5e:2x2
jax: 0.10.0
libtpu: 0.0.40
codegen_flags: <defaults>
</compile_context>

<pallas_src>
import functools

import jax
import jax.numpy as jnp
from jax import lax
from jax.experimental import pallas as pl
from jax.experimental.pallas import tpu as pltpu


# ---------------- hyper-parameters (args.*) ----------------
class Args:
    num_nodes = 16
    hidden_size = 32
    lag = 8
    horizon = 4
    d_model = 16
    d_model_spat = 32
    d_model_temp = 32
    head = 4
    only_spat = False


args = Args()
INPUT_DIM = 3
NUM_LAYER = 3
NEG = -1e30


# ---------------- BlockSpec helpers ----------------
def _rep_spec(a):
    """Whole-array block, replicated across the (batch-block) grid."""
    nd = a.ndim
    return pl.BlockSpec(tuple(a.shape), lambda i: (0,) * nd)


# ---------------- fused spatial / temporal ST-GAT path ----------------
def _st_path_kernel(x_ref, mask_ref, wt_ref, bt_ref, psrc_ref, pdst_ref,
                    wv_ref, binv_ref, o_ref):
    # TODO(synk): GAT source not provided; standard dense multi-head GAT
    # (LeakyReLU(0.2) attention, softmax over neighbors, concat heads), value
    # and output (InverseTrans) projections algebraically folded host-side.
    x = x_ref[...]                                               # (R, F_in) f32
    mask = mask_ref[0]                                           # (R, R) additive, 0 / -1e30
    h0 = jnp.dot(x.astype(jnp.bfloat16), wt_ref[...],
                 preferred_element_type=jnp.float32) + bt_ref[...]   # (R, F_att)
    h0b = h0.astype(jnp.bfloat16)

    # attention scores for all heads: (R, H) and (H, R) -- direct matmuls,
    # no transposes needed in-kernel.
    e_src = jnp.dot(h0b, psrc_ref[...],
                    preferred_element_type=jnp.float32)          # (R, H)
    e_dst_t = lax.dot_general(pdst_ref[...], h0b,
                              (((0,), (1,)), ((), ())),
                              preferred_element_type=jnp.float32)    # (H, R)

    num_heads = psrc_ref.shape[1]
    acc = jnp.zeros(o_ref.shape, jnp.float32)                    # (R, F_out)
    for h in range(num_heads):
        lg = e_src[:, h:h + 1] + e_dst_t[h:h + 1, :]             # (R, R) broadcast
        lg = jnp.maximum(lg, 0.2 * lg)                           # LeakyReLU(0.2), f32
        lg = lg + mask                                           # block-diag edge mask
        lg = lg - jnp.max(lg, axis=-1, keepdims=True)
        p = jnp.exp(lg)
        denom = jnp.sum(p, axis=-1, keepdims=True)
        alpha = p * pl.reciprocal(denom, approx=True)            # softmax / row (f32)
        v_h = jnp.dot(h0b, wv_ref[h],
                      preferred_element_type=jnp.float32)        # (R, F_out), lane-dense
        acc = acc + jnp.dot(alpha.astype(jnp.bfloat16), v_h.astype(jnp.bfloat16),
                            preferred_element_type=jnp.float32)
    o_ref[...] = acc + binv_ref[...]


def st_path(x_flat, mask_blocks, path_params, rows_per_block, out_dim):
    """Fused Trans -> GAT -> InverseTrans over flattened (B*M, F_in) rows.

    Grid is over batch blocks; attention is block-diagonal over the batch via
    the precomputed additive mask.
    """
    wt, bt, psrc, pdst, wv, binv = path_params
    total_rows, f_in = x_flat.shape
    num_blocks = mask_blocks.shape[0]
    R = rows_per_block
    weights = (wt, bt, psrc, pdst, wv, binv)
    in_specs = ([pl.BlockSpec((R, f_in), lambda i: (i, 0)),
                 pl.BlockSpec((1, R, R), lambda i: (i, 0, 0))]
                + [_rep_spec(w) for w in weights])
    return pl.pallas_call(
        _st_path_kernel,
        out_shape=jax.ShapeDtypeStruct((total_rows, out_dim), jnp.float32),
        grid=(num_blocks,),
        in_specs=in_specs,
        out_specs=pl.BlockSpec((R, out_dim), lambda i: (i, 0)),
        compiler_params=pltpu.CompilerParams(dimension_semantics=("parallel",)),
    )(x_flat, mask_blocks, *weights)


# ---------------- fused head: embeddings + encoder + regression + proj ----------------
def _head_kernel(raw_ref, tx_ref, static_ref,
                 wtsc_ref, btsc_ref, wts_ref, bts_ref,
                 ew1_ref, eb1_ref, ew2_ref, eb2_ref,
                 wreg_ref, breg_ref, bns_ref, bnb_ref, wc_ref, bc_ref,
                 pred_ref, rep_ref):
    raw = raw_ref[...].astype(jnp.bfloat16)                      # (R, L*3)
    tx = tx_ref[...].astype(jnp.bfloat16)                        # (R, L*D)
    # ts_emb on raw history (start_fc folded into wtsc) and on ST-GAT output
    ts_res = jnp.dot(raw, wtsc_ref[...],
                     preferred_element_type=jnp.float32) + btsc_ref[...]
    ts_temp = jnp.dot(tx, wts_ref[...],
                      preferred_element_type=jnp.float32) + bts_ref[...]
    hidden = jnp.concatenate([ts_res, ts_temp, static_ref[...]], axis=-1)  # (R, 160)

    num_layer = ew1_ref.shape[0]
    for i in range(num_layer):
        # TODO(synk): MLP_res source not provided; Conv1x1 -> ReLU -> Conv1x1 +
        # residual (dropout omitted, eval mode).
        hb = hidden.astype(jnp.bfloat16)
        h1 = jnp.maximum(
            jnp.dot(hb, ew1_ref[i], preferred_element_type=jnp.float32)
            + eb1_ref[i], 0.0)
        hidden = (jnp.dot(h1.astype(jnp.bfloat16), ew2_ref[i],
                          preferred_element_type=jnp.float32)
                  + eb2_ref[i] + hidden)

    # regression head (Conv2d 1x1: hidden_dim -> horizon), emitted transposed
    # (horizon, R) so the store is lane-dense.
    pred_t = lax.dot_general(wreg_ref[...], hidden.astype(jnp.bfloat16),
                             (((0,), (1,)), ((), ())),
                             preferred_element_type=jnp.float32)     # (horizon, R)
    pred_ref[0] = pred_t + breg_ref[...]

    # proj head: BatchNorm1d(num_nodes) + Conv1d(num_nodes -> 1, k=1), expressed
    # as one block-structured matmul over the node axis.
    # TODO(synk): BatchNorm1d folded in eval mode with default running stats
    # (mean=0, var=1); training-mode batch statistics not reproduced.
    bn = hidden * bns_ref[...] + bnb_ref[...]
    rep_ref[0] = (jnp.dot(wc_ref[...], bn.astype(jnp.bfloat16),
                          preferred_element_type=jnp.float32) + bc_ref[...])


def head_fused(raw_flat, tempx_flat, static_flat, prep, num_blocks, block_b):
    R = raw_flat.shape[0] // num_blocks                          # block_b * N
    hidden_dim = prep["enc_w1"].shape[-1]
    horizon = prep["w_reg"].shape[-1]

    def row_spec(a):
        return pl.BlockSpec((R, a.shape[1]), lambda i: (i, 0))

    weights = (prep["wts_c"], prep["bts_c"], prep["wts"], prep["bts"],
               prep["enc_w1"], prep["enc_b1"], prep["enc_w2"], prep["enc_b2"],
               prep["w_reg"], prep["b_reg"], prep["bn_scale"], prep["bn_shift"],
               prep["proj_wc"], prep["proj_bc"])
    in_specs = ([row_spec(raw_flat), row_spec(tempx_flat), row_spec(static_flat)]
                + [_rep_spec(w) for w in weights])
    return pl.pallas_call(
        _head_kernel,
        out_shape=(jax.ShapeDtypeStruct((num_blocks, horizon, R), jnp.float32),
                   jax.ShapeDtypeStruct((num_blocks, block_b, hidden_dim),
                                        jnp.float32)),
        grid=(num_blocks,),
        in_specs=in_specs,
        out_specs=(pl.BlockSpec((1, horizon, R), lambda i: (i, 0, 0)),
                   pl.BlockSpec((1, block_b, hidden_dim), lambda i: (i, 0, 0))),
        compiler_params=pltpu.CompilerParams(dimension_semantics=("parallel",)),
    )(raw_flat, tempx_flat, static_flat, *weights)


# ---------------- parameter init (deterministic, synthetic) ----------------
def xavier_uniform(key, shape):
    fan_in, fan_out = shape[0], shape[1]
    limit = (6.0 / (fan_in + fan_out)) ** 0.5
    return jax.random.uniform(key, shape, jnp.float32, -limit, limit)


def init_linear(key, fan_in, fan_out):
    kw, kb = jax.random.split(key)
    lim = 1.0 / (fan_in ** 0.5)
    W = jax.random.uniform(kw, (fan_in, fan_out), jnp.float32, -lim, lim)
    b = jax.random.uniform(kb, (fan_out,), jnp.float32, -lim, lim)
    return W, b


def init_gat(key, f_in, f_out, heads):
    head_dim = f_out // heads
    k1, k2, k3 = jax.random.split(key, 3)
    W = xavier_uniform(k1, (f_in, f_out))
    a_src = xavier_uniform(k2, (heads, head_dim))
    a_dst = xavier_uniform(k3, (heads, head_dim))
    return W, a_src, a_dst


def init_params(key):
    N, H, L, D = args.num_nodes, args.hidden_size, args.lag, args.d_model
    hidden_dim = H * 2 + H + H + H   # 2*embed + node + tid + diw = 160
    keys = jax.random.split(key, 20)
    p = {}
    p["node_emb"] = xavier_uniform(keys[0], (N, H))
    p["T_i_D_emb"] = xavier_uniform(keys[1], (288, H))
    p["D_i_W_emb"] = xavier_uniform(keys[2], (7, H))
    p["start_fc"] = init_linear(keys[3], INPUT_DIM, D)
    p["ts_emb"] = init_linear(keys[4], D * L, H)                 # Conv2d 1x1
    p["TransSpat"] = init_linear(keys[5], D * L, args.d_model_spat)
    p["InvTransSpat"] = init_linear(keys[6], args.d_model_spat, D * L)
    p["TransTemp"] = init_linear(keys[7], D * N, args.d_model_temp)
    p["InvTransTemp"] = init_linear(keys[8], args.d_model_temp, D * N)
    p["spat_gat"] = init_gat(keys[9], args.d_model_spat, args.d_model_spat, args.head)
    p["temp_gat"] = init_gat(keys[10], args.d_model_temp, args.d_model_temp, args.head)
    enc = []
    for i in range(NUM_LAYER):
        k1, k2 = jax.random.split(keys[11 + i])
        enc.append(init_linear(k1, hidden_dim, hidden_dim)
                   + init_linear(k2, hidden_dim, hidden_dim))
    p["encoder"] = enc
    p["reg"] = init_linear(keys[15], hidden_dim, args.horizon)   # Conv2d 1x1
    p["bn_gamma"] = jnp.ones((N,), jnp.float32)
    p["bn_beta"] = jnp.zeros((N,), jnp.float32)
    wc, bc = init_linear(keys[16], N, 1)                          # Conv1d(N->1)
    p["proj_wc"] = wc[:, 0]
    p["proj_bc"] = bc
    return p


# ---------------- host-side weight preparation (constant folding) ----------------
def _bf16(a):
    return a.astype(jnp.bfloat16)


def _pack_gat_path(trans_wb, gat_wab, inv_wb, heads):
    """Fold GAT attention vectors and value/output projections into the
    projection weights so the kernel only sees lane-dense matmuls."""
    wt, bt = trans_wb                                  # (F_in, F_att), (F_att,)
    W, a_src, a_dst = gat_wab                          # (F_att, F_att), (H, hd), (H, hd)
    winv, binv = inv_wb                                # (F_att, F_out), (F_out,)
    f_att = W.shape[0]
    hd = f_att // heads
    Wh = W.reshape(f_att, heads, hd)                   # per-head W_h = Wh[:, h, :]
    p_src = jnp.einsum('fhd,hd->fh', Wh, a_src)        # (F_att, H)
    p_dst = jnp.einsum('fhd,hd->fh', Wh, a_dst)        # (F_att, H)
    winv_h = winv.reshape(heads, hd, -1)               # (H, hd, F_out)
    wv = jnp.einsum('fhd,hdo->hfo', Wh, winv_h)        # (H, F_att, F_out)  value+out folded
    return (_bf16(wt), bt.reshape(1, -1),
            _bf16(p_src), _bf16(p_dst), _bf16(wv),
            binv.reshape(1, -1))


def prepare_params(p, block_b):
    L, D, N, H = args.lag, args.d_model, args.num_nodes, args.head
    BB = block_b
    Ws, bs = p["start_fc"]                                        # (3, D), (D,)

    def compose_start(W, b):
        # Fold start_fc (3 -> D) into a downstream (L*D -> F) linear acting on
        # raw history laid out as (rows, L*3).
        Wr = W.reshape(L, D, -1)
        Wc = jnp.einsum('cd,ldf->lcf', Ws, Wr).reshape(L * INPUT_DIM, -1)
        bc = b + jnp.einsum('d,ldf->f', bs, Wr)
        return Wc, bc

    spat_trans = compose_start(*p["TransSpat"])
    wts_c, bts_c = compose_start(*p["ts_emb"])

    enc = p["encoder"]
    wc = p["proj_wc"]                                             # (N,)
    # Block-structured Conv1d(N->1): rep[b] = sum_n wc[n] * bn[b*N + n]
    wc_block = (jnp.eye(BB, dtype=jnp.float32)[:, :, None]
                * wc[None, None, :]).reshape(BB, BB * N)
    bn_scale = p["bn_gamma"] / jnp.sqrt(jnp.float32(1.0 + 1e-5))
    bn_shift = p["bn_beta"]
    prep = {
        "T_i_D_emb": p["T_i_D_emb"],
        "D_i_W_emb": p["D_i_W_emb"],
        "node_emb": p["node_emb"],
        "spat_path": _pack_gat_path(spat_trans, p["spat_gat"], p["InvTransSpat"], H),
        "temp_path": _pack_gat_path(p["TransTemp"], p["temp_gat"], p["InvTransTemp"], H),
        "wts_c": _bf16(wts_c), "bts_c": bts_c.reshape(1, -1),
        "wts": _bf16(p["ts_emb"][0]), "bts": p["ts_emb"][1].reshape(1, -1),
        "enc_w1": _bf16(jnp.stack([w1 for (w1, b1, w2, b2) in enc])),
        "enc_b1": jnp.stack([b1.reshape(1, -1) for (w1, b1, w2, b2) in enc]),
        "enc_w2": _bf16(jnp.stack([w2 for (w1, b1, w2, b2) in enc])),
        "enc_b2": jnp.stack([b2.reshape(1, -1) for (w1, b1, w2, b2) in enc]),
        "w_reg": _bf16(p["reg"][0]),
        "b_reg": p["reg"][1].reshape(-1, 1),                       # (horizon, 1)
        "bn_scale": jnp.tile(bn_scale, BB).reshape(BB * N, 1),
        "bn_shift": jnp.tile(bn_shift, BB).reshape(BB * N, 1),
        "proj_wc": _bf16(wc_block),
        "proj_bc": p["proj_bc"].reshape(1, 1),
    }
    return prep


def build_block_mask(adj, block_b):
    """Additive attention mask, block-diagonal over the batch block.

    adj: (B, M, M) dense adjacency (>0 => edge).  Returns (B//BB, BB*M, BB*M)
    with 0 on edges within the same batch element and -1e30 elsewhere.
    Requires every node to have at least one in-edge (e.g. a self-loop),
    otherwise its softmax row degenerates to uniform attention.
    """
    B, M, _ = adj.shape
    BB = block_b
    nb = B // BB
    adjb = adj.reshape(nb, BB, M, M)
    eye_bb = jnp.eye(BB, dtype=adj.dtype)
    big = jnp.einsum('nbij,bc->nbicj', adjb, eye_bb).reshape(nb, BB * M, BB * M)
    return jnp.where(big > 0, 0.0, NEG).astype(jnp.float32)


# ---------------- model forward ----------------
def stgat_cl_forward(history_data, prep, adj_spat, adj_temp, *, block_b):
    B, L, N, _ = history_data.shape
    D = args.d_model
    BB = block_b
    assert B % BB == 0
    nb = B // BB

    X = history_data[..., :INPUT_DIM]                             # (B, L, N, 3)
    t_idx = history_data[:, -1, :, 1].astype(jnp.int32)           # (B, N)
    d_idx = history_data[:, -1, :, 2].astype(jnp.int32)
    tid = prep["T_i_D_emb"][t_idx]                                # (B, N, 32)
    diw = prep["D_i_W_emb"][d_idx]
    node = jnp.broadcast_to(prep["node_emb"][None], (B, N, args.hidden_size))
    static_flat = jnp.concatenate([node, tid, diw], axis=-1).reshape(B * N, -1)

    # raw history in (B*N, L*3) layout; start_fc is folded into the weights.
    raw_flat = jnp.transpose(X, (0, 2, 1, 3)).reshape(B * N, L * INPUT_DIM)

    mask_spat = build_block_mask(adj_spat, BB)                    # (nb, BB*N, BB*N)
    mask_temp = build_block_mask(adj_temp, BB)                    # (nb, BB*L, BB*L)

    # fused spatial path: (start_fc o TransSpat) -> spat GAT -> InvTransSpat
    spa_out = st_path(raw_flat, mask_spat, prep["spat_path"], BB * N, L * D)
    # relayout to the temporal view (B*L, N*D)  (tiny XLA transpose)
    temp_in = jnp.transpose(spa_out.reshape(B, N, L, D),
                            (0, 2, 1, 3)).reshape(B * L, N * D)
    # fused temporal path: TransTemp -> temp GAT -> InvTransTemp
    temp_out = st_path(temp_in, mask_temp, prep["temp_path"], BB * L, N * D)
    temp_x = jnp.transpose(temp_out.reshape(B, L, N, D),
                           (0, 2, 1, 3)).reshape(B * N, L * D)

    # fused head: ts embeddings + concat + 3x MLP_res + regression + proj head
    pred_blk, rep_blk = head_fused(raw_flat, temp_x, static_flat, prep, nb, BB)
    horizon = args.horizon
    prediction = (pred_blk.reshape(nb, horizon, BB, N)
                  .transpose(0, 2, 1, 3).reshape(B, horizon, N, 1))
    output_rep = rep_blk.reshape(B, -1)                           # (B, hidden_dim)
    return prediction, output_rep


# ---------------- main ----------------
if __name__ == "__main__":
    B, L, N = 16, args.lag, args.num_nodes
    BLOCK_B = 8                                                   # batch elems per grid step
    key = jax.random.PRNGKey(0)
    kp, kx, kt, kd, ka1, ka2 = jax.random.split(key, 6)

    params = init_params(kp)
    prep = prepare_params(params, BLOCK_B)

    vals = jax.random.normal(kx, (B, L, N, 1), jnp.float32)
    tid = jax.random.randint(kt, (B, L, N, 1), 0, 288).astype(jnp.float32)
    diw = jax.random.randint(kd, (B, L, N, 1), 0, 7).astype(jnp.float32)
    history_data = jnp.concatenate([vals, tid, diw], axis=-1)     # (B, L, N, 3)

    # dense adjacency masks (stand-in for edge_idx_spat / edge_idx_temp kwargs);
    # self-loops included so no attention row is fully masked.
    adj_spat = jnp.maximum(
        jax.random.bernoulli(ka1, 0.5, (B, N, N)).astype(jnp.float32),
        jnp.eye(N, dtype=jnp.float32)[None])
    adj_temp = jnp.maximum(
        jax.random.bernoulli(ka2, 0.5, (B, L, L)).astype(jnp.float32),
        jnp.eye(L, dtype=jnp.float32)[None])

    fwd = jax.jit(functools.partial(stgat_cl_forward, block_b=BLOCK_B))
    prediction, output_rep = fwd(history_data, prep, adj_spat, adj_temp)
    jax.block_until_ready((prediction, output_rep))

    assert prediction.shape == (B, args.horizon, N, 1)
    assert output_rep.shape == (B, args.hidden_size * 5)
    assert bool(jnp.all(jnp.isfinite(prediction)))
    assert bool(jnp.all(jnp.isfinite(output_rep)))
    print("KERNEL_OK")
</pallas_src>

<mosaic_0001>
module attributes {stable_mosaic.version = 11 : i64} {
  func.func @_st_path_kernel(%arg0: i32, %arg1: memref<128x24xf32, #tpu.memory_space<vmem>>, %arg2: memref<1x128x128xf32, #tpu.memory_space<vmem>>, %arg3: memref<24x32xbf16, #tpu.memory_space<vmem>>, %arg4: memref<1x32xf32, #tpu.memory_space<vmem>>, %arg5: memref<32x4xbf16, #tpu.memory_space<vmem>>, %arg6: memref<32x4xbf16, #tpu.memory_space<vmem>>, %arg7: memref<4x32x128xbf16, #tpu.memory_space<vmem>>, %arg8: memref<1x128xf32, #tpu.memory_space<vmem>>, %arg9: memref<128x128xf32, #tpu.memory_space<vmem>>) attributes {dimension_semantics = [#tpu.dimension_semantics<parallel>], iteration_bounds = array<i64: 2>, scalar_prefetch = 0 : i64, scratch_operands = 0 : i64, tpu.core_type = #tpu.core_type<tc>, window_params = [{transform_indices = @transform_0, window_bounds = array<i64: 128, 24>}, {transform_indices = @transform_1, window_bounds = array<i64: 1, 128, 128>}, {pipeline_mode = #tpu.pipeline_mode<synchronous>, transform_indices = @transform_2, window_bounds = array<i64: 24, 32>}, {pipeline_mode = #tpu.pipeline_mode<synchronous>, transform_indices = @transform_3, window_bounds = array<i64: 1, 32>}, {pipeline_mode = #tpu.pipeline_mode<synchronous>, transform_indices = @transform_4, window_bounds = array<i64: 32, 4>}, {pipeline_mode = #tpu.pipeline_mode<synchronous>, transform_indices = @transform_5, window_bounds = array<i64: 32, 4>}, {pipeline_mode = #tpu.pipeline_mode<synchronous>, transform_indices = @transform_6, window_bounds = array<i64: 4, 32, 128>}, {pipeline_mode = #tpu.pipeline_mode<synchronous>, transform_indices = @transform_7, window_bounds = array<i64: 1, 128>}, {transform_indices = @transform_8, window_bounds = array<i64: 128, 128>}]} {
    %c0 = arith.constant 0 : index
    %c0_0 = arith.constant 0 : index
    %0 = vector.load %arg1[%c0, %c0_0] : memref<128x24xf32, #tpu.memory_space<vmem>>, vector<128x24xf32>
    %c0_1 = arith.constant 0 : index
    %c0_2 = arith.constant 0 : index
    %c0_3 = arith.constant 0 : index
    %1 = vector.load %arg2[%c0_1, %c0_2, %c0_3] : memref<1x128x128xf32, #tpu.memory_space<vmem>>, vector<1x128x128xf32>
    %2 = vector.shape_cast %1 : vector<1x128x128xf32> to vector<128x128xf32>
    %3 = arith.truncf %0 : vector<128x24xf32> to vector<128x24xbf16>
    %c0_4 = arith.constant 0 : index
    %c0_5 = arith.constant 0 : index
    %4 = vector.load %arg3[%c0_4, %c0_5] : memref<24x32xbf16, #tpu.memory_space<vmem>>, vector<24x32xbf16>
    %cst = arith.constant dense<0.000000e+00> : vector<128x32xf32>
    %5 = tpu.matmul %3, %4, %cst {dimension_numbers = #tpu.dot_dimension_numbers<[1], [0], [0], [1], [0, 0, 1, 1], [], []>} : vector<128x24xbf16>, vector<24x32xbf16>, vector<128x32xf32> -> vector<128x32xf32>
    %c0_6 = arith.constant 0 : index
    %c0_7 = arith.constant 0 : index
    %6 = vector.load %arg4[%c0_6, %c0_7] : memref<1x32xf32, #tpu.memory_space<vmem>>, vector<1x32xf32>
    %7 = vector.broadcast %6 : vector<1x32xf32> to vector<128x32xf32>
    %8 = arith.addf %5, %7 : vector<128x32xf32>
    %9 = arith.truncf %8 : vector<128x32xf32> to vector<128x32xbf16>
    %c0_8 = arith.constant 0 : index
    %c0_9 = arith.constant 0 : index
    %10 = vector.load %arg5[%c0_8, %c0_9] : memref<32x4xbf16, #tpu.memory_space<vmem>>, vector<32x4xbf16>
    %cst_10 = arith.constant dense<0.000000e+00> : vector<128x4xf32>
    %11 = tpu.matmul %9, %10, %cst_10 {dimension_numbers = #tpu.dot_dimension_numbers<[1], [0], [0], [1], [0, 0, 1, 1], [], []>} : vector<128x32xbf16>, vector<32x4xbf16>, vector<128x4xf32> -> vector<128x4xf32>
    %c0_11 = arith.constant 0 : index
    %c0_12 = arith.constant 0 : index
    %12 = vector.load %arg6[%c0_11, %c0_12] : memref<32x4xbf16, #tpu.memory_space<vmem>>, vector<32x4xbf16>
    %cst_13 = arith.constant dense<0.000000e+00> : vector<4x128xf32>
    %13 = tpu.matmul %12, %9, %cst_13 {dimension_numbers = #tpu.dot_dimension_numbers<[0], [1], [1], [0], [0, 1, 1, 0], [], []>} : vector<32x4xbf16>, vector<128x32xbf16>, vector<4x128xf32> -> vector<4x128xf32>
    %cst_14 = arith.constant 0.000000e+00 : f32
    %14 = vector.broadcast %cst_14 : f32 to vector<128x128xf32>
    %15 = vector.extract_strided_slice %11 {offsets = [0, 0], sizes = [128, 1], strides = [1, 1]} : vector<128x4xf32> to vector<128x1xf32>
    %16 = vector.extract_strided_slice %13 {offsets = [0, 0], sizes = [1, 128], strides = [1, 1]} : vector<4x128xf32> to vector<1x128xf32>
    %17 = vector.broadcast %15 : vector<128x1xf32> to vector<128x128xf32>
    %18 = vector.broadcast %16 : vector<1x128xf32> to vector<128x128xf32>
    %19 = arith.addf %17, %18 : vector<128x128xf32>
    %cst_15 = arith.constant 2.000000e-01 : f32
    %20 = vector.broadcast %cst_15 : f32 to vector<128x128xf32>
    %21 = arith.mulf %20, %19 : vector<128x128xf32>
    %22 = arith.maximumf %19, %21 : vector<128x128xf32>
    %23 = arith.addf %22, %2 : vector<128x128xf32>
    %cst_16 = arith.constant dense<0xFF800000> : vector<128xf32>
    %24 = vector.multi_reduction <maximumf>, %23, %cst_16 [1] : vector<128x128xf32> to vector<128xf32>
    %25 = vector.shape_cast %24 : vector<128xf32> to vector<128x1xf32>
    %26 = vector.broadcast %25 : vector<128x1xf32> to vector<128x128xf32>
    %27 = arith.subf %23, %26 : vector<128x128xf32>
    %28 = math.exp %27 : vector<128x128xf32>
    %cst_17 = arith.constant dense<0.000000e+00> : vector<128xf32>
    %29 = vector.multi_reduction <add>, %28, %cst_17 [1] : vector<128x128xf32> to vector<128xf32>
    %30 = vector.shape_cast %29 : vector<128xf32> to vector<128x1xf32>
    %31 = tpu.reciprocal %30 {approx = true} : vector<128x1xf32> -> vector<128x1xf32>
    %32 = vector.broadcast %31 : vector<128x1xf32> to vector<128x128xf32>
    %33 = arith.mulf %28, %32 : vector<128x128xf32>
    %c0_18 = arith.constant 0 : index
    %c0_19 = arith.constant 0 : index
    %c0_20 = arith.constant 0 : index
    %34 = vector.load %arg7[%c0_18, %c0_19, %c0_20] : memref<4x32x128xbf16, #tpu.memory_space<vmem>>, vector<1x32x128xbf16>
    %35 = vector.shape_cast %34 : vector<1x32x128xbf16> to vector<32x128xbf16>
    %cst_21 = arith.constant dense<0.000000e+00> : vector<128x128xf32>
    %36 = tpu.matmul %9, %35, %cst_21 {dimension_numbers = #tpu.dot_dimension_numbers<[1], [0], [0], [1], [0, 0, 1, 1], [], []>} : vector<128x32xbf16>, vector<32x128xbf16>, vector<128x128xf32> -> vector<128x128xf32>
    %37 = arith.truncf %33 : vector<128x128xf32> to vector<128x128xbf16>
    %38 = arith.truncf %36 : vector<128x128xf32> to vector<128x128xbf16>
    %cst_22 = arith.constant dense<0.000000e+00> : vector<128x128xf32>
    %39 = tpu.matmul %37, %38, %cst_22 {dimension_numbers = #tpu.dot_dimension_numbers<[1], [0], [0], [1], [0, 0, 1, 1], [], []>} : vector<128x128xbf16>, vector<128x128xbf16>, vector<128x128xf32> -> vector<128x128xf32>
    %40 = arith.addf %14, %39 : vector<128x128xf32>
    %41 = vector.extract_strided_slice %11 {offsets = [0, 1], sizes = [128, 1], strides = [1, 1]} : vector<128x4xf32> to vector<128x1xf32>
    %42 = vector.extract_strided_slice %13 {offsets = [1, 0], sizes = [1, 128], strides = [1, 1]} : vector<4x128xf32> to vector<1x128xf32>
    %43 = vector.broadcast %41 : vector<128x1xf32> to vector<128x128xf32>
    %44 = vector.broadcast %42 : vector<1x128xf32> to vector<128x128xf32>
    %45 = arith.addf %43, %44 : vector<128x128xf32>
    %cst_23 = arith.constant 2.000000e-01 : f32
    %46 = vector.broadcast %cst_23 : f32 to vector<128x128xf32>
    %47 = arith.mulf %46, %45 : vector<128x128xf32>
    %48 = arith.maximumf %45, %47 : vector<128x128xf32>
    %49 = arith.addf %48, %2 : vector<128x128xf32>
    %cst_24 = arith.constant dense<0xFF800000> : vector<128xf32>
    %50 = vector.multi_reduction <maximumf>, %49, %cst_24 [1] : vector<128x128xf32> to vector<128xf32>
    %51 = vector.shape_cast %50 : vector<128xf32> to vector<128x1xf32>
    %52 = vector.broadcast %51 : vector<128x1xf32> to vector<128x128xf32>
    %53 = arith.subf %49, %52 : vector<128x128xf32>
    %54 = math.exp %53 : vector<128x128xf32>
    %cst_25 = arith.constant dense<0.000000e+00> : vector<128xf32>
    %55 = vector.multi_reduction <add>, %54, %cst_25 [1] : vector<128x128xf32> to vector<128xf32>
    %56 = vector.shape_cast %55 : vector<128xf32> to vector<128x1xf32>
    %57 = tpu.reciprocal %56 {approx = true} : vector<128x1xf32> -> vector<128x1xf32>
    %58 = vector.broadcast %57 : vector<128x1xf32> to vector<128x128xf32>
    %59 = arith.mulf %54, %58 : vector<128x128xf32>
    %c1 = arith.constant 1 : index
    %c0_26 = arith.constant 0 : index
    %c0_27 = arith.constant 0 : index
    %60 = vector.load %arg7[%c1, %c0_26, %c0_27] : memref<4x32x128xbf16, #tpu.memory_space<vmem>>, vector<1x32x128xbf16>
    %61 = vector.shape_cast %60 : vector<1x32x128xbf16> to vector<32x128xbf16>
    %cst_28 = arith.constant dense<0.000000e+00> : vector<128x128xf32>
    %62 = tpu.matmul %9, %61, %cst_28 {dimension_numbers = #tpu.dot_dimension_numbers<[1], [0], [0], [1], [0, 0, 1, 1], [], []>} : vector<128x32xbf16>, vector<32x128xbf16>, vector<128x128xf32> -> vector<128x128xf32>
    %63 = arith.truncf %59 : vector<128x128xf32> to vector<128x128xbf16>
    %64 = arith.truncf %62 : vector<128x128xf32> to vector<128x128xbf16>
    %cst_29 = arith.constant dense<0.000000e+00> : vector<128x128xf32>
    %65 = tpu.matmul %63, %64, %cst_29 {dimension_numbers = #tpu.dot_dimension_numbers<[1], [0], [0], [1], [0, 0, 1, 1], [], []>} : vector<128x128xbf16>, vector<128x128xbf16>, vector<128x128xf32> -> vector<128x128xf32>
    %66 = arith.addf %40, %65 : vector<128x128xf32>
    %67 = vector.extract_strided_slice %11 {offsets = [0, 2], sizes = [128, 1], strides = [1, 1]} : vector<128x4xf32> to vector<128x1xf32>
    %68 = vector.extract_strided_slice %13 {offsets = [2, 0], sizes = [1, 128], strides = [1, 1]} : vector<4x128xf32> to vector<1x128xf32>
    %69 = vector.broadcast %67 : vector<128x1xf32> to vector<128x128xf32>
    %70 = vector.broadcast %68 : vector<1x128xf32> to vector<128x128xf32>
    %71 = arith.addf %69, %70 : vector<128x128xf32>
    %cst_30 = arith.constant 2.000000e-01 : f32
    %72 = vector.broadcast %cst_30 : f32 to vector<128x128xf32>
    %73 = arith.mulf %72, %71 : vector<128x128xf32>
    %74 = arith.maximumf %71, %73 : vector<128x128xf32>
    %75 = arith.addf %74, %2 : vector<128x128xf32>
    %cst_31 = arith.constant dense<0xFF800000> : vector<128xf32>
    %76 = vector.multi_reduction <maximumf>, %75, %cst_31 [1] : vector<128x128xf32> to vector<128xf32>
    %77 = vector.shape_cast %76 : vector<128xf32> to vector<128x1xf32>
    %78 = vector.broadcast %77 : vector<128x1xf32> to vector<128x128xf32>
    %79 = arith.subf %75, %78 : vector<128x128xf32>
    %80 = math.exp %79 : vector<128x128xf32>
    %cst_32 = arith.constant dense<0.000000e+00> : vector<128xf32>
    %81 = vector.multi_reduction <add>, %80, %cst_32 [1] : vector<128x128xf32> to vector<128xf32>
    %82 = vector.shape_cast %81 : vector<128xf32> to vector<128x1xf32>
    %83 = tpu.reciprocal %82 {approx = true} : vector<128x1xf32> -> vector<128x1xf32>
    %84 = vector.broadcast %83 : vector<128x1xf32> to vector<128x128xf32>
    %85 = arith.mulf %80, %84 : vector<128x128xf32>
    %c2 = arith.constant 2 : index
    %c0_33 = arith.constant 0 : index
    %c0_34 = arith.constant 0 : index
    %86 = vector.load %arg7[%c2, %c0_33, %c0_34] : memref<4x32x128xbf16, #tpu.memory_space<vmem>>, vector<1x32x128xbf16>
    %87 = vector.shape_cast %86 : vector<1x32x128xbf16> to vector<32x128xbf16>
    %cst_35 = arith.constant dense<0.000000e+00> : vector<128x128xf32>
    %88 = tpu.matmul %9, %87, %cst_35 {dimension_numbers = #tpu.dot_dimension_numbers<[1], [0], [0], [1], [0, 0, 1, 1], [], []>} : vector<128x32xbf16>, vector<32x128xbf16>, vector<128x128xf32> -> vector<128x128xf32>
    %89 = arith.truncf %85 : vector<128x128xf32> to vector<128x128xbf16>
    %90 = arith.truncf %88 : vector<128x128xf32> to vector<128x128xbf16>
    %cst_36 = arith.constant dense<0.000000e+00> : vector<128x128xf32>
    %91 = tpu.matmul %89, %90, %cst_36 {dimension_numbers = #tpu.dot_dimension_numbers<[1], [0], [0], [1], [0, 0, 1, 1], [], []>} : vector<128x128xbf16>, vector<128x128xbf16>, vector<128x128xf32> -> vector<128x128xf32>
    %92 = arith.addf %66, %91 : vector<128x128xf32>
    %93 = vector.extract_strided_slice %11 {offsets = [0, 3], sizes = [128, 1], strides = [1, 1]} : vector<128x4xf32> to vector<128x1xf32>
    %94 = vector.extract_strided_slice %13 {offsets = [3, 0], sizes = [1, 128], strides = [1, 1]} : vector<4x128xf32> to vector<1x128xf32>
    %95 = vector.broadcast %93 : vector<128x1xf32> to vector<128x128xf32>
    %96 = vector.broadcast %94 : vector<1x128xf32> to vector<128x128xf32>
    %97 = arith.addf %95, %96 : vector<128x128xf32>
    %cst_37 = arith.constant 2.000000e-01 : f32
    %98 = vector.broadcast %cst_37 : f32 to vector<128x128xf32>
    %99 = arith.mulf %98, %97 : vector<128x128xf32>
    %100 = arith.maximumf %97, %99 : vector<128x128xf32>
    %101 = arith.addf %100, %2 : vector<128x128xf32>
    %cst_38 = arith.constant dense<0xFF800000> : vector<128xf32>
    %102 = vector.multi_reduction <maximumf>, %101, %cst_38 [1] : vector<128x128xf32> to vector<128xf32>
    %103 = vector.shape_cast %102 : vector<128xf32> to vector<128x1xf32>
    %104 = vector.broadcast %103 : vector<128x1xf32> to vector<128x128xf32>
    %105 = arith.subf %101, %104 : vector<128x128xf32>
    %106 = math.exp %105 : vector<128x128xf32>
    %cst_39 = arith.constant dense<0.000000e+00> : vector<128xf32>
    %107 = vector.multi_reduction <add>, %106, %cst_39 [1] : vector<128x128xf32> to vector<128xf32>
    %108 = vector.shape_cast %107 : vector<128xf32> to vector<128x1xf32>
    %109 = tpu.reciprocal %108 {approx = true} : vector<128x1xf32> -> vector<128x1xf32>
    %110 = vector.broadcast %109 : vector<128x1xf32> to vector<128x128xf32>
    %111 = arith.mulf %106, %110 : vector<128x128xf32>
    %c3 = arith.constant 3 : index
    %c0_40 = arith.constant 0 : index
    %c0_41 = arith.constant 0 : index
    %112 = vector.load %arg7[%c3, %c0_40, %c0_41] : memref<4x32x128xbf16, #tpu.memory_space<vmem>>, vector<1x32x128xbf16>
    %113 = vector.shape_cast %112 : vector<1x32x128xbf16> to vector<32x128xbf16>
    %cst_42 = arith.constant dense<0.000000e+00> : vector<128x128xf32>
    %114 = tpu.matmul %9, %113, %cst_42 {dimension_numbers = #tpu.dot_dimension_numbers<[1], [0], [0], [1], [0, 0, 1, 1], [], []>} : vector<128x32xbf16>, vector<32x128xbf16>, vector<128x128xf32> -> vector<128x128xf32>
    %115 = arith.truncf %111 : vector<128x128xf32> to vector<128x128xbf16>
    %116 = arith.truncf %114 : vector<128x128xf32> to vector<128x128xbf16>
    %cst_43 = arith.constant dense<0.000000e+00> : vector<128x128xf32>
    %117 = tpu.matmul %115, %116, %cst_43 {dimension_numbers = #tpu.dot_dimension_numbers<[1], [0], [0], [1], [0, 0, 1, 1], [], []>} : vector<128x128xbf16>, vector<128x128xbf16>, vector<128x128xf32> -> vector<128x128xf32>
    %118 = arith.addf %92, %117 : vector<128x128xf32>
    %c0_44 = arith.constant 0 : index
    %c0_45 = arith.constant 0 : index
    %119 = vector.load %arg8[%c0_44, %c0_45] : memref<1x128xf32, #tpu.memory_space<vmem>>, vector<1x128xf32>
    %120 = vector.broadcast %119 : vector<1x128xf32> to vector<128x128xf32>
    %121 = arith.addf %118, %120 : vector<128x128xf32>
    %c0_46 = arith.constant 0 : index
    %c0_47 = arith.constant 0 : index
    %122 = vector.load %arg9[%c0_46, %c0_47] : memref<128x128xf32, #tpu.memory_space<vmem>>, vector<128x128xf32>
    tpu.vector_store %arg9[%c0_46, %c0_47], %121 {strides = array<i32>} : memref<128x128xf32, #tpu.memory_space<vmem>>, vector<128x128xf32>,
    return
  }
  func.func @transform_0(%arg0: i32) -> (i32, i32) {
    %c0_i32 = arith.constant 0 : i32
    %c0_i32_0 = arith.constant 0 : i32
    return %arg0, %c0_i32 : i32, i32
  }
  func.func @transform_1(%arg0: i32) -> (i32, i32, i32) {
    %c0_i32 = arith.constant 0 : i32
    %c0_i32_0 = arith.constant 0 : i32
    %c0_i32_1 = arith.constant 0 : i32
    return %arg0, %c0_i32, %c0_i32_0 : i32, i32, i32
  }
  func.func @transform_2(%arg0: i32) -> (i32, i32) {
    %c0_i32 = arith.constant 0 : i32
    %c0_i32_0 = arith.constant 0 : i32
    %c0_i32_1 = arith.constant 0 : i32
    return %c0_i32, %c0_i32_0 : i32, i32
  }
  func.func @transform_3(%arg0: i32) -> (i32, i32) {
    %c0_i32 = arith.constant 0 : i32
    %c0_i32_0 = arith.constant 0 : i32
    %c0_i32_1 = arith.constant 0 : i32
    return %c0_i32, %c0_i32_0 : i32, i32
  }
  func.func @transform_4(%arg0: i32) -> (i32, i32) {
    %c0_i32 = arith.constant 0 : i32
    %c0_i32_0 = arith.constant 0 : i32
    %c0_i32_1 = arith.constant 0 : i32
    return %c0_i32, %c0_i32_0 : i32, i32
  }
  func.func @transform_5(%arg0: i32) -> (i32, i32) {
    %c0_i32 = arith.constant 0 : i32
    %c0_i32_0 = arith.constant 0 : i32
    %c0_i32_1 = arith.constant 0 : i32
    return %c0_i32, %c0_i32_0 : i32, i32
  }
  func.func @transform_6(%arg0: i32) -> (i32, i32, i32) {
    %c0_i32 = arith.constant 0 : i32
    %c0_i32_0 = arith.constant 0 : i32
    %c0_i32_1 = arith.constant 0 : i32
    %c0_i32_2 = arith.constant 0 : i32
    return %c0_i32, %c0_i32_0, %c0_i32_1 : i32, i32, i32
  }
  func.func @transform_7(%arg0: i32) -> (i32, i32) {
    %c0_i32 = arith.constant 0 : i32
    %c0_i32_0 = arith.constant 0 : i32
    %c0_i32_1 = arith.constant 0 : i32
    return %c0_i32, %c0_i32_0 : i32, i32
  }
  func.func @transform_8(%arg0: i32) -> (i32, i32) {
    %c0_i32 = arith.constant 0 : i32
    %c0_i32_0 = arith.constant 0 : i32
    return %arg0, %c0_i32 : i32, i32
  }
}

module attributes {stable_mosaic.version = 11 : i64} {
  func.func @_st_path_kernel(%arg0: i32, %arg1: memref<64x256xf32, #tpu.memory_space<vmem>>, %arg2: memref<1x64x64xf32, #tpu.memory_space<vmem>>, %arg3: memref<256x32xbf16, #tpu.memory_space<vmem>>, %arg4: memref<1x32xf32, #tpu.memory_space<vmem>>, %arg5: memref<32x4xbf16, #tpu.memory_space<vmem>>, %arg6: memref<32x4xbf16, #tpu.memory_space<vmem>>, %arg7: memref<4x32x256xbf16, #tpu.memory_space<vmem>>, %arg8: memref<1x256xf32, #tpu.memory_space<vmem>>, %arg9: memref<64x256xf32, #tpu.memory_space<vmem>>) attributes {dimension_semantics = [#tpu.dimension_semantics<parallel>], iteration_bounds = array<i64: 2>, scalar_prefetch = 0 : i64, scratch_operands = 0 : i64, tpu.core_type = #tpu.core_type<tc>, window_params = [{transform_indices = @transform_0, window_bounds = array<i64: 64, 256>}, {transform_indices = @transform_1, window_bounds = array<i64: 1, 64, 64>}, {pipeline_mode = #tpu.pipeline_mode<synchronous>, transform_indices = @transform_2, window_bounds = array<i64: 256, 32>}, {pipeline_mode = #tpu.pipeline_mode<synchronous>, transform_indices = @transform_3, window_bounds = array<i64: 1, 32>}, {pipeline_mode = #tpu.pipeline_mode<synchronous>, transform_indices = @transform_4, window_bounds = array<i64: 32, 4>}, {pipeline_mode = #tpu.pipeline_mode<synchronous>, transform_indices = @transform_5, window_bounds = array<i64: 32, 4>}, {pipeline_mode = #tpu.pipeline_mode<synchronous>, transform_indices = @transform_6, window_bounds = array<i64: 4, 32, 256>}, {pipeline_mode = #tpu.pipeline_mode<synchronous>, transform_indices = @transform_7, window_bounds = array<i64: 1, 256>}, {transform_indices = @transform_8, window_bounds = array<i64: 64, 256>}]} {
    %c0 = arith.constant 0 : index
    %c0_0 = arith.constant 0 : index
    %0 = vector.load %arg1[%c0, %c0_0] : memref<64x256xf32, #tpu.memory_space<vmem>>, vector<64x256xf32>
    %c0_1 = arith.constant 0 : index
    %c0_2 = arith.constant 0 : index
    %c0_3 = arith.constant 0 : index
    %1 = vector.load %arg2[%c0_1, %c0_2, %c0_3] : memref<1x64x64xf32, #tpu.memory_space<vmem>>, vector<1x64x64xf32>
    %2 = vector.shape_cast %1 : vector<1x64x64xf32> to vector<64x64xf32>
    %3 = arith.truncf %0 : vector<64x256xf32> to vector<64x256xbf16>
    %c0_4 = arith.constant 0 : index
    %c0_5 = arith.constant 0 : index
    %4 = vector.load %arg3[%c0_4, %c0_5] : memref<256x32xbf16, #tpu.memory_space<vmem>>, vector<256x32xbf16>
    %cst = arith.constant dense<0.000000e+00> : vector<64x32xf32>
    %5 = tpu.matmul %3, %4, %cst {dimension_numbers = #tpu.dot_dimension_numbers<[1], [0], [0], [1], [0, 0, 1, 1], [], []>} : vector<64x256xbf16>, vector<256x32xbf16>, vector<64x32xf32> -> vector<64x32xf32>
    %c0_6 = arith.constant 0 : index
    %c0_7 = arith.constant 0 : index
    %6 = vector.load %arg4[%c0_6, %c0_7] : memref<1x32xf32, #tpu.memory_space<vmem>>, vector<1x32xf32>
    %7 = vector.broadcast %6 : vector<1x32xf32> to vector<64x32xf32>
    %8 = arith.addf %5, %7 : vector<64x32xf32>
    %9 = arith.truncf %8 : vector<64x32xf32> to vector<64x32xbf16>
    %c0_8 = arith.constant 0 : index
    %c0_9 = arith.constant 0 : index
    %10 = vector.load %arg5[%c0_8, %c0_9] : memref<32x4xbf16, #tpu.memory_space<vmem>>, vector<32x4xbf16>
    %cst_10 = arith.constant dense<0.000000e+00> : vector<64x4xf32>
    %11 = tpu.matmul %9, %10, %cst_10 {dimension_numbers = #tpu.dot_dimension_numbers<[1], [0], [0], [1], [0, 0, 1, 1], [], []>} : vector<64x32xbf16>, vector<32x4xbf16>, vector<64x4xf32> -> vector<64x4xf32>
    %c0_11 = arith.constant 0 : index
    %c0_12 = arith.constant 0 : index
    %12 = vector.load %arg6[%c0_11, %c0_12] : memref<32x4xbf16, #tpu.memory_space<vmem>>, vector<32x4xbf16>
    %cst_13 = arith.constant dense<0.000000e+00> : vector<4x64xf32>
    %13 = tpu.matmul %12, %9, %cst_13 {dimension_numbers = #tpu.dot_dimension_numbers<[0], [1], [1], [0], [0, 1, 1, 0], [], []>} : vector<32x4xbf16>, vector<64x32xbf16>, vector<4x64xf32> -> vector<4x64xf32>
    %cst_14 = arith.constant 0.000000e+00 : f32
    %14 = vector.broadcast %cst_14 : f32 to vector<64x256xf32>
    %15 = vector.extract_strided_slice %11 {offsets = [0, 0], sizes = [64, 1], strides = [1, 1]} : vector<64x4xf32> to vector<64x1xf32>
    %16 = vector.extract_strided_slice %13 {offsets = [0, 0], sizes = [1, 64], strides = [1, 1]} : vector<4x64xf32> to vector<1x64xf32>
    %17 = vector.broadcast %15 : vector<64x1xf32> to vector<64x64xf32>
    %18 = vector.broadcast %16 : vector<1x64xf32> to vector<64x64xf32>
    %19 = arith.addf %17, %18 : vector<64x64xf32>
    %cst_15 = arith.constant 2.000000e-01 : f32
    %20 = vector.broadcast %cst_15 : f32 to vector<64x64xf32>
    %21 = arith.mulf %20, %19 : vector<64x64xf32>
    %22 = arith.maximumf %19, %21 : vector<64x64xf32>
    %23 = arith.addf %22, %2 : vector<64x64xf32>
    %cst_16 = arith.constant dense<0xFF800000> : vector<64xf32>
    %24 = vector.multi_reduction <maximumf>, %23, %cst_16 [1] : vector<64x64xf32> to vector<64xf32>
    %25 = vector.shape_cast %24 : vector<64xf32> to vector<64x1xf32>
    %26 = vector.broadcast %25 : vector<64x1xf32> to vector<64x64xf32>
    %27 = arith.subf %23, %26 : vector<64x64xf32>
    %28 = math.exp %27 : vector<64x64xf32>
    %cst_17 = arith.constant dense<0.000000e+00> : vector<64xf32>
    %29 = vector.multi_reduction <add>, %28, %cst_17 [1] : vector<64x64xf32> to vector<64xf32>
    %30 = vector.shape_cast %29 : vector<64xf32> to vector<64x1xf32>
    %31 = tpu.reciprocal %30 {approx = true} : vector<64x1xf32> -> vector<64x1xf32>
    %32 = vector.broadcast %31 : vector<64x1xf32> to vector<64x64xf32>
    %33 = arith.mulf %28, %32 : vector<64x64xf32>
    %c0_18 = arith.constant 0 : index
    %c0_19 = arith.constant 0 : index
    %c0_20 = arith.constant 0 : index
    %34 = vector.load %arg7[%c0_18, %c0_19, %c0_20] : memref<4x32x256xbf16, #tpu.memory_space<vmem>>, vector<1x32x256xbf16>
    %35 = vector.shape_cast %34 : vector<1x32x256xbf16> to vector<32x256xbf16>
    %cst_21 = arith.constant dense<0.000000e+00> : vector<64x256xf32>
    %36 = tpu.matmul %9, %35, %cst_21 {dimension_numbers = #tpu.dot_dimension_numbers<[1], [0], [0], [1], [0, 0, 1, 1], [], []>} : vector<64x32xbf16>, vector<32x256xbf16>, vector<64x256xf32> -> vector<64x256xf32>
    %37 = arith.truncf %33 : vector<64x64xf32> to vector<64x64xbf16>
    %38 = arith.truncf %36 : vector<64x256xf32> to vector<64x256xbf16>
    %cst_22 = arith.constant dense<0.000000e+00> : vector<64x256xf32>
    %39 = tpu.matmul %37, %38, %cst_22 {dimension_numbers = #tpu.dot_dimension_numbers<[1], [0], [0], [1], [0, 0, 1, 1], [], []>} : vector<64x64xbf16>, vector<64x256xbf16>, vector<64x256xf32> -> vector<64x256xf32>
    %40 = arith.addf %14, %39 : vector<64x256xf32>
    %41 = vector.extract_strided_slice %11 {offsets = [0, 1], sizes = [64, 1], strides = [1, 1]} : vector<64x4xf32> to vector<64x1xf32>
    %42 = vector.extract_strided_slice %13 {offsets = [1, 0], sizes = [1, 64], strides = [1, 1]} : vector<4x64xf32> to vector<1x64xf32>
    %43 = vector.broadcast %41 : vector<64x1xf32> to vector<64x64xf32>
    %44 = vector.broadcast %42 : vector<1x64xf32> to vector<64x64xf32>
    %45 = arith.addf %43, %44 : vector<64x64xf32>
    %cst_23 = arith.constant 2.000000e-01 : f32
    %46 = vector.broadcast %cst_23 : f32 to vector<64x64xf32>
    %47 = arith.mulf %46, %45 : vector<64x64xf32>
    %48 = arith.maximumf %45, %47 : vector<64x64xf32>
    %49 = arith.addf %48, %2 : vector<64x64xf32>
    %cst_24 = arith.constant dense<0xFF800000> : vector<64xf32>
    %50 = vector.multi_reduction <maximumf>, %49, %cst_24 [1] : vector<64x64xf32> to vector<64xf32>
    %51 = vector.shape_cast %50 : vector<64xf32> to vector<64x1xf32>
    %52 = vector.broadcast %51 : vector<64x1xf32> to vector<64x64xf32>
    %53 = arith.subf %49, %52 : vector<64x64xf32>
    %54 = math.exp %53 : vector<64x64xf32>
    %cst_25 = arith.constant dense<0.000000e+00> : vector<64xf32>
    %55 = vector.multi_reduction <add>, %54, %cst_25 [1] : vector<64x64xf32> to vector<64xf32>
    %56 = vector.shape_cast %55 : vector<64xf32> to vector<64x1xf32>
    %57 = tpu.reciprocal %56 {approx = true} : vector<64x1xf32> -> vector<64x1xf32>
    %58 = vector.broadcast %57 : vector<64x1xf32> to vector<64x64xf32>
    %59 = arith.mulf %54, %58 : vector<64x64xf32>
    %c1 = arith.constant 1 : index
    %c0_26 = arith.constant 0 : index
    %c0_27 = arith.constant 0 : index
    %60 = vector.load %arg7[%c1, %c0_26, %c0_27] : memref<4x32x256xbf16, #tpu.memory_space<vmem>>, vector<1x32x256xbf16>
    %61 = vector.shape_cast %60 : vector<1x32x256xbf16> to vector<32x256xbf16>
    %cst_28 = arith.constant dense<0.000000e+00> : vector<64x256xf32>
    %62 = tpu.matmul %9, %61, %cst_28 {dimension_numbers = #tpu.dot_dimension_numbers<[1], [0], [0], [1], [0, 0, 1, 1], [], []>} : vector<64x32xbf16>, vector<32x256xbf16>, vector<64x256xf32> -> vector<64x256xf32>
    %63 = arith.truncf %59 : vector<64x64xf32> to vector<64x64xbf16>
    %64 = arith.truncf %62 : vector<64x256xf32> to vector<64x256xbf16>
    %cst_29 = arith.constant dense<0.000000e+00> : vector<64x256xf32>
    %65 = tpu.matmul %63, %64, %cst_29 {dimension_numbers = #tpu.dot_dimension_numbers<[1], [0], [0], [1], [0, 0, 1, 1], [], []>} : vector<64x64xbf16>, vector<64x256xbf16>, vector<64x256xf32> -> vector<64x256xf32>
    %66 = arith.addf %40, %65 : vector<64x256xf32>
    %67 = vector.extract_strided_slice %11 {offsets = [0, 2], sizes = [64, 1], strides = [1, 1]} : vector<64x4xf32> to vector<64x1xf32>
    %68 = vector.extract_strided_slice %13 {offsets = [2, 0], sizes = [1, 64], strides = [1, 1]} : vector<4x64xf32> to vector<1x64xf32>
    %69 = vector.broadcast %67 : vector<64x1xf32> to vector<64x64xf32>
    %70 = vector.broadcast %68 : vector<1x64xf32> to vector<64x64xf32>
    %71 = arith.addf %69, %70 : vector<64x64xf32>
    %cst_30 = arith.constant 2.000000e-01 : f32
    %72 = vector.broadcast %cst_30 : f32 to vector<64x64xf32>
    %73 = arith.mulf %72, %71 : vector<64x64xf32>
    %74 = arith.maximumf %71, %73 : vector<64x64xf32>
    %75 = arith.addf %74, %2 : vector<64x64xf32>
    %cst_31 = arith.constant dense<0xFF800000> : vector<64xf32>
    %76 = vector.multi_reduction <maximumf>, %75, %cst_31 [1] : vector<64x64xf32> to vector<64xf32>
    %77 = vector.shape_cast %76 : vector<64xf32> to vector<64x1xf32>
    %78 = vector.broadcast %77 : vector<64x1xf32> to vector<64x64xf32>
    %79 = arith.subf %75, %78 : vector<64x64xf32>
    %80 = math.exp %79 : vector<64x64xf32>
    %cst_32 = arith.constant dense<0.000000e+00> : vector<64xf32>
    %81 = vector.multi_reduction <add>, %80, %cst_32 [1] : vector<64x64xf32> to vector<64xf32>
    %82 = vector.shape_cast %81 : vector<64xf32> to vector<64x1xf32>
    %83 = tpu.reciprocal %82 {approx = true} : vector<64x1xf32> -> vector<64x1xf32>
    %84 = vector.broadcast %83 : vector<64x1xf32> to vector<64x64xf32>
    %85 = arith.mulf %80, %84 : vector<64x64xf32>
    %c2 = arith.constant 2 : index
    %c0_33 = arith.constant 0 : index
    %c0_34 = arith.constant 0 : index
    %86 = vector.load %arg7[%c2, %c0_33, %c0_34] : memref<4x32x256xbf16, #tpu.memory_space<vmem>>, vector<1x32x256xbf16>
    %87 = vector.shape_cast %86 : vector<1x32x256xbf16> to vector<32x256xbf16>
    %cst_35 = arith.constant dense<0.000000e+00> : vector<64x256xf32>
    %88 = tpu.matmul %9, %87, %cst_35 {dimension_numbers = #tpu.dot_dimension_numbers<[1], [0], [0], [1], [0, 0, 1, 1], [], []>} : vector<64x32xbf16>, vector<32x256xbf16>, vector<64x256xf32> -> vector<64x256xf32>
    %89 = arith.truncf %85 : vector<64x64xf32> to vector<64x64xbf16>
    %90 = arith.truncf %88 : vector<64x256xf32> to vector<64x256xbf16>
    %cst_36 = arith.constant dense<0.000000e+00> : vector<64x256xf32>
    %91 = tpu.matmul %89, %90, %cst_36 {dimension_numbers = #tpu.dot_dimension_numbers<[1], [0], [0], [1], [0, 0, 1, 1], [], []>} : vector<64x64xbf16>, vector<64x256xbf16>, vector<64x256xf32> -> vector<64x256xf32>
    %92 = arith.addf %66, %91 : vector<64x256xf32>
    %93 = vector.extract_strided_slice %11 {offsets = [0, 3], sizes = [64, 1], strides = [1, 1]} : vector<64x4xf32> to vector<64x1xf32>
    %94 = vector.extract_strided_slice %13 {offsets = [3, 0], sizes = [1, 64], strides = [1, 1]} : vector<4x64xf32> to vector<1x64xf32>
    %95 = vector.broadcast %93 : vector<64x1xf32> to vector<64x64xf32>
    %96 = vector.broadcast %94 : vector<1x64xf32> to vector<64x64xf32>
    %97 = arith.addf %95, %96 : vector<64x64xf32>
    %cst_37 = arith.constant 2.000000e-01 : f32
    %98 = vector.broadcast %cst_37 : f32 to vector<64x64xf32>
    %99 = arith.mulf %98, %97 : vector<64x64xf32>
    %100 = arith.maximumf %97, %99 : vector<64x64xf32>
    %101 = arith.addf %100, %2 : vector<64x64xf32>
    %cst_38 = arith.constant dense<0xFF800000> : vector<64xf32>
    %102 = vector.multi_reduction <maximumf>, %101, %cst_38 [1] : vector<64x64xf32> to vector<64xf32>
    %103 = vector.shape_cast %102 : vector<64xf32> to vector<64x1xf32>
    %104 = vector.broadcast %103 : vector<64x1xf32> to vector<64x64xf32>
    %105 = arith.subf %101, %104 : vector<64x64xf32>
    %106 = math.exp %105 : vector<64x64xf32>
    %cst_39 = arith.constant dense<0.000000e+00> : vector<64xf32>
    %107 = vector.multi_reduction <add>, %106, %cst_39 [1] : vector<64x64xf32> to vector<64xf32>
    %108 = vector.shape_cast %107 : vector<64xf32> to vector<64x1xf32>
    %109 = tpu.reciprocal %108 {approx = true} : vector<64x1xf32> -> vector<64x1xf32>
    %110 = vector.broadcast %109 : vector<64x1xf32> to vector<64x64xf32>
    %111 = arith.mulf %106, %110 : vector<64x64xf32>
    %c3 = arith.constant 3 : index
    %c0_40 = arith.constant 0 : index
    %c0_41 = arith.constant 0 : index
    %112 = vector.load %arg7[%c3, %c0_40, %c0_41] : memref<4x32x256xbf16, #tpu.memory_space<vmem>>, vector<1x32x256xbf16>
    %113 = vector.shape_cast %112 : vector<1x32x256xbf16> to vector<32x256xbf16>
    %cst_42 = arith.constant dense<0.000000e+00> : vector<64x256xf32>
    %114 = tpu.matmul %9, %113, %cst_42 {dimension_numbers = #tpu.dot_dimension_numbers<[1], [0], [0], [1], [0, 0, 1, 1], [], []>} : vector<64x32xbf16>, vector<32x256xbf16>, vector<64x256xf32> -> vector<64x256xf32>
    %115 = arith.truncf %111 : vector<64x64xf32> to vector<64x64xbf16>
    %116 = arith.truncf %114 : vector<64x256xf32> to vector<64x256xbf16>
    %cst_43 = arith.constant dense<0.000000e+00> : vector<64x256xf32>
    %117 = tpu.matmul %115, %116, %cst_43 {dimension_numbers = #tpu.dot_dimension_numbers<[1], [0], [0], [1], [0, 0, 1, 1], [], []>} : vector<64x64xbf16>, vector<64x256xbf16>, vector<64x256xf32> -> vector<64x256xf32>
    %118 = arith.addf %92, %117 : vector<64x256xf32>
    %c0_44 = arith.constant 0 : index
    %c0_45 = arith.constant 0 : index
    %119 = vector.load %arg8[%c0_44, %c0_45] : memref<1x256xf32, #tpu.memory_space<vmem>>, vector<1x256xf32>
    %120 = vector.broadcast %119 : vector<1x256xf32> to vector<64x256xf32>
    %121 = arith.addf %118, %120 : vector<64x256xf32>
    %c0_46 = arith.constant 0 : index
    %c0_47 = arith.constant 0 : index
    %122 = vector.load %arg9[%c0_46, %c0_47] : memref<64x256xf32, #tpu.memory_space<vmem>>, vector<64x256xf32>
    tpu.vector_store %arg9[%c0_46, %c0_47], %121 {strides = array<i32>} : memref<64x256xf32, #tpu.memory_space<vmem>>, vector<64x256xf32>,
    return
  }
  func.func @transform_0(%arg0: i32) -> (i32, i32) {
    %c0_i32 = arith.constant 0 : i32
    %c0_i32_0 = arith.constant 0 : i32
    return %arg0, %c0_i32 : i32, i32
  }
  func.func @transform_1(%arg0: i32) -> (i32, i32, i32) {
    %c0_i32 = arith.constant 0 : i32
    %c0_i32_0 = arith.constant 0 : i32
    %c0_i32_1 = arith.constant 0 : i32
    return %arg0, %c0_i32, %c0_i32_0 : i32, i32, i32
  }
  func.func @transform_2(%arg0: i32) -> (i32, i32) {
    %c0_i32 = arith.constant 0 : i32
    %c0_i32_0 = arith.constant 0 : i32
    %c0_i32_1 = arith.constant 0 : i32
    return %c0_i32, %c0_i32_0 : i32, i32
  }
  func.func @transform_3(%arg0: i32) -> (i32, i32) {
    %c0_i32 = arith.constant 0 : i32
    %c0_i32_0 = arith.constant 0 : i32
    %c0_i32_1 = arith.constant 0 : i32
    return %c0_i32, %c0_i32_0 : i32, i32
  }
  func.func @transform_4(%arg0: i32) -> (i32, i32) {
    %c0_i32 = arith.constant 0 : i32
    %c0_i32_0 = arith.constant 0 : i32
    %c0_i32_1 = arith.constant 0 : i32
    return %c0_i32, %c0_i32_0 : i32, i32
  }
  func.func @transform_5(%arg0: i32) -> (i32, i32) {
    %c0_i32 = arith.constant 0 : i32
    %c0_i32_0 = arith.constant 0 : i32
    %c0_i32_1 = arith.constant 0 : i32
    return %c0_i32, %c0_i32_0 : i32, i32
  }
  func.func @transform_6(%arg0: i32) -> (i32, i32, i32) {
    %c0_i32 = arith.constant 0 : i32
    %c0_i32_0 = arith.constant 0 : i32
    %c0_i32_1 = arith.constant 0 : i32
    %c0_i32_2 = arith.constant 0 : i32
    return %c0_i32, %c0_i32_0, %c0_i32_1 : i32, i32, i32
  }
  func.func @transform_7(%arg0: i32) -> (i32, i32) {
    %c0_i32 = arith.constant 0 : i32
    %c0_i32_0 = arith.constant 0 : i32
    %c0_i32_1 = arith.constant 0 : i32
    return %c0_i32, %c0_i32_0 : i32, i32
  }
  func.func @transform_8(%arg0: i32) -> (i32, i32) {
    %c0_i32 = arith.constant 0 : i32
    %c0_i32_0 = arith.constant 0 : i32
    return %arg0, %c0_i32 : i32, i32
  }
}

module attributes {stable_mosaic.version = 11 : i64} {
  func.func @_head_kernel(%arg0: i32, %arg1: memref<128x24xf32, #tpu.memory_space<vmem>>, %arg2: memref<128x128xf32, #tpu.memory_space<vmem>>, %arg3: memref<128x96xf32, #tpu.memory_space<vmem>>, %arg4: memref<24x32xbf16, #tpu.memory_space<vmem>>, %arg5: memref<1x32xf32, #tpu.memory_space<vmem>>, %arg6: memref<128x32xbf16, #tpu.memory_space<vmem>>, %arg7: memref<1x32xf32, #tpu.memory_space<vmem>>, %arg8: memref<3x160x160xbf16, #tpu.memory_space<vmem>>, %arg9: memref<3x1x160xf32, #tpu.memory_space<vmem>>, %arg10: memref<3x160x160xbf16, #tpu.memory_space<vmem>>, %arg11: memref<3x1x160xf32, #tpu.memory_space<vmem>>, %arg12: memref<160x4xbf16, #tpu.memory_space<vmem>>, %arg13: memref<4x1xf32, #tpu.memory_space<vmem>>, %arg14: memref<128x1xf32, #tpu.memory_space<vmem>>, %arg15: memref<128x1xf32, #tpu.memory_space<vmem>>, %arg16: memref<8x128xbf16, #tpu.memory_space<vmem>>, %arg17: memref<1x1xf32, #tpu.memory_space<vmem>>, %arg18: memref<1x4x128xf32, #tpu.memory_space<vmem>>, %arg19: memref<1x8x160xf32, #tpu.memory_space<vmem>>) attributes {dimension_semantics = [#tpu.dimension_semantics<parallel>], iteration_bounds = array<i64: 2>, scalar_prefetch = 0 : i64, scratch_operands = 0 : i64, tpu.core_type = #tpu.core_type<tc>, window_params = [{transform_indices = @transform_0, window_bounds = array<i64: 128, 24>}, {transform_indices = @transform_1, window_bounds = array<i64: 128, 128>}, {transform_indices = @transform_2, window_bounds = array<i64: 128, 96>}, {pipeline_mode = #tpu.pipeline_mode<synchronous>, transform_indices = @transform_3, window_bounds = array<i64: 24, 32>}, {pipeline_mode = #tpu.pipeline_mode<synchronous>, transform_indices = @transform_4, window_bounds = array<i64: 1, 32>}, {pipeline_mode = #tpu.pipeline_mode<synchronous>, transform_indices = @transform_5, window_bounds = array<i64: 128, 32>}, {pipeline_mode = #tpu.pipeline_mode<synchronous>, transform_indices = @transform_6, window_bounds = array<i64: 1, 32>}, {pipeline_mode = #tpu.pipeline_mode<synchronous>, transform_indices = @transform_7, window_bounds = array<i64: 3, 160, 160>}, {pipeline_mode = #tpu.pipeline_mode<synchronous>, transform_indices = @transform_8, window_bounds = array<i64: 3, 1, 160>}, {pipeline_mode = #tpu.pipeline_mode<synchronous>, transform_indices = @transform_9, window_bounds = array<i64: 3, 160, 160>}, {pipeline_mode = #tpu.pipeline_mode<synchronous>, transform_indices = @transform_10, window_bounds = array<i64: 3, 1, 160>}, {pipeline_mode = #tpu.pipeline_mode<synchronous>, transform_indices = @transform_11, window_bounds = array<i64: 160, 4>}, {pipeline_mode = #tpu.pipeline_mode<synchronous>, transform_indices = @transform_12, window_bounds = array<i64: 4, 1>}, {pipeline_mode = #tpu.pipeline_mode<synchronous>, transform_indices = @transform_13, window_bounds = array<i64: 128, 1>}, {pipeline_mode = #tpu.pipeline_mode<synchronous>, transform_indices = @transform_14, window_bounds = array<i64: 128, 1>}, {pipeline_mode = #tpu.pipeline_mode<synchronous>, transform_indices = @transform_15, window_bounds = array<i64: 8, 128>}, {pipeline_mode = #tpu.pipeline_mode<synchronous>, transform_indices = @transform_16, window_bounds = array<i64: 1, 1>}, {transform_indices = @transform_17, window_bounds = array<i64: 1, 4, 128>}, {transform_indices = @transform_18, window_bounds = array<i64: 1, 8, 160>}]} {
    %c0 = arith.constant 0 : index
    %c0_0 = arith.constant 0 : index
    %0 = vector.load %arg1[%c0, %c0_0] : memref<128x24xf32, #tpu.memory_space<vmem>>, vector<128x24xf32>
    %1 = arith.truncf %0 : vector<128x24xf32> to vector<128x24xbf16>
    %c0_1 = arith.constant 0 : index
    %c0_2 = arith.constant 0 : index
    %2 = vector.load %arg2[%c0_1, %c0_2] : memref<128x128xf32, #tpu.memory_space<vmem>>, vector<128x128xf32>
    %3 = arith.truncf %2 : vector<128x128xf32> to vector<128x128xbf16>
    %c0_3 = arith.constant 0 : index
    %c0_4 = arith.constant 0 : index
    %4 = vector.load %arg4[%c0_3, %c0_4] : memref<24x32xbf16, #tpu.memory_space<vmem>>, vector<24x32xbf16>
    %cst = arith.constant dense<0.000000e+00> : vector<128x32xf32>
    %5 = tpu.matmul %1, %4, %cst {dimension_numbers = #tpu.dot_dimension_numbers<[1], [0], [0], [1], [0, 0, 1, 1], [], []>} : vector<128x24xbf16>, vector<24x32xbf16>, vector<128x32xf32> -> vector<128x32xf32>
    %c0_5 = arith.constant 0 : index
    %c0_6 = arith.constant 0 : index
    %6 = vector.load %arg5[%c0_5, %c0_6] : memref<1x32xf32, #tpu.memory_space<vmem>>, vector<1x32xf32>
    %7 = vector.broadcast %6 : vector<1x32xf32> to vector<128x32xf32>
    %8 = arith.addf %5, %7 : vector<128x32xf32>
    %c0_7 = arith.constant 0 : index
    %c0_8 = arith.constant 0 : index
    %9 = vector.load %arg6[%c0_7, %c0_8] : memref<128x32xbf16, #tpu.memory_space<vmem>>, vector<128x32xbf16>
    %cst_9 = arith.constant dense<0.000000e+00> : vector<128x32xf32>
    %10 = tpu.matmul %3, %9, %cst_9 {dimension_numbers = #tpu.dot_dimension_numbers<[1], [0], [0], [1], [0, 0, 1, 1], [], []>} : vector<128x128xbf16>, vector<128x32xbf16>, vector<128x32xf32> -> vector<128x32xf32>
    %c0_10 = arith.constant 0 : index
    %c0_11 = arith.constant 0 : index
    %11 = vector.load %arg7[%c0_10, %c0_11] : memref<1x32xf32, #tpu.memory_space<vmem>>, vector<1x32xf32>
    %12 = vector.broadcast %11 : vector<1x32xf32> to vector<128x32xf32>
    %13 = arith.addf %10, %12 : vector<128x32xf32>
    %c0_12 = arith.constant 0 : index
    %c0_13 = arith.constant 0 : index
    %14 = vector.load %arg3[%c0_12, %c0_13] : memref<128x96xf32, #tpu.memory_space<vmem>>, vector<128x96xf32>
    %15 = tpu.concatenate %8, %13, %14 in 1 : vector<128x32xf32>, vector<128x32xf32>, vector<128x96xf32> -> vector<128x160xf32>
    %16 = arith.truncf %15 : vector<128x160xf32> to vector<128x160xbf16>
    %c0_14 = arith.constant 0 : index
    %c0_15 = arith.constant 0 : index
    %c0_16 = arith.constant 0 : index
    %17 = vector.load %arg8[%c0_14, %c0_15, %c0_16] : memref<3x160x160xbf16, #tpu.memory_space<vmem>>, vector<1x160x160xbf16>
    %18 = vector.shape_cast %17 : vector<1x160x160xbf16> to vector<160x160xbf16>
    %cst_17 = arith.constant dense<0.000000e+00> : vector<128x160xf32>
    %19 = tpu.matmul %16, %18, %cst_17 {dimension_numbers = #tpu.dot_dimension_numbers<[1], [0], [0], [1], [0, 0, 1, 1], [], []>} : vector<128x160xbf16>, vector<160x160xbf16>, vector<128x160xf32> -> vector<128x160xf32>
    %c0_18 = arith.constant 0 : index
    %c0_19 = arith.constant 0 : index
    %c0_20 = arith.constant 0 : index
    %20 = vector.load %arg9[%c0_18, %c0_19, %c0_20] : memref<3x1x160xf32, #tpu.memory_space<vmem>>, vector<1x1x160xf32>
    %21 = vector.shape_cast %20 : vector<1x1x160xf32> to vector<1x160xf32>
    %22 = vector.broadcast %21 : vector<1x160xf32> to vector<128x160xf32>
    %23 = arith.addf %19, %22 : vector<128x160xf32>
    %cst_21 = arith.constant 0.000000e+00 : f32
    %24 = vector.broadcast %cst_21 : f32 to vector<128x160xf32>
    %25 = arith.maximumf %23, %24 : vector<128x160xf32>
    %26 = arith.truncf %25 : vector<128x160xf32> to vector<128x160xbf16>
    %c0_22 = arith.constant 0 : index
    %c0_23 = arith.constant 0 : index
    %c0_24 = arith.constant 0 : index
    %27 = vector.load %arg10[%c0_22, %c0_23, %c0_24] : memref<3x160x160xbf16, #tpu.memory_space<vmem>>, vector<1x160x160xbf16>
    %28 = vector.shape_cast %27 : vector<1x160x160xbf16> to vector<160x160xbf16>
    %cst_25 = arith.constant dense<0.000000e+00> : vector<128x160xf32>
    %29 = tpu.matmul %26, %28, %cst_25 {dimension_numbers = #tpu.dot_dimension_numbers<[1], [0], [0], [1], [0, 0, 1, 1], [], []>} : vector<128x160xbf16>, vector<160x160xbf16>, vector<128x160xf32> -> vector<128x160xf32>
    %c0_26 = arith.constant 0 : index
    %c0_27 = arith.constant 0 : index
    %c0_28 = arith.constant 0 : index
    %30 = vector.load %arg11[%c0_26, %c0_27, %c0_28] : memref<3x1x160xf32, #tpu.memory_space<vmem>>, vector<1x1x160xf32>
    %31 = vector.shape_cast %30 : vector<1x1x160xf32> to vector<1x160xf32>
    %32 = vector.broadcast %31 : vector<1x160xf32> to vector<128x160xf32>
    %33 = arith.addf %29, %32 : vector<128x160xf32>
    %34 = arith.addf %33, %15 : vector<128x160xf32>
    %35 = arith.truncf %34 : vector<128x160xf32> to vector<128x160xbf16>
    %c1 = arith.constant 1 : index
    %c0_29 = arith.constant 0 : index
    %c0_30 = arith.constant 0 : index
    %36 = vector.load %arg8[%c1, %c0_29, %c0_30] : memref<3x160x160xbf16, #tpu.memory_space<vmem>>, vector<1x160x160xbf16>
    %37 = vector.shape_cast %36 : vector<1x160x160xbf16> to vector<160x160xbf16>
    %cst_31 = arith.constant dense<0.000000e+00> : vector<128x160xf32>
    %38 = tpu.matmul %35, %37, %cst_31 {dimension_numbers = #tpu.dot_dimension_numbers<[1], [0], [0], [1], [0, 0, 1, 1], [], []>} : vector<128x160xbf16>, vector<160x160xbf16>, vector<128x160xf32> -> vector<128x160xf32>
    %c1_32 = arith.constant 1 : index
    %c0_33 = arith.constant 0 : index
    %c0_34 = arith.constant 0 : index
    %39 = vector.load %arg9[%c1_32, %c0_33, %c0_34] : memref<3x1x160xf32, #tpu.memory_space<vmem>>, vector<1x1x160xf32>
    %40 = vector.shape_cast %39 : vector<1x1x160xf32> to vector<1x160xf32>
    %41 = vector.broadcast %40 : vector<1x160xf32> to vector<128x160xf32>
    %42 = arith.addf %38, %41 : vector<128x160xf32>
    %cst_35 = arith.constant 0.000000e+00 : f32
    %43 = vector.broadcast %cst_35 : f32 to vector<128x160xf32>
    %44 = arith.maximumf %42, %43 : vector<128x160xf32>
    %45 = arith.truncf %44 : vector<128x160xf32> to vector<128x160xbf16>
    %c1_36 = arith.constant 1 : index
    %c0_37 = arith.constant 0 : index
    %c0_38 = arith.constant 0 : index
    %46 = vector.load %arg10[%c1_36, %c0_37, %c0_38] : memref<3x160x160xbf16, #tpu.memory_space<vmem>>, vector<1x160x160xbf16>
    %47 = vector.shape_cast %46 : vector<1x160x160xbf16> to vector<160x160xbf16>
    %cst_39 = arith.constant dense<0.000000e+00> : vector<128x160xf32>
    %48 = tpu.matmul %45, %47, %cst_39 {dimension_numbers = #tpu.dot_dimension_numbers<[1], [0], [0], [1], [0, 0, 1, 1], [], []>} : vector<128x160xbf16>, vector<160x160xbf16>, vector<128x160xf32> -> vector<128x160xf32>
    %c1_40 = arith.constant 1 : index
    %c0_41 = arith.constant 0 : index
    %c0_42 = arith.constant 0 : index
    %49 = vector.load %arg11[%c1_40, %c0_41, %c0_42] : memref<3x1x160xf32, #tpu.memory_space<vmem>>, vector<1x1x160xf32>
    %50 = vector.shape_cast %49 : vector<1x1x160xf32> to vector<1x160xf32>
    %51 = vector.broadcast %50 : vector<1x160xf32> to vector<128x160xf32>
    %52 = arith.addf %48, %51 : vector<128x160xf32>
    %53 = arith.addf %52, %34 : vector<128x160xf32>
    %54 = arith.truncf %53 : vector<128x160xf32> to vector<128x160xbf16>
    %c2 = arith.constant 2 : index
    %c0_43 = arith.constant 0 : index
    %c0_44 = arith.constant 0 : index
    %55 = vector.load %arg8[%c2, %c0_43, %c0_44] : memref<3x160x160xbf16, #tpu.memory_space<vmem>>, vector<1x160x160xbf16>
    %56 = vector.shape_cast %55 : vector<1x160x160xbf16> to vector<160x160xbf16>
    %cst_45 = arith.constant dense<0.000000e+00> : vector<128x160xf32>
    %57 = tpu.matmul %54, %56, %cst_45 {dimension_numbers = #tpu.dot_dimension_numbers<[1], [0], [0], [1], [0, 0, 1, 1], [], []>} : vector<128x160xbf16>, vector<160x160xbf16>, vector<128x160xf32> -> vector<128x160xf32>
    %c2_46 = arith.constant 2 : index
    %c0_47 = arith.constant 0 : index
    %c0_48 = arith.constant 0 : index
    %58 = vector.load %arg9[%c2_46, %c0_47, %c0_48] : memref<3x1x160xf32, #tpu.memory_space<vmem>>, vector<1x1x160xf32>
    %59 = vector.shape_cast %58 : vector<1x1x160xf32> to vector<1x160xf32>
    %60 = vector.broadcast %59 : vector<1x160xf32> to vector<128x160xf32>
    %61 = arith.addf %57, %60 : vector<128x160xf32>
    %cst_49 = arith.constant 0.000000e+00 : f32
    %62 = vector.broadcast %cst_49 : f32 to vector<128x160xf32>
    %63 = arith.maximumf %61, %62 : vector<128x160xf32>
    %64 = arith.truncf %63 : vector<128x160xf32> to vector<128x160xbf16>
    %c2_50 = arith.constant 2 : index
    %c0_51 = arith.constant 0 : index
    %c0_52 = arith.constant 0 : index
    %65 = vector.load %arg10[%c2_50, %c0_51, %c0_52] : memref<3x160x160xbf16, #tpu.memory_space<vmem>>, vector<1x160x160xbf16>
    %66 = vector.shape_cast %65 : vector<1x160x160xbf16> to vector<160x160xbf16>
    %cst_53 = arith.constant dense<0.000000e+00> : vector<128x160xf32>
    %67 = tpu.matmul %64, %66, %cst_53 {dimension_numbers = #tpu.dot_dimension_numbers<[1], [0], [0], [1], [0, 0, 1, 1], [], []>} : vector<128x160xbf16>, vector<160x160xbf16>, vector<128x160xf32> -> vector<128x160xf32>
    %c2_54 = arith.constant 2 : index
    %c0_55 = arith.constant 0 : index
    %c0_56 = arith.constant 0 : index
    %68 = vector.load %arg11[%c2_54, %c0_55, %c0_56] : memref<3x1x160xf32, #tpu.memory_space<vmem>>, vector<1x1x160xf32>
    %69 = vector.shape_cast %68 : vector<1x1x160xf32> to vector<1x160xf32>
    %70 = vector.broadcast %69 : vector<1x160xf32> to vector<128x160xf32>
    %71 = arith.addf %67, %70 : vector<128x160xf32>
    %72 = arith.addf %71, %53 : vector<128x160xf32>
    %c0_57 = arith.constant 0 : index
    %c0_58 = arith.constant 0 : index
    %73 = vector.load %arg12[%c0_57, %c0_58] : memref<160x4xbf16, #tpu.memory_space<vmem>>, vector<160x4xbf16>
    %74 = arith.truncf %72 : vector<128x160xf32> to vector<128x160xbf16>
    %cst_59 = arith.constant dense<0.000000e+00> : vector<4x128xf32>
    %75 = tpu.matmul %73, %74, %cst_59 {dimension_numbers = #tpu.dot_dimension_numbers<[0], [1], [1], [0], [0, 1, 1, 0], [], []>} : vector<160x4xbf16>, vector<128x160xbf16>, vector<4x128xf32> -> vector<4x128xf32>
    %c0_60 = arith.constant 0 : index
    %c0_61 = arith.constant 0 : index
    %76 = vector.load %arg13[%c0_60, %c0_61] : memref<4x1xf32, #tpu.memory_space<vmem>>, vector<4x1xf32>
    %77 = vector.broadcast %76 : vector<4x1xf32> to vector<4x128xf32>
    %78 = arith.addf %75, %77 : vector<4x128xf32>
    %c0_62 = arith.constant 0 : index
    %c0_63 = arith.constant 0 : index
    %c0_64 = arith.constant 0 : index
    %79 = vector.load %arg18[%c0_62, %c0_63, %c0_64] : memref<1x4x128xf32, #tpu.memory_space<vmem>>, vector<1x4x128xf32>
    %80 = vector.shape_cast %79 : vector<1x4x128xf32> to vector<4x128xf32>
    %81 = vector.shape_cast %78 : vector<4x128xf32> to vector<1x4x128xf32>
    tpu.vector_store %arg18[%c0_62, %c0_63, %c0_64], %81 {strides = array<i32>} : memref<1x4x128xf32, #tpu.memory_space<vmem>>, vector<1x4x128xf32>,
    %c0_65 = arith.constant 0 : index
    %c0_66 = arith.constant 0 : index
    %82 = vector.load %arg14[%c0_65, %c0_66] : memref<128x1xf32, #tpu.memory_space<vmem>>, vector<128x1xf32>
    %83 = vector.broadcast %82 : vector<128x1xf32> to vector<128x160xf32>
    %84 = arith.mulf %72, %83 : vector<128x160xf32>
    %c0_67 = arith.constant 0 : index
    %c0_68 = arith.constant 0 : index
    %85 = vector.load %arg15[%c0_67, %c0_68] : memref<128x1xf32, #tpu.memory_space<vmem>>, vector<128x1xf32>
    %86 = vector.broadcast %85 : vector<128x1xf32> to vector<128x160xf32>
    %87 = arith.addf %84, %86 : vector<128x160xf32>
    %c0_69 = arith.constant 0 : index
    %c0_70 = arith.constant 0 : index
    %88 = vector.load %arg16[%c0_69, %c0_70] : memref<8x128xbf16, #tpu.memory_space<vmem>>, vector<8x128xbf16>
    %89 = arith.truncf %87 : vector<128x160xf32> to vector<128x160xbf16>
    %cst_71 = arith.constant dense<0.000000e+00> : vector<8x160xf32>
    %90 = tpu.matmul %88, %89, %cst_71 {dimension_numbers = #tpu.dot_dimension_numbers<[1], [0], [0], [1], [0, 0, 1, 1], [], []>} : vector<8x128xbf16>, vector<128x160xbf16>, vector<8x160xf32> -> vector<8x160xf32>
    %c0_72 = arith.constant 0 : index
    %c0_73 = arith.constant 0 : index
    %91 = vector.load %arg17[%c0_72, %c0_73] : memref<1x1xf32, #tpu.memory_space<vmem>>, vector<1x1xf32>
    %92 = vector.broadcast %91 : vector<1x1xf32> to vector<8x160xf32>
    %93 = arith.addf %90, %92 : vector<8x160xf32>
    %c0_74 = arith.constant 0 : index
    %c0_75 = arith.constant 0 : index
    %c0_76 = arith.constant 0 : index
    %94 = vector.load %arg19[%c0_74, %c0_75, %c0_76] : memref<1x8x160xf32, #tpu.memory_space<vmem>>, vector<1x8x160xf32>
    %95 = vector.shape_cast %94 : vector<1x8x160xf32> to vector<8x160xf32>
    %96 = vector.shape_cast %93 : vector<8x160xf32> to vector<1x8x160xf32>
    tpu.vector_store %arg19[%c0_74, %c0_75, %c0_76], %96 {strides = array<i32>} : memref<1x8x160xf32, #tpu.memory_space<vmem>>, vector<1x8x160xf32>,
    return
  }
  func.func @transform_0(%arg0: i32) -> (i32, i32) {
    %c0_i32 = arith.constant 0 : i32
    %c0_i32_0 = arith.constant 0 : i32
    return %arg0, %c0_i32 : i32, i32
  }
  func.func @transform_1(%arg0: i32) -> (i32, i32) {
    %c0_i32 = arith.constant 0 : i32
    %c0_i32_0 = arith.constant 0 : i32
    return %arg0, %c0_i32 : i32, i32
  }
  func.func @transform_2(%arg0: i32) -> (i32, i32) {
    %c0_i32 = arith.constant 0 : i32
    %c0_i32_0 = arith.constant 0 : i32
    return %arg0, %c0_i32 : i32, i32
  }
  func.func @transform_3(%arg0: i32) -> (i32, i32) {
    %c0_i32 = arith.constant 0 : i32
    %c0_i32_0 = arith.constant 0 : i32
    %c0_i32_1 = arith.constant 0 : i32
    return %c0_i32, %c0_i32_0 : i32, i32
  }
  func.func @transform_4(%arg0: i32) -> (i32, i32) {
    %c0_i32 = arith.constant 0 : i32
    %c0_i32_0 = arith.constant 0 : i32
    %c0_i32_1 = arith.constant 0 : i32
    return %c0_i32, %c0_i32_0 : i32, i32
  }
  func.func @transform_5(%arg0: i32) -> (i32, i32) {
    %c0_i32 = arith.constant 0 : i32
    %c0_i32_0 = arith.constant 0 : i32
    %c0_i32_1 = arith.constant 0 : i32
    return %c0_i32, %c0_i32_0 : i32, i32
  }
  func.func @transform_6(%arg0: i32) -> (i32, i32) {
    %c0_i32 = arith.constant 0 : i32
    %c0_i32_0 = arith.constant 0 : i32
    %c0_i32_1 = arith.constant 0 : i32
    return %c0_i32, %c0_i32_0 : i32, i32
  }
  func.func @transform_7(%arg0: i32) -> (i32, i32, i32) {
    %c0_i32 = arith.constant 0 : i32
    %c0_i32_0 = arith.constant 0 : i32
    %c0_i32_1 = arith.constant 0 : i32
    %c0_i32_2 = arith.constant 0 : i32
    return %c0_i32, %c0_i32_0, %c0_i32_1 : i32, i32, i32
  }
  func.func @transform_8(%arg0: i32) -> (i32, i32, i32) {
    %c0_i32 = arith.constant 0 : i32
    %c0_i32_0 = arith.constant 0 : i32
    %c0_i32_1 = arith.constant 0 : i32
    %c0_i32_2 = arith.constant 0 : i32
    return %c0_i32, %c0_i32_0, %c0_i32_1 : i32, i32, i32
  }
  func.func @transform_9(%arg0: i32) -> (i32, i32, i32) {
    %c0_i32 = arith.constant 0 : i32
    %c0_i32_0 = arith.constant 0 : i32
    %c0_i32_1 = arith.constant 0 : i32
    %c0_i32_2 = arith.constant 0 : i32
    return %c0_i32, %c0_i32_0, %c0_i32_1 : i32, i32, i32
  }
  func.func @transform_10(%arg0: i32) -> (i32, i32, i32) {
    %c0_i32 = arith.constant 0 : i32
    %c0_i32_0 = arith.constant 0 : i32
    %c0_i32_1 = arith.constant 0 : i32
    %c0_i32_2 = arith.constant 0 : i32
    return %c0_i32, %c0_i32_0, %c0_i32_1 : i32, i32, i32
  }
  func.func @transform_11(%arg0: i32) -> (i32, i32) {
    %c0_i32 = arith.constant 0 : i32
    %c0_i32_0 = arith.constant 0 : i32
    %c0_i32_1 = arith.constant 0 : i32
    return %c0_i32, %c0_i32_0 : i32, i32
  }
  func.func @transform_12(%arg0: i32) -> (i32, i32) {
    %c0_i32 = arith.constant 0 : i32
    %c0_i32_0 = arith.constant 0 : i32
    %c0_i32_1 = arith.constant 0 : i32
    return %c0_i32, %c0_i32_0 : i32, i32
  }
  func.func @transform_13(%arg0: i32) -> (i32, i32) {
    %c0_i32 = arith.constant 0 : i32
    %c0_i32_0 = arith.constant 0 : i32
    %c0_i32_1 = arith.constant 0 : i32
    return %c0_i32, %c0_i32_0 : i32, i32
  }
  func.func @transform_14(%arg0: i32) -> (i32, i32) {
    %c0_i32 = arith.constant 0 : i32
    %c0_i32_0 = arith.constant 0 : i32
    %c0_i32_1 = arith.constant 0 : i32
    return %c0_i32, %c0_i32_0 : i32, i32
  }
  func.func @transform_15(%arg0: i32) -> (i32, i32) {
    %c0_i32 = arith.constant 0 : i32
    %c0_i32_0 = arith.constant 0 : i32
    %c0_i32_1 = arith.constant 0 : i32
    return %c0_i32, %c0_i32_0 : i32, i32
  }
  func.func @transform_16(%arg0: i32) -> (i32, i32) {
    %c0_i32 = arith.constant 0 : i32
    %c0_i32_0 = arith.constant 0 : i32
    %c0_i32_1 = arith.constant 0 : i32
    return %c0_i32, %c0_i32_0 : i32, i32
  }
  func.func @transform_17(%arg0: i32) -> (i32, i32, i32) {
    %c0_i32 = arith.constant 0 : i32
    %c0_i32_0 = arith.constant 0 : i32
    %c0_i32_1 = arith.constant 0 : i32
    return %arg0, %c0_i32, %c0_i32_0 : i32, i32, i32
  }
  func.func @transform_18(%arg0: i32) -> (i32, i32, i32) {
    %c0_i32 = arith.constant 0 : i32
    %c0_i32_0 = arith.constant 0 : i32
    %c0_i32_1 = arith.constant 0 : i32
    return %arg0, %c0_i32, %c0_i32_0 : i32, i32, i32
  }
}

</mosaic_0001>

<bundles_post_ra>
// kernel: stgat_cl_forward.3
= control target key start
LH: loop header
LB: loop body
LE: loop exit
PB: predicated region body
PF: predicated region fallthrough
CT: control target
= control target key end

     0   :  { %s2902_s27 = smov 0   ;;  %s4398_s0 = inlined_call_operand.vmem [shape: f32[256,24], index: 0, kind: input, shape index: {}]   ;;  %s4399_s1 = inlined_call_operand.vmem [shape: f32[2,128,128], index: 1, kind: input, shape index: {}]   ;;  %s4400_s2 = inlined_call_operand.vmem [shape: bf16[24,32], index: 2, kind: input, shape index: {}]   ;;  %s4401_s3 = inlined_call_operand.vmem [shape: f32[1,32], index: 3, kind: input, shape index: {}]   ;;  %s4402_s4 = inlined_call_operand.vmem [shape: bf16[32,4], index: 4, kind: input, shape index: {}]   ;;  %s4403_s5 = inlined_call_operand.vmem [shape: bf16[32,4], index: 5, kind: input, shape index: {}]   ;;  %s4404_s6 = inlined_call_operand.vmem [shape: bf16[4,32,128], index: 6, kind: input, shape index: {}]   ;;  %s4405_s7 = inlined_call_operand.vmem [shape: f32[1,128], index: 7, kind: input, shape index: {}]   ;;  %s4406_s8 = inlined_call_operand.vmem [shape: f32[256,128], index: 8, kind: output, shape index: {}]  }
   0x1 LB: > { %s2908_s28 = sadd.s32 4294967295, %s2851_s27   ;;  %p2381_p0 = scmp.ge.s32.totalorder %s2851_s27, 1  ;;  %s2851_s27 = sphi %s2902_s27, %s18_s27  }
   0x2   : > { %p273_p1 = scmp.lt.s32.totalorder %s2851_s27, 3 }
   0x4   : > { %p274_p2 = pnand %p2381_p0, %p273_p1 }
   0x6   : > { %277 = sbr.rel (%p274_p2) target bundleno = 1816 (0x718), region = 52 }
   0xb   : > { %v372_v0 = vld [vmem:[%s4400_s2 + $0x8] sm:$0xf]  ;;  %s2382_s9 = sshll.u32 %s2908_s28, 4  ;;  %vm411_vm0 = vcmask 1043456   ;;  %v2504_v4 = vld [vmem:[%s4400_s2] sm:$0xff]  ;;  %vm386_vm1 = vcmask 195584  }
   0xc   : > { %v382_v1 = vunpack.c.l.b16 %v372_v0  ;;  %p313_p3 = scmp.lt.s32.totalorder %s2382_s9, 31  ;;  %v2507_v23 = vld [vmem:[%s4403_s5] sm:$0xff]  ;;  %v2508_v30 = vld [vmem:[%s4403_s5 + $0x8] sm:$0xff]  ;;  %vm488_vm2 = vcmask 261120   ;;  %p318_p4 = scmp.lt.s32.totalorder %s2908_s28, 1 }
   0xd   : > { %578 = vxpose.xlu0.c.b16.start [1/2] (short) (narrow) %v2507_v23, 16  ;;  %v2506_v31 = vld [vmem:[%s4402_s4 + $0x8] sm:$0xff]  ;;  %v2505_v33 = vld [vmem:[%s4402_s4] sm:$0xff] }
   0xe   : > { %v384_v2 = vpack.c.b16 %v382_v1, %v382_v1  ;;  %s4585_s9 = smov (!%p313_p3, %s2382_s9), 31  ;;  %v2510_v32 = vld [vmem:[%s4404_s6 + $0x8] sm:$0xff]  ;;  %2519 = vmatpush.bf16.msra.mxu1 %v2506_v31  ;;  %v2509_v34 = vld [vmem:[%s4404_s6] sm:$0xff]  ;;  %s4587_s28 = smov (!%p318_p4, %s2908_s28), 1 }
   0xf   : > { %s2383_s10 = sshll.u32 %s4585_s9, 3  ;;  %v2571_v36 = vld [vmem:[%s4401_s3] ss:$0 sm:$0xff]  ;;  %s2503_s20 = sshll.u32 %s4587_s28, 7 }
  0x10   : > { %v413_v3 = vsel %vm411_vm0, %v384_v2, 0  ;;  %s2927_s15 = scalar_lea.vmem %s4398_s0, %s2383_s10  ;;  %s3252_s22 = scalar_lea.vmem %s4399_s1, %s2503_s20 }
  0x11   : > { %421 = vmatpush.bf16.msra.mxu0 %v413_v3  ;;  %2517 = vmatpush.bf16.msra.mxu3 %v413_v3  ;;  %v330_v5 = vld [vmem:[%s2927_s15] sm:$0xff]  ;;  %v331_v6 = vld [vmem:[%s2927_s15 + $0x8] sm:$0xff]  ;;  %v332_v11 = vld [vmem:[%s2927_s15 + $0x10] sm:$0xff]  ;;  %s4258_s13 = scalar_lea.vmem %s4406_s8, %s2383_s10 }
  0x12   : > { %v334_v7 = vld [vmem:[%s2927_s15 + $0x20] sm:$0xff]  ;;  %v335_v8 = vld [vmem:[%s2927_s15 + $0x28] sm:$0xff]  ;;  %v362_v9 = vpack.c.bf16 %v331_v6, %v330_v5  ;;  %v333_v12 = vld [vmem:[%s2927_s15 + $0x18] sm:$0xff]  ;;  %2520 = vmatpush.bf16.msra.mxu1 %v2505_v33 }
  0x13   : > { %v364_v10 = vpack.c.bf16 %v335_v8, %v334_v7  ;;  %v336_v13 = vld [vmem:[%s2927_s15 + $0x30] sm:$0xff]  ;;  %v337_v14 = vld [vmem:[%s2927_s15 + $0x38] sm:$0xff]  ;;  %v363_v15 = vpack.c.bf16 %v333_v12, %v332_v11  ;;  %v338_v17 = vld [vmem:[%s2927_s15 + $0x40] sm:$0xff] }
  0x14   : > { %v365_v16 = vpack.c.bf16 %v337_v14, %v336_v13  ;;  %v339_v18 = vld [vmem:[%s2927_s15 + $0x48] sm:$0xff]  ;;  %v340_v20 = vld [vmem:[%s2927_s15 + $0x50] sm:$0xff]  ;;  %v341_v21 = vld [vmem:[%s2927_s15 + $0x58] sm:$0xff]  ;;  %v2853_v14 = vmov 0  }
  0x15   : > { %422 = vmatpush.bf16.msra.mxu0 %v2504_v4  ;;  %2518 = vmatpush.bf16.msra.mxu3 %v2504_v4  ;;  %v366_v19 = vpack.c.bf16 %v339_v18, %v338_v17  ;;  %v367_v22 = vpack.c.bf16 %v341_v21, %v340_v20  ;;  %v342_v24 = vld [vmem:[%s2927_s15 + $0x60] sm:$0xff]  ;;  %v343_v25 = vld [vmem:[%s2927_s15 + $0x68] sm:$0xff]  ;;  %v344_v27 = vld [vmem:[%s2927_s15 + $0x70] sm:$0xff]  ;;  %v2854_v17 = vmov 1  }
  0x16   : > { %v368_v26 = vpack.c.bf16 %v343_v25, %v342_v24  ;;  %v345_v28 = vld [vmem:[%s2927_s15 + $0x78] sm:$0xff]  ;;  %v2514_v13 = vld [vmem:[%s4404_s6 + $0x28] sm:$0xff]  ;;  %2533 = vset.pattern.permute.xlu1 %v2853_v14  ;;  %2534 = vset.pattern.permute.xlu2 %v2854_v17 }
  0x17   : > { %v369_v29 = vpack.c.bf16 %v345_v28, %v344_v27 }
  0x18   : > { %2392 = vmatmul.msk.bf16.vlgmr.msra.gmra.mxu0 %vm386_vm1, %v362_v9  ;;  %2394 = vmatmul.msk.bf16.vlgmr.msra.gmra.mxu3 %vm386_vm1, %v364_v10 }
  0x19   : > { %519 = vmatpush.bf16.msrb.mxu0 %v2506_v31  ;;  %921 = vmatpush.bf16.msrb.mxu3 %v2510_v32  ;;  %v2511_v32 = vld [vmem:[%s4404_s6 + $0x10] sm:$0xff] }
  0x1d   : > { %579 = vxpose.xlu0.c.b16.end [2/2] (short) (narrow) %v2508_v30, 16  ;;  %520 = vmatpush.bf16.msrb.mxu0 %v2505_v33 }
  0x1e   : > { %922 = vmatpush.bf16.msrb.mxu3 %v2509_v34 }
  0x22   : > { %1729 = vmatpush.bf16.msra.mxu3 %v2514_v13 }
  0x28   : > { %2393 = vmatmul.msk.bf16.gmra.mxu0 %vm386_vm1, %v363_v15  ;;  %2395 = vmatmul.msk.bf16.gmra.mxu3 %vm386_vm1, %v365_v16  ;;  %v2513_v15 = vld [vmem:[%s4404_s6 + $0x20] sm:$0xff] }
  0x29   : > { %1730 = vmatpush.bf16.msra.mxu3 %v2513_v15 }
  0x38   : > { %2396 = vmatmul.msk.bf16.gmra.mxu3 %vm386_vm1, %v366_v19 }
  0x48   : > { %2397 = vmatmul.msk.bf16.gmra.mxu3 %vm386_vm1, %v367_v22 }
  0x58   : > { %2398 = vmatmul.msk.bf16.gmra.mxu3 %vm386_vm1, %v368_v26 }
  0x68   : > { %2399 = vmatmul.msk.bf16.gmra.mxu3 %vm386_vm1, %v369_v29  ;;  %v2512_v29 = vld [vmem:[%s4404_s6 + $0x18] sm:$0xff] }
  0x84   : > { %2537 = vset.pattern.permute.xlu0 %v2854_v17 }
  0x95   : > { %v424_v35 = vpop.f32.mrf.mxu0 }
  0x96   : > { %v425_v38 = vadd.f32 %v2571_v36, %v424_v35 }
  0x9b   : > { %v434_v37 = vpop.f32.mrf.mxu3 }
  0x9c   : > { %v435_v43 = vadd.f32 %v2571_v36, %v434_v37 }
  0x9d   : > { %v426_v39 = vpop.f32.mrf.mxu0 }
  0x9e   : > { %v427_v40 = vadd.f32 %v2571_v36, %v426_v39 }
  0xa0   : > { %v2974_v41 = vpack.c.bf16 %v427_v40, %v425_v38 }
  0xa2   : > { %4454 = vst [vmem:[#allocation2_spill] sm:$0xff] %v2974_v41  ;;  %2408 = vmatmul.msk.bf16.vlgmr.msrb.gmra.mxu0 %vm488_vm2, %v2974_v41  ;;  %2433 = vmatmul.msk.bf16.vlgmr.msrb.gmra.mxu3 %vm488_vm2, %v2974_v41  ;;  %v490_v31 = vsel %vm488_vm2, %v2974_v41, 0 }
  0xa3   : > { %v436_v42 = vpop.f32.mrf.mxu3 }
  0xa4   : > { %v437_v44 = vadd.f32 %v2571_v36, %v436_v42 }
  0xa5   : > { %v429_v45 = vpop.f32.mrf.mxu0 }
  0xa6   : > { %v2980_v46 = vpack.c.bf16 %v437_v44, %v435_v43  ;;  %v430_v48 = vadd.f32 %v2571_v36, %v429_v45 }
  0xa8   : > { %4455 = vst [vmem:[#allocation3_spill] sm:$0xff] %v2980_v46  ;;  %2410 = vmatmul.msk.bf16.vlgmr.msra.gmra.mxu1 %vm488_vm2, %v2980_v46  ;;  %v496_v22 = vsel %vm488_vm2, %v2980_v46, 0 }
  0xab   : > { %v439_v47 = vpop.f32.mrf.mxu3 }
  0xac   : > { %v440_v53 = vadd.f32 %v2571_v36, %v439_v47 }
  0xad   : > { %v431_v49 = vpop.f32.mrf.mxu0 }
  0xae   : > { %v432_v50 = vadd.f32 %v2571_v36, %v431_v49 }
  0xb0   : > { %v2984_v51 = vpack.c.bf16 %v432_v50, %v430_v48 }
  0xb2   : > { %4456 = vst [vmem:[#allocation4_spill] sm:$0xff] %v2984_v51  ;;  %2434 = vmatmul.msk.bf16.gmra.mxu3 %vm488_vm2, %v2984_v51  ;;  %2409 = vmatmul.msk.bf16.gmra.mxu0 %vm488_vm2, %v2984_v51  ;;  %v493_v26 = vsel %vm488_vm2, %v2984_v51, 0 }
  0xb3   : > { %v441_v52 = vpop.f32.mrf.mxu3 }
  0xb4   : > { %v442_v54 = vadd.f32 %v2571_v36, %v441_v52 }
  0xb6   : > { %v2990_v55 = vpack.c.bf16 %v442_v54, %v440_v53 }
  0xb8   : > { %4457 = vst [vmem:[#allocation5_spill] sm:$0xff] %v2990_v55  ;;  %2411 = vmatmul.msk.bf16.gmra.mxu1 %vm488_vm2, %v2990_v55  ;;  %v499_v20 = vsel %vm488_vm2, %v2990_v55, 0 }
  0xb9   : > { %v586_v34 = vpop.trf.xlu0 }
  0xbb   : > { %v444_v56 = vpop.f32.mrf.mxu3 }
  0xbc   : > { %v445_v58 = vadd.f32 %v2571_v36, %v444_v56 }
  0xc2   : > { %2435 = vmatmul.msk.bf16.gmra.mxu3 %vm488_vm2, %v2980_v46 }
  0xc3   : > { %v446_v57 = vpop.f32.mrf.mxu3 }
  0xc4   : > { %v447_v59 = vadd.f32 %v2571_v36, %v446_v57 }
  0xc6   : > { %v2996_v60 = vpack.c.bf16 %v447_v59, %v445_v58 }
  0xc8   : > { %4458 = vst [vmem:[#allocation6_spill] sm:$0xff] %v2996_v60  ;;  %2412 = vmatmul.msk.bf16.gmra.mxu1 %vm488_vm2, %v2996_v60  ;;  %v502_v19 = vsel %vm488_vm2, %v2996_v60, 0 }
  0xcb   : > { %v449_v61 = vpop.f32.mrf.mxu3 }
  0xcc   : > { %v450_v63 = vadd.f32 %v2571_v36, %v449_v61 }
  0xd2   : > { %2436 = vmatmul.msk.bf16.gmra.mxu3 %vm488_vm2, %v2990_v55 }
  0xd3   : > { %v451_v62 = vpop.f32.mrf.mxu3 }
  0xd4   : > { %v452_v0 = vadd.f32 %v2571_v36, %v451_v62 }
  0xd6   : > { %v3002_v1 = vpack.c.bf16 %v452_v0, %v450_v63 }
  0xd8   : > { %4459 = vst [vmem:[#allocation7_spill] sm:$0xff] %v3002_v1  ;;  %2413 = vmatmul.msk.bf16.gmra.mxu1 %vm488_vm2, %v3002_v1  ;;  %v505_v18 = vsel %vm488_vm2, %v3002_v1, 0 }
  0xdb   : > { %v454_v2 = vpop.f32.mrf.mxu3 }
  0xdc   : > { %v455_v4 = vadd.f32 %v2571_v36, %v454_v2 }
  0xe2   : > { %2437 = vmatmul.msk.bf16.gmra.mxu3 %vm488_vm2, %v2996_v60 }
  0xe3   : > { %v456_v3 = vpop.f32.mrf.mxu3 }
  0xe4   : > { %v457_v5 = vadd.f32 %v2571_v36, %v456_v3 }
  0xe6   : > { %v3008_v6 = vpack.c.bf16 %v457_v5, %v455_v4 }
  0xe8   : > { %4460 = vst [vmem:[#allocation8_spill] sm:$0xff] %v3008_v6  ;;  %2414 = vmatmul.msk.bf16.gmra.mxu1 %vm488_vm2, %v3008_v6  ;;  %v508_v16 = vsel %vm488_vm2, %v3008_v6, 0 }
  0xeb   : > { %v459_v7 = vpop.f32.mrf.mxu3 }
  0xec   : > { %v460_v9 = vadd.f32 %v2571_v36, %v459_v7 }
  0xf2   : > { %2438 = vmatmul.msk.bf16.gmra.mxu3 %vm488_vm2, %v3002_v1 }
  0xf3   : > { %v461_v8 = vpop.f32.mrf.mxu3 }
  0xf4   : > { %v462_v10 = vadd.f32 %v2571_v36, %v461_v8 }
  0xf6   : > { %v3014_v11 = vpack.c.bf16 %v462_v10, %v460_v9 }
  0xf8   : > { %4461 = vst [vmem:[#allocation9_spill] sm:$0xff] %v3014_v11  ;;  %2415 = vmatmul.msk.bf16.gmra.mxu1 %vm488_vm2, %v3014_v11  ;;  %v511_v12 = vsel %vm488_vm2, %v3014_v11, 0 }
  0xf9   : > { %597 = vmatpush.bf16.xpose.msra.mxu2 %v511_v12 }
 0x101   : > { %598 = vmatpush.bf16.xpose.msra.mxu2 %v508_v16 }
 0x102   : > { %2439 = vmatmul.msk.bf16.gmra.mxu3 %vm488_vm2, %v3008_v6 }
 0x109   : > { %599 = vmatpush.bf16.xpose.msra.mxu2 %v505_v18 }
 0x111   : > { %600 = vmatpush.bf16.xpose.msra.mxu2 %v502_v19 }
 0x112   : > { %2440 = vmatmul.msk.bf16.gmra.mxu3 %vm488_vm2, %v3014_v11 }
 0x119   : > { %601 = vmatpush.bf16.xpose.msra.mxu2 %v499_v20 }
 0x11f   : > { %v3041_v21 = vpop.f32.mrf.mxu0 }
 0x120   : > { %612 = vperm.xlu1 %2533, %v3041_v21   ;;  %981 = vperm.xlu2 %2534, %v3041_v21  }
 0x121   : > { %602 = vmatpush.bf16.xpose.msra.mxu2 %v496_v22 }
 0x122   : > { %2473 = vmatmul.msk.bf16.vlgmr.msra.gmra.mxu3 %vm488_vm2, %v2974_v41 }
 0x125   : > { %v3049_v23 = vpop.f32.mrf.mxu1  ;;  %v3051_v24 = vpop.f32.mrf.mxu3 }
 0x126   : > { %4462 = vst [vmem:[#allocation10_spill] sm:$0xff] %v3049_v23 }
 0x127   : > { %v3053_v25 = vpop.f32.mrf.mxu0 }
 0x128   : > { %632 = vperm.xlu1 %2533, %v3049_v23   ;;  %985 = vperm.xlu0 %2537, %v3053_v25  }
 0x129   : > { %603 = vmatpush.bf16.xpose.msra.mxu2 %v493_v26 }
 0x12d   : > { %v3059_v27 = vpop.f32.mrf.mxu1  ;;  %v3061_v28 = vpop.f32.mrf.mxu3 }
 0x12e   : > { %4463 = vst [vmem:[#allocation11_spill] sm:$0xff] %v3059_v27  ;;  %1001 = vperm.xlu2 %2534, %v3059_v27   ;;  %v972_v30 = vpack.c.bf16 %v3061_v28, %v3051_v24 }
 0x12f   : > { %v3079_v33 = vpop.f32.mrf.mxu0 }
 0x130   : > { %2535 = vset.pattern.permute.xlu1 %v2854_v17  ;;  %2544 = vset.pattern.permute.xlu0 %v2853_v14  ;;  %4464 = vst [vmem:[#allocation12_spill] sm:$0xff] %v3079_v33 }
 0x131   : > { %997 = vperm.xlu1 %2535, %v3049_v23   ;;  %604 = vmatpush.bf16.xpose.msra.mxu2 %v490_v31 }
 0x132   : > { %2474 = vmatmul.msk.bf16.gmra.mxu3 %vm488_vm2, %v2984_v51 }
 0x135   : > { %v3081_v35 = vpop.f32.mrf.mxu1  ;;  %v3083_v36 = vpop.f32.mrf.mxu3 }
 0x136   : > { %4465 = vst [vmem:[#allocation13_spill] sm:$0xff] %v3081_v35  ;;  %2538 = vset.pattern.permute.xlu2 %v2853_v14 }
 0x137   : > { %622 = vperm.xlu2 %2538, %v3079_v33   ;;  %v3111_v43 = vpop.f32.mrf.mxu0 }
 0x138   : > { %2424 = vmatmul.msk.bf16.vlgmr.msra.gmra.mxu2 %vm488_vm2, %v586_v34  ;;  %4468 = vst [vmem:[#allocation16_spill] sm:$0xff] %v3111_v43 }
 0x139   : > { %1276 = vmatpush.bf16.msrb.mxu2 %v2512_v29  ;;  %2536 = vset.pattern.permute.xlu1 %v2853_v14 }
 0x13a   : > { %617 = vperm.xlu1 %2536, %v3053_v25  }
 0x13d   : > { %1277 = vmatpush.bf16.msrb.mxu2 %v2511_v32  ;;  %v3090_v37 = vpop.f32.mrf.mxu1  ;;  %v3092_v38 = vpop.f32.mrf.mxu3 }
 0x13e   : > { %4466 = vst [vmem:[#allocation14_spill] sm:$0xff] %v3090_v37  ;;  %647 = vperm.xlu0 %2544, %v3090_v37   ;;  %v973_v39 = vpack.c.bf16 %v3092_v38, %v3083_v36 }
 0x13f   : > { %2539 = vset.pattern.permute.xlu2 %v2854_v17 }
 0x140   : > { %989 = vperm.xlu2 %2539, %v3079_v33  }
 0x142   : > { %2475 = vmatmul.msk.bf16.gmra.mxu3 %vm488_vm2, %v2980_v46  ;;  %637 = vperm.xlu1 %2536, %v3059_v27  }
 0x145   : > { %v3102_v40 = vpop.f32.mrf.mxu1  ;;  %v3104_v42 = vpop.f32.mrf.mxu3 }
 0x146   : > { %4467 = vst [vmem:[#allocation15_spill] sm:$0xff] %v3102_v40  ;;  %2545 = vset.pattern.permute.xlu0 %v2854_v17 }
 0x147   : > { %1013 = vperm.xlu0 %2545, %v3102_v40  }
 0x148   : > { %2540 = vset.pattern.permute.xlu2 %v2853_v14  ;;  %2453 = vmatmul.msk.bf16.vlgmr.msrb.gmra.mxu2 %vm488_vm2, %v2974_v41 }
 0x149   : > { %642 = vperm.xlu2 %2540, %v3081_v35  }
 0x14a   : > { %2543 = vset.pattern.permute.xlu1 %v2854_v17 }
 0x14b   : > { %993 = vperm.xlu1 %2543, %v3111_v43  }
 0x14d   : > { %v3116_v44 = vpop.f32.mrf.mxu1  ;;  %v3118_v45 = vpop.f32.mrf.mxu3 }
 0x14e   : > { %4469 = vst [vmem:[#allocation17_spill] sm:$0xff] %v3116_v44  ;;  %v974_v47 = vpack.c.bf16 %v3118_v45, %v3104_v42 }
 0x14f   : > { %1017 = vperm.xlu0 %2545, %v3116_v44  }
 0x151   : > { %2541 = vset.pattern.permute.xlu2 %v2854_v17 }
 0x152   : > { %2476 = vmatmul.msk.bf16.gmra.mxu3 %vm488_vm2, %v2990_v55  ;;  %1005 = vperm.xlu2 %2541, %v3081_v35  }
 0x153   : > { %1009 = vperm.xlu1 %2543, %v3090_v37  }
 0x155   : > { %v3128_v48 = vpop.f32.mrf.mxu1  ;;  %v3130_v49 = vpop.f32.mrf.mxu3 }
 0x156   : > { %4470 = vst [vmem:[#allocation18_spill] sm:$0xff] %v3128_v48 }
 0x157   : > { %2550 = vset.pattern.permute.xlu0 %v2853_v14 }
 0x158   : > { %2454 = vmatmul.msk.bf16.gmra.mxu2 %vm488_vm2, %v2984_v51  ;;  %v353_v51 = vld [vmem:[%s3252_s22 + $0x38] sm:$0xff] }
 0x15a   : > { %2542 = vset.pattern.permute.xlu2 %v2853_v14 }
 0x15b   : > { %2546 = vset.pattern.permute.xlu1 %v2853_v14  ;;  %627 = vperm.xlu2 %2542, %v3111_v43  }
 0x15c   : > { %652 = vperm.xlu1 %2546, %v3102_v40  }
 0x15d   : > { %v3139_v50 = vpop.f32.mrf.mxu1  ;;  %v3141_v52 = vpop.f32.mrf.mxu3 }
 0x15e   : > { %4471 = vst [vmem:[#allocation19_spill] sm:$0xff] %v3139_v50  ;;  %667 = vperm.xlu0 %2550, %v3139_v50   ;;  %v975_v53 = vpack.c.bf16 %v3141_v52, %v3130_v49 }
 0x162   : > { %2477 = vmatmul.msk.bf16.gmra.mxu3 %vm488_vm2, %v2996_v60 }
 0x163   : > { %657 = vperm.xlu2 %2542, %v3116_v44  }
 0x164   : > { %2547 = vset.pattern.permute.xlu1 %v2854_v17 }
 0x165   : > { %v3150_v54 = vpop.f32.mrf.mxu1  ;;  %v944_v56 = vpop.f32.mrf.mxu3  ;;  %1021 = vperm.xlu1 %2547, %v3128_v48  }
 0x166   : > { %4472 = vst [vmem:[#allocation20_spill] sm:$0xff] %v3150_v54  ;;  %2551 = vset.pattern.permute.xlu0 %v2854_v17 }
 0x167   : > { %1029 = vperm.xlu0 %2551, %v3150_v54  }
 0x168   : > { %2455 = vmatmul.msk.bf16.gmra.mxu2 %vm488_vm2, %v2980_v46 }
 0x16b   : > { %2549 = vset.pattern.permute.xlu2 %v2854_v17 }
 0x16c   : > { %1025 = vperm.xlu2 %2549, %v3139_v50  }
 0x16d   : > { %v3159_v57 = vpop.f32.mrf.mxu1  ;;  %v946_v58 = vpop.f32.mrf.mxu3  ;;  %2548 = vset.pattern.permute.xlu1 %v2853_v14 }
 0x16e   : > { %4473 = vst [vmem:[#allocation21_spill] sm:$0xff] %v3159_v57  ;;  %662 = vperm.xlu1 %2548, %v3128_v48   ;;  %v976_v20 = vpack.c.bf16 %v946_v58, %v944_v56  ;;  %v349_v48 = vld [vmem:[%s3252_s22 + $0x18] sm:$0xff] }
 0x16f   : > { %2552 = vset.pattern.permute.xlu0 %v2853_v14 }
 0x170   : > { %672 = vperm.xlu0 %2552, %v3150_v54  }
 0x172   : > { %2478 = vmatmul.msk.bf16.gmra.mxu3 %vm488_vm2, %v3002_v1 }
 0x174   : > { %2554 = vset.pattern.permute.xlu2 %v2853_v14 }
 0x175   : > { %v3168_v59 = vpop.f32.mrf.mxu1  ;;  %v949_v61 = vpop.f32.mrf.mxu3  ;;  %677 = vperm.xlu2 %2554, %v3159_v57  }
 0x176   : > { %2556 = vset.pattern.permute.xlu1 %v2854_v17 }
 0x178   : > { %2553 = vset.pattern.permute.xlu0 %v2854_v17  ;;  %2456 = vmatmul.msk.bf16.gmra.mxu2 %vm488_vm2, %v2990_v55 }
 0x179   : > { %1033 = vperm.xlu0 %2553, %v3159_v57  }
 0x17a   : > { %v982_v0 = vpop.permute.xlu2 %981 }
 0x17d   : > { %v3176_v62 = vpop.f32.mrf.mxu1  ;;  %v951_v63 = vpop.f32.mrf.mxu3  ;;  %2555 = vset.pattern.permute.xlu2 %v2854_v17 }
 0x17e   : > { %1041 = vperm.xlu1 %2556, %v3176_v62   ;;  %1037 = vperm.xlu2 %2555, %v3168_v59   ;;  %v977_v18 = vpack.c.bf16 %v951_v63, %v949_v61 }
 0x181   : > { %2557 = vset.pattern.permute.xlu0 %v2853_v14 }
 0x182   : > { %2479 = vmatmul.msk.bf16.gmra.mxu3 %vm488_vm2, %v3008_v6 }
 0x185   : > { %v954_v2 = vpop.f32.mrf.mxu3 }
 0x186   : > { %2558 = vset.pattern.permute.xlu1 %v2853_v14 }
 0x188   : > { %2457 = vmatmul.msk.bf16.gmra.mxu2 %vm488_vm2, %v2996_v60  ;;  %v3187_v3 = vpop.permute.xlu2 %1001 }
 0x18d   : > { %v956_v4 = vpop.f32.mrf.mxu3 }
 0x18e   : > { %v978_v14 = vpack.c.bf16 %v956_v4, %v954_v2 }
 0x191   : > { %v3189_v5 = vpop.permute.xlu2 %622 }
 0x192   : > { %2480 = vmatmul.msk.bf16.gmra.mxu3 %vm488_vm2, %v3014_v11  ;;  %v3193_v7 = vpop.permute.xlu1 %612 }
 0x195   : > { %v959_v8 = vpop.f32.mrf.mxu3 }
 0x198   : > { %2458 = vmatmul.msk.bf16.gmra.mxu2 %vm488_vm2, %v3002_v1  ;;  %v3318_v1 = vld [vmem:[%s3252_s22 + $0x30] sm:$0xff] }
 0x19a   : > { %v633_v9 = vpop.permute.xlu1 %632  ;;  %v990_v10 = vpop.permute.xlu2 %989 }
 0x19b   : > { %v986_v19 = vpop.permute.xlu0 %985 }
 0x19d   : > { %v961_v12 = vpop.f32.mrf.mxu3 }
 0x19e   : > { %v979_v13 = vpack.c.bf16 %v961_v12, %v959_v8  ;;  %v350_v8 = vld [vmem:[%s3252_s22 + $0x20] sm:$0xff]  ;;  %v3262_v12 = vld [vmem:[%s3252_s22 + $0x8] sm:$0xff] }
 0x19f   : > { %4475 = vst [vmem:[#allocation23_spill] sm:$0xff] %v3262_v12 }
 0x1a0   : > { %1384 = vmatpush.bf16.msrb.mxu1 %v979_v13 }
 0x1a3   : > { %v998_v15 = vpop.permute.xlu1 %997  ;;  %v3197_v16 = vpop.permute.xlu2 %642 }
 0x1a4   : > { %1385 = vmatpush.bf16.msrb.mxu1 %v978_v14 }
 0x1a5   : > { %v3199_v17 = vpop.f32.mrf.mxu3 }
 0x1a8   : > { %2459 = vmatmul.msk.bf16.gmra.mxu2 %vm488_vm2, %v3008_v6  ;;  %1386 = vmatpush.bf16.msrb.mxu1 %v977_v18 }
 0x1ac   : > { %1387 = vmatpush.bf16.msrb.mxu1 %v976_v20  ;;  %v3203_v22 = vpop.permute.xlu1 %617  ;;  %v1006_v26 = vpop.permute.xlu2 %1005  ;;  %v3265_v20 = vld [vmem:[%s3252_s22] sm:$0xff] }
 0x1ad   : > { %v3205_v29 = vpop.f32.mrf.mxu3  ;;  %4476 = vst [vmem:[#allocation24_spill] sm:$0xff] %v3265_v20 }
 0x1b0   : > { %1388 = vmatpush.bf16.msrb.mxu1 %v975_v53  ;;  %v3212_v32 = vpop.permute.xlu0 %647 }
 0x1b4   : > { %1389 = vmatpush.bf16.msrb.mxu1 %v974_v47  ;;  %v3218_v34 = vpop.permute.xlu1 %637 }
 0x1b5   : > { %v3220_v56 = vpop.f32.mrf.mxu3  ;;  %v3222_v58 = vpop.permute.xlu2 %627 }
 0x1b8   : > { %2460 = vmatmul.msk.bf16.gmra.mxu2 %vm488_vm2, %v3014_v11  ;;  %1390 = vmatpush.bf16.msrb.mxu1 %v973_v39 }
 0x1b9   : > { %v3241_v47 = vpop.permute.xlu0 %1013 }
 0x1bb   : > { %v3230_v49 = vpop.f32.mrf.mxu2 }
 0x1bc   : > { %4474 = vst [vmem:[#allocation22_spill] sm:$0xff] %v3230_v49  ;;  %v3233_v42 = vperm.slane %v3230_v49, 0  ;;  %v3236_v45 = vperm.slane %v3230_v49, 1  ;;  %1391 = vmatpush.bf16.msrb.mxu1 %v972_v30  ;;  %v354_v49 = vld [vmem:[%s3252_s22 + $0x40] sm:$0xff] }
 0x1bd   : > { %v3243_v52 = vpop.f32.mrf.mxu3  ;;  %v994_v38 = vpop.permute.xlu1 %993 }
 0x1be   : > { %v3247_v39 = vpop.permute.xlu2 %657  ;;  %v1049_v24 = vadd.f32 %v3236_v45, %v998_v15  ;;  %v1046_v28 = vadd.f32 %v3236_v45, %v986_v19  ;;  %v1045_v30 = vadd.f32 %v3236_v45, %v982_v0  ;;  %v1047_v63 = vadd.f32 %v3236_v45, %v990_v10 }
 0x1bf   : > { %v695_v2 = vadd.f32 %v3233_v42, %v633_v9  ;;  %v1048_v4 = vadd.f32 %v3236_v45, %v994_v38 }
 0x1c0   : > { %v1065_v53 = vmul.f32 0.2, %v1049_v24  ;;  %v1062_v61 = vmul.f32 0.2, %v1046_v28  ;;  %v1061_v13 = vmul.f32 0.2, %v1045_v30 }
 0x1c1   : > { %v1063_v10 = vmul.f32 0.2, %v1047_v63  ;;  %v711_v9 = vmul.f32 0.2, %v695_v2  ;;  %v1064_v36 = vmul.f32 0.2, %v1048_v4 }
 0x1c2   : > { %v1081_v14 = vmax.f32 %v1049_v24, %v1065_v53  ;;  %v1078_v18 = vmax.f32 %v1046_v28, %v1062_v61  ;;  %v1077_v19 = vmax.f32 %v1045_v30, %v1061_v13  ;;  %v3280_v28 = vpop.permute.xlu0 %1017  ;;  %v1050_v13 = vadd.f32 %v3236_v45, %v3187_v3 }
 0x1c3   : > { %v608_v15 = vpop.f32.mrf.mxu2  ;;  %v1079_v53 = vmax.f32 %v1047_v63, %v1063_v10  ;;  %v727_v61 = vmax.f32 %v695_v2, %v711_v9 }
 0x1c4   : > { %v3267_v31 = vadd.f32 %v1081_v14, %v350_v8  ;;  %v3270_v0 = vadd.f32 %v1078_v18, %v3262_v12  ;;  %v3275_v57 = vadd.f32 %v1077_v19, %v3265_v20  ;;  %v3286_v14 = vld [vmem:[%s3252_s22 + $0x10] sm:$0xff]  ;;  %v1080_v18 = vmax.f32 %v1048_v4, %v1064_v36 }
 0x1c5   : > { %v3272_v38 = vpop.f32.mrf.mxu3  ;;  %v1051_v15 = vadd.f32 %v3236_v45, %v1006_v26  ;;  %v1010_v19 = vpop.permute.xlu1 %1009  ;;  %v3293_v6 = vadd.f32 %v1079_v53, %v3286_v14  ;;  %v3295_v63 = vadd.f32 %v727_v61, %v350_v8  ;;  %v1066_v2 = vmul.f32 0.2, %v1050_v13  ;;  %v3310_v53 = vld [vmem:[%s3252_s22 + $0x28] sm:$0xff] }
 0x1c6   : > { %v1026_v24 = vpop.permute.xlu2 %1025  ;;  %1117 = vmax.xlane.f32.xlu0 %v3267_v31  ;;  %1111 = vmax.xlane.f32.xlu2 %v3270_v0  ;;  %v3299_v10 = vadd.f32 %v1080_v18, %v349_v48  ;;  %v1052_v4 = vadd.f32 %v3236_v45, %v1010_v19  ;;  %v3313_v18 = vld [vmem:[%s3252_s22 + $0x58] sm:$0xff]  ;;  %v694_v26 = vadd.f32 %v3233_v42, %v3222_v58 }
 0x1c7   : > { %1109 = vmax.xlane.f32.xlu1 %v3275_v57  ;;  %v1056_v30 = vadd.f32 %v3236_v45, %v1026_v24  ;;  %v1067_v36 = vmul.f32 0.2, %v1051_v15  ;;  %v1082_v9 = vmax.f32 %v1050_v13, %v1066_v2  ;;  %v1053_v2 = vadd.f32 %v3236_v45, %v3241_v47  ;;  %v3351_v47 = vld [vmem:[%s3252_s22 + $0x60] sm:$0xff] }
 0x1c8   : > { %v1068_v55 = vmul.f32 0.2, %v1052_v4  ;;  %4478 = vst [vmem:[#allocation26_spill] sm:$0xff] %v3351_v47 }
 0x1c9   : > { %v1072_v54 = vmul.f32 0.2, %v1056_v30  ;;  %v1083_v61 = vmax.f32 %v1051_v15, %v1067_v36  ;;  %v3323_v19 = vadd.f32 %v1082_v9, %v3310_v53  ;;  %v710_v15 = vmul.f32 0.2, %v694_v26 }
 0x1ca   : > { %v1084_v58 = vmax.f32 %v1052_v4, %v1068_v55  ;;  %v1069_v35 = vmul.f32 0.2, %v1053_v2 }
 0x1cb   : > { %v3290_v11 = vpop.f32.mrf.mxu2  ;;  %v1088_v24 = vmax.f32 %v1056_v30, %v1072_v54  ;;  %v3331_v13 = vadd.f32 %v1083_v61, %v3318_v1  ;;  %v726_v9 = vmax.f32 %v694_v26, %v710_v15 }
 0x1cc   : > { %v3344_v40 = vadd.f32 %v1084_v58, %v353_v51 }
 0x1cd   : > { %v3297_v3 = vpop.f32.mrf.mxu3  ;;  %v3326_v54 = vadd.f32 %v1088_v24, %v3313_v18  ;;  %v698_v24 = vadd.f32 %v3233_v42, %v3212_v32  ;;  %v3348_v55 = vadd.f32 %v726_v9, %v349_v48  ;;  %v691_v48 = vadd.f32 %v3233_v42, %v3193_v7 }
 0x1ce   : > { %1113 = vmax.xlane.f32.xlu2 %v3293_v6  ;;  %763 = vmax.xlane.f32.xlu0 %v3295_v63  ;;  %v653_v50 = vpop.permute.xlu1 %652  ;;  %v692_v7 = vadd.f32 %v3233_v42, %v3203_v22 }
 0x1cf   : > { %1115 = vmax.xlane.f32.xlu1 %v3299_v10  ;;  %4477 = vst [vmem:[#allocation25_spill] sm:$0xff] %v3326_v54  ;;  %v714_v26 = vmul.f32 0.2, %v698_v24  ;;  %v699_v9 = vadd.f32 %v3233_v42, %v653_v50 }
 0x1d0   : > { %v3307_v8 = vpop.permute.xlu0 %667 }
 0x1d1   : > { %v730_v23 = vmax.f32 %v698_v24, %v714_v26 }
 0x1d3   : > { %v3320_v60 = vpop.f32.mrf.mxu2 }
 0x1d5   : > { %v3328_v30 = vpop.f32.mrf.mxu3 }
 0x1d6   : > { %1119 = vmax.xlane.f32.xlu2 %v3323_v19  ;;  %1131 = vmax.xlane.f32.xlu0 %v3326_v54 }
 0x1d7   : > { %1121 = vmax.xlane.f32.xlu1 %v3331_v13  ;;  %v1022_v4 = vpop.permute.xlu1 %1021 }
 0x1d9   : > { %v1030_v36 = vpop.permute.xlu0 %1029 }
 0x1da   : > { %v1057_v61 = vadd.f32 %v3236_v45, %v1030_v36  ;;  %v1085_v36 = vmax.f32 %v1053_v2, %v1069_v35  ;;  %v1054_v2 = vadd.f32 %v3236_v45, %v3280_v28 }
 0x1db   : > { %v3341_v46 = vpop.f32.mrf.mxu2 }
 0x1dc   : > { %v1073_v41 = vmul.f32 0.2, %v1057_v61  ;;  %v3367_v32 = vadd.f32 %v1085_v36, %v354_v49  ;;  %v1070_v36 = vmul.f32 0.2, %v1054_v2 }
 0x1dd   : > { %v3346_v44 = vpop.f32.mrf.mxu3 }
 0x1de   : > { %1123 = vmax.xlane.f32.xlu2 %v3344_v40  ;;  %v1089_v15 = vmax.f32 %v1057_v61, %v1073_v41  ;;  %v707_v41 = vmul.f32 0.2, %v691_v48  ;;  %v715_v61 = vmul.f32 0.2, %v699_v9 }
 0x1df   : > { %761 = vmax.xlane.f32.xlu1 %v3348_v55 }
 0x1e0   : > { %v3358_v58 = vadd.f32 %v1089_v15, %v3351_v47  ;;  %v3371_v15 = vadd.f32 %v730_v23, %v353_v51  ;;  %v3375_v35 = vpop.permute.xlu1 %662  ;;  %v723_v50 = vmax.f32 %v691_v48, %v707_v41  ;;  %v731_v24 = vmax.f32 %v699_v9, %v715_v61 }
 0x1e1   : > { %v708_v23 = vmul.f32 0.2, %v692_v7  ;;  %v693_v48 = vadd.f32 %v3233_v42, %v3189_v5  ;;  %v700_v9 = vadd.f32 %v3233_v42, %v3247_v39  ;;  %v1086_v61 = vmax.f32 %v1054_v2, %v1070_v36 }
 0x1e2   : > { %4479 = vst [vmem:[#allocation27_spill] sm:$0xff] %v3358_v58  ;;  %1133 = vmax.xlane.f32.xlu0 %v3358_v58  ;;  %v3384_v51 = vadd.f32 %v723_v50, %v3265_v20  ;;  %v3388_v27 = vadd.f32 %v731_v24, %v354_v49  ;;  %v355_v49 = vld [vmem:[%s3252_s22 + $0x48] sm:$0xff]  ;;  %v696_v36 = vadd.f32 %v3233_v42, %v3218_v34 }
 0x1e3   : > { %v3365_v54 = vpop.f32.mrf.mxu2  ;;  %4480 = vst [vmem:[#allocation28_spill] sm:$0xff] %v3371_v15  ;;  %v724_v28 = vmax.f32 %v692_v7, %v708_v23  ;;  %v709_v33 = vmul.f32 0.2, %v693_v48  ;;  %v716_v7 = vmul.f32 0.2, %v700_v9  ;;  %v3406_v47 = vadd.f32 %v1086_v61, %v355_v49  ;;  %v3417_v61 = vpop.permute.xlu0 %672 }
 0x1e4   : > { %4483 = vst [vmem:[#allocation31_spill] sm:$0xff] %v3417_v61 }
 0x1e5   : > { %v3369_v43 = vpop.f32.mrf.mxu3  ;;  %v3401_v24 = vadd.f32 %v724_v28, %v3262_v12  ;;  %v725_v2 = vmax.f32 %v693_v48, %v709_v33  ;;  %v732_v28 = vmax.f32 %v700_v9, %v716_v7  ;;  %v712_v12 = vmul.f32 0.2, %v696_v36  ;;  %v3431_v9 = vld [vmem:[%s3252_s22 + $0x50] sm:$0xff]  ;;  %v3433_v7 = vpop.permute.xlu2 %677 }
 0x1e6   : > { %1125 = vmax.xlane.f32.xlu2 %v3367_v32  ;;  %4485 = vst [vmem:[#allocation33_spill] sm:$0xff] %v3431_v9 }
 0x1e7   : > { %769 = vmax.xlane.f32.xlu1 %v3371_v15  ;;  %v3404_v15 = vld [vmem:[%s3252_s22 + $0x78] sm:$0xff]  ;;  %v3424_v33 = vadd.f32 %v732_v28, %v355_v49  ;;  %v728_v34 = vmax.f32 %v696_v36, %v712_v12  ;;  %4486 = vst [vmem:[#allocation34_spill] sm:$0xff] %v3433_v7 }
 0x1e8   : > { %4481 = vst [vmem:[#allocation29_spill] sm:$0xff] %v3404_v15 }
 0x1e9   : > { %4484 = vst [vmem:[#allocation32_spill] sm:$0xff] %v3424_v33 }
 0x1eb   : > { %v3381_v26 = vpop.f32.mrf.mxu2  ;;  %v1034_v28 = vpop.permute.xlu0 %1033 }
 0x1ed   : > { %v3386_v37 = vpop.f32.mrf.mxu3 }
 0x1ee   : > { %755 = vmax.xlane.f32.xlu2 %v3384_v51 }
 0x1ef   : > { %771 = vmax.xlane.f32.xlu1 %v3388_v27 }
 0x1f0   : > { %v1042_v22 = vpop.permute.xlu1 %1041 }
 0x1f1   : > { %v1060_v41 = vadd.f32 %v3236_v45, %v1042_v22  ;;  %v1055_v22 = vadd.f32 %v3236_v45, %v1022_v4  ;;  %v697_v4 = vadd.f32 %v3233_v42, %v3197_v16  ;;  %v1058_v16 = vadd.f32 %v3236_v45, %v1034_v28 }
 0x1f3   : > { %v1076_v50 = vmul.f32 0.2, %v1060_v41  ;;  %v3397_v20 = vpop.f32.mrf.mxu2  ;;  %v713_v49 = vmul.f32 0.2, %v697_v4 }
 0x1f5   : > { %v1757_v23 = vpop.f32.mrf.mxu3  ;;  %v1092_v5 = vmax.f32 %v1060_v41, %v1076_v50  ;;  %v3422_v50 = vadd.f32 %v725_v2, %v3286_v14  ;;  %v3438_v2 = vadd.f32 %v728_v34, %v3310_v53  ;;  %v729_v12 = vmax.f32 %v697_v4, %v713_v49 }
 0x1f6   : > { %757 = vmax.xlane.f32.xlu2 %v3401_v24 }
 0x1f7   : > { %1127 = vmax.xlane.f32.xlu1 %v3406_v47  ;;  %v3411_v39 = vadd.f32 %v1092_v5, %v3404_v15  ;;  %v1071_v5 = vmul.f32 0.2, %v1055_v22  ;;  %4487 = vst [vmem:[#allocation35_spill] sm:$0xff] %v3438_v2  ;;  %v3449_v53 = vadd.f32 %v729_v12, %v3318_v1  ;;  %v3463_v12 = vld [vmem:[%s3252_s22 + $0x70] sm:$0xff] }
 0x1f9   : > { %4482 = vst [vmem:[#allocation30_spill] sm:$0xff] %v3411_v39  ;;  %1139 = vmax.xlane.f32.xlu0 %v3411_v39  ;;  %v1087_v48 = vmax.f32 %v1055_v22, %v1071_v5  ;;  %v1074_v22 = vmul.f32 0.2, %v1058_v16  ;;  %v1038_v5 = vpop.permute.xlu2 %1037 }
 0x1fb   : > { %v3419_v41 = vpop.f32.mrf.mxu2  ;;  %v1090_v7 = vmax.f32 %v1058_v16, %v1074_v22 }
 0x1fd   : > { %v1759_v15 = vpop.f32.mrf.mxu3 }
 0x1fe   : > { %759 = vmax.xlane.f32.xlu2 %v3422_v50 }
 0x1ff   : > { %773 = vmax.xlane.f32.xlu1 %v3424_v33  ;;  %v3441_v33 = vadd.f32 %v1087_v48, %v3431_v9  ;;  %v1059_v48 = vadd.f32 %v3236_v45, %v1038_v5  ;;  %v3456_v9 = vld [vmem:[%s3252_s22 + $0x68] sm:$0xff] }
 0x200   : > { %4488 = vst [vmem:[#allocation36_spill] sm:$0xff] %v3456_v9  ;;  %v3459_v4 = vadd.f32 %v1090_v7, %v3456_v9  ;;  %v1785_v7 = vpack.c.bf16 %v1759_v15, %v1757_v23  ;;  %v1784_v9 = vpack.c.bf16 %v3386_v37, %v3369_v43 }
 0x201   : > { %v1075_v28 = vmul.f32 0.2, %v1059_v48 }
 0x203   : > { %v3435_v14 = vpop.f32.mrf.mxu2  ;;  %v1091_v1 = vmax.f32 %v1059_v48, %v1075_v28  ;;  %v4489_v28 = vpack.c.bf16 %v3346_v44, %v3328_v30  ;;  %v4492_v44 = vpack.c.bf16 %v3205_v29, %v3199_v17 }
 0x205   : > { %v1762_v39 = vpop.f32.mrf.mxu3 }
 0x206   : > { %765 = vmax.xlane.f32.xlu2 %v3438_v2  ;;  %v3466_v2 = vadd.f32 %v1091_v1, %v3463_v12 }
 0x207   : > { %1129 = vmax.xlane.f32.xlu1 %v3441_v33 }
 0x20b   : > { %v3446_v36 = vpop.f32.mrf.mxu2 }
 0x20d   : > { %v1764_v34 = vpop.f32.mrf.mxu3 }
 0x20e   : > { %767 = vmax.xlane.f32.xlu2 %v3449_v53  ;;  %v1786_v22 = vpack.c.bf16 %v1764_v34, %v1762_v39  ;;  %v4491_v39 = vpack.c.bf16 %v3243_v52, %v3220_v56 }
 0x213   : > { %v3453_v58 = vpop.f32.mrf.mxu2 }
 0x215   : > { %v1767_v49 = vpop.f32.mrf.mxu3 }
 0x216   : > { %1135 = vmax.xlane.f32.xlu2 %v3459_v4 }
 0x21b   : > { %v1304_v61 = vpop.f32.mrf.mxu2 }
 0x21d   : > { %v1769_v45 = vpop.f32.mrf.mxu3 }
 0x21e   : > { %v1787_v16 = vpack.c.bf16 %v1769_v45, %v1767_v49  ;;  %1137 = vmax.xlane.f32.xlu2 %v3466_v2  ;;  %v4490_v49 = vpack.c.bf16 %v3297_v3, %v3272_v38 }
 0x220   : > { %1788 = vmatpush.bf16.msra.mxu2 %v1787_v16 }
 0x223   : > { %v1306_v5 = vpop.f32.mrf.mxu2 }
 0x224   : > { %1789 = vmatpush.bf16.msra.mxu2 %v1786_v22 }
 0x228   : > { %1790 = vmatpush.bf16.msra.mxu2 %v1785_v7 }
 0x22b   : > { %v1309_v48 = vpop.f32.mrf.mxu2 }
 0x22c   : > { %1791 = vmatpush.bf16.msra.mxu2 %v1784_v9 }
 0x230   : > { %1792 = vmatpush.bf16.msra.mxu2 %v4489_v28 }
 0x233   : > { %v1311_v1 = vpop.f32.mrf.mxu2 }
 0x234   : > { %1793 = vmatpush.bf16.msra.mxu2 %v4490_v49 }
 0x238   : > { %1794 = vmatpush.bf16.msra.mxu2 %v4491_v39  ;;  %v1332_v39 = vpack.c.bf16 %v1306_v5, %v1304_v61 }
 0x239   : > { %v1112_v15 = vpop.xlane.xlu2 %1111 }
 0x23a   : > { %v1142_v23 = vsub.f32 %v3270_v0, %v1112_v15  ;;  %v1110_v34 = vpop.xlane.xlu1 %1109 }
 0x23b   : > { %v1141_v37 = vsub.f32 %v3275_v57, %v1110_v34  ;;  %v1314_v43 = vpop.f32.mrf.mxu2  ;;  %v1118_v57 = vpop.xlane.xlu0 %1117  ;;  %v1331_v34 = vpack.c.bf16 %v3453_v58, %v3446_v36  ;;  %v1328_v36 = vpack.c.bf16 %v3365_v54, %v3341_v46 }
 0x23c   : > { %v1159_v9 = vmul.f32 1.442695, %v1142_v23  ;;  %1795 = vmatpush.bf16.msra.mxu2 %v4492_v44  ;;  %v1145_v17 = vsub.f32 %v3267_v31, %v1118_v57 }
 0x23d   : > { %v1157_v30 = vmul.f32 1.442695, %v1141_v37 }
 0x23e   : > { %2573 = vpow2.f32 %v1159_v9  ;;  %v1165_v15 = vmul.f32 1.442695, %v1145_v17 }
 0x23f   : > { %2575 = vpow2.f32 %v1157_v30 }
 0x241   : > { %v1114_v38 = vpop.xlane.xlu2 %1113 }
 0x242   : > { %v1143_v3 = vsub.f32 %v3293_v6, %v1114_v38  ;;  %v1116_v56 = vpop.xlane.xlu1 %1115  ;;  %v1333_v6 = vpack.c.bf16 %v1311_v1, %v1309_v48  ;;  %v1330_v1 = vpack.c.bf16 %v3435_v14, %v3419_v41 }
 0x243   : > { %v1144_v52 = vsub.f32 %v3299_v10, %v1116_v56  ;;  %v1316_v45 = vpop.f32.mrf.mxu2 }
 0x244   : > { %v1161_v0 = vmul.f32 1.442695, %v1143_v3  ;;  %v1334_v16 = vpack.c.bf16 %v1316_v45, %v1314_v43  ;;  %v3487_v22 = vpop.eup %2573  ;;  %v1329_v43 = vpack.c.bf16 %v3397_v20, %v3381_v26  ;;  %v1327_v20 = vpack.c.bf16 %v3320_v60, %v3290_v11 }
 0x245   : > { %v1163_v7 = vmul.f32 1.442695, %v1144_v52  ;;  %v3489_v28 = vpop.eup %2575  ;;  %1191 = vadd.xlane.f32.xlu1 %v3487_v22  ;;  %v2855_v45 = vmov 2  }
 0x246   : > { %2577 = vpow2.f32 %v1161_v0  ;;  %1335 = vmatpush.bf16.msra.mxu0 %v1334_v16  ;;  %1189 = vadd.xlane.f32.xlu0 %v3489_v28 }
 0x247   : > { %2579 = vpow2.f32 %v1163_v7  ;;  %2559 = vset.pattern.permute.xlu2 %v2855_v45 }
 0x248   : > { %2581 = vpow2.f32 %v1165_v15 }
 0x249   : > { %v1120_v29 = vpop.xlane.xlu2 %1119 }
 0x24a   : > { %1336 = vmatpush.bf16.msra.mxu0 %v1333_v6  ;;  %v1122_v10 = vpop.xlane.xlu1 %1121  ;;  %v1146_v31 = vsub.f32 %v3323_v19, %v1120_v29 }
 0x24b   : > { %v1147_v58 = vsub.f32 %v3331_v13, %v1122_v10  ;;  %v764_v10 = vpop.xlane.xlu0 %763 }
 0x24c   : > { %v3494_v49 = vpop.eup %2577  ;;  %v1167_v61 = vmul.f32 1.442695, %v1146_v31 }
 0x24d   : > { %v3496_v23 = vpop.eup %2579  ;;  %1193 = vadd.xlane.f32.xlu2 %v3494_v49  ;;  %v1169_v41 = vmul.f32 1.442695, %v1147_v58 }
 0x24e   : > { %1337 = vmatpush.bf16.msra.mxu0 %v1332_v39  ;;  %1195 = vadd.xlane.f32.xlu0 %v3496_v23  ;;  %v3507_v37 = vpop.eup %2581  ;;  %2583 = vpow2.f32 %v1167_v61 }
 0x24f   : > { %2585 = vpow2.f32 %v1169_v41 }
 0x251   : > { %v1124_v48 = vpop.xlane.xlu2 %1123 }
 0x252   : > { %1338 = vmatpush.bf16.msra.mxu0 %v1331_v34  ;;  %v3505_v5 = vpop.xlane.xlu1 %761 }
 0x254   : > { %v3515_v14 = vpop.eup %2583 }
 0x255   : > { %v3523_v26 = vpop.eup %2585 }
 0x256   : > { %1339 = vmatpush.bf16.msra.mxu0 %v1330_v1  ;;  %1197 = vadd.xlane.f32.xlu0 %v3507_v37 }
 0x259   : > { %v1126_v19 = vpop.xlane.xlu2 %1125 }
 0x25a   : > { %1340 = vmatpush.bf16.msra.mxu0 %v1329_v43  ;;  %v3517_v9 = vpop.xlane.xlu1 %769 }
 0x25e   : > { %1341 = vmatpush.bf16.msra.mxu0 %v1328_v36  ;;  %1199 = vadd.xlane.f32.xlu0 %v3515_v14 }
 0x25f   : > { %687 = vperm.xlu1 %2558, %v3176_v62  }
 0x261   : > { %v756_v13 = vpop.xlane.xlu2 %755 }
 0x262   : > { %1342 = vmatpush.bf16.msra.mxu0 %v1327_v20  ;;  %v3526_v46 = vpop.xlane.xlu1 %771 }
 0x266   : > { %1201 = vadd.xlane.f32.xlu0 %v3523_v26 }
 0x267   : > { %2560 = vset.pattern.permute.xlu1 %v2855_v45 }
 0x269   : > { %v758_v54 = vpop.xlane.xlu2 %757 }
 0x26a   : > { %v788_v44 = vsub.f32 %v3401_v24, %v758_v54  ;;  %v1128_v56 = vpop.xlane.xlu1 %1127  ;;  %v1148_v24 = vsub.f32 %v3344_v40, %v1124_v48  ;;  %v3559_v48 = vpop.xlane.xlu0 %1131 }
 0x26b   : > { %v1150_v11 = vsub.f32 %v3406_v47, %v1128_v56  ;;  %v1149_v47 = vsub.f32 %v3367_v32, %v1126_v19  ;;  %v787_v32 = vsub.f32 %v3384_v51, %v756_v13  ;;  %v790_v51 = vsub.f32 %v3348_v55, %v3505_v5 }
 0x26c   : > { %v805_v30 = vmul.f32 1.442695, %v788_v44  ;;  %v1171_v16 = vmul.f32 1.442695, %v1148_v24  ;;  %v702_v5 = vadd.f32 %v3233_v42, %v3307_v8  ;;  %v791_v56 = vsub.f32 %v3295_v63, %v764_v10 }
 0x26d   : > { %v1175_v0 = vmul.f32 1.442695, %v1150_v11  ;;  %v1173_v7 = vmul.f32 1.442695, %v1149_v47  ;;  %v803_v39 = vmul.f32 1.442695, %v787_v32 }
 0x26e   : > { %2587 = vpow2.f32 %v805_v30  ;;  %v809_v43 = vmul.f32 1.442695, %v790_v51  ;;  %v811_v8 = vmul.f32 1.442695, %v791_v56 }
 0x271   : > { %v760_v38 = vpop.xlane.xlu2 %759 }
 0x272   : > { %v789_v3 = vsub.f32 %v3422_v50, %v760_v38  ;;  %v3551_v17 = vpop.xlane.xlu1 %773  ;;  %v3566_v58 = vpop.xlane.xlu0 %1133 }
 0x274   : > { %v3530_v52 = vpop.eup %2587  ;;  %v807_v60 = vmul.f32 1.442695, %v789_v3  ;;  %v718_v3 = vmul.f32 0.2, %v702_v5 }
 0x275   : > { %837 = vadd.xlane.f32.xlu2 %v3530_v52 }
 0x276   : > { %2589 = vpow2.f32 %v807_v60  ;;  %v795_v60 = vsub.f32 %v3388_v27, %v3526_v46  ;;  %v734_v11 = vmax.f32 %v702_v5, %v718_v3  ;;  %v701_v46 = vadd.f32 %v3233_v42, %v3375_v35 }
 0x277   : > { %2591 = vpow2.f32 %v1175_v0  ;;  %v2856_v5 = vmov 3  }
 0x278   : > { %2593 = vpow2.f32 %v1171_v16  ;;  %v819_v0 = vmul.f32 1.442695, %v795_v60  ;;  %v3594_v27 = vadd.f32 %v734_v11, %v3313_v18 }
 0x279   : > { %2595 = vpow2.f32 %v1173_v7  ;;  %v3555_v29 = vpop.xlane.xlu2 %765 }
 0x27a   : > { %682 = vperm.xlu0 %2557, %v3168_v59   ;;  %v1130_v15 = vpop.xlane.xlu1 %1129  ;;  %2597 = vpow2.f32 %v803_v39  ;;  %v3573_v41 = vpop.xlane.xlu0 %1139 }
 0x27b   : > { %v1151_v34 = vsub.f32 %v3441_v33, %v1130_v15  ;;  %v717_v15 = vmul.f32 0.2, %v701_v46 }
 0x27c   : > { %v3538_v50 = vpop.eup %2589 }
 0x27d   : > { %839 = vadd.xlane.f32.xlu2 %v3538_v50  ;;  %v3543_v57 = vpop.eup %2591  ;;  %v1177_v1 = vmul.f32 1.442695, %v1151_v34  ;;  %v733_v35 = vmax.f32 %v701_v46, %v717_v15  ;;  %v4501_v15 = vld [vmem:[#allocation11_spill] sm:$0xff] }
 0x27e   : > { %v3546_v40 = vpop.eup %2593 }
 0x27f   : > { %v3549_v6 = vpop.eup %2595  ;;  %2599 = vpow2.f32 %v1177_v1 }
 0x280   : > { %v3561_v61 = vpop.eup %2597  ;;  %2601 = vpow2.f32 %v809_v43  ;;  %v4494_v43 = vld [vmem:[#allocation31_spill] sm:$0xff] }
 0x281   : > { %v768_v31 = vpop.xlane.xlu2 %767 }
 0x282   : > { %2564 = vset.pattern.permute.xlu0 %v2855_v45  ;;  %v793_v55 = vsub.f32 %v3449_v53, %v768_v31 }
 0x284   : > { %v815_v44 = vmul.f32 1.442695, %v793_v55 }
 0x285   : > { %1207 = vadd.xlane.f32.xlu2 %v3543_v57  ;;  %v3569_v36 = vpop.eup %2599 }
 0x286   : > { %v3575_v13 = vpop.eup %2601 }
 0x289   : > { %1203 = vadd.xlane.f32.xlu1 %v3546_v40  ;;  %v1136_v19 = vpop.xlane.xlu2 %1135 }
 0x28a   : > { %v1154_v33 = vsub.f32 %v3459_v4, %v1136_v19  ;;  %v703_v19 = vadd.f32 %v3233_v42, %v4494_v43 }
 0x28c   : > { %v1183_v20 = vmul.f32 1.442695, %v1154_v33 }
 0x28e   : > { %2603 = vpow2.f32 %v1183_v20  ;;  %v4495_v20 = vld [vmem:[#allocation33_spill] sm:$0xff] }
 0x28f   : > { %v3613_v55 = vadd.f32 %v733_v35, %v4495_v20 }
 0x291   : > { %1205 = vadd.xlane.f32.xlu1 %v3549_v6  ;;  %v3581_v38 = vpop.xlane.xlu2 %1137 }
 0x294   : > { %v3583_v4 = vpop.eup %2603 }
 0x29d   : > { %1434 = vperm.xlu2 %2559, %v3041_v21  }
 0x2a4   : > { %835 = vadd.xlane.f32.xlu0 %v3561_v61 }
 0x2a5   : > { %2563 = vset.pattern.permute.xlu2 %v2856_v5 }
 0x2aa   : > { %1438 = vperm.xlu1 %2560, %v3053_v25  }
 0x2ac   : > { %1209 = vadd.xlane.f32.xlu0 %v3569_v36 }
 0x2b2   : > { %2561 = vset.pattern.permute.xlu1 %v2856_v5 }
 0x2b4   : > { %841 = vadd.xlane.f32.xlu0 %v3575_v13 }
 0x2b8   : > { %v1192_v54 = vpop.xlane.xlu1 %1191 }
 0x2b9   : > { %v1190_v30 = vpop.xlane.xlu0 %1189  ;;  %2605 = vrcp.f32 %v1192_v54  ;;  %v719_v54 = vmul.f32 0.2, %v703_v19 }
 0x2ba   : > { %2607 = vrcp.f32 %v1190_v30 }
 0x2bb   : > { %2609 = vpow2.f32 %v815_v44  ;;  %v735_v56 = vmax.f32 %v703_v19, %v719_v54 }
 0x2bc   : > { %1215 = vadd.xlane.f32.xlu0 %v3583_v4  ;;  %2611 = vpow2.f32 %v811_v8 }
 0x2bd   : > { %2613 = vpow2.f32 %v819_v0  ;;  %v4498_v0 = vld [vmem:[#allocation30_spill] sm:$0xff] }
 0x2bf   : > { %v2606_v53 = vpop.eup %2605 }
 0x2c0   : > { %v2608_v24 = vpop.eup %2607  ;;  %v1238_v16 = vmul.f32 %v2606_v53, %v3487_v22  ;;  %v1194_v32 = vpop.xlane.xlu2 %1193  ;;  %v4493_v22 = vld [vmem:[#allocation35_spill] sm:$0xff]  ;;  %v4497_v53 = vld [vmem:[#allocation26_spill] sm:$0xff] }
 0x2c1   : > { %v1237_v47 = vmul.f32 %v2608_v24, %v3489_v28  ;;  %v1196_v7 = vpop.xlane.xlu0 %1195  ;;  %v3591_v39 = vpop.eup %2609  ;;  %2615 = vrcp.f32 %v1194_v32  ;;  %v792_v28 = vsub.f32 %v4493_v22, %v3555_v29  ;;  %v3624_v8 = vadd.f32 %v735_v56, %v4497_v53  ;;  %v4500_v22 = vld [vmem:[#allocation28_spill] sm:$0xff]  ;;  %v4505_v53 = vld [vmem:[#allocation25_spill] sm:$0xff] }
 0x2c2   : > { %2617 = vrcp.f32 %v1196_v7  ;;  %v3602_v10 = vpop.eup %2611  ;;  %v4499_v7 = vld [vmem:[#allocation12_spill] sm:$0xff] }
 0x2c3   : > { %v1319_v63 = vpack.c.bf16 %v1238_v16, %v1237_v47  ;;  %v3604_v18 = vpop.eup %2613  ;;  %v813_v31 = vmul.f32 1.442695, %v792_v28  ;;  %v1156_v16 = vsub.f32 %v4498_v0, %v3573_v41  ;;  %v794_v28 = vsub.f32 %v4500_v22, %v3517_v9  ;;  %v4503_v9 = vld [vmem:[#allocation16_spill] sm:$0xff] }
 0x2c4   : > { %847 = vadd.xlane.f32.xlu0 %v3591_v39 }
 0x2c5   : > { %1343 = vmatmul.bf16.vlgmr.msra.gmra.mxu0 %v1319_v63  ;;  %2619 = vpow2.f32 %v813_v31  ;;  %v1187_v32 = vmul.f32 1.442695, %v1156_v16  ;;  %v817_v41 = vmul.f32 1.442695, %v794_v28  ;;  %v4502_v31 = vld [vmem:[#allocation14_spill] sm:$0xff] }
 0x2c6   : > { %777 = vmax.xlane.f32.xlu2 %v3594_v27  ;;  %v4506_v28 = vld [vmem:[#allocation10_spill] sm:$0xff] }
 0x2c7   : > { %v2616_v1 = vpop.eup %2615 }
 0x2c8   : > { %v2618_v51 = vpop.eup %2617  ;;  %v1239_v29 = vmul.f32 %v2616_v1, %v3494_v49  ;;  %v4496_v49 = vld [vmem:[#allocation27_spill] sm:$0xff] }
 0x2c9   : > { %v1198_v34 = vpop.xlane.xlu0 %1197  ;;  %v1240_v33 = vmul.f32 %v2618_v51, %v3496_v23  ;;  %v1153_v23 = vsub.f32 %v4496_v49, %v3566_v58 }
 0x2cb   : > { %v1320_v30 = vpack.c.bf16 %v1240_v33, %v1239_v29  ;;  %v3618_v3 = vpop.eup %2619  ;;  %v1181_v60 = vmul.f32 1.442695, %v1153_v23  ;;  %v4504_v29 = vld [vmem:[#allocation29_spill] sm:$0xff] }
 0x2cc   : > { %851 = vadd.xlane.f32.xlu0 %v3604_v18 }
 0x2ce   : > { %843 = vadd.xlane.f32.xlu2 %v3602_v10 }
 0x2d1   : > { %v1200_v44 = vpop.xlane.xlu0 %1199 }
 0x2d2   : > { %2621 = vrcp.f32 %v1200_v44 }
 0x2d3   : > { %2623 = vrcp.f32 %v1198_v34 }
 0x2d4   : > { %775 = vmax.xlane.f32.xlu1 %v3613_v55  ;;  %2625 = vpow2.f32 %v1181_v60 }
 0x2d5   : > { %1348 = vmatmul.bf16.gmra.mxu0 %v1320_v30  ;;  %2627 = vpow2.f32 %v1187_v32  ;;  %v1155_v32 = vsub.f32 %v3466_v2, %v3581_v38 }
 0x2d6   : > { %845 = vadd.xlane.f32.xlu2 %v3618_v3  ;;  %2629 = vpow2.f32 %v817_v41 }
 0x2d8   : > { %v2622_v11 = vpop.eup %2621 }
 0x2d9   : > { %v2624_v24 = vpop.eup %2623  ;;  %v1242_v47 = vmul.f32 %v2622_v11, %v3515_v14  ;;  %v688_v14 = vpop.permute.xlu1 %687  ;;  %v1152_v11 = vsub.f32 %v4505_v53, %v3559_v48  ;;  %v1185_v48 = vmul.f32 1.442695, %v1155_v32 }
 0x2da   : > { %v1241_v58 = vmul.f32 %v2624_v24, %v3507_v37  ;;  %v3632_v46 = vpop.eup %2625  ;;  %v706_v37 = vadd.f32 %v3233_v42, %v688_v14  ;;  %v1202_v19 = vpop.xlane.xlu0 %1201  ;;  %v4507_v14 = vld [vmem:[#allocation34_spill] sm:$0xff] }
 0x2db   : > { %v3638_v34 = vpop.eup %2627  ;;  %2631 = vrcp.f32 %v1202_v19  ;;  %v704_v2 = vadd.f32 %v3233_v42, %v4507_v14 }
 0x2dc   : > { %v1321_v63 = vpack.c.bf16 %v1242_v47, %v1241_v58  ;;  %v722_v1 = vmul.f32 0.2, %v706_v37  ;;  %v3644_v35 = vpop.eup %2629  ;;  %v1179_v47 = vmul.f32 1.442695, %v1152_v11 }
 0x2de   : > { %779 = vmax.xlane.f32.xlu2 %v3624_v8  ;;  %v738_v43 = vmax.f32 %v706_v37, %v722_v1  ;;  %v720_v37 = vmul.f32 0.2, %v704_v2 }
 0x2e0   : > { %1442 = vperm.xlu0 %2564, %v4499_v7   ;;  %v3652_v33 = vadd.f32 %v738_v43, %v4504_v29  ;;  %v4508_v43 = vld [vmem:[#allocation36_spill] sm:$0xff] }
 0x2e1   : > { %v2632_v54 = vpop.eup %2631 }
 0x2e2   : > { %v1243_v30 = vmul.f32 %v2632_v54, %v3523_v26 }
 0x2e5   : > { %1353 = vmatmul.bf16.gmra.mxu0 %v1321_v63 }
 0x2e6   : > { %1213 = vadd.xlane.f32.xlu2 %v3632_v46 }
 0x2e8   : > { %1454 = vperm.xlu0 %2564, %v4501_v15   ;;  %v838_v51 = vpop.xlane.xlu2 %837 }
 0x2ec   : > { %v683_v24 = vpop.permute.xlu0 %682 }
 0x2ed   : > { %1858 = vperm.xlu1 %2561, %v3053_v25  }
 0x2ee   : > { %1219 = vadd.xlane.f32.xlu2 %v3638_v34 }
 0x2f0   : > { %1462 = vperm.xlu0 %2564, %v4502_v31   ;;  %v840_v20 = vpop.xlane.xlu2 %839 }
 0x2f5   : > { %2562 = vset.pattern.permute.xlu1 %v2855_v45 }
 0x2f6   : > { %1446 = vperm.xlu1 %2562, %v4503_v9   ;;  %849 = vadd.xlane.f32.xlu2 %v3644_v35 }
 0x2f8   : > { %2565 = vset.pattern.permute.xlu0 %v2856_v5 }
 0x2f9   : > { %1854 = vperm.xlu0 %2565, %v3041_v21   ;;  %v1208_v21 = vpop.xlane.xlu2 %1207 }
 0x2fc   : > { %v1204_v25 = vpop.xlane.xlu1 %1203 }
 0x2fd   : > { %2633 = vrcp.f32 %v1204_v25 }
 0x2fe   : > { %785 = vmax.xlane.f32.xlu2 %v3652_v33 }
 0x301   : > { %1866 = vperm.xlu0 %2565, %v4503_v9   ;;  %v1435_v29 = vpop.permute.xlu2 %1434 }
 0x303   : > { %v2634_v44 = vpop.eup %2633 }
 0x304   : > { %v1244_v49 = vmul.f32 %v2634_v44, %v3546_v40  ;;  %v1206_v23 = vpop.xlane.xlu1 %1205 }
 0x305   : > { %2635 = vrcp.f32 %v1206_v23 }
 0x306   : > { %v1322_v56 = vpack.c.bf16 %v1244_v49, %v1243_v30  ;;  %2637 = vrcp.f32 %v1208_v21 }
 0x307   : > { %2639 = vrcp.f32 %v838_v51  ;;  %v736_v51 = vmax.f32 %v704_v2, %v720_v37 }
 0x308   : > { %1358 = vmatmul.bf16.gmra.mxu0 %v1322_v56  ;;  %2641 = vpow2.f32 %v1179_v47 }
 0x309   : > { %1882 = vperm.xlu0 %2565, %v4502_v31   ;;  %v3682_v19 = vadd.f32 %v736_v51, %v4508_v43 }
 0x30b   : > { %v2636_v60 = vpop.eup %2635 }
 0x30c   : > { %v2638_v0 = vpop.eup %2637  ;;  %v1245_v16 = vmul.f32 %v2636_v60, %v3549_v6 }
 0x30d   : > { %v1246_v26 = vmul.f32 %v2638_v0, %v3543_v57  ;;  %v2640_v63 = vpop.eup %2639 }
 0x30e   : > { %v3666_v22 = vpop.eup %2641 }
 0x30f   : > { %v1323_v40 = vpack.c.bf16 %v1246_v26, %v1245_v16  ;;  %v4510_v16 = vld [vmem:[#allocation24_spill] sm:$0xff] }
 0x310   : > { %v4511_v26 = vld [vmem:[#allocation32_spill] sm:$0xff] }
 0x316   : > { %1862 = vperm.xlu2 %2563, %v4499_v7   ;;  %v884_v7 = vmul.f32 %v2640_v63, %v3530_v52 }
 0x317   : > { %v836_v58 = vpop.xlane.xlu0 %835 }
 0x318   : > { %1363 = vmatmul.bf16.gmra.mxu0 %v1323_v40  ;;  %2643 = vrcp.f32 %v836_v58 }
 0x319   : > { %2645 = vpow2.f32 %v1185_v48 }
 0x31a   : > { %2647 = vrcp.f32 %v840_v20 }
 0x31c   : > { %v1439_v21 = vpop.permute.xlu1 %1438 }
 0x31e   : > { %1870 = vperm.xlu2 %2563, %v4506_v28   ;;  %v2644_v6 = vpop.eup %2643 }
 0x31f   : > { %v3669_v41 = vpop.xlane.xlu0 %1209  ;;  %v883_v57 = vmul.f32 %v2644_v6, %v3561_v61  ;;  %v3677_v31 = vpop.eup %2645  ;;  %v705_v61 = vadd.f32 %v3233_v42, %v683_v24 }
 0x320   : > { %1211 = vadd.xlane.f32.xlu1 %v3666_v22  ;;  %v2648_v52 = vpop.eup %2647 }
 0x321   : > { %v964_v38 = vpack.c.bf16 %v884_v7, %v883_v57  ;;  %v721_v9 = vmul.f32 0.2, %v705_v61  ;;  %v885_v20 = vmul.f32 %v2648_v52, %v3538_v50 }
 0x323   : > { %1392 = vmatmul.bf16.vlgmr.msrb.gmra.mxu1 %v964_v38  ;;  %v737_v42 = vmax.f32 %v705_v61, %v721_v9 }
 0x325   : > { %v3693_v56 = vadd.f32 %v737_v42, %v3463_v12  ;;  %v796_v12 = vsub.f32 %v4511_v26, %v3551_v17 }
 0x326   : > { %1874 = vperm.xlu2 %2563, %v4501_v15   ;;  %v4509_v15 = vld [vmem:[#allocation22_spill] sm:$0xff] }
 0x327   : > { %v842_v1 = vpop.xlane.xlu0 %841  ;;  %v3686_v54 = vperm.slane %v4509_v15, 2  ;;  %v821_v63 = vmul.f32 1.442695, %v796_v12 }
 0x328   : > { %1217 = vadd.xlane.f32.xlu1 %v3677_v31  ;;  %2649 = vrcp.f32 %v842_v1 }
 0x329   : > { %v1498_v30 = vadd.f32 %v3686_v54, %v1435_v29  ;;  %v1499_v24 = vadd.f32 %v3686_v54, %v1439_v21  ;;  %v3723_v29 = vperm.slane %v4509_v15, 3 }
 0x32b   : > { %v1514_v23 = vmul.f32 0.2, %v1498_v30  ;;  %v1515_v0 = vmul.f32 0.2, %v1499_v24 }
 0x32d   : > { %v1530_v11 = vmax.f32 %v1498_v30, %v1514_v23  ;;  %v1531_v32 = vmax.f32 %v1499_v24, %v1515_v0 }
 0x32e   : > { %2566 = vset.pattern.permute.xlu2 %v2855_v45  ;;  %v2650_v25 = vpop.eup %2649 }
 0x32f   : > { %v886_v44 = vmul.f32 %v2650_v25, %v3575_v13  ;;  %v1216_v60 = vpop.xlane.xlu0 %1215  ;;  %v3699_v47 = vadd.f32 %v1530_v11, %v4510_v16  ;;  %v2829_v11 = vld [vmem:[%s3252_s22 + $0x8] sm:$0xff] }
 0x330   : > { %781 = vmax.xlane.f32.xlu1 %v3682_v19 }
 0x331   : > { %v965_v49 = vpack.c.bf16 %v886_v44, %v885_v20 }
 0x333   : > { %1397 = vmatmul.bf16.gmra.mxu1 %v965_v49 }
 0x337   : > { %v848_v40 = vpop.xlane.xlu0 %847 }
 0x338   : > { %783 = vmax.xlane.f32.xlu1 %v3693_v56 }
 0x339   : > { %v778_v53 = vpop.xlane.xlu2 %777 }
 0x33a   : > { %v798_v50 = vsub.f32 %v3594_v27, %v778_v53  ;;  %v4512_v27 = vld [vmem:[#allocation23_spill] sm:$0xff] }
 0x33b   : > { %v3708_v6 = vadd.f32 %v1531_v32, %v4512_v27  ;;  %v2830_v32 = vld [vmem:[%s3252_s22 + $0x10] sm:$0xff] }
 0x33c   : > { %v825_v13 = vmul.f32 1.442695, %v798_v50 }
 0x33e   : > { %2651 = vpow2.f32 %v825_v13 }
 0x33f   : > { %2653 = vpow2.f32 %v821_v63  ;;  %v3711_v17 = vpop.xlane.xlu0 %851 }
 0x340   : > { %1562 = vmax.xlane.f32.xlu1 %v3699_v47 }
 0x341   : > { %v844_v58 = vpop.xlane.xlu2 %843 }
 0x342   : > { %2655 = vrcp.f32 %v844_v58 }
 0x344   : > { %v3704_v48 = vpop.eup %2651 }
 0x345   : > { %857 = vadd.xlane.f32.xlu0 %v3704_v48  ;;  %v3713_v7 = vpop.eup %2653 }
 0x347   : > { %v776_v52 = vpop.xlane.xlu1 %775 }
 0x348   : > { %1564 = vmax.xlane.f32.xlu1 %v3708_v6  ;;  %v2656_v14 = vpop.eup %2655  ;;  %v797_v12 = vsub.f32 %v3613_v55, %v776_v52 }
 0x349   : > { %v846_v57 = vpop.xlane.xlu2 %845  ;;  %v887_v37 = vmul.f32 %v2656_v14, %v3602_v10 }
 0x34a   : > { %2657 = vrcp.f32 %v846_v57 }
 0x34b   : > { %2659 = vrcp.f32 %v1216_v60 }
 0x34f   : > { %853 = vadd.xlane.f32.xlu2 %v3713_v7 }
 0x350   : > { %v2658_v2 = vpop.eup %2657 }
 0x351   : > { %v3716_v38 = vpop.xlane.xlu2 %779  ;;  %v888_v1 = vmul.f32 %v2658_v2, %v3618_v3  ;;  %v2660_v25 = vpop.eup %2659 }
 0x352   : > { %v1443_v61 = vpop.permute.xlu0 %1442  ;;  %v3732_v30 = vmul.f32 %v2660_v25, %v3583_v4 }
 0x353   : > { %v966_v51 = vpack.c.bf16 %v888_v1, %v887_v37  ;;  %v1500_v49 = vadd.f32 %v3686_v54, %v1443_v61  ;;  %v823_v1 = vmul.f32 1.442695, %v797_v12 }
 0x355   : > { %1402 = vmatmul.bf16.gmra.mxu1 %v966_v51  ;;  %v1516_v53 = vmul.f32 0.2, %v1500_v49  ;;  %v2831_v51 = vld [vmem:[%s3252_s22] sm:$0xff] }
 0x357   : > { %v1532_v50 = vmax.f32 %v1500_v49, %v1516_v53 }
 0x359   : > { %v1214_v9 = vpop.xlane.xlu2 %1213  ;;  %v3747_v63 = vadd.f32 %v2830_v32, %v1532_v50  ;;  %v4513_v50 = vld [vmem:[#allocation17_spill] sm:$0xff] }
 0x35a   : > { %2661 = vrcp.f32 %v1214_v9  ;;  %v3720_v43 = vpop.permute.xlu0 %1454  ;;  %v2832_v9 = vld [vmem:[%s3252_s22 + $0x18] sm:$0xff] }
 0x35b   : > { %2663 = vrcp.f32 %v848_v40 }
 0x35f   : > { %v1859_v20 = vpop.permute.xlu1 %1858 }
 0x360   : > { %v2662_v44 = vpop.eup %2661  ;;  %v1919_v10 = vadd.f32 %v3723_v29, %v1859_v20 }
 0x361   : > { %v3726_v42 = vpop.xlane.xlu2 %1219  ;;  %v3729_v3 = vmul.f32 %v2662_v44, %v3632_v46  ;;  %v2664_v26 = vpop.eup %2663 }
 0x362   : > { %v1935_v23 = vmul.f32 0.2, %v1919_v10  ;;  %v3735_v21 = vpop.permute.xlu0 %1462  ;;  %v889_v2 = vmul.f32 %v2664_v26, %v3591_v39 }
 0x363   : > { %v1325_v15 = vpack.c.bf16 %v3732_v30, %v3729_v3  ;;  %v799_v3 = vsub.f32 %v3624_v8, %v3716_v38  ;;  %v1503_v8 = vadd.f32 %v3686_v54, %v3720_v43  ;;  %v4518_v43 = vld [vmem:[#allocation2_spill] sm:$0xff] }
 0x364   : > { %v1951_v60 = vmax.f32 %v1919_v10, %v1935_v23 }
 0x366   : > { %v3740_v24 = vadd.f32 %v2829_v11, %v1951_v60 }
 0x368   : > { %v1447_v46 = vpop.permute.xlu1 %1446  ;;  %1984 = vmax.xlane.f32.xlu1 %v3740_v24 }
 0x369   : > { %v850_v4 = vpop.xlane.xlu2 %849  ;;  %v1501_v13 = vadd.f32 %v3686_v54, %v1447_v46 }
 0x36a   : > { %2665 = vrcp.f32 %v850_v4 }
 0x36b   : > { %v1855_v0 = vpop.permute.xlu0 %1854  ;;  %v1517_v58 = vmul.f32 0.2, %v1501_v13  ;;  %2667 = vpow2.f32 %v823_v1 }
 0x36c   : > { %v1918_v16 = vadd.f32 %v3723_v29, %v1855_v0  ;;  %2669 = vrcp.f32 %v3669_v41  ;;  %v4514_v0 = vld [vmem:[#allocation13_spill] sm:$0xff] }
 0x36d   : > { %v1533_v61 = vmax.f32 %v1501_v13, %v1517_v58  ;;  %v2516_v41 = vld [vmem:[%s4404_s6 + $0x38] sm:$0xff] }
 0x36e   : > { %v1934_v40 = vmul.f32 0.2, %v1918_v16  ;;  %2149 = vmatpush.bf16.msrb.mxu0 %v2516_v41 }
 0x36f   : > { %v3759_v25 = vadd.f32 %v2832_v9, %v1533_v61 }
 0x370   : > { %v2666_v27 = vpop.eup %2665  ;;  %1566 = vmax.xlane.f32.xlu1 %v3747_v63  ;;  %v1950_v57 = vmax.f32 %v1918_v16, %v1934_v40 }
 0x371   : > { %v3750_v14 = vpop.xlane.xlu2 %785  ;;  %v890_v37 = vmul.f32 %v2666_v27, %v3644_v35  ;;  %v3763_v35 = vpop.eup %2667 }
 0x372   : > { %v3755_v55 = vadd.f32 %v2831_v51, %v1950_v57  ;;  %v2670_v13 = vpop.eup %2669 }
 0x373   : > { %v967_v52 = vpack.c.bf16 %v890_v37, %v889_v2  ;;  %v1867_v20 = vpop.permute.xlu0 %1866  ;;  %v1247_v26 = vmul.f32 %v2670_v13, %v3569_v36  ;;  %v2515_v36 = vld [vmem:[%s4404_s6 + $0x30] sm:$0xff] }
 0x374   : > { %1982 = vmax.xlane.f32.xlu2 %v3755_v55  ;;  %v1921_v10 = vadd.f32 %v3723_v29, %v1867_v20  ;;  %2150 = vmatpush.bf16.msrb.mxu0 %v2515_v36 }
 0x375   : > { %1407 = vmatmul.bf16.gmra.mxu1 %v967_v52  ;;  %v827_v52 = vmul.f32 1.442695, %v799_v3 }
 0x376   : > { %v1937_v60 = vmul.f32 0.2, %v1921_v10 }
 0x378   : > { %1568 = vmax.xlane.f32.xlu1 %v3759_v25  ;;  %v1953_v11 = vmax.f32 %v1921_v10, %v1937_v60  ;;  %v1519_v10 = vmul.f32 0.2, %v1503_v8 }
 0x379   : > { %v1863_v44 = vpop.permute.xlu2 %1862 }
 0x37a   : > { %v1920_v39 = vadd.f32 %v3723_v29, %v1863_v44  ;;  %v3770_v46 = vadd.f32 %v2832_v9, %v1953_v11 }
 0x37c   : > { %v1936_v49 = vmul.f32 0.2, %v1920_v39  ;;  %855 = vadd.xlane.f32.xlu2 %v3763_v35 }
 0x37e   : > { %v1952_v23 = vmax.f32 %v1920_v39, %v1936_v49 }
 0x380   : > { %v3767_v53 = vadd.f32 %v2830_v32, %v1952_v23  ;;  %v4515_v32 = vld [vmem:[#allocation15_spill] sm:$0xff] }
 0x381   : > { %v3785_v40 = vpop.permute.xlu2 %1870 }
 0x382   : > { %1986 = vmax.xlane.f32.xlu0 %v3767_v53 }
 0x389   : > { %v1875_v2 = vpop.permute.xlu2 %1874 }
 0x38a   : > { %1988 = vmax.xlane.f32.xlu0 %v3770_v46  ;;  %v1923_v1 = vadd.f32 %v3723_v29, %v1875_v2 }
 0x38c   : > { %v1939_v30 = vmul.f32 0.2, %v1923_v1 }
 0x38e   : > { %v1955_v9 = vmax.f32 %v1923_v1, %v1939_v30 }
 0x391   : > { %1450 = vperm.xlu1 %2562, %v4506_v28  }
 0x393   : > { %v1212_v4 = vpop.xlane.xlu1 %1211 }
 0x394   : > { %2671 = vrcp.f32 %v1212_v4  ;;  %1470 = vperm.xlu2 %2566, %v4513_v50   ;;  %v1535_v4 = vmax.f32 %v1503_v8, %v1519_v10 }
 0x399   : > { %1458 = vperm.xlu1 %2562, %v4514_v0  }
 0x39a   : > { %v2672_v16 = vpop.eup %2671 }
 0x39b   : > { %v1248_v12 = vmul.f32 %v2672_v16, %v3666_v22  ;;  %v1218_v28 = vpop.xlane.xlu1 %1217 }
 0x39c   : > { %2568 = vset.pattern.permute.xlu2 %v2856_v5  ;;  %2673 = vrcp.f32 %v1218_v28  ;;  %v1883_v28 = vpop.permute.xlu0 %1882 }
 0x39d   : > { %v1324_v58 = vpack.c.bf16 %v1248_v12, %v1247_v26  ;;  %2675 = vrcp.f32 %v3726_v42  ;;  %v4521_v12 = vld [vmem:[#allocation4_spill] sm:$0xff] }
 0x39f   : > { %1368 = vmatmul.bf16.gmra.mxu0 %v1324_v58 }
 0x3a1   : > { %1466 = vperm.xlu1 %2562, %v4515_v32  }
 0x3a3   : > { %v782_v22 = vpop.xlane.xlu1 %781 }
 0x3a4   : > { %v800_v27 = vsub.f32 %v3682_v19, %v782_v22  ;;  %v3798_v19 = vpop.f32.mrf.mxu0 }
 0x3a5   : > { %4516 = vst [vmem:[#allocation35_spill] sm:$0xff] %v3798_v19 }
 0x3a6   : > { %v829_v57 = vmul.f32 1.442695, %v800_v27 }
 0x3a8   : > { %2677 = vpow2.f32 %v829_v57  ;;  %v4524_v57 = vld [vmem:[#allocation3_spill] sm:$0xff] }
 0x3a9   : > { %2567 = vset.pattern.permute.xlu1 %v2856_v5  ;;  %v2674_v5 = vpop.eup %2673  ;;  %2679 = vrcp.f32 %v3711_v17 }
 0x3aa   : > { %v2676_v37 = vpop.eup %2675  ;;  %v1251_v61 = vmul.f32 %v2674_v5, %v3677_v31 }
 0x3ab   : > { %v1252_v51 = vmul.f32 %v2676_v37, %v3638_v34  ;;  %v2833_v34 = vld [vmem:[%s3252_s22 + $0x28] sm:$0xff]  ;;  %v3818_v60 = vpop.xlane.xlu1 %783 }
 0x3ac   : > { %v3807_v31 = vadd.f32 %v2833_v34, %v1955_v9  ;;  %v3811_v38 = vpop.f32.mrf.mxu0  ;;  %v3825_v16 = vadd.f32 %v2833_v34, %v1535_v4  ;;  %v4525_v37 = vld [vmem:[#allocation19_spill] sm:$0xff] }
 0x3ad   : > { %v1326_v42 = vpack.c.bf16 %v1252_v51, %v1251_v61  ;;  %4517 = vst [vmem:[#allocation31_spill] sm:$0xff] %v3811_v38 }
 0x3af   : > { %1373 = vmatmul.bf16.gmra.mxu0 %v1325_v15  ;;  %v3802_v15 = vpop.eup %2677 }
 0x3b0   : > { %v2680_v44 = vpop.eup %2679 }
 0x3b1   : > { %v891_v17 = vmul.f32 %v2680_v44, %v3604_v18 }
 0x3b3   : > { %v3828_v26 = vpop.xlane.xlu1 %1562 }
 0x3b4   : > { %v3823_v13 = vpop.f32.mrf.mxu0 }
 0x3b5   : > { %4519 = vst [vmem:[#allocation33_spill] sm:$0xff] %v3823_v13 }
 0x3b8   : > { %v858_v22 = vpop.xlane.xlu0 %857 }
 0x3bc   : > { %v3830_v18 = vpop.f32.mrf.mxu0 }
 0x3bd   : > { %861 = vadd.xlane.f32.xlu2 %v3802_v15  ;;  %4520 = vst [vmem:[#allocation27_spill] sm:$0xff] %v3830_v18 }
 0x3bf   : > { %1378 = vmatmul.bf16.gmra.mxu0 %v1326_v42 }
 0x3c2   : > { %v854_v20 = vpop.xlane.xlu2 %853 }
 0x3c3   : > { %2681 = vrcp.f32 %v854_v20  ;;  %v3861_v20 = vpop.f32.mrf.mxu1 }
 0x3c4   : > { %2683 = vpow2.f32 %v827_v52  ;;  %v3836_v58 = vpop.f32.mrf.mxu0  ;;  %v4527_v52 = vld [vmem:[#allocation5_spill] sm:$0xff]  ;;  %4529 = vst [vmem:[#allocation11_spill] sm:$0xff] %v3861_v20 }
 0x3c5   : > { %1992 = vmax.xlane.f32.xlu2 %v3807_v31  ;;  %4522 = vst [vmem:[#allocation26_spill] sm:$0xff] %v3836_v58  ;;  %2685 = vrcp.f32 %v858_v22 }
 0x3c9   : > { %v2682_v39 = vpop.eup %2681 }
 0x3ca   : > { %v3814_v49 = vpop.eup %2683  ;;  %v892_v23 = vmul.f32 %v2682_v39, %v3713_v7  ;;  %v3832_v7 = vpop.xlane.xlu1 %1564 }
 0x3cb   : > { %859 = vadd.xlane.f32.xlu1 %v3814_v49  ;;  %v2686_v1 = vpop.eup %2685 }
 0x3cc   : > { %v968_v11 = vpack.c.bf16 %v892_v23, %v891_v17  ;;  %v3843_v27 = vpop.f32.mrf.mxu0  ;;  %v2834_v17 = vld [vmem:[%s3252_s22 + $0x20] sm:$0xff] }
 0x3cd   : > { %4523 = vst [vmem:[#allocation30_spill] sm:$0xff] %v3843_v27 }
 0x3ce   : > { %1412 = vmatmul.bf16.gmra.mxu1 %v968_v11  ;;  %v3871_v11 = vpop.f32.mrf.mxu1 }
 0x3cf   : > { %2493 = vmatmul.msk.bf16.vlgmr.msrb.gmra.mxu0 %vm488_vm2, %v4518_v43  ;;  %4531 = vst [vmem:[#allocation16_spill] sm:$0xff] %v3871_v11 }
 0x3d3   : > { %1572 = vmax.xlane.f32.xlu1 %v3825_v16 }
 0x3d4   : > { %v3850_v61 = vpop.f32.mrf.mxu0 }
 0x3d5   : > { %4526 = vst [vmem:[#allocation12_spill] sm:$0xff] %v3850_v61 }
 0x3db   : > { %v3838_v41 = vpop.xlane.xlu1 %1984 }
 0x3dc   : > { %v3859_v9 = vpop.f32.mrf.mxu0  ;;  %v2015_v18 = vsub.f32 %v3740_v24, %v3838_v41 }
 0x3dd   : > { %4528 = vst [vmem:[#allocation28_spill] sm:$0xff] %v3859_v9 }
 0x3de   : > { %v2032_v20 = vmul.f32 1.442695, %v2015_v18 }
 0x3df   : > { %2494 = vmatmul.msk.bf16.gmra.mxu0 %vm488_vm2, %v4521_v12  ;;  %v802_v12 = vsub.f32 %v3652_v33, %v3750_v14 }
 0x3e3   : > { %v3847_v5 = vpop.xlane.xlu1 %1566 }
 0x3e4   : > { %v3866_v10 = vpop.f32.mrf.mxu0  ;;  %v1596_v24 = vsub.f32 %v3747_v63, %v3847_v5 }
 0x3e5   : > { %4530 = vst [vmem:[#allocation14_spill] sm:$0xff] %v3866_v10 }
 0x3e7   : > { %v3840_v36 = vpop.xlane.xlu2 %1982 }
 0x3eb   : > { %v3854_v42 = vpop.xlane.xlu1 %1568 }
 0x3ec   : > { %1886 = vperm.xlu1 %2567, %v4515_v32   ;;  %v894_v32 = vmul.f32 %v2686_v1, %v3704_v48  ;;  %v4532_v1 = vld [vmem:[#allocation6_spill] sm:$0xff]  ;;  %v3891_v14 = vpop.f32.mrf.mxu0 }
 0x3ef   : > { %2495 = vmatmul.msk.bf16.gmra.mxu0 %vm488_vm2, %v4524_v57  ;;  %v856_v2 = vpop.xlane.xlu2 %855 }
 0x3f0   : > { %2687 = vrcp.f32 %v856_v2  ;;  %v801_v2 = vsub.f32 %v3693_v56, %v3818_v60  ;;  %v3895_v56 = vpop.f32.mrf.mxu1  ;;  %v1594_v60 = vsub.f32 %v3699_v47, %v3828_v26  ;;  %v1595_v47 = vsub.f32 %v3708_v6, %v3832_v7 }
 0x3f1   : > { %4533 = vst [vmem:[#allocation29_spill] sm:$0xff] %v3895_v56 }
 0x3f4   : > { %1898 = vperm.xlu1 %2567, %v4525_v37  }
 0x3f6   : > { %v2688_v51 = vpop.eup %2687 }
 0x3f7   : > { %v893_v3 = vmul.f32 %v2688_v51, %v3763_v35  ;;  %v1922_v35 = vadd.f32 %v3723_v29, %v3785_v40  ;;  %v1505_v40 = vadd.f32 %v3686_v54, %v3735_v21  ;;  %v831_v21 = vmul.f32 1.442695, %v801_v2 }
 0x3f9   : > { %v969_v30 = vpack.c.bf16 %v894_v32, %v893_v3  ;;  %v1938_v39 = vmul.f32 0.2, %v1922_v35  ;;  %v833_v3 = vmul.f32 1.442695, %v802_v12  ;;  %v1521_v32 = vmul.f32 0.2, %v1505_v40 }
 0x3fa   : > { %v4536_v12 = vld [vmem:[#allocation7_spill] sm:$0xff] }
 0x3fb   : > { %1417 = vmatmul.bf16.gmra.mxu1 %v969_v30  ;;  %v1954_v22 = vmax.f32 %v1922_v35, %v1938_v39  ;;  %2689 = vpow2.f32 %v833_v3  ;;  %v1610_v35 = vmul.f32 1.442695, %v1594_v60  ;;  %v3935_v60 = vld [vmem:[%s3252_s22 + $0x40] sm:$0xff] }
 0x3fc   : > { %2569 = vset.pattern.permute.xlu1 %v2855_v45  ;;  %2691 = vpow2.f32 %v831_v21 }
 0x3fd   : > { %v3883_v30 = vadd.f32 %v2834_v17, %v1954_v22  ;;  %2693 = vpow2.f32 %v1610_v35 }
 0x3ff   : > { %2496 = vmatmul.msk.bf16.gmra.mxu0 %vm488_vm2, %v4527_v52  ;;  %v3886_v52 = vld [vmem:[%s3252_s22 + $0x30] sm:$0xff] }
 0x401   : > { %v3903_v39 = vpop.eup %2689 }
 0x403   : > { %v1451_v34 = vpop.permute.xlu1 %1450 }
 0x404   : > { %v1502_v8 = vadd.f32 %v3686_v54, %v1451_v34  ;;  %v1537_v34 = vmax.f32 %v1505_v40, %v1521_v32 }
 0x406   : > { %v1518_v48 = vmul.f32 0.2, %v1502_v8 }
 0x408   : > { %v1534_v44 = vmax.f32 %v1502_v8, %v1518_v48  ;;  %v1925_v8 = vadd.f32 %v3723_v29, %v1883_v28  ;;  %v2836_v48 = vld [vmem:[%s3252_s22 + $0x38] sm:$0xff]  ;;  %v3914_v28 = vpop.f32.mrf.mxu1 }
 0x409   : > { %4535 = vst [vmem:[#allocation10_spill] sm:$0xff] %v3914_v28 }
 0x40a   : > { %v3869_v23 = vadd.f32 %v2834_v17, %v1534_v44  ;;  %v3901_v44 = vadd.f32 %v2836_v48, %v1537_v34  ;;  %v1941_v17 = vmul.f32 0.2, %v1925_v8 }
 0x40b   : > { %v1459_v4 = vpop.permute.xlu1 %1458 }
 0x40c   : > { %v1504_v43 = vadd.f32 %v3686_v54, %v1459_v4  ;;  %1570 = vmax.xlane.f32.xlu0 %v3869_v23  ;;  %v1957_v40 = vmax.f32 %v1925_v8, %v1941_v17  ;;  %v4540_v8 = vld [vmem:[#allocation8_spill] sm:$0xff] }
 0x40e   : > { %v1520_v57 = vmul.f32 0.2, %v1504_v43  ;;  %v3924_v6 = vadd.f32 %v2836_v48, %v1957_v40  ;;  %v1471_v48 = vpop.permute.xlu2 %1470 }
 0x40f   : > { %2497 = vmatmul.msk.bf16.gmra.mxu0 %vm488_vm2, %v4532_v1 }
 0x410   : > { %v1536_v51 = vmax.f32 %v1504_v43, %v1520_v57  ;;  %v3909_v43 = vpop.eup %2691  ;;  %v1612_v57 = vmul.f32 1.442695, %v1595_v47  ;;  %v3927_v7 = vpop.f32.mrf.mxu1 }
 0x411   : > { %v3919_v2 = vpop.eup %2693  ;;  %4538 = vst [vmem:[#allocation36_spill] sm:$0xff] %v3927_v7 }
 0x412   : > { %v3889_v33 = vadd.f32 %v3886_v52, %v1536_v51  ;;  %2695 = vpow2.f32 %v1612_v57  ;;  %v4546_v57 = vld [vmem:[#allocation9_spill] sm:$0xff] }
 0x413   : > { %v1467_v26 = vpop.permute.xlu1 %1466 }
 0x414   : > { %1990 = vmax.xlane.f32.xlu0 %v3883_v30  ;;  %1574 = vmax.xlane.f32.xlu2 %v3889_v33  ;;  %v1506_v22 = vadd.f32 %v3686_v54, %v1467_v26 }
 0x416   : > { %v1522_v1 = vmul.f32 0.2, %v1506_v22 }
 0x418   : > { %v1538_v3 = vmax.f32 %v1506_v22, %v1522_v1  ;;  %v3929_v32 = vpop.eup %2695  ;;  %v3943_v35 = vpop.f32.mrf.mxu1 }
 0x419   : > { %4541 = vst [vmem:[#allocation24_spill] sm:$0xff] %v3943_v35 }
 0x41a   : > { %v3938_v34 = vadd.f32 %v3935_v60, %v1538_v3 }
 0x41c   : > { %865 = vadd.xlane.f32.xlu0 %v3903_v39  ;;  %1576 = vmax.xlane.f32.xlu2 %v3901_v44  ;;  %v3907_v4 = vpop.f32.mrf.mxu0 }
 0x41d   : > { %4534 = vst [vmem:[#allocation25_spill] sm:$0xff] %v3907_v4 }
 0x41e   : > { %863 = vadd.xlane.f32.xlu1 %v3909_v43 }
 0x41f   : > { %2498 = vmatmul.msk.bf16.gmra.mxu0 %vm488_vm2, %v4536_v12  ;;  %v4544_v12 = vld [vmem:[#allocation20_spill] sm:$0xff] }
 0x420   : > { %v3948_v47 = vpop.f32.mrf.mxu1 }
 0x421   : > { %4543 = vst [vmem:[#allocation23_spill] sm:$0xff] %v3948_v47 }
 0x424   : > { %1642 = vadd.xlane.f32.xlu0 %v3919_v2  ;;  %v3922_v51 = vpop.f32.mrf.mxu0 }
 0x425   : > { %4537 = vst [vmem:[#allocation34_spill] sm:$0xff] %v3922_v51 }
 0x426   : > { %1996 = vmax.xlane.f32.xlu1 %v3924_v6 }
 0x428   : > { %v3955_v3 = vpop.f32.mrf.mxu1 }
 0x429   : > { %4547 = vst [vmem:[#allocation13_spill] sm:$0xff] %v3955_v3 }
 0x42c   : > { %1644 = vadd.xlane.f32.xlu0 %v3929_v32  ;;  %v3932_v21 = vpop.f32.mrf.mxu0 }
 0x42d   : > { %4539 = vst [vmem:[#allocation22_spill] sm:$0xff] %v3932_v21 }
 0x42e   : > { %1578 = vmax.xlane.f32.xlu1 %v3938_v34 }
 0x42f   : > { %2499 = vmatmul.msk.bf16.gmra.mxu0 %vm488_vm2, %v4540_v8 }
 0x430   : > { %v862_v26 = vpop.xlane.xlu2 %861 }
 0x431   : > { %2697 = vrcp.f32 %v862_v26 }
 0x434   : > { %1878 = vperm.xlu2 %2568, %v4514_v0   ;;  %v3946_v17 = vpop.f32.mrf.mxu0 }
 0x435   : > { %4542 = vst [vmem:[#allocation32_spill] sm:$0xff] %v3946_v17 }
 0x437   : > { %v2698_v1 = vpop.eup %2697 }
 0x438   : > { %v896_v21 = vmul.f32 %v2698_v1, %v3802_v15 }
 0x43c   : > { %1902 = vperm.xlu2 %2568, %v4544_v12   ;;  %v3951_v40 = vpop.f32.mrf.mxu0 }
 0x43d   : > { %4545 = vst [vmem:[#allocation17_spill] sm:$0xff] %v3951_v40 }
 0x43e   : > { %v860_v22 = vpop.xlane.xlu1 %859 }
 0x43f   : > { %2699 = vrcp.f32 %v860_v22  ;;  %2500 = vmatmul.msk.bf16.gmra.mxu0 %vm488_vm2, %v4546_v57 }
 0x444   : > { %v3957_v8 = vpop.f32.mrf.mxu0  ;;  %2570 = vset.pattern.permute.xlu2 %v2855_v45 }
 0x445   : > { %4548 = vst [vmem:[#allocation15_spill] sm:$0xff] %v3957_v8  ;;  %v2700_v0 = vpop.eup %2699 }
 0x446   : > { %v895_v17 = vmul.f32 %v2700_v0, %v3814_v49  ;;  %v2014_v49 = vsub.f32 %v3755_v55, %v3840_v36  ;;  %v3989_v55 = vld [vmem:[%s3252_s22 + $0x48] sm:$0xff]  ;;  %v4005_v0 = vpop.xlane.xlu1 %1572 }
 0x447   : > { %1478 = vperm.xlu1 %2569, %v4525_v37  }
 0x448   : > { %v970_v26 = vpack.c.bf16 %v896_v21, %v895_v17  ;;  %v2030_v37 = vmul.f32 1.442695, %v2014_v49  ;;  %v1507_v17 = vadd.f32 %v3686_v54, %v1471_v48  ;;  %v3996_v49 = vpop.xlane.xlu0 %1986  ;;  %v1597_v48 = vsub.f32 %v3759_v25, %v3854_v42 }
 0x44a   : > { %1422 = vmatmul.bf16.gmra.mxu1 %v970_v26  ;;  %2701 = vpow2.f32 %v2030_v37 }
 0x44b   : > { %v3963_v22 = vpop.f32.mrf.mxu1 }
 0x44c   : > { %4549 = vst [vmem:[#allocation2_spill] sm:$0xff] %v3963_v22  ;;  %v3965_v40 = vpop.f32.mrf.mxu0 }
 0x44f   : > { %1482 = vperm.xlu1 %2569, %v4544_v12   ;;  %v1523_v12 = vmul.f32 0.2, %v1507_v17 }
 0x450   : > { %v3981_v1 = vpop.eup %2701 }
 0x451   : > { %v1539_v26 = vmax.f32 %v1507_v17, %v1523_v12  ;;  %v1616_v17 = vmul.f32 1.442695, %v1597_v48  ;;  %v1989_v12 = vpop.xlane.xlu0 %1988 }
 0x453   : > { %v1415_v57 = vpop.f32.mrf.mxu1  ;;  %v3992_v36 = vadd.f32 %v3989_v55, %v1539_v26  ;;  %2703 = vpow2.f32 %v1616_v17  ;;  %v2017_v26 = vsub.f32 %v3770_v46, %v1989_v12  ;;  %v4551_v17 = vld [vmem:[#allocation18_spill] sm:$0xff] }
 0x454   : > { %v3969_v8 = vadd.f32 %v1415_v57, %v3891_v14  ;;  %v3971_v45 = vpop.f32.mrf.mxu0 }
 0x455   : > { %v2036_v4 = vmul.f32 1.442695, %v2017_v26 }
 0x456   : > { %4550 = vst [vmem:[#allocation4_spill] sm:$0xff] %v3969_v8  ;;  %v4010_v8 = vpop.xlane.xlu2 %1992 }
 0x457   : > { %1490 = vperm.xlu1 %2569, %v3168_v59   ;;  %2705 = vpow2.f32 %v2036_v4  ;;  %v4553_v4 = vld [vmem:[#allocation21_spill] sm:$0xff] }
 0x459   : > { %v4014_v25 = vpop.eup %2703 }
 0x45c   : > { %v3978_v21 = vpop.f32.mrf.mxu0 }
 0x45d   : > { %v4026_v26 = vpop.eup %2705 }
 0x45e   : > { %v1887_v22 = vpop.permute.xlu1 %1886  ;;  %4552 = vst [vmem:[#allocation3_spill] sm:$0xff] %v4026_v26 }
 0x464   : > { %v3983_v14 = vpop.f32.mrf.mxu0 }
 0x465   : > { %2062 = vadd.xlane.f32.xlu2 %v3981_v1 }
 0x466   : > { %v4028_v15 = vpop.permute.xlu1 %1898 }
 0x46c   : > { %v3994_v57 = vpop.f32.mrf.mxu0 }
 0x46d   : > { %1580 = vmax.xlane.f32.xlu2 %v3992_v36 }
 0x474   : > { %v4001_v37 = vpop.f32.mrf.mxu0 }
 0x47c   : > { %v4008_v51 = vpop.f32.mrf.mxu0 }
 0x47f   : > { %v4012_v10 = vpop.xlane.xlu0 %1570 }
 0x481   : > { %1648 = vadd.xlane.f32.xlu1 %v4014_v25 }
 0x484   : > { %v4017_v42 = vpop.f32.mrf.mxu0 }
 0x485   : > { %1474 = vperm.xlu2 %2570, %v4551_v17  }
 0x487   : > { %v4022_v46 = vpop.xlane.xlu0 %1990  ;;  %v4024_v12 = vpop.xlane.xlu2 %1574 }
 0x489   : > { %2068 = vadd.xlane.f32.xlu1 %v4026_v26 }
 0x48c   : > { %v4031_v3 = vpop.f32.mrf.mxu0 }
 0x48d   : > { %1486 = vperm.xlu2 %2570, %v4553_v4  }
 0x48f   : > { %v866_v9 = vpop.xlane.xlu0 %865  ;;  %v4034_v47 = vpop.xlane.xlu2 %1576 }
 0x490   : > { %2707 = vrcp.f32 %v866_v9 }
 0x491   : > { %v864_v48 = vpop.xlane.xlu1 %863 }
 0x492   : > { %2709 = vrcp.f32 %v864_v48 }
 0x494   : > { %v4036_v61 = vpop.f32.mrf.mxu0 }
 0x495   : > { %1494 = vperm.xlu2 %2570, %v3176_v62  }
 0x496   : > { %v2708_v35 = vpop.eup %2707 }
 0x497   : > { %v1643_v27 = vpop.xlane.xlu0 %1642  ;;  %v1879_v7 = vpop.permute.xlu2 %1878  ;;  %v898_v13 = vmul.f32 %v2708_v35, %v3903_v39  ;;  %v1614_v39 = vmul.f32 1.442695, %v1596_v24 }
 0x498   : > { %v2710_v58 = vpop.eup %2709  ;;  %v1924_v28 = vadd.f32 %v3723_v29, %v1879_v7  ;;  %2711 = vrcp.f32 %v1643_v27 }
 0x499   : > { %v897_v56 = vmul.f32 %v2710_v58, %v3909_v43  ;;  %v4053_v27 = vpop.xlane.xlu1 %1996 }
 0x49a   : > { %v1940_v9 = vmul.f32 0.2, %v1924_v28 }
 0x49b   : > { %v971_v11 = vpack.c.bf16 %v898_v13, %v897_v56 }
 0x49c   : > { %v1956_v48 = vmax.f32 %v1924_v28, %v1940_v9  ;;  %v2177_v38 = vpop.f32.mrf.mxu0 }
 0x49d   : > { %1427 = vmatmul.bf16.gmra.mxu1 %v971_v11 }
 0x49e   : > { %v4045_v19 = vadd.f32 %v3886_v52, %v1956_v48  ;;  %v2712_v58 = vpop.eup %2711 }
 0x49f   : > { %v1645_v26 = vpop.xlane.xlu0 %1644  ;;  %v1690_v18 = vmul.f32 %v2712_v58, %v3919_v2 }
 0x4a0   : > { %2713 = vrcp.f32 %v1645_v26  ;;  %1994 = vmax.xlane.f32.xlu0 %v4045_v19  ;;  %v1599_v26 = vsub.f32 %v3825_v16, %v4005_v0  ;;  %v2019_v0 = vsub.f32 %v3807_v31, %v4010_v8  ;;  %v4111_v8 = vpop.permute.xlu2 %1902 }
 0x4a1   : > { %2715 = vpow2.f32 %v2032_v20  ;;  %v1926_v20 = vadd.f32 %v3723_v29, %v1887_v22  ;;  %v4061_v28 = vpop.xlane.xlu1 %1578 }
 0x4a2   : > { %2717 = vpow2.f32 %v1614_v39  ;;  %v1620_v58 = vmul.f32 1.442695, %v1599_v26  ;;  %v2839_v39 = vld [vmem:[%s3252_s22 + $0x58] sm:$0xff]  ;;  %v4126_v26 = vld [vmem:[%s3252_s22 + $0x60] sm:$0xff] }
 0x4a3   : > { %v1942_v5 = vmul.f32 0.2, %v1926_v20 }
 0x4a4   : > { %v2179_v41 = vpop.f32.mrf.mxu0  ;;  %2719 = vpow2.f32 %v1620_v58 }
 0x4a5   : > { %v1958_v2 = vmax.f32 %v1926_v20, %v1942_v5 }
 0x4a6   : > { %v2714_v13 = vpop.eup %2713 }
 0x4a7   : > { %v4050_v56 = vpop.eup %2715  ;;  %v1691_v11 = vmul.f32 %v2714_v13, %v3929_v32  ;;  %v4064_v32 = vadd.f32 %v3935_v60, %v1958_v2  ;;  %v1929_v60 = vadd.f32 %v3723_v29, %v4028_v15  ;;  %v2205_v2 = vpack.c.bf16 %v2179_v41, %v2177_v38 }
 0x4a8   : > { %2064 = vadd.xlane.f32.xlu0 %v4050_v56  ;;  %v4058_v43 = vpop.eup %2717 }
 0x4a9   : > { %v1772_v52 = vpack.c.bf16 %v1691_v11, %v1690_v18 }
 0x4aa   : > { %v4076_v20 = vpop.eup %2719 }
 0x4ab   : > { %1796 = vmatmul.bf16.vlgmr.msra.gmra.mxu2 %v1772_v52  ;;  %v1945_v52 = vmul.f32 0.2, %v1929_v60 }
 0x4ac   : > { %v2182_v63 = vpop.f32.mrf.mxu0 }
 0x4ad   : > { %v1961_v5 = vmax.f32 %v1929_v60, %v1945_v52 }
 0x4af   : > { %v4082_v15 = vadd.f32 %v2839_v39, %v1961_v5 }
 0x4b0   : > { %1646 = vadd.xlane.f32.xlu0 %v4058_v43 }
 0x4b4   : > { %v2184_v7 = vpop.f32.mrf.mxu0 }
 0x4b5   : > { %v2206_v16 = vpack.c.bf16 %v2184_v7, %v2182_v63  ;;  %v1600_v63 = vsub.f32 %v3889_v33, %v4024_v12  ;;  %v4556_v33 = vpack.c.bf16 %v3983_v14, %v3978_v21 }
 0x4b7   : > { %v1622_v31 = vmul.f32 1.442695, %v1600_v63 }
 0x4b8   : > { %1998 = vmax.xlane.f32.xlu0 %v4064_v32 }
 0x4b9   : > { %v1479_v35 = vpop.permute.xlu1 %1478 }
 0x4ba   : > { %v1509_v22 = vadd.f32 %v3686_v54, %v1479_v35  ;;  %v2040_v35 = vmul.f32 1.442695, %v2019_v0 }
 0x4bc   : > { %v1525_v9 = vmul.f32 0.2, %v1509_v22  ;;  %v2187_v48 = vpop.f32.mrf.mxu0  ;;  %2721 = vpow2.f32 %v2040_v35 }
 0x4bd   : > { %2723 = vpow2.f32 %v1622_v31  ;;  %v4145_v31 = vld [vmem:[%s3252_s22 + $0x78] sm:$0xff] }
 0x4be   : > { %v1541_v24 = vmax.f32 %v1509_v22, %v1525_v9  ;;  %v2204_v22 = vpack.c.bf16 %v4036_v61, %v4031_v3  ;;  %v4555_v61 = vpack.c.bf16 %v4001_v37, %v3994_v57  ;;  %v2016_v37 = vsub.f32 %v3767_v53, %v3996_v49 }
 0x4c0   : > { %v4071_v13 = vadd.f32 %v2839_v39, %v1541_v24  ;;  %v2034_v14 = vmul.f32 1.442695, %v2016_v37 }
 0x4c2   : > { %1584 = vmax.xlane.f32.xlu1 %v4071_v13  ;;  %v4093_v38 = vpop.eup %2721  ;;  %2725 = vpow2.f32 %v2034_v14 }
 0x4c3   : > { %v4103_v3 = vpop.eup %2723 }
 0x4c4   : > { %v2189_v18 = vpop.f32.mrf.mxu0 }
 0x4c5   : > { %v2207_v11 = vpack.c.bf16 %v2189_v18, %v2187_v48 }
 0x4c7   : > { %2208 = vmatpush.bf16.msra.mxu1 %v2207_v11 }
 0x4ca   : > { %1652 = vadd.xlane.f32.xlu1 %v4076_v20 }
 0x4cb   : > { %2209 = vmatpush.bf16.msra.mxu1 %v2206_v16 }
 0x4cc   : > { %1890 = vperm.xlu0 %2565, %v4513_v50   ;;  %v4554_v50 = vpack.c.bf16 %v4017_v42, %v4008_v51  ;;  %v4557_v51 = vpack.c.bf16 %v3971_v45, %v3965_v40  ;;  %v1483_v42 = vpop.permute.xlu1 %1482 }
 0x4cf   : > { %2210 = vmatpush.bf16.msra.mxu1 %v2205_v2 }
 0x4d2   : > { %2004 = vmax.xlane.f32.xlu1 %v4082_v15 }
 0x4d3   : > { %2211 = vmatpush.bf16.msra.mxu1 %v2204_v22 }
 0x4d4   : > { %1894 = vperm.xlu0 %2565, %v4551_v17   ;;  %v1510_v17 = vadd.f32 %v3686_v54, %v1483_v42 }
 0x4d6   : > { %v1526_v12 = vmul.f32 0.2, %v1510_v17 }
 0x4d7   : > { %2212 = vmatpush.bf16.msra.mxu1 %v4554_v50 }
 0x4d8   : > { %v2063_v57 = vpop.xlane.xlu2 %2062  ;;  %v1542_v53 = vmax.f32 %v1510_v17, %v1526_v12  ;;  %v1598_v17 = vsub.f32 %v3869_v23, %v4012_v10  ;;  %v2843_v10 = vld [vmem:[%s3252_s22 + $0x68] sm:$0xff] }
 0x4d9   : > { %2727 = vrcp.f32 %v2063_v57 }
 0x4da   : > { %2072 = vadd.xlane.f32.xlu1 %v4093_v38  ;;  %v4129_v9 = vadd.f32 %v4126_v26, %v1542_v53  ;;  %v1618_v12 = vmul.f32 1.442695, %v1598_v17  ;;  %v4204_v17 = vpop.f32.mrf.mxu1 }
 0x4db   : > { %2213 = vmatpush.bf16.msra.mxu1 %v4555_v61 }
 0x4dc   : > { %1906 = vperm.xlu0 %2565, %v4553_v4   ;;  %v1491_v4 = vpop.permute.xlu1 %1490 }
 0x4df   : > { %2214 = vmatpush.bf16.msra.mxu1 %v4556_v33 }
 0x4e0   : > { %v4115_v21 = vpop.xlane.xlu2 %1580 }
 0x4e2   : > { %1654 = vadd.xlane.f32.xlu1 %v4103_v3 }
 0x4e3   : > { %2215 = vmatpush.bf16.msra.mxu1 %v4557_v51 }
 0x4e4   : > { %1910 = vperm.xlu0 %2565, %v3168_v59   ;;  %v4118_v59 = vpop.eup %2725 }
 0x4e8   : > { %v1475_v40 = vpop.permute.xlu2 %1474 }
 0x4e9   : > { %v1508_v33 = vadd.f32 %v3686_v54, %v1475_v40 }
 0x4eb   : > { %v1524_v37 = vmul.f32 0.2, %v1508_v33 }
 0x4ec   : > { %1914 = vperm.xlu0 %2565, %v3176_v62   ;;  %v1601_v62 = vsub.f32 %v3901_v44, %v4034_v47  ;;  %v2728_v44 = vpop.eup %2727 }
 0x4ed   : > { %v2110_v58 = vmul.f32 %v2728_v44, %v3981_v1 }
 0x4ee   : > { %v1624_v49 = vmul.f32 1.442695, %v1601_v62  ;;  %v2842_v62 = vld [vmem:[%s3252_s22 + $0x50] sm:$0xff] }
 0x4f0   : > { %v4123_v41 = vpop.permute.xlu2 %1486 }
 0x4f4   : > { %v1649_v48 = vpop.xlane.xlu1 %1648 }
 0x4f8   : > { %v1495_v52 = vpop.permute.xlu2 %1494 }
 0x4f9   : > { %v1513_v0 = vadd.f32 %v3686_v54, %v1495_v52 }
 0x513   : > { %v1995_v45 = vpop.xlane.xlu0 %1994 }
 0x514   : > { %v2020_v24 = vsub.f32 %v4045_v19, %v1995_v45  ;;  %v1540_v45 = vmax.f32 %v1508_v33, %v1524_v37 }
 0x516   : > { %2066 = vadd.xlane.f32.xlu0 %v4118_v59  ;;  %v2042_v39 = vmul.f32 1.442695, %v2020_v24  ;;  %v4160_v53 = vadd.f32 %v2842_v62, %v1540_v45  ;;  %v2021_v45 = vsub.f32 %v3924_v6, %v4053_v27 }
 0x51b   : > { %v2065_v7 = vpop.xlane.xlu0 %2064 }
 0x51c   : > { %2729 = vrcp.f32 %v2065_v7 }
 0x51d   : > { %2731 = vpow2.f32 %v1624_v49 }
 0x51e   : > { %1586 = vmax.xlane.f32.xlu0 %v4129_v9  ;;  %2733 = vrcp.f32 %v1649_v48 }
 0x522   : > { %v2730_v47 = vpop.eup %2729 }
 0x523   : > { %v2111_v60 = vmul.f32 %v2730_v47, %v4050_v56  ;;  %v1647_v18 = vpop.xlane.xlu0 %1646  ;;  %v4135_v11 = vpop.eup %2731  ;;  %v1529_v56 = vmul.f32 0.2, %v1513_v0 }
 0x524   : > { %2735 = vrcp.f32 %v1647_v18  ;;  %v2734_v19 = vpop.eup %2733 }
 0x525   : > { %v2192_v16 = vpack.c.bf16 %v2111_v60, %v2110_v58  ;;  %2737 = vpow2.f32 %v2042_v39  ;;  %v1693_v2 = vmul.f32 %v2734_v19, %v4014_v25  ;;  %v1545_v63 = vmax.f32 %v1513_v0, %v1529_v56  ;;  %v2844_v56 = vld [vmem:[%s3252_s22 + $0x70] sm:$0xff] }
 0x526   : > { %1656 = vadd.xlane.f32.xlu0 %v4135_v11  ;;  %2739 = vpow2.f32 %v1618_v12  ;;  %v2018_v60 = vsub.f32 %v3883_v30, %v4022_v46  ;;  %v2044_v12 = vmul.f32 1.442695, %v2021_v45 }
 0x527   : > { %2216 = vmatmul.bf16.vlgmr.msra.gmra.mxu1 %v2192_v16  ;;  %v4148_v50 = vadd.f32 %v4145_v31, %v1545_v63 }
 0x528   : > { %v2038_v0 = vmul.f32 1.442695, %v2018_v60 }
 0x52a   : > { %v2736_v5 = vpop.eup %2735  ;;  %2741 = vpow2.f32 %v2038_v0 }
 0x52b   : > { %v1692_v1 = vmul.f32 %v2736_v5, %v4058_v43  ;;  %v4141_v35 = vpop.eup %2737  ;;  %v1999_v61 = vpop.xlane.xlu0 %1998 }
 0x52c   : > { %v4169_v58 = vpop.eup %2739 }
 0x52d   : > { %v1773_v22 = vpack.c.bf16 %v1693_v2, %v1692_v1  ;;  %v2069_v2 = vpop.xlane.xlu1 %2068 }
 0x52e   : > { %2074 = vadd.xlane.f32.xlu0 %v4141_v35 }
 0x52f   : > { %1801 = vmatmul.bf16.gmra.mxu2 %v1773_v22 }
 0x535   : > { %v1585_v33 = vpop.xlane.xlu1 %1584 }
 0x536   : > { %1592 = vmax.xlane.f32.xlu0 %v4148_v50 }
 0x53e   : > { %v1891_v43 = vpop.permute.xlu0 %1890 }
 0x53f   : > { %v1927_v25 = vadd.f32 %v3723_v29, %v1891_v43  ;;  %v4191_v43 = vpop.eup %2741 }
 0x541   : > { %v1943_v51 = vmul.f32 0.2, %v1927_v25 }
 0x543   : > { %v1959_v57 = vmax.f32 %v1927_v25, %v1943_v51 }
 0x545   : > { %v4154_v14 = vadd.f32 %v3989_v55, %v1959_v57  ;;  %v1512_v55 = vadd.f32 %v3686_v54, %v1491_v4  ;;  %v1603_v4 = vsub.f32 %v3992_v36, %v4115_v21  ;;  %v2022_v36 = vsub.f32 %v4064_v32, %v1999_v61 }
 0x546   : > { %v1895_v42 = vpop.permute.xlu0 %1894  ;;  %v1511_v21 = vadd.f32 %v3686_v54, %v4123_v41  ;;  %v1605_v57 = vsub.f32 %v4071_v13, %v1585_v33  ;;  %v1930_v32 = vadd.f32 %v3723_v29, %v4111_v8 }
 0x547   : > { %2000 = vmax.xlane.f32.xlu2 %v4154_v14  ;;  %v1928_v7 = vadd.f32 %v3723_v29, %v1895_v42  ;;  %v1528_v44 = vmul.f32 0.2, %v1512_v55  ;;  %v1628_v1 = vmul.f32 1.442695, %v1603_v4  ;;  %v2046_v63 = vmul.f32 1.442695, %v2022_v36 }
 0x548   : > { %v1527_v25 = vmul.f32 0.2, %v1511_v21  ;;  %v1632_v37 = vmul.f32 1.442695, %v1605_v57  ;;  %v1946_v54 = vmul.f32 0.2, %v1930_v32 }
 0x549   : > { %v1944_v47 = vmul.f32 0.2, %v1928_v7  ;;  %v1544_v52 = vmax.f32 %v1512_v55, %v1528_v44  ;;  %2743 = vpow2.f32 %v1628_v1  ;;  %v1797_v1 = vpop.f32.mrf.mxu2 }
 0x54a   : > { %2745 = vpow2.f32 %v2046_v63  ;;  %v1543_v61 = vmax.f32 %v1511_v21, %v1527_v25  ;;  %v1962_v13 = vmax.f32 %v1930_v32, %v1946_v54  ;;  %v4251_v21 = vld [vmem:[%s4405_s7] ss:$0 sm:$0xff]  ;;  %v4561_v32 = vld [vmem:[#allocation31_spill] sm:$0xff] }
 0x54b   : > { %v1960_v16 = vmax.f32 %v1928_v7, %v1944_v47  ;;  %v4179_v22 = vadd.f32 %v2844_v56, %v1544_v52  ;;  %2747 = vpow2.f32 %v1632_v37 }
 0x54c   : > { %v4200_v41 = vadd.f32 %v2843_v10, %v1543_v61  ;;  %v4211_v8 = vadd.f32 %v4126_v26, %v1962_v13  ;;  %2749 = vpow2.f32 %v2044_v12  ;;  %v4562_v61 = vld [vmem:[#allocation16_spill] sm:$0xff] }
 0x54d   : > { %v4181_v30 = vadd.f32 %v2842_v62, %v1960_v16  ;;  %v1396_v37 = vadd.f32 %v4562_v61, %v4561_v32 }
 0x54e   : > { %v1907_v49 = vpop.permute.xlu0 %1906 }
 0x54f   : > { %v1931_v40 = vadd.f32 %v3723_v29, %v1907_v49  ;;  %1582 = vmax.xlane.f32.xlu2 %v4160_v53  ;;  %v4193_v51 = vpop.eup %2743  ;;  %v4217_v49 = vpop.f32.mrf.mxu1 }
 0x550   : > { %v4202_v42 = vpop.eup %2745 }
 0x551   : > { %v1947_v48 = vmul.f32 0.2, %v1931_v40  ;;  %v4213_v62 = vpop.eup %2747  ;;  %v1799_v57 = vpop.f32.mrf.mxu2 }
 0x552   : > { %v4221_v6 = vpop.eup %2749  ;;  %v1838_v54 = vadd.f32 %v1799_v57, %v1396_v37 }
 0x553   : > { %v1963_v24 = vmax.f32 %v1931_v40, %v1947_v48  ;;  %v1602_v40 = vsub.f32 %v3938_v34, %v4061_v28 }
 0x555   : > { %v4167_v23 = vadd.f32 %v2843_v10, %v1963_v24  ;;  %v1626_v55 = vmul.f32 1.442695, %v1602_v40 }
 0x556   : > { %v1911_v39 = vpop.permute.xlu0 %1910 }
 0x557   : > { %v1932_v18 = vadd.f32 %v3723_v29, %v1911_v39  ;;  %2008 = vmax.xlane.f32.xlu1 %v4167_v23  ;;  %1650 = vadd.xlane.f32.xlu2 %v4169_v58  ;;  %2751 = vpow2.f32 %v1626_v55  ;;  %v4224_v26 = vpop.f32.mrf.mxu1 }
 0x558   : > { %2753 = vrcp.f32 %v2069_v2  ;;  %v4559_v2 = vld [vmem:[#allocation35_spill] sm:$0xff] }
 0x559   : > { %v1948_v19 = vmul.f32 0.2, %v1932_v18 }
 0x55b   : > { %v1964_v5 = vmax.f32 %v1932_v18, %v1948_v19  ;;  %v4558_v18 = vld [vmem:[#allocation3_spill] sm:$0xff] }
 0x55d   : > { %v4183_v46 = vadd.f32 %v2844_v56, %v1964_v5  ;;  %v4227_v24 = vpop.eup %2751 }
 0x55e   : > { %v1915_v27 = vpop.permute.xlu0 %1914  ;;  %v2754_v10 = vpop.eup %2753 }
 0x55f   : > { %1590 = vmax.xlane.f32.xlu1 %v4179_v22  ;;  %2002 = vmax.xlane.f32.xlu2 %v4181_v30  ;;  %v1933_v7 = vadd.f32 %v3723_v29, %v1915_v27  ;;  %v4230_v34 = vpop.f32.mrf.mxu1  ;;  %v2113_v4 = vmul.f32 %v2754_v10, %v4558_v18 }
 0x560   : > { %2010 = vmax.xlane.f32.xlu0 %v4183_v46 }
 0x561   : > { %v1949_v48 = vmul.f32 0.2, %v1933_v7 }
 0x563   : > { %v1965_v44 = vmax.f32 %v1933_v7, %v1949_v48 }
 0x565   : > { %v4233_v28 = vadd.f32 %v4145_v31, %v1965_v44 }
 0x567   : > { %1660 = vadd.xlane.f32.xlu1 %v4193_v51  ;;  %2070 = vadd.xlane.f32.xlu2 %v4191_v43  ;;  %v4238_v52 = vpop.f32.mrf.mxu1 }
 0x56f   : > { %2078 = vadd.xlane.f32.xlu1 %v4202_v42  ;;  %1588 = vmax.xlane.f32.xlu2 %v4200_v41  ;;  %v4243_v5 = vpop.f32.mrf.mxu1 }
 0x577   : > { %1664 = vadd.xlane.f32.xlu1 %v4213_v62  ;;  %2006 = vmax.xlane.f32.xlu2 %v4211_v8 }
 0x57f   : > { %2076 = vadd.xlane.f32.xlu2 %v4221_v6 }
 0x587   : > { %1658 = vadd.xlane.f32.xlu2 %v4227_v24 }
 0x589   : > { %v2067_v47 = vpop.xlane.xlu0 %2066 }
 0x58a   : > { %2755 = vrcp.f32 %v2067_v47 }
 0x58f   : > { %2012 = vmax.xlane.f32.xlu2 %v4233_v28 }
 0x590   : > { %v2756_v39 = vpop.eup %2755 }
 0x591   : > { %v1587_v60 = vpop.xlane.xlu0 %1586  ;;  %v2112_v29 = vmul.f32 %v2756_v39, %v4118_v59  ;;  %v4560_v59 = vld [vmem:[#allocation11_spill] sm:$0xff] }
 0x592   : > { %v1606_v16 = vsub.f32 %v4129_v9, %v1587_v60  ;;  %v1394_v56 = vadd.f32 %v4560_v59, %v4559_v2  ;;  %v1653_v9 = vpop.xlane.xlu1 %1652 }
 0x593   : > { %v2193_v19 = vpack.c.bf16 %v2113_v4, %v2112_v29 }
 0x594   : > { %v1634_v0 = vmul.f32 1.442695, %v1606_v16  ;;  %v1837_v36 = vadd.f32 %v1797_v1, %v1394_v56 }
 0x595   : > { %2221 = vmatmul.bf16.gmra.mxu1 %v2193_v19 }
 0x596   : > { %2757 = vpow2.f32 %v1634_v0 }
 0x599   : > { %v1657_v55 = vpop.xlane.xlu0 %1656 }
 0x59a   : > { %v2005_v12 = vpop.xlane.xlu1 %2004 }
 0x59b   : > { %v2025_v4 = vsub.f32 %v4082_v15, %v2005_v12 }
 0x59c   : > { %v4241_v31 = vpop.eup %2757 }
 0x59d   : > { %1666 = vadd.xlane.f32.xlu1 %v4241_v31  ;;  %v2052_v16 = vmul.f32 1.442695, %v2025_v4 }
 0x5a1   : > { %v4267_v47 = vpop.xlane.xlu0 %2074 }
 0x5a2   : > { %v2073_v27 = vpop.xlane.xlu1 %2072 }
 0x5a4   : > { %v2217_v63 = vpop.f32.mrf.mxu1 }
 0x5a5   : > { %v2257_v25 = vadd.f32 %v2217_v63, %v1837_v36 }
 0x5a7   : > { %v2277_v33 = vadd.f32 %v4251_v21, %v2257_v25 }
 0x5a9   : > { %2293 = vst [vmem:[%s4258_s13] sm:$0xff] %v2277_v33  ;;  %v4274_v0 = vpop.xlane.xlu0 %1592 }
 0x5aa   : > { %v1655_v10 = vpop.xlane.xlu1 %1654 }
 0x5ac   : > { %v2219_v45 = vpop.f32.mrf.mxu1 }
 0x5ad   : > { %v2258_v13 = vadd.f32 %v2219_v45, %v1838_v54 }
 0x5af   : > { %v2278_v40 = vadd.f32 %v4251_v21, %v2258_v13 }
 0x5b1   : > { %2294 = vst [vmem:[%s4258_s13 + $0x8] sm:$0xff] %v2278_v40 }
 0x5ba   : > { %v2001_v7 = vpop.xlane.xlu2 %2000 }
 0x5bb   : > { %v2023_v48 = vsub.f32 %v4154_v14, %v2001_v7 }
 0x5bd   : > { %v2048_v44 = vmul.f32 1.442695, %v2023_v48 }
 0x5bf   : > { %2759 = vpow2.f32 %v2048_v44 }
 0x5c2   : > { %v1583_v39 = vpop.xlane.xlu2 %1582 }
 0x5c3   : > { %v1604_v60 = vsub.f32 %v4160_v53, %v1583_v39 }
 0x5c5   : > { %v4270_v29 = vpop.eup %2759  ;;  %v1630_v18 = vmul.f32 1.442695, %v1604_v60 }
 0x5c6   : > { %2080 = vadd.xlane.f32.xlu0 %v4270_v29 }
 0x5c7   : > { %2761 = vpow2.f32 %v1630_v18 }
 0x5c8   : > { %2763 = vrcp.f32 %v1653_v9 }
 0x5ca   : > { %v2009_v19 = vpop.xlane.xlu1 %2008  ;;  %v1651_v14 = vpop.xlane.xlu2 %1650 }
 0x5cb   : > { %v2027_v1 = vsub.f32 %v4167_v23, %v2009_v19  ;;  %2765 = vrcp.f32 %v1651_v14 }
 0x5cc   : > { %2767 = vpow2.f32 %v2052_v16 }
 0x5cd   : > { %v4277_v2 = vpop.eup %2761  ;;  %v2056_v53 = vmul.f32 1.442695, %v2027_v1 }
 0x5ce   : > { %1662 = vadd.xlane.f32.xlu2 %v4277_v2  ;;  %v2764_v59 = vpop.eup %2763 }
 0x5cf   : > { %2769 = vpow2.f32 %v2056_v53  ;;  %v1695_v9 = vmul.f32 %v2764_v59, %v4076_v20 }
 0x5d0   : > { %2771 = vrcp.f32 %v2073_v27 }
 0x5d1   : > { %v2766_v15 = vpop.eup %2765  ;;  %2773 = vrcp.f32 %v1657_v55 }
 0x5d2   : > { %v2003_v56 = vpop.xlane.xlu2 %2002  ;;  %v1694_v36 = vmul.f32 %v2766_v15, %v4169_v58  ;;  %v4283_v33 = vpop.eup %2767 }
 0x5d3   : > { %v2011_v63 = vpop.xlane.xlu0 %2010  ;;  %v2024_v25 = vsub.f32 %v4181_v30, %v2003_v56  ;;  %v1591_v55 = vpop.xlane.xlu1 %1590 }
 0x5d4   : > { %v2028_v23 = vsub.f32 %v4183_v46, %v2011_v63  ;;  %v1774_v57 = vpack.c.bf16 %v1695_v9, %v1694_v36  ;;  %v1608_v18 = vsub.f32 %v4179_v22, %v1591_v55 }
 0x5d5   : > { %v4286_v32 = vpop.eup %2769  ;;  %v2050_v61 = vmul.f32 1.442695, %v2024_v25 }
 0x5d6   : > { %v2058_v37 = vmul.f32 1.442695, %v2028_v23  ;;  %2088 = vadd.xlane.f32.xlu1 %v4286_v32  ;;  %2084 = vadd.xlane.f32.xlu2 %v4283_v33  ;;  %v2772_v58 = vpop.eup %2771 }
 0x5d7   : > { %1806 = vmatmul.bf16.gmra.mxu2 %v1774_v57  ;;  %v2774_v30 = vpop.eup %2773  ;;  %v2115_v44 = vmul.f32 %v2772_v58, %v4093_v38  ;;  %v1609_v38 = vsub.f32 %v4148_v50, %v4274_v0 }
 0x5d8   : > { %2775 = vpow2.f32 %v2058_v37  ;;  %v1697_v13 = vmul.f32 %v2774_v30, %v4135_v11  ;;  %v1638_v11 = vmul.f32 1.442695, %v1608_v18  ;;  %v4563_v37 = vld [vmem:[#allocation33_spill] sm:$0xff] }
 0x5d9   : > { %2777 = vpow2.f32 %v2050_v61  ;;  %v1640_v22 = vmul.f32 1.442695, %v1609_v38 }
 0x5da   : > { %2779 = vrcp.f32 %v1655_v10  ;;  %v2071_v20 = vpop.xlane.xlu2 %2070 }
 0x5db   : > { %2781 = vrcp.f32 %v2071_v20  ;;  %v4564_v20 = vld [vmem:[#allocation29_spill] sm:$0xff] }
 0x5dc   : > { %v1399_v58 = vadd.f32 %v4564_v20, %v4563_v37  ;;  %v4569_v20 = vld [vmem:[#allocation30_spill] sm:$0xff] }
 0x5de   : > { %v4290_v46 = vpop.eup %2775 }
 0x5df   : > { %v4292_v54 = vpop.eup %2777  ;;  %2090 = vadd.xlane.f32.xlu1 %v4290_v46 }
 0x5e0   : > { %v2780_v45 = vpop.eup %2779  ;;  %2082 = vadd.xlane.f32.xlu0 %v4292_v54 }
 0x5e1   : > { %v2782_v12 = vpop.eup %2781  ;;  %v1696_v7 = vmul.f32 %v2780_v45, %v4103_v3 }
 0x5e2   : > { %v1589_v40 = vpop.xlane.xlu2 %1588  ;;  %v2114_v48 = vmul.f32 %v2782_v12, %v4191_v43  ;;  %v4566_v12 = vld [vmem:[#allocation10_spill] sm:$0xff] }
 0x5e3   : > { %v1607_v27 = vsub.f32 %v4200_v41, %v1589_v40  ;;  %v1775_v39 = vpack.c.bf16 %v1697_v13, %v1696_v7 }
 0x5e4   : > { %v2194_v60 = vpack.c.bf16 %v2115_v44, %v2114_v48 }
 0x5e5   : > { %v1636_v10 = vmul.f32 1.442695, %v1607_v27 }
 0x5e6   : > { %2226 = vmatmul.bf16.gmra.mxu1 %v2194_v60 }
 0x5e7   : > { %2783 = vpow2.f32 %v1636_v10  ;;  %1811 = vmatmul.bf16.gmra.mxu2 %v1775_v39 }
 0x5e8   : > { %2785 = vpow2.f32 %v1638_v11 }
 0x5ea   : > { %v2007_v4 = vpop.xlane.xlu2 %2006 }
 0x5eb   : > { %v2026_v16 = vsub.f32 %v4211_v8, %v2007_v4  ;;  %v1661_v8 = vpop.xlane.xlu1 %1660 }
 0x5ed   : > { %v4303_v19 = vpop.eup %2783  ;;  %v2054_v41 = vmul.f32 1.442695, %v2026_v16 }
 0x5ee   : > { %1668 = vadd.xlane.f32.xlu0 %v4303_v19  ;;  %v4309_v43 = vpop.eup %2785 }
 0x5ef   : > { %2787 = vpow2.f32 %v2054_v41 }
 0x5f0   : > { %2789 = vrcp.f32 %v4267_v47 }
 0x5f2   : > { %v2077_v3 = vpop.xlane.xlu2 %2076 }
 0x5f3   : > { %2791 = vrcp.f32 %v2077_v3  ;;  %v2079_v44 = vpop.xlane.xlu1 %2078 }
 0x5f4   : > { %2793 = vpow2.f32 %v1640_v22 }
 0x5f5   : > { %v4311_v14 = vpop.eup %2787  ;;  %2795 = vrcp.f32 %v1661_v8 }
 0x5f6   : > { %1670 = vadd.xlane.f32.xlu0 %v4309_v43  ;;  %2086 = vadd.xlane.f32.xlu2 %v4311_v14  ;;  %v2790_v1 = vpop.eup %2789 }
 0x5f7   : > { %v2116_v0 = vmul.f32 %v2790_v1, %v4141_v35 }
 0x5f9   : > { %v2792_v53 = vpop.eup %2791 }
 0x5fa   : > { %v1659_v50 = vpop.xlane.xlu2 %1658  ;;  %v2117_v47 = vmul.f32 %v2792_v53, %v4221_v6  ;;  %v4317_v15 = vpop.eup %2793 }
 0x5fb   : > { %2797 = vrcp.f32 %v1659_v50  ;;  %v2796_v56 = vpop.eup %2795  ;;  %v1802_v6 = vpop.f32.mrf.mxu2 }
 0x5fc   : > { %v2195_v59 = vpack.c.bf16 %v2117_v47, %v2116_v0  ;;  %v1699_v25 = vmul.f32 %v2796_v56, %v4193_v51  ;;  %v1839_v30 = vadd.f32 %v1802_v6, %v1399_v58  ;;  %v1665_v39 = vpop.xlane.xlu1 %1664  ;;  %v4570_v58 = vld [vmem:[#allocation24_spill] sm:$0xff] }
 0x5fe   : > { %1672 = vadd.xlane.f32.xlu2 %v4317_v15  ;;  %2231 = vmatmul.bf16.gmra.mxu1 %v2195_v59 }
 0x601   : > { %v2798_v36 = vpop.eup %2797 }
 0x602   : > { %v2013_v9 = vpop.xlane.xlu2 %2012  ;;  %v1698_v63 = vmul.f32 %v2798_v36, %v4227_v24 }
 0x603   : > { %v2029_v23 = vsub.f32 %v4233_v28, %v2013_v9  ;;  %v1804_v13 = vpop.f32.mrf.mxu2  ;;  %v4565_v28 = vld [vmem:[#allocation27_spill] sm:$0xff] }
 0x604   : > { %v1776_v35 = vpack.c.bf16 %v1699_v25, %v1698_v63  ;;  %v1401_v40 = vadd.f32 %v4566_v12, %v4565_v28 }
 0x605   : > { %v2060_v57 = vmul.f32 1.442695, %v2029_v23 }
 0x606   : > { %1816 = vmatmul.bf16.gmra.mxu2 %v1776_v35  ;;  %v1840_v55 = vadd.f32 %v1804_v13, %v1401_v40 }
 0x607   : > { %2799 = vpow2.f32 %v2060_v57 }
 0x608   : > { %2801 = vrcp.f32 %v2079_v44 }
 0x60d   : > { %v4323_v61 = vpop.eup %2799 }
 0x60e   : > { %2092 = vadd.xlane.f32.xlu0 %v4323_v61  ;;  %v2802_v60 = vpop.eup %2801 }
 0x60f   : > { %v2118_v4 = vmul.f32 %v2802_v60, %v4202_v42 }
 0x610   : > { %v1667_v59 = vpop.xlane.xlu1 %1666 }
 0x612   : > { %v2222_v24 = vpop.f32.mrf.mxu1 }
 0x613   : > { %v2259_v45 = vadd.f32 %v2222_v24, %v1839_v30  ;;  %v1406_v30 = vadd.f32 %v4570_v58, %v4569_v20  ;;  %v4577_v20 = vld [vmem:[#allocation4_spill] sm:$0xff] }
 0x615   : > { %v2279_v51 = vadd.f32 %v4251_v21, %v2259_v45 }
 0x617   : > { %2295 = vst [vmem:[%s4258_s13 + $0x10] sm:$0xff] %v2279_v51 }
 0x61a   : > { %v2224_v27 = vpop.f32.mrf.mxu1 }
 0x61b   : > { %v2260_v7 = vadd.f32 %v2224_v27, %v1840_v55 }
 0x61d   : > { %v2280_v48 = vadd.f32 %v4251_v21, %v2260_v7 }
 0x61f   : > { %2296 = vst [vmem:[%s4258_s13 + $0x18] sm:$0xff] %v2280_v48 }
 0x639   : > { %v2081_v10 = vpop.xlane.xlu0 %2080 }
 0x63a   : > { %2803 = vrcp.f32 %v2081_v10 }
 0x63b   : > { %2805 = vrcp.f32 %v1665_v39 }
 0x640   : > { %v2804_v18 = vpop.eup %2803 }
 0x641   : > { %v1663_v11 = vpop.xlane.xlu2 %1662  ;;  %v2119_v16 = vmul.f32 %v2804_v18, %v4270_v29  ;;  %v2806_v38 = vpop.eup %2805 }
 0x642   : > { %2807 = vrcp.f32 %v1663_v11  ;;  %v1701_v8 = vmul.f32 %v2806_v38, %v4213_v62  ;;  %v4568_v62 = vld [vmem:[#allocation36_spill] sm:$0xff] }
 0x643   : > { %v2196_v41 = vpack.c.bf16 %v2119_v16, %v2118_v4  ;;  %v4571_v11 = vld [vmem:[#allocation12_spill] sm:$0xff]  ;;  %v4572_v4 = vld [vmem:[#allocation23_spill] sm:$0xff] }
 0x644   : > { %v1409_v16 = vadd.f32 %v4572_v4, %v4571_v11 }
 0x645   : > { %2236 = vmatmul.bf16.gmra.mxu1 %v2196_v41 }
 0x648   : > { %v2808_v3 = vpop.eup %2807 }
 0x649   : > { %v1700_v22 = vmul.f32 %v2808_v3, %v4277_v2  ;;  %v2085_v53 = vpop.xlane.xlu2 %2084  ;;  %v4567_v2 = vld [vmem:[#allocation26_spill] sm:$0xff]  ;;  %v2089_v6 = vpop.xlane.xlu1 %2088 }
 0x64a   : > { %2809 = vrcp.f32 %v2085_v53  ;;  %v1404_v9 = vadd.f32 %v4568_v62, %v4567_v2 }
 0x64b   : > { %v1777_v1 = vpack.c.bf16 %v1701_v8, %v1700_v22 }
 0x64d   : > { %1821 = vmatmul.bf16.gmra.mxu2 %v1777_v1 }
 0x650   : > { %v2810_v0 = vpop.eup %2809 }
 0x651   : > { %v2121_v29 = vmul.f32 %v2810_v0, %v4283_v33  ;;  %v4574_v0 = vld [vmem:[#allocation13_spill] sm:$0xff] }
 0x653   : > { %v2083_v50 = vpop.xlane.xlu0 %2082 }
 0x654   : > { %2811 = vrcp.f32 %v2083_v50  ;;  %v4573_v50 = vld [vmem:[#allocation28_spill] sm:$0xff] }
 0x655   : > { %2813 = vrcp.f32 %v1667_v59 }
 0x65a   : > { %v2812_v47 = vpop.eup %2811  ;;  %v1807_v36 = vpop.f32.mrf.mxu2 }
 0x65b   : > { %v2120_v42 = vmul.f32 %v2812_v47, %v4292_v54  ;;  %v1841_v25 = vadd.f32 %v1807_v36, %v1404_v9  ;;  %v2814_v57 = vpop.eup %2813  ;;  %v1411_v47 = vadd.f32 %v4574_v0, %v4573_v50 }
 0x65c   : > { %v1702_v45 = vmul.f32 %v2814_v57, %v4241_v31 }
 0x65d   : > { %v2197_v56 = vpack.c.bf16 %v2121_v29, %v2120_v42 }
 0x65f   : > { %2241 = vmatmul.bf16.gmra.mxu1 %v2197_v56 }
 0x661   : > { %v1669_v63 = vpop.xlane.xlu0 %1668 }
 0x662   : > { %2815 = vrcp.f32 %v1669_v63  ;;  %v1809_v33 = vpop.f32.mrf.mxu2 }
 0x663   : > { %v2227_v23 = vpop.f32.mrf.mxu1  ;;  %2817 = vrcp.f32 %v2089_v6  ;;  %v1842_v13 = vadd.f32 %v1809_v33, %v1406_v30 }
 0x664   : > { %v2261_v35 = vadd.f32 %v2227_v23, %v1841_v25  ;;  %v4575_v25 = vld [vmem:[#allocation14_spill] sm:$0xff] }
 0x665   : > { %v4576_v23 = vld [vmem:[#allocation2_spill] sm:$0xff] }
 0x666   : > { %v2281_v54 = vadd.f32 %v4251_v21, %v2261_v35  ;;  %v1414_v35 = vadd.f32 %v4576_v23, %v4575_v25 }
 0x668   : > { %v2816_v37 = vpop.eup %2815  ;;  %2297 = vst [vmem:[%s4258_s13 + $0x20] sm:$0xff] %v2281_v54 }
 0x669   : > { %v2087_v24 = vpop.xlane.xlu2 %2086  ;;  %v1703_v51 = vmul.f32 %v2816_v37, %v4303_v19  ;;  %v1671_v40 = vpop.xlane.xlu0 %1670 }
 0x66a   : > { %2819 = vrcp.f32 %v2087_v24  ;;  %v2818_v27 = vpop.eup %2817  ;;  %v1812_v39 = vpop.f32.mrf.mxu2 }
 0x66b   : > { %v1778_v28 = vpack.c.bf16 %v1703_v51, %v1702_v45  ;;  %v2229_v12 = vpop.f32.mrf.mxu1  ;;  %2821 = vrcp.f32 %v1671_v40  ;;  %v2123_v31 = vmul.f32 %v2818_v27, %v4286_v32  ;;  %v1843_v3 = vadd.f32 %v1812_v39, %v1409_v16  ;;  %v4578_v45 = vld [vmem:[#allocation25_spill] sm:$0xff]  ;;  %v4579_v27 = vld [vmem:[#allocation34_spill] sm:$0xff]  ;;  %v4581_v16 = vld [vmem:[#allocation32_spill] sm:$0xff] }
 0x66c   : > { %v2262_v55 = vadd.f32 %v2229_v12, %v1842_v13  ;;  %v1419_v51 = vadd.f32 %v4204_v17, %v4578_v45 }
 0x66d   : > { %1826 = vmatmul.bf16.gmra.mxu2 %v1778_v28 }
 0x66e   : > { %v2282_v7 = vadd.f32 %v4251_v21, %v2262_v55 }
 0x670   : > { %v2820_v48 = vpop.eup %2819  ;;  %2298 = vst [vmem:[%s4258_s13 + $0x28] sm:$0xff] %v2282_v7  ;;  %v1421_v7 = vadd.f32 %v4217_v49, %v4579_v27  ;;  %v1426_v49 = vadd.f32 %v4230_v34, %v4581_v16 }
 0x671   : > { %v1673_v44 = vpop.xlane.xlu2 %1672  ;;  %v2122_v10 = vmul.f32 %v2820_v48, %v4311_v14  ;;  %v2822_v60 = vpop.eup %2821 }
 0x672   : > { %2823 = vrcp.f32 %v1673_v44  ;;  %v1704_v41 = vmul.f32 %v2822_v60, %v4309_v43  ;;  %v2091_v14 = vpop.xlane.xlu1 %2090  ;;  %v1814_v53 = vpop.f32.mrf.mxu2 }
 0x673   : > { %v2198_v19 = vpack.c.bf16 %v2123_v31, %v2122_v10  ;;  %2825 = vrcp.f32 %v2091_v14  ;;  %v1844_v29 = vadd.f32 %v1814_v53, %v1411_v47  ;;  %v4583_v47 = vld [vmem:[#allocation15_spill] sm:$0xff] }
 0x675   : > { %2246 = vmatmul.bf16.gmra.mxu1 %v2198_v19  ;;  %v4580_v19 = vld [vmem:[#allocation22_spill] sm:$0xff] }
 0x676   : > { %v1424_v17 = vadd.f32 %v4224_v26, %v4580_v19 }
 0x678   : > { %v2824_v18 = vpop.eup %2823 }
 0x679   : > { %v1705_v38 = vmul.f32 %v2824_v18, %v4317_v15  ;;  %v2826_v59 = vpop.eup %2825 }
 0x67a   : > { %v2124_v2 = vmul.f32 %v2826_v59, %v4290_v46 }
 0x67b   : > { %v2232_v22 = vpop.f32.mrf.mxu1  ;;  %v1779_v8 = vpack.c.bf16 %v1705_v38, %v1704_v41 }
 0x67c   : > { %v2263_v1 = vadd.f32 %v2232_v22, %v1843_v3 }
 0x67d   : > { %1831 = vmatmul.bf16.gmra.mxu2 %v1779_v8 }
 0x67e   : > { %v2283_v32 = vadd.f32 %v4251_v21, %v2263_v1  ;;  %v4582_v1 = vld [vmem:[#allocation17_spill] sm:$0xff] }
 0x67f   : > { %v1429_v14 = vadd.f32 %v4238_v52, %v4582_v1 }
 0x680   : > { %2299 = vst [vmem:[%s4258_s13 + $0x30] sm:$0xff] %v2283_v32 }
 0x681   : > { %v2093_v42 = vpop.xlane.xlu0 %2092 }
 0x682   : > { %2827 = vrcp.f32 %v2093_v42  ;;  %v1431_v42 = vadd.f32 %v4243_v5, %v4583_v47 }
 0x683   : > { %v2234_v43 = vpop.f32.mrf.mxu1 }
 0x684   : > { %v2264_v15 = vadd.f32 %v2234_v43, %v1844_v29 }
 0x686   : > { %v2284_v56 = vadd.f32 %v4251_v21, %v2264_v15 }
 0x688   : > { %v2828_v36 = vpop.eup %2827  ;;  %2300 = vst [vmem:[%s4258_s13 + $0x38] sm:$0xff] %v2284_v56 }
 0x689   : > { %v2125_v62 = vmul.f32 %v2828_v36, %v4323_v61  ;;  %v1817_v63 = vpop.f32.mrf.mxu2 }
 0x68a   : > { %v1845_v57 = vadd.f32 %v1817_v63, %v1414_v35 }
 0x68b   : > { %v2199_v9 = vpack.c.bf16 %v2125_v62, %v2124_v2 }
 0x68d   : > { %2251 = vmatmul.bf16.gmra.mxu1 %v2199_v9 }
 0x691   : > { %v1819_v33 = vpop.f32.mrf.mxu2 }
 0x692   : > { %v1846_v58 = vadd.f32 %v1819_v33, %v4577_v20 }
 0x6c2   : > { %v2237_v6 = vpop.f32.mrf.mxu1 }
 0x6c3   : > { %v2265_v54 = vadd.f32 %v2237_v6, %v1845_v57 }
 0x6c5   : > { %v2285_v37 = vadd.f32 %v4251_v21, %v2265_v54 }
 0x6c7   : > { %2301 = vst [vmem:[%s4258_s13 + $0x40] sm:$0xff] %v2285_v37 }
 0x6ca   : > { %v2239_v46 = vpop.f32.mrf.mxu1 }
 0x6cb   : > { %v2266_v30 = vadd.f32 %v2239_v46, %v1846_v58 }
 0x6cd   : > { %v2286_v61 = vadd.f32 %v4251_v21, %v2266_v30 }
 0x6cf   : > { %2302 = vst [vmem:[%s4258_s13 + $0x48] sm:$0xff] %v2286_v61 }
 0x6d0   : > { %v1822_v24 = vpop.f32.mrf.mxu2 }
 0x6d1   : > { %v1847_v13 = vadd.f32 %v1822_v24, %v1419_v51 }
 0x6d8   : > { %v1824_v55 = vpop.f32.mrf.mxu2 }
 0x6d9   : > { %v1848_v48 = vadd.f32 %v1824_v55, %v1421_v7 }
 0x6dc   : > { %v2242_v28 = vpop.f32.mrf.mxu1 }
 0x6dd   : > { %v2267_v12 = vadd.f32 %v2242_v28, %v1847_v13 }
 0x6df   : > { %v2287_v40 = vadd.f32 %v4251_v21, %v2267_v12 }
 0x6e1   : > { %2303 = vst [vmem:[%s4258_s13 + $0x50] sm:$0xff] %v2287_v40 }
 0x6e4   : > { %v2244_v44 = vpop.f32.mrf.mxu1 }
 0x6e5   : > { %v2268_v10 = vadd.f32 %v2244_v44, %v1848_v48 }
 0x6e7   : > { %v2288_v31 = vadd.f32 %v4251_v21, %v2268_v10 }
 0x6e9   : > { %2304 = vst [vmem:[%s4258_s13 + $0x58] sm:$0xff] %v2288_v31 }
 0x6f0   : > { %v1827_v39 = vpop.f32.mrf.mxu2 }
 0x6f1   : > { %v1849_v60 = vadd.f32 %v1827_v39, %v1424_v17 }
 0x6f2   : > { %v2247_v18 = vpop.f32.mrf.mxu1 }
 0x6f3   : > { %v2269_v11 = vadd.f32 %v2247_v18, %v1849_v60 }
 0x6f5   : > { %v2289_v4 = vadd.f32 %v4251_v21, %v2269_v11 }
 0x6f7   : > { %2305 = vst [vmem:[%s4258_s13 + $0x60] sm:$0xff] %v2289_v4 }
 0x6f8   : > { %v1829_v41 = vpop.f32.mrf.mxu2 }
 0x6f9   : > { %v1850_v38 = vadd.f32 %v1829_v41, %v1426_v49 }
 0x6fa   : > { %v2249_v3 = vpop.f32.mrf.mxu1 }
 0x6fb   : > { %v2270_v22 = vadd.f32 %v2249_v3, %v1850_v38 }
 0x6fd   : > { %v2290_v8 = vadd.f32 %v4251_v21, %v2270_v22 }
 0x6ff   : > { %2306 = vst [vmem:[%s4258_s13 + $0x68] sm:$0xff] %v2290_v8 }
 0x700   : > { %v1832_v26 = vpop.f32.mrf.mxu2 }
 0x701   : > { %v1851_v32 = vadd.f32 %v1832_v26, %v1429_v14 }
 0x708   : > { %v1834_v34 = vpop.f32.mrf.mxu2 }
 0x709   : > { %v1852_v29 = vadd.f32 %v1834_v34, %v1431_v42 }
 0x70a   : > { %v2252_v53 = vpop.f32.mrf.mxu1 }
 0x70b   : > { %v2271_v50 = vadd.f32 %v2252_v53, %v1851_v32 }
 0x70d   : > { %v2291_v0 = vadd.f32 %v4251_v21, %v2271_v50 }
 0x70f   : > { %2307 = vst [vmem:[%s4258_s13 + $0x70] sm:$0xff] %v2291_v0 }
 0x712   : > { %v2254_v43 = vpop.f32.mrf.mxu1 }
 0x713   : > { %v2272_v15 = vadd.f32 %v2254_v43, %v1852_v29 }
 0x715   : > { %v2292_v59 = vadd.f32 %v4251_v21, %v2272_v15 }
 0x717   : > { %2308 = vst [vmem:[%s4258_s13 + $0x78] sm:$0xff] %v2292_v59 }
 0x718 PF: > { %s18_s27 = sadd.s32 1, %s2851_s27  }
 0x719   : > { %p15_p5 = scmp.ge.s32.totalorder %s18_s27, 4  }
 0x71b   :  { %17 = sbr.rel (!%p15_p5) target bundleno = 1 (0x1), region = 88 }

// kernel: stgat_cl_forward.4
= control target key start
LH: loop header
LB: loop body
LE: loop exit
PB: predicated region body
PF: predicated region fallthrough
CT: control target
= control target key end

     0   :  { %s2588_s27 = smov 0   ;;  %s3647_s0 = inlined_call_operand.vmem [shape: f32[128,256], index: 0, kind: input, shape index: {}]   ;;  %s3648_s1 = inlined_call_operand.vmem [shape: f32[2,64,64], index: 1, kind: input, shape index: {}]   ;;  %s3649_s2 = inlined_call_operand.vmem [shape: bf16[256,32], index: 2, kind: input, shape index: {}]   ;;  %s3650_s3 = inlined_call_operand.vmem [shape: f32[1,32], index: 3, kind: input, shape index: {}]   ;;  %s3651_s4 = inlined_call_operand.vmem [shape: bf16[32,4], index: 4, kind: input, shape index: {}]   ;;  %s3652_s5 = inlined_call_operand.vmem [shape: bf16[32,4], index: 5, kind: input, shape index: {}]   ;;  %s3653_s6 = inlined_call_operand.vmem [shape: bf16[4,32,256], index: 6, kind: input, shape index: {}]   ;;  %s3654_s7 = inlined_call_operand.vmem [shape: f32[1,256], index: 7, kind: input, shape index: {}]   ;;  %s3655_s8 = inlined_call_operand.vmem [shape: f32[128,256], index: 8, kind: output, shape index: {}]  }
   0x1 LB: > { %s2594_s28 = sadd.s32 4294967295, %s2537_s27   ;;  %p2091_p0 = scmp.ge.s32.totalorder %s2537_s27, 1  ;;  %s2537_s27 = sphi %s2588_s27, %s18_s27  }
   0x2   : > { %p274_p1 = scmp.lt.s32.totalorder %s2537_s27, 3 }
   0x4   : > { %p275_p2 = pnand %p2091_p0, %p274_p1 }
   0x5   : > { %s2092_s19 = sshll.u32 (!%p275_p2), %s2594_s28, 3  ;;  %p322_p4 = scmp.lt.s32.totalorder (!%p275_p2), %s2594_s28, 1 }
   0x6   : > { %278 = sbr.rel (%p275_p2) target bundleno = 1476 (0x5c4), region = 52  ;;  %p316_p3 = scmp.lt.s32.totalorder (!%p275_p2), %s2092_s19, 15 }
   0xb   : > { %v2337_v0 = vld [vmem:[%s3649_s2 + $0x38] sm:$0xff]  ;;  %v2336_v2 = vld [vmem:[%s3649_s2 + $0x30] sm:$0xff]  ;;  %v2335_v4 = vld [vmem:[%s3649_s2 + $0x28] sm:$0xff]  ;;  %s3657_s19 = smov (!%p316_p3, %s2092_s19), 15  ;;  %vm577_vm0 = vcmask 261120   ;;  %s3659_s28 = smov (!%p322_p4, %s2594_s28), 1 }
   0xc   : > { %v2345_v1 = vld [vmem:[%s3649_s2 + $0x78] sm:$0xff]  ;;  %499 = vmatpush.bf16.msra.mxu0 %v2337_v0  ;;  %v2344_v3 = vld [vmem:[%s3649_s2 + $0x70] sm:$0xff]  ;;  %v2343_v5 = vld [vmem:[%s3649_s2 + $0x68] sm:$0xff]  ;;  %s2327_s12 = sshll.u32 %s3657_s19, 4  ;;  %s2328_s11 = sshll.u32 %s3659_s28, 6  ;;  %vm740_vm1 = vcmask 523264  }
   0xd   : > { %528 = vmatpush.bf16.msra.mxu1 %v2345_v1  ;;  %v2334_v6 = vld [vmem:[%s3649_s2 + $0x20] sm:$0xff]  ;;  %v2333_v8 = vld [vmem:[%s3649_s2 + $0x18] sm:$0xff]  ;;  %v2332_v10 = vld [vmem:[%s3649_s2 + $0x10] sm:$0xff]  ;;  %s2649_s20 = scalar_lea.vmem %s3647_s0, %s2327_s12  ;;  %s2857_s15 = scalar_lea.vmem %s3648_s1, %s2328_s11 }
   0xe   : > { %v2342_v7 = vld [vmem:[%s3649_s2 + $0x60] sm:$0xff]  ;;  %v2341_v9 = vld [vmem:[%s3649_s2 + $0x58] sm:$0xff]  ;;  %v2340_v11 = vld [vmem:[%s3649_s2 + $0x50] sm:$0xff]  ;;  %s3576_s14 = scalar_lea.vmem %s3655_s8, %s2327_s12 }
   0xf   : > { %v2331_v12 = vld [vmem:[%s3649_s2 + $0x8] sm:$0xff]  ;;  %v2330_v14 = vld [vmem:[%s3649_s2] sm:$0xff]  ;;  %v337_v17 = vld [vmem:[%s2649_s20 + $0x10] sm:$0xff] }
  0x10   : > { %500 = vmatpush.bf16.msra.mxu0 %v2336_v2  ;;  %v2339_v13 = vld [vmem:[%s3649_s2 + $0x48] sm:$0xff]  ;;  %v2338_v15 = vld [vmem:[%s3649_s2 + $0x40] sm:$0xff]  ;;  %v338_v19 = vld [vmem:[%s2649_s20 + $0x18] sm:$0xff] }
  0x11   : > { %529 = vmatpush.bf16.msra.mxu1 %v2344_v3  ;;  %v335_v16 = vld [vmem:[%s2649_s20] sm:$0xff]  ;;  %v336_v18 = vld [vmem:[%s2649_s20 + $0x8] sm:$0xff]  ;;  %v341_v24 = vld [vmem:[%s2649_s20 + $0x30] sm:$0xff] }
  0x12   : > { %v359_v20 = vpack.c.bf16 %v337_v17, %v335_v16  ;;  %v360_v21 = vpack.c.bf16 %v338_v19, %v336_v18  ;;  %v2348_v22 = vld [vmem:[%s3652_s5] sm:$0xff]  ;;  %v340_v25 = vld [vmem:[%s2649_s20 + $0x28] sm:$0xff]  ;;  %v342_v26 = vld [vmem:[%s2649_s20 + $0x38] sm:$0xff] }
  0x13   : > { %635 = vxpose.xlu0.c.b16.start [1/2] (short) (narrow) %v2348_v22, 16  ;;  %v339_v23 = vld [vmem:[%s2649_s20 + $0x20] sm:$0xff]  ;;  %v362_v28 = vpack.c.bf16 %v342_v26, %v340_v25  ;;  %v2349_v29 = vld [vmem:[%s3652_s5 + $0x8] sm:$0xff]  ;;  %v345_v31 = vld [vmem:[%s2649_s20 + $0x50] sm:$0xff] }
  0x14   : > { %501 = vmatpush.bf16.msra.mxu0 %v2335_v4  ;;  %v361_v27 = vpack.c.bf16 %v341_v24, %v339_v23  ;;  %v343_v30 = vld [vmem:[%s2649_s20 + $0x40] sm:$0xff]  ;;  %v344_v32 = vld [vmem:[%s2649_s20 + $0x48] sm:$0xff]  ;;  %v346_v33 = vld [vmem:[%s2649_s20 + $0x58] sm:$0xff] }
  0x15   : > { %530 = vmatpush.bf16.msra.mxu1 %v2343_v5  ;;  %v363_v34 = vpack.c.bf16 %v345_v31, %v343_v30  ;;  %v364_v35 = vpack.c.bf16 %v346_v33, %v344_v32  ;;  %v347_v36 = vld [vmem:[%s2649_s20 + $0x60] sm:$0xff]  ;;  %v349_v37 = vld [vmem:[%s2649_s20 + $0x70] sm:$0xff]  ;;  %v348_v38 = vld [vmem:[%s2649_s20 + $0x68] sm:$0xff] }
  0x16   : > { %v350_v39 = vld [vmem:[%s2649_s20 + $0x78] sm:$0xff]  ;;  %v365_v40 = vpack.c.bf16 %v349_v37, %v347_v36  ;;  %v2223_v42 = vld [vmem:[%s3653_s6 + $0x30] sm:$0xf]  ;;  %v2356_v44 = vld [vmem:[%s3653_s6 + $0x34] sm:$0xf] }
  0x17   : > { %v366_v41 = vpack.c.bf16 %v350_v39, %v348_v38  ;;  %v2357_v43 = vld [vmem:[%s3653_s6 + $0x34] sm:$0xf0]  ;;  %v2347_v45 = vld [vmem:[%s3651_s4 + $0x8] sm:$0xff]  ;;  %v2225_v47 = vld [vmem:[%s3653_s6 + $0x38] sm:$0xf0] }
  0x18   : > { %502 = vmatpush.bf16.msra.mxu0 %v2334_v6  ;;  %v2691_v46 = vor.u32 %v2357_v43, %v2223_v42  ;;  %v2696_v48 = vor.u32 %v2356_v44, %v2225_v47  ;;  %596 = vmatpush.bf16.msra.mxu2 %v2347_v45  ;;  %v2215_v49 = vld [vmem:[%s3653_s6 + $0x20] sm:$0xf]  ;;  %v2355_v50 = vld [vmem:[%s3653_s6 + $0x24] sm:$0xf0]  ;;  %v2354_v51 = vld [vmem:[%s3653_s6 + $0x24] sm:$0xf] }
  0x19   : > { %531 = vmatpush.bf16.msra.mxu1 %v2342_v7  ;;  %v2346_v52 = vld [vmem:[%s3651_s4] sm:$0xff]  ;;  %v2712_v53 = vor.u32 %v2355_v50, %v2215_v49  ;;  %v2217_v54 = vld [vmem:[%s3653_s6 + $0x28] sm:$0xf0]  ;;  %v2195_v38 = vld [vmem:[%s3653_s6 + $0x10] sm:$0xf]  ;;  %v2539_v47 = vmov 1  }
  0x1a   : > { %v2717_v55 = vor.u32 %v2354_v51, %v2217_v54  ;;  %v2396_v58 = vld [vmem:[%s3650_s3] ss:$0 sm:$0xff]  ;;  %v2350_v19 = vld [vmem:[%s3653_s6 + $0x4] sm:$0xf]  ;;  %v2353_v39 = vld [vmem:[%s3653_s6 + $0x14] sm:$0xf0]  ;;  %2382 = vset.pattern.permute.xlu1 %v2539_v47  ;;  %2383 = vset.pattern.permute.xlu2 %v2539_v47 }
  0x1b   : > { %v2351_v42 = vld [vmem:[%s3653_s6 + $0x4] sm:$0xf0] }
  0x1c   : > { %503 = vmatpush.bf16.msra.mxu0 %v2333_v8  ;;  %597 = vmatpush.bf16.msra.mxu2 %v2346_v52 }
  0x1d   : > { %532 = vmatpush.bf16.msra.mxu1 %v2341_v9 }
  0x20   : > { %504 = vmatpush.bf16.msra.mxu0 %v2332_v10 }
  0x21   : > { %533 = vmatpush.bf16.msra.mxu1 %v2340_v11 }
  0x23   : > { %636 = vxpose.xlu0.c.b16.end [2/2] (short) (narrow) %v2349_v29, 16 }
  0x24   : > { %505 = vmatpush.bf16.msra.mxu0 %v2331_v12 }
  0x25   : > { %534 = vmatpush.bf16.msra.mxu1 %v2339_v13 }
  0x28   : > { %506 = vmatpush.bf16.msra.mxu0 %v2330_v14  ;;  %v2352_v14 = vld [vmem:[%s3653_s6 + $0x14] sm:$0xf] }
  0x29   : > { %535 = vmatpush.bf16.msra.mxu1 %v2338_v15  ;;  %v2197_v15 = vld [vmem:[%s3653_s6 + $0x18] sm:$0xf0] }
  0x2a   : > { %v2200_v16 = vor.u32 %v2352_v14, %v2197_v15 }
  0x2b   : > { %507 = vmatmul.bf16.vlgmr.msra.gmra.mxu0 %v359_v20  ;;  %v2189_v20 = vld [vmem:[%s3653_s6 + $0x8] sm:$0xf0] }
  0x2c   : > { %536 = vmatmul.bf16.vlgmr.msra.gmra.mxu1 %v360_v21  ;;  %1107 = vmatpush.bf16.msrb.mxu0 %v2691_v46  ;;  %v2192_v23 = vor.u32 %v2350_v19, %v2189_v20 }
  0x2d   : > { %1136 = vmatpush.bf16.msrb.mxu1 %v2696_v48  ;;  %888 = vmatpush.bf16.msrb.mxu2 %v2200_v16 }
  0x30   : > { %1108 = vmatpush.bf16.msrb.mxu0 %v2712_v53 }
  0x31   : > { %1137 = vmatpush.bf16.msrb.mxu1 %v2717_v55  ;;  %889 = vmatpush.bf16.msrb.mxu2 %v2192_v23 }
  0x3b   : > { %512 = vmatmul.bf16.gmra.mxu0 %v361_v27 }
  0x3c   : > { %541 = vmatmul.bf16.gmra.mxu1 %v362_v28 }
  0x4b   : > { %517 = vmatmul.bf16.gmra.mxu0 %v363_v34 }
  0x4c   : > { %546 = vmatmul.bf16.gmra.mxu1 %v364_v35 }
  0x5b   : > { %522 = vmatmul.bf16.gmra.mxu0 %v365_v40  ;;  %v2196_v40 = vor.u32 %v2353_v39, %v2195_v38 }
  0x5c   : > { %551 = vmatmul.bf16.gmra.mxu1 %v366_v41  ;;  %v2187_v41 = vld [vmem:[%s3653_s6] sm:$0xf] }
  0x5d   : > { %v2188_v44 = vor.u32 %v2351_v42, %v2187_v41 }
  0x8a   : > { %2384 = vset.pattern.permute.xlu0 %v2539_v47 }
  0xa8   : > { %v508_v56 = vpop.f32.mrf.mxu0 }
  0xa9   : > { %v537_v57 = vpop.f32.mrf.mxu1  ;;  %v509_v59 = vadd.f32 %v2396_v58, %v508_v56 }
  0xab   : > { %v538_v63 = vadd.f32 %v537_v57, %v509_v59 }
  0xb0   : > { %v510_v60 = vpop.f32.mrf.mxu0 }
  0xb1   : > { %v539_v61 = vpop.f32.mrf.mxu1  ;;  %v511_v62 = vadd.f32 %v2396_v58, %v510_v60 }
  0xb3   : > { %v540_v0 = vadd.f32 %v539_v61, %v511_v62 }
  0xb5   : > { %v2724_v1 = vpack.c.bf16 %v540_v0, %v538_v63 }
  0xb7   : > { %2172 = vmatmul.msk.bf16.vlgmr.msra.gmra.mxu2 %vm577_vm0, %v2724_v1  ;;  %2229 = vmatmul.msk.bf16.vlgmr.msrb.gmra.mxu0 %vm577_vm0, %v2724_v1  ;;  %v579_v43 = vsel %vm577_vm0, %v2724_v1, 0 }
  0xb8   : > { %2233 = vmatmul.msk.bf16.vlgmr.msrb.gmra.mxu1 %vm577_vm0, %v2724_v1  ;;  %v513_v2 = vpop.f32.mrf.mxu0 }
  0xb9   : > { %v542_v3 = vpop.f32.mrf.mxu1  ;;  %v514_v4 = vadd.f32 %v2396_v58, %v513_v2 }
  0xbb   : > { %v543_v7 = vadd.f32 %v542_v3, %v514_v4 }
  0xbf   : > { %v643_v45 = vpop.trf.xlu0 }
  0xc0   : > { %v515_v5 = vpop.f32.mrf.mxu0 }
  0xc1   : > { %v544_v6 = vpop.f32.mrf.mxu1  ;;  %v516_v8 = vadd.f32 %v2396_v58, %v515_v5 }
  0xc3   : > { %v545_v9 = vadd.f32 %v544_v6, %v516_v8 }
  0xc5   : > { %v2732_v10 = vpack.c.bf16 %v545_v9, %v543_v7 }
  0xc7   : > { %2173 = vmatmul.msk.bf16.gmra.mxu2 %vm577_vm0, %v2732_v10  ;;  %2230 = vmatmul.msk.bf16.gmra.mxu0 %vm577_vm0, %v2732_v10  ;;  %v582_v37 = vsel %vm577_vm0, %v2732_v10, 0 }
  0xc8   : > { %v518_v11 = vpop.f32.mrf.mxu0  ;;  %2234 = vmatmul.msk.bf16.gmra.mxu1 %vm577_vm0, %v2732_v10 }
  0xc9   : > { %v547_v12 = vpop.f32.mrf.mxu1  ;;  %v519_v13 = vadd.f32 %v2396_v58, %v518_v11 }
  0xcb   : > { %v548_v21 = vadd.f32 %v547_v12, %v519_v13  ;;  %v2860_v12 = vld [vmem:[%s2857_s15] sm:$0xff] }
  0xd0   : > { %v520_v17 = vpop.f32.mrf.mxu0 }
  0xd1   : > { %v549_v18 = vpop.f32.mrf.mxu1  ;;  %v521_v22 = vadd.f32 %v2396_v58, %v520_v17 }
  0xd3   : > { %v550_v24 = vadd.f32 %v549_v18, %v521_v22 }
  0xd5   : > { %v2752_v25 = vpack.c.bf16 %v550_v24, %v548_v21 }
  0xd7   : > { %2174 = vmatmul.msk.bf16.gmra.mxu2 %vm577_vm0, %v2752_v25  ;;  %2231 = vmatmul.msk.bf16.gmra.mxu0 %vm577_vm0, %v2752_v25  ;;  %v585_v36 = vsel %vm577_vm0, %v2752_v25, 0 }
  0xd8   : > { %v523_v26 = vpop.f32.mrf.mxu0  ;;  %2235 = vmatmul.msk.bf16.gmra.mxu1 %vm577_vm0, %v2752_v25 }
  0xd9   : > { %v552_v27 = vpop.f32.mrf.mxu1  ;;  %v524_v28 = vadd.f32 %v2396_v58, %v523_v26 }
  0xdb   : > { %v553_v31 = vadd.f32 %v552_v27, %v524_v28  ;;  %v2872_v28 = vld [vmem:[%s2857_s15 + $0x10] sm:$0xff] }
  0xe0   : > { %v525_v29 = vpop.f32.mrf.mxu0 }
  0xe1   : > { %v554_v30 = vpop.f32.mrf.mxu1  ;;  %v526_v32 = vadd.f32 %v2396_v58, %v525_v29 }
  0xe3   : > { %v555_v33 = vadd.f32 %v554_v30, %v526_v32  ;;  %v2875_v30 = vld [vmem:[%s2857_s15 + $0x8] sm:$0xff] }
  0xe5   : > { %v2760_v34 = vpack.c.bf16 %v555_v33, %v553_v31 }
  0xe7   : > { %2175 = vmatmul.msk.bf16.gmra.mxu2 %vm577_vm0, %v2760_v34  ;;  %v588_v35 = vsel %vm577_vm0, %v2760_v34, 0 }
  0xe8   : > { %658 = vmatpush.bf16.xpose.msra.mxu3 %v588_v35 }
  0xf0   : > { %659 = vmatpush.bf16.xpose.msra.mxu3 %v585_v36 }
  0xf7   : > { %2205 = vmatmul.msk.bf16.vlgmr.msrb.gmra.mxu2 %vm577_vm0, %v2724_v1 }
  0xf8   : > { %660 = vmatpush.bf16.xpose.msra.mxu3 %v582_v37 }
 0x100   : > { %661 = vmatpush.bf16.xpose.msra.mxu3 %v579_v43  ;;  %v2888_v43 = vld [vmem:[%s2857_s15 + $0x18] sm:$0xff] }
 0x107   : > { %2184 = vmatmul.msk.bf16.vlgmr.msra.gmra.mxu3 %vm577_vm0, %v643_v45  ;;  %2206 = vmatmul.msk.bf16.gmra.mxu2 %vm577_vm0, %v2732_v10 }
 0x108   : > { %859 = vmatpush.bf16.msrb.mxu3 %v2196_v40 }
 0x10c   : > { %860 = vmatpush.bf16.msrb.mxu3 %v2188_v44 }
 0x110   : > { %2366 = vmatpush.bf16.msra.mxu3 %v2691_v46 }
 0x114   : > { %2367 = vmatpush.bf16.msra.mxu3 %v2712_v53  ;;  %v2540_v53 = vmov 0  }
 0x117   : > { %2201 = vmatmul.msk.bf16.vlgmr.msrb.gmra.mxu3 %vm577_vm0, %v2724_v1  ;;  %2207 = vmatmul.msk.bf16.gmra.mxu2 %vm577_vm0, %v2752_v25 }
 0x118   : > { %2368 = vmatpush.bf16.msrb.mxu3 %v2696_v48 }
 0x11c   : > { %2369 = vmatpush.bf16.msrb.mxu3 %v2717_v55 }
 0x127   : > { %2202 = vmatmul.msk.bf16.gmra.mxu3 %vm577_vm0, %v2732_v10  ;;  %2208 = vmatmul.msk.bf16.gmra.mxu2 %vm577_vm0, %v2760_v34 }
 0x134   : > { %v2862_v19 = vpop.f32.mrf.mxu0 }
 0x137   : > { %2203 = vmatmul.msk.bf16.gmra.mxu3 %vm577_vm0, %v2752_v25 }
 0x13a   : > { %v2803_v46 = vpop.f32.mrf.mxu2 }
 0x13b   : > { %924 = vperm.xlu1 %2382, %v2803_v46  }
 0x13c   : > { %v1112_v38 = vpop.f32.mrf.mxu0 }
 0x142   : > { %v2806_v49 = vpop.f32.mrf.mxu2 }
 0x143   : > { %928 = vperm.xlu1 %2382, %v2806_v49  }
 0x147   : > { %2204 = vmatmul.msk.bf16.gmra.mxu3 %vm577_vm0, %v2760_v34 }
 0x14a   : > { %v2811_v48 = vpop.f32.mrf.mxu2 }
 0x14b   : > { %932 = vperm.xlu2 %2383, %v2811_v48  }
 0x152   : > { %v2814_v50 = vpop.f32.mrf.mxu2 }
 0x153   : > { %936 = vperm.xlu2 %2383, %v2814_v50  }
 0x157   : > { %2232 = vmatmul.msk.bf16.vlgmr.msra.gmra.mxu3 %vm577_vm0, %v2760_v34 }
 0x15a   : > { %v2819_v51 = vpop.f32.mrf.mxu2 }
 0x15b   : > { %940 = vperm.xlu1 %2382, %v2819_v51  }
 0x162   : > { %v2822_v52 = vpop.f32.mrf.mxu2 }
 0x163   : > { %2385 = vset.pattern.permute.xlu1 %v2540_v53  ;;  %944 = vperm.xlu2 %2383, %v2822_v52  }
 0x164   : > { %669 = vperm.xlu1 %2385, %v2803_v46  }
 0x167   : > { %2236 = vmatmul.msk.bf16.vlgmr.msrb.gmra.mxu3 %vm577_vm0, %v2760_v34 }
 0x16a   : > { %v2828_v54 = vpop.f32.mrf.mxu2 }
 0x16b   : > { %2386 = vset.pattern.permute.xlu2 %v2540_v53  ;;  %948 = vperm.xlu0 %2384, %v2828_v54  }
 0x16c   : > { %684 = vperm.xlu1 %2385, %v2814_v50   ;;  %674 = vperm.xlu2 %2386, %v2806_v49  }
 0x172   : > { %v2833_v55 = vpop.f32.mrf.mxu2 }
 0x173   : > { %2387 = vset.pattern.permute.xlu0 %v2540_v53 }
 0x174   : > { %2388 = vset.pattern.permute.xlu1 %v2539_v47  ;;  %679 = vperm.xlu0 %2387, %v2811_v48   ;;  %v2893_v47 = vpop.f32.mrf.mxu1 }
 0x175   : > { %952 = vperm.xlu1 %2388, %v2833_v55  }
 0x17a   : > { %v891_v56 = vpop.f32.mrf.mxu2 }
 0x17c   : > { %689 = vperm.xlu0 %2387, %v2819_v51  }
 0x17d   : > { %2389 = vset.pattern.permute.xlu1 %v2540_v53  ;;  %v1115_v53 = vpop.f32.mrf.mxu0 }
 0x182   : > { %v893_v57 = vpop.f32.mrf.mxu2 }
 0x183   : > { %v916_v42 = vpack.c.bf16 %v893_v57, %v891_v56 }
 0x184   : > { %704 = vperm.xlu0 %2387, %v2833_v55  }
 0x185   : > { %v1117_v56 = vpop.f32.mrf.mxu0 }
 0x18a   : > { %v2839_v58 = vpop.f32.mrf.mxu3  ;;  %v896_v59 = vpop.f32.mrf.mxu2 }
 0x18b   : > { %v2848_v4 = vperm.slane %v2839_v58, 1 }
 0x192   : > { %v665_v60 = vpop.f32.mrf.mxu3  ;;  %v898_v61 = vpop.f32.mrf.mxu2 }
 0x193   : > { %v918_v36 = vpack.c.bf16 %v898_v61, %v896_v59  ;;  %v2897_v61 = vpop.f32.mrf.mxu1 }
 0x19a   : > { %v2841_v62 = vpop.f32.mrf.mxu3  ;;  %v901_v63 = vpop.f32.mrf.mxu2 }
 0x1a2   : > { %v2843_v0 = vpop.f32.mrf.mxu3  ;;  %v903_v2 = vpop.f32.mrf.mxu2 }
 0x1a3   : > { %v920_v27 = vpack.c.bf16 %v903_v2, %v901_v63  ;;  %v2899_v2 = vpop.f32.mrf.mxu1 }
 0x1a5   : > { %v933_v3 = vpop.permute.xlu2 %932 }
 0x1a6   : > { %v958_v8 = vadd.f32 %v2848_v4, %v933_v3 }
 0x1a8   : > { %v966_v13 = vmul.f32 0.2, %v958_v8 }
 0x1aa   : > { %v2850_v5 = vpop.f32.mrf.mxu3  ;;  %v906_v6 = vpop.f32.mrf.mxu2  ;;  %v974_v22 = vmax.f32 %v958_v8, %v966_v13  ;;  %v915_v13 = vpack.c.bf16 %v2843_v0, %v2841_v62 }
 0x1ac   : > { %v2878_v35 = vadd.f32 %v974_v22, %v2872_v28 }
 0x1ad   : > { %v925_v7 = vpop.permute.xlu1 %924  ;;  %v937_v17 = vpop.permute.xlu2 %936 }
 0x1ae   : > { %v956_v9 = vadd.f32 %v2848_v4, %v925_v7  ;;  %v959_v23 = vadd.f32 %v2848_v4, %v937_v17  ;;  %v994_v41 = vsel %vm740_vm1, %v2878_v35, -inf }
 0x1b0   : > { %v964_v11 = vmul.f32 0.2, %v956_v9  ;;  %v967_v31 = vmul.f32 0.2, %v959_v23 }
 0x1b2   : > { %v972_v14 = vmax.f32 %v956_v9, %v964_v11  ;;  %v869_v15 = vpop.f32.mrf.mxu3  ;;  %v908_v16 = vpop.f32.mrf.mxu2  ;;  %v975_v39 = vmax.f32 %v959_v23, %v967_v31 }
 0x1b3   : > { %v922_v18 = vpack.c.bf16 %v908_v16, %v906_v6  ;;  %v1120_v6 = vpop.f32.mrf.mxu0  ;;  %v917_v8 = vpack.c.bf16 %v869_v15, %v2850_v5 }
 0x1b4   : > { %v2865_v20 = vadd.f32 %v972_v14, %v2860_v12  ;;  %v2891_v45 = vadd.f32 %v975_v39, %v2888_v43  ;;  %v1146_v14 = vpop.f32.mrf.mxu1  ;;  %v2541_v39 = vmov 2  }
 0x1b5   : > { %v929_v21 = vpop.permute.xlu1 %928  ;;  %1286 = vmatpush.bf16.msra.mxu1 %v922_v18  ;;  %2391 = vset.pattern.permute.xlu0 %v2541_v39 }
 0x1b6   : > { %v957_v24 = vadd.f32 %v2848_v4, %v929_v21  ;;  %v988_v26 = vsel %vm740_vm1, %v2865_v20, -inf  ;;  %v997_v59 = vsel %vm740_vm1, %v2891_v45, -inf  ;;  %v2907_v21 = vperm.slane %v2839_v58, 0 }
 0x1b7   : > { %989 = vmax.xlane.f32.xlu2 %v988_v26  ;;  %v1165_v26 = vpack.c.bf16 %v1117_v56, %v1115_v53 }
 0x1b8   : > { %v965_v29 = vmul.f32 0.2, %v957_v24 }
 0x1b9   : > { %1287 = vmatpush.bf16.msra.mxu1 %v920_v27 }
 0x1ba   : > { %v973_v32 = vmax.f32 %v957_v24, %v965_v29  ;;  %v872_v33 = vpop.f32.mrf.mxu3 }
 0x1bb   : > { %v1122_v18 = vpop.f32.mrf.mxu0 }
 0x1bc   : > { %v2881_v37 = vadd.f32 %v973_v32, %v2875_v30  ;;  %v1167_v23 = vpack.c.bf16 %v1122_v18, %v1120_v6  ;;  %v1149_v62 = vpop.f32.mrf.mxu1  ;;  %v1163_v32 = vpack.c.bf16 %v1112_v38, %v2862_v19  ;;  %v2927_v6 = vld [vmem:[%s2857_s15 + $0x20] sm:$0xff] }
 0x1bd   : > { %1288 = vmatpush.bf16.msra.mxu1 %v918_v36  ;;  %v945_v53 = vpop.permute.xlu2 %944 }
 0x1be   : > { %v991_v40 = vsel %vm740_vm1, %v2881_v37, -inf }
 0x1bf   : > { %992 = vmax.xlane.f32.xlu1 %v991_v40  ;;  %995 = vmax.xlane.f32.xlu2 %v994_v41 }
 0x1c1   : > { %1289 = vmatpush.bf16.msra.mxu1 %v916_v42 }
 0x1c2   : > { %v874_v44 = vpop.f32.mrf.mxu3 }
 0x1c3   : > { %v919_v3 = vpack.c.bf16 %v874_v44, %v872_v33 }
 0x1c4   : > { %v1151_v44 = vpop.f32.mrf.mxu1 }
 0x1c7   : > { %998 = vmax.xlane.f32.xlu2 %v997_v59  ;;  %v1168_v59 = vpack.c.bf16 %v1151_v44, %v1149_v62 }
 0x1ca   : > { %v877_v60 = vpop.f32.mrf.mxu3 }
 0x1cd   : > { %v941_v11 = vpop.permute.xlu1 %940 }
 0x1ce   : > { %v960_v36 = vadd.f32 %v2848_v4, %v941_v11 }
 0x1d0   : > { %v968_v19 = vmul.f32 0.2, %v960_v36 }
 0x1d2   : > { %v879_v57 = vpop.f32.mrf.mxu3 }
 0x1d3   : > { %v921_v63 = vpack.c.bf16 %v879_v57, %v877_v60  ;;  %v961_v60 = vadd.f32 %v2848_v4, %v945_v53  ;;  %v976_v57 = vmax.f32 %v960_v36, %v968_v19 }
 0x1d5   : > { %1257 = vmatpush.bf16.msra.mxu0 %v921_v63 }
 0x1d6   : > { %v2910_v15 = vpop.permute.xlu1 %669 }
 0x1d8   : > { %699 = vperm.xlu1 %2389, %v2828_v54  }
 0x1d9   : > { %1258 = vmatpush.bf16.msra.mxu0 %v919_v3 }
 0x1da   : > { %v1125_v7 = vpop.f32.mrf.mxu3 }
 0x1dd   : > { %v949_v9 = vpop.permute.xlu0 %948  ;;  %1259 = vmatpush.bf16.msra.mxu0 %v917_v8  ;;  %v969_v8 = vmul.f32 0.2, %v961_v60 }
 0x1de   : > { %v2921_v40 = vpop.permute.xlu1 %684  ;;  %v962_v63 = vadd.f32 %v2848_v4, %v949_v9  ;;  %v2937_v9 = vadd.f32 %v976_v57, %v2927_v6 }
 0x1df   : > { %694 = vperm.xlu2 %2386, %v2822_v52  }
 0x1e0   : > { %2392 = vset.pattern.permute.xlu1 %v2541_v39  ;;  %v1000_v62 = vsel %vm740_vm1, %v2937_v9, -inf }
 0x1e1   : > { %1260 = vmatpush.bf16.msra.mxu0 %v915_v13 }
 0x1e2   : > { %v1127_v16 = vpop.f32.mrf.mxu3 }
 0x1e3   : > { %v1169_v17 = vpack.c.bf16 %v1127_v16, %v1125_v7  ;;  %v1166_v7 = vpack.c.bf16 %v1146_v14, %v2899_v2  ;;  %v2931_v16 = vld [vmem:[%s2857_s15 + $0x38] sm:$0xff] }
 0x1e5   : > { %1187 = vmatpush.bf16.msra.mxu3 %v1169_v17  ;;  %v970_v17 = vmul.f32 0.2, %v962_v63 }
 0x1e6   : > { %v680_v22 = vpop.permute.xlu0 %679 }
 0x1e7   : > { %v710_v5 = vadd.f32 %v2907_v21, %v680_v22  ;;  %2390 = vset.pattern.permute.xlu2 %v2541_v39  ;;  %v953_v13 = vpop.permute.xlu1 %952  ;;  %v1164_v22 = vpack.c.bf16 %v2897_v61, %v2893_v47  ;;  %v675_v39 = vpop.permute.xlu2 %674 }
 0x1e8   : > { %v963_v2 = vadd.f32 %v2848_v4, %v953_v13  ;;  %v709_v53 = vadd.f32 %v2907_v21, %v675_v39 }
 0x1e9   : > { %v718_v24 = vmul.f32 0.2, %v710_v5  ;;  %1188 = vmatpush.bf16.msra.mxu3 %v1167_v23  ;;  %v977_v23 = vmax.f32 %v961_v60, %v969_v8 }
 0x1ea   : > { %v1154_v0 = vpop.f32.mrf.mxu3  ;;  %v717_v19 = vmul.f32 0.2, %v709_v53 }
 0x1eb   : > { %v726_v27 = vmax.f32 %v710_v5, %v718_v24  ;;  %v2945_v5 = vld [vmem:[%s2857_s15 + $0x28] sm:$0xff]  ;;  %v978_v24 = vmax.f32 %v962_v63, %v970_v17 }
 0x1ec   : > { %v2953_v47 = vadd.f32 %v977_v23, %v2945_v5 }
 0x1ed   : > { %1189 = vmatpush.bf16.msra.mxu3 %v1165_v26  ;;  %v2913_v29 = vadd.f32 %v726_v27, %v2872_v28  ;;  %v971_v26 = vmul.f32 0.2, %v963_v2 }
 0x1ee   : > { %v2915_v31 = vpop.permute.xlu0 %689  ;;  %v1003_v27 = vsel %vm740_vm1, %v2953_v47, -inf }
 0x1ef   : > { %v747_v33 = vsel %vm740_vm1, %v2913_v29, -inf  ;;  %v979_v61 = vmax.f32 %v963_v2, %v971_v26 }
 0x1f0   : > { %748 = vmax.xlane.f32.xlu0 %v747_v33 }
 0x1f1   : > { %1190 = vmatpush.bf16.msra.mxu3 %v1163_v32  ;;  %v2963_v33 = vadd.f32 %v979_v61, %v2931_v16 }
 0x1f2   : > { %v1156_v41 = vpop.f32.mrf.mxu3 }
 0x1f3   : > { %v1170_v42 = vpack.c.bf16 %v1156_v41, %v1154_v0  ;;  %v2950_v0 = vld [vmem:[%s2857_s15 + $0x30] sm:$0xff]  ;;  %v1009_v36 = vsel %vm740_vm1, %v2963_v33, -inf }
 0x1f4   : > { %v2956_v4 = vadd.f32 %v978_v24, %v2950_v0 }
 0x1f5   : > { %1216 = vmatpush.bf16.msra.mxu2 %v1170_v42 }
 0x1f6   : > { %v705_v38 = vpop.permute.xlu0 %704  ;;  %v1006_v32 = vsel %vm740_vm1, %v2956_v4, -inf }
 0x1f7   : > { %v715_v56 = vadd.f32 %v2907_v21, %v705_v38 }
 0x1f9   : > { %v723_v3 = vmul.f32 0.2, %v715_v56  ;;  %1217 = vmatpush.bf16.msra.mxu2 %v1168_v59 }
 0x1fb   : > { %v731_v11 = vmax.f32 %v715_v56, %v723_v3  ;;  %v725_v3 = vmax.f32 %v709_v53, %v717_v19 }
 0x1fd   : > { %1218 = vmatpush.bf16.msra.mxu2 %v1166_v7  ;;  %v2934_v18 = vadd.f32 %v731_v11, %v2931_v16  ;;  %v708_v7 = vadd.f32 %v2907_v21, %v2910_v15  ;;  %v2980_v17 = vadd.f32 %v725_v3, %v2875_v30 }
 0x1ff   : > { %v762_v14 = vsel %vm740_vm1, %v2934_v18, -inf  ;;  %v716_v11 = vmul.f32 0.2, %v708_v7  ;;  %v744_v23 = vsel %vm740_vm1, %v2980_v17, -inf }
 0x200   : > { %763 = vmax.xlane.f32.xlu0 %v762_v14 }
 0x201   : > { %1219 = vmatpush.bf16.msra.mxu2 %v1164_v22  ;;  %v724_v22 = vmax.f32 %v708_v7, %v716_v11 }
 0x202   : > { %1001 = vmax.xlane.f32.xlu1 %v1000_v62  ;;  %v711_v62 = vadd.f32 %v2907_v21, %v2921_v40 }
 0x203   : > { %v2990_v14 = vadd.f32 %v724_v22, %v2860_v12  ;;  %v3024_v22 = vperm.slane %v2839_v58, 2 }
 0x204   : > { %v719_v61 = vmul.f32 0.2, %v711_v62 }
 0x205   : > { %v741_v26 = vsel %vm740_vm1, %v2990_v14, -inf }
 0x208   : > { %1004 = vmax.xlane.f32.xlu2 %v1003_v27 }
 0x20a   : > { %1007 = vmax.xlane.f32.xlu1 %v1006_v32  ;;  %v727_v32 = vmax.f32 %v711_v62, %v719_v61 }
 0x20c   : > { %v3005_v39 = vadd.f32 %v727_v32, %v2888_v43 }
 0x20e   : > { %v750_v40 = vsel %vm740_vm1, %v3005_v39, -inf }
 0x210   : > { %1010 = vmax.xlane.f32.xlu2 %v1009_v36 }
 0x214   : > { %1316 = vperm.xlu0 %2391, %v2806_v49  }
 0x21c   : > { %1340 = vperm.xlu0 %2391, %v2833_v55  }
 0x22a   : > { %v990_v41 = vpop.xlane.xlu2 %989 }
 0x22b   : > { %v1012_v42 = vsub.f32 %v2865_v20, %v990_v41 }
 0x22d   : > { %v1020_v44 = vmul.f32 1.442695, %v1012_v42 }
 0x22f   : > { %2397 = vpow2.f32 %v1020_v44 }
 0x232   : > { %v993_v38 = vpop.xlane.xlu1 %992  ;;  %v996_v59 = vpop.xlane.xlu2 %995 }
 0x233   : > { %v1013_v60 = vsub.f32 %v2881_v37, %v993_v38  ;;  %v1014_v63 = vsub.f32 %v2878_v35, %v996_v59 }
 0x235   : > { %v2972_v56 = vpop.eup %2397  ;;  %v1022_v57 = vmul.f32 1.442695, %v1013_v60  ;;  %v1024_v8 = vmul.f32 1.442695, %v1014_v63 }
 0x236   : > { %v1036_v20 = vsel %vm740_vm1, %v2972_v56, 0.0 }
 0x237   : > { %2399 = vpow2.f32 %v1022_v57  ;;  %1037 = vadd.xlane.f32.xlu1 %v1036_v20  ;;  %v712_v20 = vadd.f32 %v2907_v21, %v2915_v31 }
 0x238   : > { %2401 = vpow2.f32 %v1024_v8 }
 0x23a   : > { %v999_v13 = vpop.xlane.xlu2 %998 }
 0x23b   : > { %v1015_v35 = vsub.f32 %v2891_v45, %v999_v13 }
 0x23d   : > { %v2982_v37 = vpop.eup %2399  ;;  %v1026_v2 = vmul.f32 1.442695, %v1015_v35 }
 0x23e   : > { %v1039_v15 = vsel %vm740_vm1, %v2982_v37, 0.0  ;;  %v2992_v24 = vpop.eup %2401 }
 0x23f   : > { %1040 = vadd.xlane.f32.xlu2 %v1039_v15  ;;  %745 = vmax.xlane.f32.xlu1 %v744_v23  ;;  %2403 = vpow2.f32 %v1026_v2  ;;  %v1042_v45 = vsel %vm740_vm1, %v2992_v24, 0.0 }
 0x242   : > { %v695_v42 = vpop.permute.xlu2 %694 }
 0x245   : > { %v3000_v27 = vpop.eup %2403 }
 0x246   : > { %v1045_v36 = vsel %vm740_vm1, %v3000_v27, 0.0 }
 0x247   : > { %1043 = vadd.xlane.f32.xlu1 %v1042_v45  ;;  %742 = vmax.xlane.f32.xlu2 %v741_v26 }
 0x24a   : > { %v700_v41 = vpop.permute.xlu1 %699 }
 0x24f   : > { %1046 = vadd.xlane.f32.xlu2 %v1045_v36 }
 0x257   : > { %751 = vmax.xlane.f32.xlu2 %v750_v40 }
 0x263   : > { %v3009_v53 = vpop.xlane.xlu0 %748 }
 0x273   : > { %v3013_v63 = vpop.xlane.xlu0 %763 }
 0x275   : > { %v1002_v44 = vpop.xlane.xlu1 %1001 }
 0x276   : > { %v1016_v19 = vsub.f32 %v2937_v9, %v1002_v44  ;;  %v714_v9 = vadd.f32 %v2907_v21, %v700_v41 }
 0x278   : > { %v1028_v38 = vmul.f32 1.442695, %v1016_v19 }
 0x27a   : > { %2405 = vpow2.f32 %v1028_v38  ;;  %v713_v38 = vadd.f32 %v2907_v21, %v695_v42 }
 0x27b   : > { %v1005_v59 = vpop.xlane.xlu2 %1004 }
 0x27c   : > { %v1017_v60 = vsub.f32 %v2953_v47, %v1005_v59  ;;  %v720_v47 = vmul.f32 0.2, %v712_v20 }
 0x27d   : > { %v1008_v57 = vpop.xlane.xlu1 %1007 }
 0x27e   : > { %v1030_v3 = vmul.f32 1.442695, %v1017_v60  ;;  %v1018_v7 = vsub.f32 %v2956_v4, %v1008_v57  ;;  %v722_v4 = vmul.f32 0.2, %v714_v9  ;;  %v728_v2 = vmax.f32 %v712_v20, %v720_v47 }
 0x280   : > { %v3018_v8 = vpop.eup %2405  ;;  %2407 = vpow2.f32 %v1030_v3  ;;  %v1032_v11 = vmul.f32 1.442695, %v1018_v7  ;;  %v730_v61 = vmax.f32 %v714_v9, %v722_v4  ;;  %v721_v3 = vmul.f32 0.2, %v713_v38 }
 0x281   : > { %v1048_v13 = vsel %vm740_vm1, %v3018_v8, 0.0 }
 0x282   : > { %2409 = vpow2.f32 %v1032_v11  ;;  %1049 = vadd.xlane.f32.xlu1 %v1048_v13  ;;  %v3043_v19 = vadd.f32 %v730_v61, %v2950_v0  ;;  %v729_v20 = vmax.f32 %v713_v38, %v721_v3 }
 0x283   : > { %v1011_v35 = vpop.xlane.xlu2 %1010 }
 0x284   : > { %v1019_v31 = vsub.f32 %v2963_v33, %v1011_v35  ;;  %v3037_v33 = vadd.f32 %v728_v2, %v2927_v6  ;;  %v759_v57 = vsel %vm740_vm1, %v3043_v19, -inf  ;;  %v3057_v21 = vadd.f32 %v729_v20, %v2945_v5 }
 0x286   : > { %v3026_v15 = vpop.eup %2407  ;;  %v1317_v23 = vpop.permute.xlu0 %1316  ;;  %v1034_v40 = vmul.f32 1.442695, %v1019_v31  ;;  %v753_v60 = vsel %vm740_vm1, %v3037_v33, -inf  ;;  %v756_v42 = vsel %vm740_vm1, %v3057_v21, -inf }
 0x287   : > { %v1345_v62 = vadd.f32 %v3024_v22, %v1317_v23  ;;  %v1051_v45 = vsel %vm740_vm1, %v3026_v15, 0.0 }
 0x288   : > { %v3032_v26 = vpop.eup %2409  ;;  %1052 = vadd.xlane.f32.xlu2 %v1051_v45  ;;  %2411 = vpow2.f32 %v1034_v40 }
 0x289   : > { %v1353_v32 = vmul.f32 0.2, %v1345_v62  ;;  %v1054_v36 = vsel %vm740_vm1, %v3032_v26, 0.0 }
 0x28a   : > { %1055 = vadd.xlane.f32.xlu1 %v1054_v36 }
 0x28b   : > { %v1361_v41 = vmax.f32 %v1345_v62, %v1353_v32 }
 0x28d   : > { %v3040_v44 = vadd.f32 %v1361_v41, %v2875_v30 }
 0x28e   : > { %v3052_v7 = vpop.eup %2411 }
 0x28f   : > { %v1379_v59 = vsel %vm740_vm1, %v3040_v44, -inf  ;;  %v1057_v11 = vsel %vm740_vm1, %v3052_v7, 0.0 }
 0x290   : > { %1380 = vmax.xlane.f32.xlu0 %v1379_v59  ;;  %754 = vmax.xlane.f32.xlu2 %v753_v60 }
 0x292   : > { %760 = vmax.xlane.f32.xlu1 %v759_v57 }
 0x298   : > { %1058 = vadd.xlane.f32.xlu2 %v1057_v11 }
 0x2a0   : > { %757 = vmax.xlane.f32.xlu2 %v756_v42 }
 0x2aa   : > { %v1038_v9 = vpop.xlane.xlu1 %1037 }
 0x2ab   : > { %2413 = vrcp.f32 %v1038_v9  ;;  %v2361_v9 = vld [vmem:[%s3653_s6 + $0x54] sm:$0xf0] }
 0x2b1   : > { %v2414_v31 = vpop.eup %2413 }
 0x2b2   : > { %v1041_v13 = vpop.xlane.xlu2 %1040  ;;  %v746_v47 = vpop.xlane.xlu1 %745  ;;  %v1068_v2 = vmul.f32 %v2414_v31, %v2972_v56  ;;  %v767_v31 = vsub.f32 %v2913_v29, %v3009_v53 }
 0x2b3   : > { %2415 = vrcp.f32 %v1041_v13  ;;  %v766_v35 = vsub.f32 %v2980_v17, %v746_v47  ;;  %v2360_v13 = vld [vmem:[%s3653_s6 + $0x54] sm:$0xf] }
 0x2b5   : > { %v775_v4 = vmul.f32 1.442695, %v766_v35  ;;  %v2269_v35 = vld [vmem:[%s3653_s6 + $0x58] sm:$0xf0] }
 0x2b7   : > { %2417 = vpow2.f32 %v775_v4 }
 0x2b8   : > { %1320 = vperm.xlu2 %2390, %v2811_v48  }
 0x2b9   : > { %v2416_v23 = vpop.eup %2415 }
 0x2ba   : > { %v1069_v62 = vmul.f32 %v2416_v23, %v2982_v37  ;;  %v743_v45 = vpop.xlane.xlu2 %742  ;;  %v1044_v36 = vpop.xlane.xlu1 %1043  ;;  %v2272_v23 = vor.u32 %v2360_v13, %v2269_v35 }
 0x2bb   : > { %2419 = vrcp.f32 %v1044_v36  ;;  %v765_v60 = vsub.f32 %v2990_v14, %v743_v45  ;;  %v2267_v14 = vld [vmem:[%s3653_s6 + $0x50] sm:$0xf]  ;;  %v2359_v45 = vld [vmem:[%s3653_s6 + $0x44] sm:$0xf0] }
 0x2bc   : > { %v1159_v61 = vpack.c.bf16 %v1069_v62, %v1068_v2  ;;  %v2268_v47 = vor.u32 %v2361_v9, %v2267_v14  ;;  %1524 = vmatpush.bf16.msrb.mxu2 %v2272_v23  ;;  %v2259_v62 = vld [vmem:[%s3653_s6 + $0x40] sm:$0xf] }
 0x2bd   : > { %v3065_v32 = vpop.eup %2417  ;;  %v773_v57 = vmul.f32 1.442695, %v765_v60  ;;  %v2260_v53 = vor.u32 %v2359_v45, %v2259_v62  ;;  %v2542_v60 = vmov 3  }
 0x2be   : > { %2237 = vmatmul.msk.bf16.vlgmr.msra.gmra.mxu3 %vm740_vm1, %v1159_v61  ;;  %2241 = vmatmul.msk.bf16.vlgmr.msra.gmra.mxu2 %vm740_vm1, %v1159_v61  ;;  %v792_v17 = vsel %vm740_vm1, %v3065_v32, 0.0  ;;  %v2358_v61 = vld [vmem:[%s3653_s6 + $0x44] sm:$0xf] }
 0x2bf   : > { %793 = vadd.xlane.f32.xlu1 %v792_v17  ;;  %1495 = vmatpush.bf16.msrb.mxu3 %v2268_v47 }
 0x2c0   : > { %1328 = vperm.xlu2 %2390, %v2819_v51   ;;  %2394 = vset.pattern.permute.xlu0 %v2542_v60 }
 0x2c1   : > { %v2420_v56 = vpop.eup %2419 }
 0x2c2   : > { %v1047_v40 = vpop.xlane.xlu2 %1046  ;;  %v1070_v41 = vmul.f32 %v2420_v56, %v2992_v24  ;;  %v777_v56 = vmul.f32 1.442695, %v767_v31 }
 0x2c3   : > { %2421 = vrcp.f32 %v1047_v40  ;;  %v2261_v40 = vld [vmem:[%s3653_s6 + $0x48] sm:$0xf0]  ;;  %1496 = vmatpush.bf16.msrb.mxu3 %v2260_v53 }
 0x2c4   : > { %2423 = vpow2.f32 %v773_v57 }
 0x2c8   : > { %1332 = vperm.xlu2 %2390, %v2822_v52  }
 0x2c9   : > { %v2422_v37 = vpop.eup %2421 }
 0x2ca   : > { %v1071_v38 = vmul.f32 %v2422_v37, %v3000_v27  ;;  %v3081_v3 = vpop.eup %2423  ;;  %v3085_v27 = vpop.xlane.xlu2 %751  ;;  %v2264_v37 = vor.u32 %v2358_v61, %v2261_v40 }
 0x2cb   : > { %v789_v24 = vsel %vm740_vm1, %v3081_v3, 0.0 }
 0x2cc   : > { %v1160_v59 = vpack.c.bf16 %v1071_v38, %v1070_v41  ;;  %1525 = vmatpush.bf16.msrb.mxu2 %v2264_v37 }
 0x2ce   : > { %2238 = vmatmul.msk.bf16.gmra.mxu3 %vm740_vm1, %v1160_v59  ;;  %2242 = vmatmul.msk.bf16.gmra.mxu2 %vm740_vm1, %v1160_v59 }
 0x2d0   : > { %2395 = vset.pattern.permute.xlu2 %v2542_v60 }
 0x2d8   : > { %1312 = vperm.xlu1 %2392, %v2803_v46  }
 0x2e0   : > { %1324 = vperm.xlu1 %2392, %v2814_v50  }
 0x2e8   : > { %1336 = vperm.xlu1 %2392, %v2828_v54  }
 0x2f0   : > { %2393 = vset.pattern.permute.xlu1 %v2542_v60 }
 0x2f1   : > { %790 = vadd.xlane.f32.xlu2 %v789_v24 }
 0x2f5   : > { %v1050_v20 = vpop.xlane.xlu1 %1049 }
 0x2f6   : > { %2425 = vrcp.f32 %v1050_v20 }
 0x2fb   : > { %v1053_v11 = vpop.xlane.xlu2 %1052 }
 0x2fc   : > { %2427 = vrcp.f32 %v1053_v11  ;;  %v2426_v4 = vpop.eup %2425 }
 0x2fd   : > { %v1056_v42 = vpop.xlane.xlu1 %1055  ;;  %v1072_v17 = vmul.f32 %v2426_v4, %v3018_v8  ;;  %2429 = vpow2.f32 %v777_v56  ;;  %v2305_v56 = vld [vmem:[%s3653_s6 + $0x78] sm:$0xf0] }
 0x2fe   : > { %2431 = vrcp.f32 %v1056_v42 }
 0x302   : > { %v2428_v2 = vpop.eup %2427 }
 0x303   : > { %v755_v36 = vpop.xlane.xlu2 %754  ;;  %v1073_v29 = vmul.f32 %v2428_v2, %v3026_v15  ;;  %v3119_v20 = vpop.eup %2429 }
 0x304   : > { %v769_v8 = vsub.f32 %v3037_v33, %v755_v36  ;;  %v795_v14 = vsel %vm740_vm1, %v3119_v20, 0.0 }
 0x305   : > { %v761_v41 = vpop.xlane.xlu1 %760  ;;  %v1161_v38 = vpack.c.bf16 %v1073_v29, %v1072_v17 }
 0x306   : > { %v771_v59 = vsub.f32 %v3043_v19, %v761_v41  ;;  %v781_v24 = vmul.f32 1.442695, %v769_v8  ;;  %v2432_v19 = vpop.eup %2431  ;;  %v2295_v41 = vld [vmem:[%s3653_s6 + $0x60] sm:$0xf]  ;;  %v2297_v8 = vld [vmem:[%s3653_s6 + $0x68] sm:$0xf0] }
 0x307   : > { %2239 = vmatmul.msk.bf16.gmra.mxu3 %vm740_vm1, %v1161_v38  ;;  %2243 = vmatmul.msk.bf16.gmra.mxu2 %vm740_vm1, %v1161_v38  ;;  %v1074_v13 = vmul.f32 %v2432_v19, %v3032_v26  ;;  %v2363_v38 = vld [vmem:[%s3653_s6 + $0x64] sm:$0xf0] }
 0x308   : > { %v785_v15 = vmul.f32 1.442695, %v771_v59  ;;  %v2362_v59 = vld [vmem:[%s3653_s6 + $0x64] sm:$0xf]  ;;  %v2296_v60 = vor.u32 %v2363_v38, %v2295_v41 }
 0x30a   : > { %2433 = vpow2.f32 %v785_v15  ;;  %v2300_v15 = vor.u32 %v2362_v59, %v2297_v8 }
 0x30b   : > { %v1059_v57 = vpop.xlane.xlu2 %1058 }
 0x30c   : > { %2435 = vrcp.f32 %v1059_v57  ;;  %v768_v57 = vsub.f32 %v3005_v39, %v3085_v27  ;;  %v1341_v27 = vpop.permute.xlu0 %1340 }
 0x30d   : > { %2437 = vpow2.f32 %v781_v24 }
 0x310   : > { %v3121_v11 = vpop.eup %2433 }
 0x311   : > { %v807_v33 = vsel %vm740_vm1, %v3121_v11, 0.0 }
 0x312   : > { %v2436_v9 = vpop.eup %2435  ;;  %796 = vadd.xlane.f32.xlu1 %v795_v14  ;;  %808 = vadd.xlane.f32.xlu0 %v807_v33  ;;  %v779_v33 = vmul.f32 1.442695, %v768_v57 }
 0x313   : > { %v758_v42 = vpop.xlane.xlu2 %757  ;;  %v1075_v47 = vmul.f32 %v2436_v9, %v3052_v7  ;;  %v3130_v31 = vpop.eup %2437 }
 0x314   : > { %v770_v35 = vsub.f32 %v3057_v21, %v758_v42  ;;  %v801_v2 = vsel %vm740_vm1, %v3130_v31, 0.0 }
 0x315   : > { %v1162_v4 = vpack.c.bf16 %v1075_v47, %v1074_v13 }
 0x316   : > { %v783_v23 = vmul.f32 1.442695, %v770_v35 }
 0x317   : > { %2240 = vmatmul.msk.bf16.gmra.mxu3 %vm740_vm1, %v1162_v4  ;;  %2244 = vmatmul.msk.bf16.gmra.mxu2 %vm740_vm1, %v1162_v4 }
 0x318   : > { %2439 = vpow2.f32 %v783_v23 }
 0x319   : > { %2441 = vpow2.f32 %v779_v33 }
 0x31a   : > { %802 = vadd.xlane.f32.xlu1 %v801_v2 }
 0x31b   : > { %v1321_v62 = vpop.permute.xlu2 %1320 }
 0x31c   : > { %v1346_v13 = vadd.f32 %v3024_v22, %v1321_v62 }
 0x31e   : > { %v3136_v45 = vpop.eup %2439  ;;  %v1354_v35 = vmul.f32 0.2, %v1346_v13 }
 0x31f   : > { %v804_v26 = vsel %vm740_vm1, %v3136_v45, 0.0  ;;  %v3200_v39 = vpop.eup %2441 }
 0x320   : > { %v798_v23 = vsel %vm740_vm1, %v3200_v39, 0.0 }
 0x322   : > { %805 = vadd.xlane.f32.xlu1 %v804_v26  ;;  %v1381_v26 = vpop.xlane.xlu0 %1380 }
 0x323   : > { %v1329_v7 = vpop.permute.xlu2 %1328 }
 0x326   : > { %1650 = vperm.xlu0 %2394, %v2806_v49   ;;  %v2303_v49 = vld [vmem:[%s3653_s6 + $0x70] sm:$0xf] }
 0x327   : > { %2273 = vmatmul.msk.bf16.vlgmr.msrb.gmra.mxu3 %vm577_vm0, %v2724_v1  ;;  %2277 = vmatmul.msk.bf16.vlgmr.msrb.gmra.mxu2 %vm577_vm0, %v2724_v1 }
 0x32b   : > { %v1333_v21 = vpop.permute.xlu2 %1332 }
 0x32c   : > { %v1349_v61 = vadd.f32 %v3024_v22, %v1333_v21  ;;  %v1348_v21 = vadd.f32 %v3024_v22, %v1329_v7 }
 0x32e   : > { %v1357_v36 = vmul.f32 0.2, %v1349_v61  ;;  %1658 = vperm.xlu0 %2394, %v2814_v50   ;;  %v2365_v50 = vld [vmem:[%s3653_s6 + $0x74] sm:$0xf0] }
 0x32f   : > { %v2304_v40 = vor.u32 %v2365_v50, %v2303_v49  ;;  %v1401_v50 = vsub.f32 %v3040_v44, %v1381_v26 }
 0x330   : > { %v1365_v17 = vmax.f32 %v1349_v61, %v1357_v36 }
 0x331   : > { %1829 = vmatpush.bf16.msra.mxu3 %v2304_v40 }
 0x332   : > { %v3148_v29 = vadd.f32 %v1365_v17, %v2945_v5 }
 0x334   : > { %v1391_v53 = vsel %vm740_vm1, %v3148_v29, -inf }
 0x335   : > { %1392 = vmax.xlane.f32.xlu1 %v1391_v53  ;;  %1830 = vmatpush.bf16.msra.mxu3 %v2296_v60 }
 0x336   : > { %1666 = vperm.xlu0 %2394, %v2822_v52   ;;  %v2364_v52 = vld [vmem:[%s3653_s6 + $0x74] sm:$0xf] }
 0x337   : > { %2274 = vmatmul.msk.bf16.gmra.mxu3 %vm577_vm0, %v2732_v10  ;;  %2278 = vmatmul.msk.bf16.gmra.mxu2 %vm577_vm0, %v2732_v10  ;;  %v2308_v37 = vor.u32 %v2364_v52, %v2305_v56  ;;  %v1356_v52 = vmul.f32 0.2, %v1348_v21  ;;  %v1410_v56 = vmul.f32 1.442695, %v1401_v50  ;;  %v3308_v50 = vperm.slane %v2839_v58, 3 }
 0x339   : > { %1858 = vmatpush.bf16.msra.mxu2 %v2308_v37 }
 0x33d   : > { %1859 = vmatpush.bf16.msra.mxu2 %v2300_v15 }
 0x33e   : > { %1674 = vperm.xlu0 %2394, %v2833_v55   ;;  %v794_v55 = vpop.xlane.xlu1 %793 }
 0x33f   : > { %2443 = vrcp.f32 %v794_v55  ;;  %v1364_v55 = vmax.f32 %v1348_v21, %v1356_v52 }
 0x341   : > { %v3209_v61 = vpop.f32.mrf.mxu3  ;;  %v3213_v53 = vpop.f32.mrf.mxu2  ;;  %v3235_v57 = vadd.f32 %v1364_v55, %v2927_v6 }
 0x345   : > { %v2444_v40 = vpop.eup %2443 }
 0x346   : > { %v822_v38 = vmul.f32 %v2444_v40, %v3065_v32 }
 0x347   : > { %2275 = vmatmul.msk.bf16.gmra.mxu3 %vm577_vm0, %v2752_v25  ;;  %2279 = vmatmul.msk.bf16.gmra.mxu2 %vm577_vm0, %v2752_v25 }
 0x349   : > { %v3232_v60 = vpop.f32.mrf.mxu2 }
 0x34a   : > { %v1313_v24 = vpop.permute.xlu1 %1312 }
 0x34b   : > { %v1344_v19 = vadd.f32 %v3024_v22, %v1313_v24 }
 0x34d   : > { %v1352_v14 = vmul.f32 0.2, %v1344_v19 }
 0x34e   : > { %1654 = vperm.xlu1 %2393, %v2811_v48  }
 0x34f   : > { %v1360_v9 = vmax.f32 %v1344_v19, %v1352_v14 }
 0x351   : > { %v3191_v42 = vadd.f32 %v1360_v9, %v2860_v12  ;;  %v1362_v12 = vmax.f32 %v1346_v13, %v1354_v35  ;;  %v3255_v33 = vpop.f32.mrf.mxu2 }
 0x352   : > { %v1325_v48 = vpop.permute.xlu1 %1324 }
 0x353   : > { %v1376_v47 = vsel %vm740_vm1, %v3191_v42, -inf  ;;  %v1347_v4 = vadd.f32 %v3024_v22, %v1325_v48  ;;  %v3206_v62 = vadd.f32 %v1362_v12, %v2872_v28 }
 0x354   : > { %1377 = vmax.xlane.f32.xlu2 %v1376_v47 }
 0x355   : > { %v1355_v2 = vmul.f32 0.2, %v1347_v4  ;;  %v1382_v17 = vsel %vm740_vm1, %v3206_v62, -inf }
 0x357   : > { %2276 = vmatmul.msk.bf16.gmra.mxu3 %vm577_vm0, %v2760_v34  ;;  %2280 = vmatmul.msk.bf16.gmra.mxu2 %vm577_vm0, %v2760_v34  ;;  %v1363_v36 = vmax.f32 %v1347_v4, %v1355_v2 }
 0x359   : > { %v3221_v28 = vadd.f32 %v1363_v36, %v2888_v43  ;;  %v3230_v43 = vpop.f32.mrf.mxu3  ;;  %v3268_v48 = vpop.f32.mrf.mxu2 }
 0x35a   : > { %v1337_v7 = vpop.permute.xlu1 %1336 }
 0x35b   : > { %v1350_v41 = vadd.f32 %v3024_v22, %v1337_v7  ;;  %v1385_v44 = vsel %vm740_vm1, %v3221_v28, -inf }
 0x35c   : > { %799 = vadd.xlane.f32.xlu2 %v798_v23 }
 0x35d   : > { %v1358_v15 = vmul.f32 0.2, %v1350_v41 }
 0x35f   : > { %v1366_v24 = vmax.f32 %v1350_v41, %v1358_v15 }
 0x361   : > { %v3253_v14 = vpop.f32.mrf.mxu3 }
 0x364   : > { %1383 = vmax.xlane.f32.xlu2 %v1382_v17  ;;  %v791_v49 = vpop.xlane.xlu2 %790 }
 0x365   : > { %2445 = vrcp.f32 %v791_v49 }
 0x366   : > { %2447 = vpow2.f32 %v1410_v56 }
 0x367   : > { %2309 = vmatmul.msk.bf16.vlgmr.msra.gmra.mxu3 %vm577_vm0, %v2724_v1  ;;  %2313 = vmatmul.msk.bf16.vlgmr.msra.gmra.mxu2 %vm577_vm0, %v2724_v1  ;;  %v772_v1 = vsub.f32 %v2934_v18, %v3013_v63  ;;  %v1388_v18 = vsel %vm740_vm1, %v3235_v57, -inf }
 0x369   : > { %v787_v32 = vmul.f32 1.442695, %v772_v1 }
 0x36b   : > { %v2446_v37 = vpop.eup %2445  ;;  %2449 = vpow2.f32 %v787_v32 }
 0x36c   : > { %v821_v59 = vmul.f32 %v2446_v37, %v3081_v3  ;;  %1386 = vmax.xlane.f32.xlu2 %v1385_v44  ;;  %v1351_v3 = vadd.f32 %v3024_v22, %v1341_v27  ;;  %v3242_v63 = vpop.eup %2447  ;;  %v3251_v22 = vadd.f32 %v1366_v24, %v2950_v0  ;;  %v3266_v0 = vpop.f32.mrf.mxu3 }
 0x36d   : > { %v1427_v6 = vsel %vm740_vm1, %v3242_v63, 0.0 }
 0x36e   : > { %v911_v8 = vpack.c.bf16 %v822_v38, %v821_v59  ;;  %v1359_v19 = vmul.f32 0.2, %v1351_v3  ;;  %v1394_v13 = vsel %vm740_vm1, %v3251_v22, -inf }
 0x370   : > { %2245 = vmatmul.msk.bf16.vlgmr.msra.gmra.mxu0 %vm740_vm1, %v911_v8  ;;  %2249 = vmatmul.msk.bf16.vlgmr.msra.gmra.mxu1 %vm740_vm1, %v911_v8  ;;  %v1367_v9 = vmax.f32 %v1351_v3, %v1359_v19 }
 0x371   : > { %v3259_v47 = vpop.eup %2449 }
 0x372   : > { %v3264_v35 = vadd.f32 %v1367_v9, %v2931_v16 }
 0x374   : > { %1389 = vmax.xlane.f32.xlu2 %v1388_v18  ;;  %v1397_v27 = vsel %vm740_vm1, %v3264_v35, -inf }
 0x377   : > { %2310 = vmatmul.msk.bf16.gmra.mxu3 %vm577_vm0, %v2732_v10  ;;  %2314 = vmatmul.msk.bf16.gmra.mxu2 %vm577_vm0, %v2732_v10  ;;  %v810_v10 = vsel %vm740_vm1, %v3259_v47, 0.0 }
 0x378   : > { %1428 = vadd.xlane.f32.xlu1 %v1427_v6 }
 0x37c   : > { %1395 = vmax.xlane.f32.xlu2 %v1394_v13 }
 0x380   : > { %811 = vadd.xlane.f32.xlu1 %v810_v10 }
 0x384   : > { %1398 = vmax.xlane.f32.xlu2 %v1397_v27 }
 0x385   : > { %v797_v44 = vpop.xlane.xlu1 %796 }
 0x387   : > { %2311 = vmatmul.msk.bf16.gmra.mxu3 %vm577_vm0, %v2752_v25  ;;  %2315 = vmatmul.msk.bf16.gmra.mxu2 %vm577_vm0, %v2752_v25  ;;  %v3293_v25 = vpop.xlane.xlu0 %808 }
 0x38a   : > { %v3276_v12 = vpop.f32.mrf.mxu3  ;;  %v3278_v4 = vpop.f32.mrf.mxu2 }
 0x38d   : > { %v803_v32 = vpop.xlane.xlu1 %802 }
 0x392   : > { %v3280_v16 = vpop.f32.mrf.mxu3  ;;  %v3282_v23 = vpop.f32.mrf.mxu2 }
 0x395   : > { %v806_v10 = vpop.xlane.xlu1 %805 }
 0x397   : > { %2312 = vmatmul.msk.bf16.gmra.mxu3 %vm577_vm0, %v2760_v34  ;;  %2316 = vmatmul.msk.bf16.gmra.mxu2 %vm577_vm0, %v2760_v34 }
 0x398   : > { %v1651_v17 = vpop.permute.xlu0 %1650 }
 0x399   : > { %1670 = vperm.xlu1 %2393, %v2828_v54   ;;  %v1679_v52 = vadd.f32 %v3308_v50, %v1651_v17 }
 0x39a   : > { %v3289_v2 = vpop.f32.mrf.mxu3  ;;  %v3291_v26 = vpop.f32.mrf.mxu2 }
 0x39b   : > { %v1687_v40 = vmul.f32 0.2, %v1679_v52 }
 0x39c   : > { %1646 = vperm.xlu2 %2395, %v2803_v46  }
 0x39d   : > { %v1695_v37 = vmax.f32 %v1679_v52, %v1687_v40 }
 0x39f   : > { %v3321_v58 = vadd.f32 %v1695_v37, %v2875_v30 }
 0x3a0   : > { %v3305_v54 = vpop.permute.xlu0 %1658 }
 0x3a1   : > { %v1713_v15 = vsel %vm740_vm1, %v3321_v58, -inf }
 0x3a2   : > { %v3296_v21 = vpop.f32.mrf.mxu3  ;;  %v3298_v36 = vpop.f32.mrf.mxu2 }
 0x3a4   : > { %1662 = vperm.xlu2 %2395, %v2819_v51  }
 0x3a8   : > { %v1667_v56 = vpop.permute.xlu0 %1666 }
 0x3a9   : > { %v1683_v51 = vadd.f32 %v3308_v50, %v1667_v56 }
 0x3aa   : > { %v3301_v49 = vpop.f32.mrf.mxu3  ;;  %v3303_v34 = vpop.f32.mrf.mxu2 }
 0x3ab   : > { %v1691_v38 = vmul.f32 0.2, %v1683_v51 }
 0x3ad   : > { %v1699_v59 = vmax.f32 %v1683_v51, %v1691_v38  ;;  %v3341_v38 = vpop.xlane.xlu1 %1392 }
 0x3af   : > { %v3330_v3 = vadd.f32 %v1699_v59, %v2945_v5 }
 0x3b1   : > { %v1725_v9 = vsel %vm740_vm1, %v3330_v3, -inf }
 0x3b2   : > { %v3311_v7 = vpop.f32.mrf.mxu3  ;;  %v3313_v46 = vpop.f32.mrf.mxu2 }
 0x3ba   : > { %v3316_v55 = vpop.f32.mrf.mxu3  ;;  %v3318_v41 = vpop.f32.mrf.mxu2 }
 0x3c2   : > { %v3323_v1 = vpop.f32.mrf.mxu3  ;;  %v3325_v8 = vpop.f32.mrf.mxu2 }
 0x3c3   : > { %1714 = vmax.xlane.f32.xlu1 %v1713_v15 }
 0x3c7   : > { %v1378_v24 = vpop.xlane.xlu2 %1377 }
 0x3c8   : > { %v1400_v18 = vsub.f32 %v3191_v42, %v1378_v24 }
 0x3ca   : > { %v1408_v19 = vmul.f32 1.442695, %v1400_v18  ;;  %v1508_v6 = vpop.f32.mrf.mxu3  ;;  %v1537_v30 = vpop.f32.mrf.mxu2 }
 0x3cb   : > { %1726 = vmax.xlane.f32.xlu1 %v1725_v9  ;;  %v1655_v9 = vpop.permute.xlu1 %1654 }
 0x3cc   : > { %2451 = vpow2.f32 %v1408_v19 }
 0x3cd   : > { %2453 = vrcp.f32 %v797_v44 }
 0x3cf   : > { %v800_v13 = vpop.xlane.xlu2 %799 }
 0x3d0   : > { %2455 = vrcp.f32 %v800_v13 }
 0x3d1   : > { %2457 = vrcp.f32 %v806_v10 }
 0x3d2   : > { %v3335_v27 = vpop.eup %2451  ;;  %v1510_v17 = vpop.f32.mrf.mxu3 }
 0x3d3   : > { %v1539_v5 = vpop.f32.mrf.mxu2  ;;  %v1424_v52 = vsel %vm740_vm1, %v3335_v27, 0.0  ;;  %v2454_v42 = vpop.eup %2453 }
 0x3d4   : > { %1425 = vadd.xlane.f32.xlu2 %v1424_v52  ;;  %v823_v37 = vmul.f32 %v2454_v42, %v3119_v20 }
 0x3d6   : > { %v2456_v40 = vpop.eup %2455 }
 0x3d7   : > { %v1384_v56 = vpop.xlane.xlu2 %1383  ;;  %v824_v51 = vmul.f32 %v2456_v40, %v3200_v39  ;;  %v2458_v39 = vpop.eup %2457  ;;  %v1680_v40 = vadd.f32 %v3308_v50, %v1655_v9  ;;  %v1681_v9 = vadd.f32 %v3308_v50, %v3305_v54 }
 0x3d8   : > { %v1402_v44 = vsub.f32 %v3206_v62, %v1384_v56 }
 0x3d9   : > { %v912_v59 = vpack.c.bf16 %v824_v51, %v823_v37 }
 0x3da   : > { %v1412_v15 = vmul.f32 1.442695, %v1402_v44  ;;  %v1513_v24 = vpop.f32.mrf.mxu3  ;;  %v1555_v44 = vpack.c.bf16 %v1510_v17, %v1508_v6  ;;  %v1553_v6 = vpack.c.bf16 %v3323_v1, %v3316_v55  ;;  %v1689_v17 = vmul.f32 0.2, %v1681_v9  ;;  %v2525_v1 = vld [vmem:[%s2857_s15 + $0x10] sm:$0xff] }
 0x3db   : > { %v1542_v18 = vpop.f32.mrf.mxu2  ;;  %2246 = vmatmul.msk.bf16.gmra.mxu0 %vm740_vm1, %v912_v59  ;;  %2250 = vmatmul.msk.bf16.gmra.mxu1 %vm740_vm1, %v912_v59  ;;  %v1556_v59 = vpack.c.bf16 %v1539_v5, %v1537_v30  ;;  %v1551_v5 = vpack.c.bf16 %v3311_v7, %v3301_v49  ;;  %v1552_v55 = vpack.c.bf16 %v3313_v46, %v3303_v34 }
 0x3dc   : > { %2459 = vpow2.f32 %v1412_v15  ;;  %v1697_v49 = vmax.f32 %v1681_v9, %v1689_v17 }
 0x3dd   : > { %2461 = vrcp.f32 %v803_v32  ;;  %v1688_v32 = vmul.f32 0.2, %v1680_v40 }
 0x3df   : > { %v1387_v19 = vpop.xlane.xlu2 %1386 }
 0x3e0   : > { %v1403_v20 = vsub.f32 %v3221_v28, %v1387_v19  ;;  %v826_v28 = vmul.f32 %v2458_v39, %v3136_v45  ;;  %v1696_v45 = vmax.f32 %v1680_v40, %v1688_v32  ;;  %v1405_v39 = vsub.f32 %v3148_v29, %v3341_v38 }
 0x3e2   : > { %v3347_v13 = vpop.eup %2459  ;;  %v1414_v52 = vmul.f32 1.442695, %v1403_v20  ;;  %v1515_v62 = vpop.f32.mrf.mxu3  ;;  %v1418_v46 = vmul.f32 1.442695, %v1405_v39 }
 0x3e3   : > { %v1544_v42 = vpop.f32.mrf.mxu2  ;;  %v1557_v56 = vpack.c.bf16 %v1515_v62, %v1513_v24  ;;  %v1430_v37 = vsel %vm740_vm1, %v3347_v13, 0.0  ;;  %v2462_v51 = vpop.eup %2461 }
 0x3e4   : > { %v1558_v10 = vpack.c.bf16 %v1544_v42, %v1542_v18  ;;  %2463 = vpow2.f32 %v1414_v52  ;;  %1431 = vadd.xlane.f32.xlu2 %v1430_v37  ;;  %v825_v19 = vmul.f32 %v2462_v51, %v3130_v31  ;;  %v1554_v31 = vpack.c.bf16 %v3325_v8, %v3318_v41 }
 0x3e5   : > { %1575 = vmatpush.bf16.msrb.mxu0 %v1557_v56  ;;  %v3379_v8 = vadd.f32 %v2525_v1, %v1696_v45  ;;  %2465 = vrcp.f32 %v3293_v25  ;;  %v2526_v56 = vld [vmem:[%s2857_s15 + $0x18] sm:$0xff]  ;;  %v1675_v45 = vpop.permute.xlu0 %1674 }
 0x3e6   : > { %1604 = vmatpush.bf16.msrb.mxu1 %v1558_v10  ;;  %v913_v24 = vpack.c.bf16 %v826_v28, %v825_v19  ;;  %v3391_v10 = vadd.f32 %v2526_v56, %v1697_v49 }
 0x3e7   : > { %v3353_v15 = vpop.xlane.xlu2 %1389  ;;  %v1716_v34 = vsel %vm740_vm1, %v3379_v8, -inf }
 0x3e8   : > { %v1719_v28 = vsel %vm740_vm1, %v3391_v10, -inf }
 0x3e9   : > { %1576 = vmatpush.bf16.msrb.mxu0 %v1555_v44 }
 0x3ea   : > { %1605 = vmatpush.bf16.msrb.mxu1 %v1556_v59  ;;  %v3356_v18 = vpop.eup %2463  ;;  %v3360_v20 = vpop.f32.mrf.mxu3 }
 0x3eb   : > { %v3362_v52 = vpop.f32.mrf.mxu2  ;;  %v3368_v30 = vpop.xlane.xlu1 %1428  ;;  %2247 = vmatmul.msk.bf16.gmra.mxu0 %vm740_vm1, %v913_v24  ;;  %2251 = vmatmul.msk.bf16.gmra.mxu1 %vm740_vm1, %v913_v24  ;;  %v1433_v54 = vsel %vm740_vm1, %v3356_v18, 0.0  ;;  %v1404_v24 = vsub.f32 %v3235_v57, %v3353_v15 }
 0x3ec   : > { %1434 = vadd.xlane.f32.xlu2 %v1433_v54  ;;  %v2466_v37 = vpop.eup %2465  ;;  %v1685_v54 = vadd.f32 %v3308_v50, %v1675_v45 }
 0x3ed   : > { %1577 = vmatpush.bf16.msrb.mxu0 %v1553_v6  ;;  %v827_v32 = vmul.f32 %v2466_v37, %v3121_v11  ;;  %v1416_v57 = vmul.f32 1.442695, %v1404_v24 }
 0x3ee   : > { %1606 = vmatpush.bf16.msrb.mxu1 %v1554_v31 }
 0x3ef   : > { %v1396_v41 = vpop.xlane.xlu2 %1395 }
 0x3f0   : > { %v1406_v29 = vsub.f32 %v3251_v22, %v1396_v41  ;;  %v1693_v41 = vmul.f32 0.2, %v1685_v54 }
 0x3f1   : > { %1578 = vmatpush.bf16.msrb.mxu0 %v1551_v5  ;;  %v2527_v5 = vld [vmem:[%s2857_s15] sm:$0xff] }
 0x3f2   : > { %1607 = vmatpush.bf16.msrb.mxu1 %v1552_v55  ;;  %v3383_v62 = vpop.f32.mrf.mxu3  ;;  %v1420_v59 = vmul.f32 1.442695, %v1406_v29  ;;  %v1701_v56 = vmax.f32 %v1685_v54, %v1693_v41 }
 0x3f3   : > { %v3385_v42 = vpop.f32.mrf.mxu2  ;;  %v812_v7 = vpop.xlane.xlu1 %811 }
 0x3f4   : > { %1717 = vmax.xlane.f32.xlu2 %v1716_v34  ;;  %2467 = vrcp.f32 %v812_v7 }
 0x3f5   : > { %2469 = vpow2.f32 %v1418_v46 }
 0x3f6   : > { %2471 = vpow2.f32 %v1420_v59 }
 0x3f7   : > { %v1399_v40 = vpop.xlane.xlu2 %1398  ;;  %2473 = vpow2.f32 %v1416_v57  ;;  %v2529_v57 = vld [vmem:[%s2857_s15 + $0x30] sm:$0xff] }
 0x3f8   : > { %v1407_v59 = vsub.f32 %v3264_v35, %v1399_v40  ;;  %v2530_v40 = vld [vmem:[%s2857_s15 + $0x20] sm:$0xff] }
 0x3fa   : > { %v3394_v38 = vpop.f32.mrf.mxu3  ;;  %v2468_v25 = vpop.eup %2467 }
 0x3fb   : > { %v3396_v51 = vpop.f32.mrf.mxu2  ;;  %v828_v44 = vmul.f32 %v2468_v25, %v3259_v47  ;;  %v3404_v9 = vpop.eup %2469 }
 0x3fc   : > { %1720 = vmax.xlane.f32.xlu2 %v1719_v28  ;;  %v1439_v15 = vsel %vm740_vm1, %v3404_v9, 0.0  ;;  %v3419_v39 = vpop.eup %2471 }
 0x3fd   : > { %v914_v19 = vpack.c.bf16 %v828_v44, %v827_v32  ;;  %v1442_v29 = vsel %vm740_vm1, %v3419_v39, 0.0  ;;  %v3427_v32 = vpop.eup %2473 }
 0x3ff   : > { %v1647_v22 = vpop.permute.xlu2 %1646  ;;  %2252 = vmatmul.msk.bf16.gmra.mxu1 %vm740_vm1, %v914_v19  ;;  %2248 = vmatmul.msk.bf16.gmra.mxu0 %vm740_vm1, %v914_v19  ;;  %v2528_v19 = vld [vmem:[%s2857_s15 + $0x38] sm:$0xff] }
 0x400   : > { %v1678_v6 = vadd.f32 %v3308_v50, %v1647_v22  ;;  %v3431_v24 = vadd.f32 %v2528_v19, %v1701_v56 }
 0x402   : > { %v1686_v11 = vmul.f32 0.2, %v1678_v6  ;;  %v3409_v31 = vpop.f32.mrf.mxu3 }
 0x403   : > { %v3411_v47 = vpop.f32.mrf.mxu2  ;;  %v1887_v19 = vpack.c.bf16 %v3409_v31, %v3394_v38 }
 0x404   : > { %v1694_v17 = vmax.f32 %v1678_v6, %v1686_v11  ;;  %1440 = vadd.xlane.f32.xlu2 %v1439_v15  ;;  %v1436_v6 = vsel %vm740_vm1, %v3427_v32, 0.0  ;;  %v1422_v15 = vmul.f32 1.442695, %v1407_v59 }
 0x406   : > { %v3417_v55 = vadd.f32 %v2527_v5, %v1694_v17  ;;  %v1731_v17 = vsel %vm740_vm1, %v3431_v24, -inf  ;;  %2475 = vpow2.f32 %v1422_v15 }
 0x407   : > { %v1663_v1 = vpop.permute.xlu2 %1662 }
 0x408   : > { %v1682_v49 = vadd.f32 %v3308_v50, %v1663_v1  ;;  %v1710_v7 = vsel %vm740_vm1, %v3417_v55, -inf }
 0x409   : > { %1711 = vmax.xlane.f32.xlu0 %v1710_v7 }
 0x40a   : > { %v1842_v34 = vpop.f32.mrf.mxu3  ;;  %v1690_v25 = vmul.f32 0.2, %v1682_v49 }
 0x40b   : > { %v1871_v46 = vpop.f32.mrf.mxu2  ;;  %v1671_v37 = vpop.permute.xlu1 %1670 }
 0x40c   : > { %v1684_v28 = vadd.f32 %v3308_v50, %v1671_v37  ;;  %1443 = vadd.xlane.f32.xlu2 %v1442_v29  ;;  %v1698_v22 = vmax.f32 %v1682_v49, %v1690_v25  ;;  %v3447_v7 = vpop.eup %2475 }
 0x40d   : > { %v1445_v56 = vsel %vm740_vm1, %v3447_v7, 0.0 }
 0x40e   : > { %v1692_v44 = vmul.f32 0.2, %v1684_v28  ;;  %v3443_v5 = vadd.f32 %v2530_v40, %v1698_v22  ;;  %v1888_v22 = vpack.c.bf16 %v3411_v47, %v3396_v51 }
 0x410   : > { %v1700_v45 = vmax.f32 %v1684_v28, %v1692_v44  ;;  %v1722_v41 = vsel %vm740_vm1, %v3443_v5, -inf }
 0x411   : > { %1437 = vadd.xlane.f32.xlu0 %v1436_v6  ;;  %v1886_v6 = vpack.c.bf16 %v3385_v42, %v3362_v52 }
 0x412   : > { %v1844_v11 = vpop.f32.mrf.mxu3  ;;  %v3436_v50 = vadd.f32 %v2529_v57, %v1700_v45  ;;  %v1885_v45 = vpack.c.bf16 %v3383_v62, %v3360_v20 }
 0x413   : > { %v1873_v54 = vpop.f32.mrf.mxu2  ;;  %v1889_v44 = vpack.c.bf16 %v1844_v11, %v1842_v34 }
 0x414   : > { %1732 = vmax.xlane.f32.xlu2 %v1731_v17  ;;  %v1728_v35 = vsel %vm740_vm1, %v3436_v50, -inf  ;;  %v1890_v59 = vpack.c.bf16 %v1873_v54, %v1871_v46 }
 0x415   : > { %1729 = vmax.xlane.f32.xlu1 %v1728_v35 }
 0x419   : > { %1723 = vmax.xlane.f32.xlu0 %v1722_v41 }
 0x41a   : > { %v1847_v1 = vpop.f32.mrf.mxu3 }
 0x41b   : > { %v1876_v49 = vpop.f32.mrf.mxu2 }
 0x421   : > { %1446 = vadd.xlane.f32.xlu0 %v1445_v56 }
 0x422   : > { %v1849_v37 = vpop.f32.mrf.mxu3 }
 0x423   : > { %v1878_v29 = vpop.f32.mrf.mxu2  ;;  %v1891_v25 = vpack.c.bf16 %v1849_v37, %v1847_v1 }
 0x424   : > { %v1892_v28 = vpack.c.bf16 %v1878_v29, %v1876_v49 }
 0x425   : > { %1909 = vmatpush.bf16.msra.mxu0 %v1891_v25 }
 0x426   : > { %1938 = vmatpush.bf16.msra.mxu1 %v1892_v28 }
 0x429   : > { %1910 = vmatpush.bf16.msra.mxu0 %v1889_v44 }
 0x42a   : > { %1939 = vmatpush.bf16.msra.mxu1 %v1890_v59 }
 0x42d   : > { %1911 = vmatpush.bf16.msra.mxu0 %v1887_v19 }
 0x42e   : > { %1940 = vmatpush.bf16.msra.mxu1 %v1888_v22 }
 0x431   : > { %1912 = vmatpush.bf16.msra.mxu0 %v1885_v45 }
 0x432   : > { %1941 = vmatpush.bf16.msra.mxu1 %v1886_v6 }
 0x436   : > { %v1715_v34 = vpop.xlane.xlu1 %1714 }
 0x437   : > { %v1735_v46 = vsub.f32 %v3321_v58, %v1715_v34 }
 0x439   : > { %v1744_v11 = vmul.f32 1.442695, %v1735_v46 }
 0x43b   : > { %2477 = vpow2.f32 %v1744_v11 }
 0x43c   : > { %2479 = vrcp.f32 %v3368_v30 }
 0x43e   : > { %v1727_v30 = vpop.xlane.xlu1 %1726 }
 0x43f   : > { %v1739_v41 = vsub.f32 %v3330_v3, %v1727_v30 }
 0x441   : > { %v3460_v54 = vpop.eup %2477  ;;  %v1752_v49 = vmul.f32 1.442695, %v1739_v41 }
 0x442   : > { %v1761_v38 = vsel %vm740_vm1, %v3460_v54, 0.0  ;;  %v2480_v20 = vpop.eup %2479 }
 0x443   : > { %1762 = vadd.xlane.f32.xlu1 %v1761_v38  ;;  %v1457_v52 = vmul.f32 %v2480_v20, %v3242_v63 }
 0x447   : > { %v1426_v51 = vpop.xlane.xlu2 %1425 }
 0x448   : > { %2481 = vrcp.f32 %v1426_v51 }
 0x44e   : > { %v2482_v62 = vpop.eup %2481 }
 0x44f   : > { %v1456_v42 = vmul.f32 %v2482_v62, %v3335_v27 }
 0x451   : > { %v1547_v31 = vpack.c.bf16 %v1457_v52, %v1456_v42 }
 0x453   : > { %2281 = vmatmul.msk.bf16.vlgmr.msrb.gmra.mxu0 %vm740_vm1, %v1547_v31  ;;  %2285 = vmatmul.msk.bf16.vlgmr.msrb.gmra.mxu1 %vm740_vm1, %v1547_v31 }
 0x457   : > { %v1432_v58 = vpop.xlane.xlu2 %1431 }
 0x458   : > { %2483 = vrcp.f32 %v1432_v58 }
 0x45e   : > { %v2484_v57 = vpop.eup %2483 }
 0x45f   : > { %v1435_v47 = vpop.xlane.xlu2 %1434  ;;  %v1458_v17 = vmul.f32 %v2484_v57, %v3347_v13 }
 0x460   : > { %2485 = vrcp.f32 %v1435_v47 }
 0x466   : > { %v2486_v15 = vpop.eup %2485 }
 0x467   : > { %v1459_v35 = vmul.f32 %v2486_v15, %v3356_v18  ;;  %v1718_v40 = vpop.xlane.xlu2 %1717 }
 0x468   : > { %v1736_v63 = vsub.f32 %v3379_v8, %v1718_v40 }
 0x469   : > { %v1548_v27 = vpack.c.bf16 %v1459_v35, %v1458_v17 }
 0x46a   : > { %v1746_v1 = vmul.f32 1.442695, %v1736_v63 }
 0x46b   : > { %2282 = vmatmul.msk.bf16.gmra.mxu0 %vm740_vm1, %v1548_v27  ;;  %2286 = vmatmul.msk.bf16.gmra.mxu1 %vm740_vm1, %v1548_v27 }
 0x46c   : > { %2487 = vpow2.f32 %v1746_v1  ;;  %v3504_v1 = vpop.f32.mrf.mxu0 }
 0x46d   : > { %2489 = vpow2.f32 %v1752_v49  ;;  %v3506_v49 = vpop.f32.mrf.mxu1 }
 0x46f   : > { %v1721_v56 = vpop.xlane.xlu2 %1720 }
 0x470   : > { %v1737_v28 = vsub.f32 %v3391_v10, %v1721_v56 }
 0x472   : > { %v3475_v37 = vpop.eup %2487  ;;  %v1748_v19 = vmul.f32 1.442695, %v1737_v28 }
 0x473   : > { %v1764_v13 = vsel %vm740_vm1, %v3475_v37, 0.0  ;;  %v3479_v18 = vpop.eup %2489 }
 0x474   : > { %1765 = vadd.xlane.f32.xlu2 %v1764_v13  ;;  %v1773_v3 = vsel %vm740_vm1, %v3479_v18, 0.0  ;;  %v3508_v13 = vpop.f32.mrf.mxu0 }
 0x477   : > { %v1441_v8 = vpop.xlane.xlu2 %1440 }
 0x47c   : > { %v1712_v29 = vpop.xlane.xlu0 %1711  ;;  %1774 = vadd.xlane.f32.xlu2 %v1773_v3 }
 0x47d   : > { %v1734_v25 = vsub.f32 %v3417_v55, %v1712_v29  ;;  %v3512_v29 = vpop.f32.mrf.mxu0 }
 0x47f   : > { %v1742_v44 = vmul.f32 1.442695, %v1734_v25  ;;  %v1444_v59 = vpop.xlane.xlu2 %1443 }
 0x481   : > { %2491 = vpow2.f32 %v1742_v44 }
 0x482   : > { %2493 = vrcp.f32 %v1441_v8  ;;  %v3510_v8 = vpop.f32.mrf.mxu1 }
 0x484   : > { %v1438_v22 = vpop.xlane.xlu0 %1437 }
 0x485   : > { %2495 = vrcp.f32 %v1438_v22 }
 0x486   : > { %2497 = vpow2.f32 %v1748_v19 }
 0x487   : > { %v2492_v45 = vpop.eup %2491  ;;  %v1733_v20 = vpop.xlane.xlu2 %1732 }
 0x488   : > { %v1730_v6 = vpop.xlane.xlu1 %1729  ;;  %v1758_v34 = vsel %vm740_vm1, %v2492_v45, 0.0  ;;  %v2494_v46 = vpop.eup %2493  ;;  %v1741_v58 = vsub.f32 %v3431_v24, %v1733_v20 }
 0x489   : > { %v1740_v11 = vsub.f32 %v3436_v50, %v1730_v6  ;;  %1759 = vadd.xlane.f32.xlu0 %v1758_v34  ;;  %v1461_v10 = vmul.f32 %v2494_v46, %v3404_v9  ;;  %v3519_v6 = vpop.f32.mrf.mxu0 }
 0x48a   : > { %v1756_v9 = vmul.f32 1.442695, %v1741_v58  ;;  %v3514_v25 = vpop.f32.mrf.mxu1 }
 0x48b   : > { %v2496_v38 = vpop.eup %2495  ;;  %v1754_v55 = vmul.f32 1.442695, %v1740_v11 }
 0x48c   : > { %v1460_v51 = vmul.f32 %v2496_v38, %v3427_v32  ;;  %v1724_v62 = vpop.xlane.xlu0 %1723  ;;  %v2498_v52 = vpop.eup %2497 }
 0x48d   : > { %v1738_v42 = vsub.f32 %v3443_v5, %v1724_v62  ;;  %2499 = vpow2.f32 %v1754_v55  ;;  %v1767_v50 = vsel %vm740_vm1, %v2498_v52, 0.0 }
 0x48e   : > { %v1549_v31 = vpack.c.bf16 %v1461_v10, %v1460_v51 }
 0x48f   : > { %v1750_v47 = vmul.f32 1.442695, %v1738_v42 }
 0x490   : > { %2283 = vmatmul.msk.bf16.gmra.mxu0 %vm740_vm1, %v1549_v31  ;;  %2287 = vmatmul.msk.bf16.gmra.mxu1 %vm740_vm1, %v1549_v31 }
 0x491   : > { %2501 = vpow2.f32 %v1750_v47  ;;  %1768 = vadd.xlane.f32.xlu0 %v1767_v50  ;;  %v3524_v10 = vpop.f32.mrf.mxu0 }
 0x492   : > { %2503 = vrcp.f32 %v1444_v59  ;;  %v3521_v34 = vpop.f32.mrf.mxu1 }
 0x493   : > { %v3494_v57 = vpop.eup %2499 }
 0x494   : > { %v1447_v32 = vpop.xlane.xlu0 %1446  ;;  %v1776_v15 = vsel %vm740_vm1, %v3494_v57, 0.0 }
 0x495   : > { %2505 = vrcp.f32 %v1447_v32 }
 0x496   : > { %2507 = vpow2.f32 %v1756_v9 }
 0x497   : > { %v2502_v5 = vpop.eup %2501 }
 0x498   : > { %v1770_v24 = vsel %vm740_vm1, %v2502_v5, 0.0  ;;  %v2504_v30 = vpop.eup %2503 }
 0x499   : > { %1771 = vadd.xlane.f32.xlu1 %v1770_v24  ;;  %1777 = vadd.xlane.f32.xlu0 %v1776_v15  ;;  %v1462_v35 = vmul.f32 %v2504_v30, %v3419_v39  ;;  %v3530_v31 = vpop.f32.mrf.mxu0 }
 0x49a   : > { %v3526_v51 = vpop.f32.mrf.mxu1 }
 0x49b   : > { %v2506_v17 = vpop.eup %2505 }
 0x49c   : > { %v1463_v40 = vmul.f32 %v2506_v17, %v3447_v7  ;;  %v2508_v63 = vpop.eup %2507 }
 0x49d   : > { %v1779_v41 = vsel %vm740_vm1, %v2508_v63, 0.0 }
 0x49e   : > { %v1550_v27 = vpack.c.bf16 %v1463_v40, %v1462_v35 }
 0x4a0   : > { %2284 = vmatmul.msk.bf16.gmra.mxu0 %vm740_vm1, %v1550_v27  ;;  %2288 = vmatmul.msk.bf16.gmra.mxu1 %vm740_vm1, %v1550_v27 }
 0x4a1   : > { %1780 = vadd.xlane.f32.xlu1 %v1779_v41  ;;  %v3539_v24 = vpop.f32.mrf.mxu0 }
 0x4b6   : > { %v1763_v56 = vpop.xlane.xlu1 %1762 }
 0x4b7   : > { %2509 = vrcp.f32 %v1763_v56 }
 0x4bd   : > { %v2510_v7 = vpop.eup %2509 }
 0x4be   : > { %v1791_v28 = vmul.f32 %v2510_v7, %v3460_v54 }
 0x4e7   : > { %v1766_v22 = vpop.xlane.xlu2 %1765 }
 0x4ef   : > { %v1775_v20 = vpop.xlane.xlu2 %1774 }
 0x4fc   : > { %v1760_v39 = vpop.xlane.xlu0 %1759 }
 0x4fd   : > { %2511 = vrcp.f32 %v1760_v39 }
 0x503   : > { %v2512_v3 = vpop.eup %2511 }
 0x504   : > { %v1790_v44 = vmul.f32 %v2512_v3, %v2492_v45  ;;  %v1769_v19 = vpop.xlane.xlu0 %1768 }
 0x505   : > { %2513 = vrcp.f32 %v1769_v19 }
 0x506   : > { %v1881_v59 = vpack.c.bf16 %v1791_v28, %v1790_v44  ;;  %2515 = vrcp.f32 %v1766_v22 }
 0x508   : > { %2317 = vmatmul.msk.bf16.vlgmr.msra.gmra.mxu0 %vm740_vm1, %v1881_v59  ;;  %2321 = vmatmul.msk.bf16.vlgmr.msra.gmra.mxu1 %vm740_vm1, %v1881_v59 }
 0x50b   : > { %v2514_v46 = vpop.eup %2513 }
 0x50c   : > { %v2516_v11 = vpop.eup %2515  ;;  %v1793_v38 = vmul.f32 %v2514_v46, %v2498_v52  ;;  %v1772_v54 = vpop.xlane.xlu1 %1771 }
 0x50d   : > { %v1792_v55 = vmul.f32 %v2516_v11, %v3475_v37  ;;  %2517 = vrcp.f32 %v1772_v54  ;;  %v3532_v52 = vpop.f32.mrf.mxu1  ;;  %v1778_v9 = vpop.xlane.xlu0 %1777  ;;  %v1263_v54 = vadd.f32 %v3504_v1, %v3209_v61  ;;  %v1265_v1 = vadd.f32 %v3508_v13, %v3230_v43 }
 0x50e   : > { %2519 = vrcp.f32 %v1775_v20  ;;  %v1268_v43 = vadd.f32 %v3512_v29, %v3253_v14  ;;  %v1270_v14 = vadd.f32 %v3519_v6, %v3266_v0  ;;  %v1273_v0 = vadd.f32 %v3524_v10, %v3276_v12 }
 0x50f   : > { %v1882_v45 = vpack.c.bf16 %v1793_v38, %v1792_v55  ;;  %v1979_v55 = vld [vmem:[%s3654_s7] sm:$0x3]  ;;  %v1275_v12 = vadd.f32 %v3530_v31, %v3280_v16 }
 0x513   : > { %v2518_v62 = vpop.eup %2517 }
 0x514   : > { %v2520_v42 = vpop.eup %2519  ;;  %v1794_v37 = vmul.f32 %v2518_v62, %v2502_v5  ;;  %v1781_v47 = vpop.xlane.xlu1 %1780 }
 0x515   : > { %v1795_v58 = vmul.f32 %v2520_v42, %v3479_v18  ;;  %v3537_v32 = vpop.f32.mrf.mxu1  ;;  %2521 = vrcp.f32 %v1781_v47  ;;  %v3543_v5 = vpop.f32.mrf.mxu0  ;;  %v3567_v42 = vperm.slane %v1979_v55, 0 }
 0x516   : > { %2523 = vrcp.f32 %v1778_v9  ;;  %v1307_v16 = vadd.f32 %v3537_v32, %v3291_v26 }
 0x517   : > { %v1883_v50 = vpack.c.bf16 %v1795_v58, %v1794_v37  ;;  %v3569_v37 = vperm.slane %v1979_v55, 1 }
 0x518   : > { %2318 = vmatmul.msk.bf16.gmra.mxu0 %vm740_vm1, %v1882_v45  ;;  %2322 = vmatmul.msk.bf16.gmra.mxu1 %vm740_vm1, %v1882_v45  ;;  %v1292_v45 = vadd.f32 %v3506_v49, %v3213_v53  ;;  %v1294_v49 = vadd.f32 %v3510_v8, %v3232_v60  ;;  %v1297_v60 = vadd.f32 %v3514_v25, %v3255_v33 }
 0x519   : > { %v1299_v33 = vadd.f32 %v3521_v34, %v3268_v48  ;;  %v1302_v48 = vadd.f32 %v3526_v51, %v3278_v4  ;;  %v1304_v4 = vadd.f32 %v3532_v52, %v3282_v23  ;;  %v1278_v23 = vadd.f32 %v3539_v24, %v3289_v2 }
 0x51a   : > { %v1280_v2 = vadd.f32 %v3543_v5, %v3296_v21 }
 0x51b   : > { %v2522_v15 = vpop.eup %2521 }
 0x51c   : > { %v2524_v30 = vpop.eup %2523  ;;  %v1797_v17 = vmul.f32 %v2522_v15, %v2508_v63 }
 0x51d   : > { %v3541_v35 = vpop.f32.mrf.mxu1  ;;  %v1796_v18 = vmul.f32 %v2524_v30, %v3494_v57  ;;  %v1580_v27 = vpop.f32.mrf.mxu0 }
 0x51e   : > { %v1629_v20 = vadd.f32 %v1580_v27, %v1263_v54  ;;  %v1309_v26 = vadd.f32 %v3541_v35, %v3298_v36 }
 0x51f   : > { %v1884_v40 = vpack.c.bf16 %v1797_v17, %v1796_v18 }
 0x525   : > { %v1609_v41 = vpop.f32.mrf.mxu1  ;;  %v1582_v56 = vpop.f32.mrf.mxu0 }
 0x526   : > { %v1630_v62 = vadd.f32 %v1609_v41, %v1292_v45  ;;  %v1631_v15 = vadd.f32 %v1582_v56, %v1265_v1 }
 0x528   : > { %2319 = vmatmul.msk.bf16.gmra.mxu0 %vm740_vm1, %v1883_v50  ;;  %2323 = vmatmul.msk.bf16.gmra.mxu1 %vm740_vm1, %v1883_v50 }
 0x52d   : > { %v1611_v39 = vpop.f32.mrf.mxu1  ;;  %v1585_v7 = vpop.f32.mrf.mxu0 }
 0x52e   : > { %v1632_v30 = vadd.f32 %v1611_v39, %v1294_v49  ;;  %v1633_v13 = vadd.f32 %v1585_v7, %v1268_v43 }
 0x535   : > { %v1614_v3 = vpop.f32.mrf.mxu1  ;;  %v1587_v28 = vpop.f32.mrf.mxu0 }
 0x536   : > { %v1634_v8 = vadd.f32 %v1614_v3, %v1297_v60  ;;  %v1635_v29 = vadd.f32 %v1587_v28, %v1270_v14 }
 0x538   : > { %2320 = vmatmul.msk.bf16.gmra.mxu0 %vm740_vm1, %v1884_v40  ;;  %2324 = vmatmul.msk.bf16.gmra.mxu1 %vm740_vm1, %v1884_v40 }
 0x53d   : > { %v1616_v44 = vpop.f32.mrf.mxu1  ;;  %v1590_v63 = vpop.f32.mrf.mxu0 }
 0x53e   : > { %v1636_v25 = vadd.f32 %v1616_v44, %v1299_v33  ;;  %v1637_v6 = vadd.f32 %v1590_v63, %v1273_v0 }
 0x545   : > { %v1619_v59 = vpop.f32.mrf.mxu1  ;;  %v3548_v19 = vpop.f32.mrf.mxu0 }
 0x546   : > { %v1638_v34 = vadd.f32 %v1619_v59, %v1302_v48  ;;  %v1639_v10 = vadd.f32 %v3548_v19, %v1275_v12 }
 0x54d   : > { %v3550_v22 = vpop.f32.mrf.mxu1  ;;  %v3552_v57 = vpop.f32.mrf.mxu0 }
 0x54e   : > { %v1640_v51 = vadd.f32 %v3550_v22, %v1304_v4  ;;  %v1641_v31 = vadd.f32 %v3552_v57, %v1278_v23 }
 0x555   : > { %v3554_v46 = vpop.f32.mrf.mxu1  ;;  %v3556_v11 = vpop.f32.mrf.mxu0 }
 0x556   : > { %v1642_v52 = vadd.f32 %v3554_v46, %v1307_v16  ;;  %v1643_v32 = vadd.f32 %v3556_v11, %v1280_v2 }
 0x55d   : > { %v3558_v38 = vpop.f32.mrf.mxu1 }
 0x55e   : > { %v1644_v24 = vadd.f32 %v3558_v38, %v1309_v26 }
 0x585   : > { %v1914_v58 = vpop.f32.mrf.mxu0  ;;  %v1943_v47 = vpop.f32.mrf.mxu1 }
 0x586   : > { %v1963_v50 = vadd.f32 %v1914_v58, %v1629_v20  ;;  %v1964_v9 = vadd.f32 %v1943_v47, %v1630_v62 }
 0x588   : > { %v1985_v61 = vadd.f32 %v3567_v42, %v1963_v50  ;;  %v1986_v53 = vadd.f32 %v3569_v37, %v1964_v9 }
 0x58a   : > { %2001 = vst [vmem:[%s3576_s14] sm:$0xff] %v1985_v61 }
 0x58b   : > { %2002 = vst [vmem:[%s3576_s14 + $0x8] sm:$0xff] %v1986_v53 }
 0x58d   : > { %v1916_v17 = vpop.f32.mrf.mxu0  ;;  %v1945_v18 = vpop.f32.mrf.mxu1 }
 0x58e   : > { %v1965_v40 = vadd.f32 %v1916_v17, %v1631_v15  ;;  %v1966_v27 = vadd.f32 %v1945_v18, %v1632_v30 }
 0x590   : > { %v1987_v41 = vadd.f32 %v3567_v42, %v1965_v40  ;;  %v1988_v55 = vadd.f32 %v3569_v37, %v1966_v27 }
 0x592   : > { %2003 = vst [vmem:[%s3576_s14 + $0x10] sm:$0xff] %v1987_v41 }
 0x593   : > { %2004 = vst [vmem:[%s3576_s14 + $0x18] sm:$0xff] %v1988_v55 }
 0x595   : > { %v1919_v56 = vpop.f32.mrf.mxu0  ;;  %v1948_v39 = vpop.f32.mrf.mxu1 }
 0x596   : > { %v1967_v54 = vadd.f32 %v1919_v56, %v1633_v13  ;;  %v1968_v45 = vadd.f32 %v1948_v39, %v1634_v8 }
 0x598   : > { %v1989_v20 = vadd.f32 %v3567_v42, %v1967_v54  ;;  %v1990_v62 = vadd.f32 %v3569_v37, %v1968_v45 }
 0x59a   : > { %2005 = vst [vmem:[%s3576_s14 + $0x20] sm:$0xff] %v1989_v20 }
 0x59b   : > { %2006 = vst [vmem:[%s3576_s14 + $0x28] sm:$0xff] %v1990_v62 }
 0x59d   : > { %v1921_v7 = vpop.f32.mrf.mxu0  ;;  %v1950_v3 = vpop.f32.mrf.mxu1 }
 0x59e   : > { %v1969_v58 = vadd.f32 %v1921_v7, %v1635_v29  ;;  %v1970_v47 = vadd.f32 %v1950_v3, %v1636_v25 }
 0x5a0   : > { %v1991_v50 = vadd.f32 %v3567_v42, %v1969_v58  ;;  %v1992_v9 = vadd.f32 %v3569_v37, %v1970_v47 }
 0x5a2   : > { %2007 = vst [vmem:[%s3576_s14 + $0x30] sm:$0xff] %v1991_v50 }
 0x5a3   : > { %2008 = vst [vmem:[%s3576_s14 + $0x38] sm:$0xff] %v1992_v9 }
 0x5a5   : > { %v1924_v28 = vpop.f32.mrf.mxu0  ;;  %v1953_v44 = vpop.f32.mrf.mxu1 }
 0x5a6   : > { %v1971_v61 = vadd.f32 %v1924_v28, %v1637_v6  ;;  %v1972_v53 = vadd.f32 %v1953_v44, %v1638_v34 }
 0x5a8   : > { %v1993_v1 = vadd.f32 %v3567_v42, %v1971_v61  ;;  %v1994_v49 = vadd.f32 %v3569_v37, %v1972_v53 }
 0x5aa   : > { %2009 = vst [vmem:[%s3576_s14 + $0x40] sm:$0xff] %v1993_v1 }
 0x5ab   : > { %2010 = vst [vmem:[%s3576_s14 + $0x48] sm:$0xff] %v1994_v49 }
 0x5ad   : > { %v1926_v63 = vpop.f32.mrf.mxu0  ;;  %v1955_v59 = vpop.f32.mrf.mxu1 }
 0x5ae   : > { %v1973_v15 = vadd.f32 %v1926_v63, %v1639_v10  ;;  %v1974_v30 = vadd.f32 %v1955_v59, %v1640_v51 }
 0x5b0   : > { %v1995_v17 = vadd.f32 %v3567_v42, %v1973_v15  ;;  %v1996_v18 = vadd.f32 %v3569_v37, %v1974_v30 }
 0x5b2   : > { %2011 = vst [vmem:[%s3576_s14 + $0x50] sm:$0xff] %v1995_v17 }
 0x5b3   : > { %2012 = vst [vmem:[%s3576_s14 + $0x58] sm:$0xff] %v1996_v18 }
 0x5b5   : > { %v1929_v19 = vpop.f32.mrf.mxu0  ;;  %v1958_v22 = vpop.f32.mrf.mxu1 }
 0x5b6   : > { %v1975_v40 = vadd.f32 %v1929_v19, %v1641_v31  ;;  %v1976_v27 = vadd.f32 %v1958_v22, %v1642_v52 }
 0x5b8   : > { %v1997_v41 = vadd.f32 %v3567_v42, %v1975_v40  ;;  %v1998_v55 = vadd.f32 %v3569_v37, %v1976_v27 }
 0x5ba   : > { %2013 = vst [vmem:[%s3576_s14 + $0x60] sm:$0xff] %v1997_v41 }
 0x5bb   : > { %2014 = vst [vmem:[%s3576_s14 + $0x68] sm:$0xff] %v1998_v55 }
 0x5bd   : > { %v1931_v57 = vpop.f32.mrf.mxu0  ;;  %v1960_v46 = vpop.f32.mrf.mxu1 }
 0x5be   : > { %v1977_v43 = vadd.f32 %v1931_v57, %v1643_v32  ;;  %v1978_v60 = vadd.f32 %v1960_v46, %v1644_v24 }
 0x5c0   : > { %v1999_v13 = vadd.f32 %v3567_v42, %v1977_v43  ;;  %v2000_v8 = vadd.f32 %v3569_v37, %v1978_v60 }
 0x5c2   : > { %2015 = vst [vmem:[%s3576_s14 + $0x70] sm:$0xff] %v1999_v13 }
 0x5c3   : > { %2016 = vst [vmem:[%s3576_s14 + $0x78] sm:$0xff] %v2000_v8 }
 0x5c4 PF: > { %s18_s27 = sadd.s32 1, %s2537_s27  }
 0x5c5   : > { %p15_p5 = scmp.ge.s32.totalorder %s18_s27, 4  }
 0x5c7   :  { %17 = sbr.rel (!%p15_p5) target bundleno = 1 (0x1), region = 88 }

// kernel: stgat_cl_forward.5
= control target key start
LH: loop header
LB: loop body
LE: loop exit
PB: predicated region body
PF: predicated region fallthrough
CT: control target
= control target key end

     0   :  { %s7556_s0 = inlined_call_operand.vmem [shape: f32[256,24], index: 0, kind: input, shape index: {}]   ;;  %s7557_s1 = inlined_call_operand.vmem [shape: f32[256,128], index: 1, kind: input, shape index: {}]   ;;  %s7558_s2 = inlined_call_operand.vmem [shape: f32[256,96], index: 2, kind: input, shape index: {}]   ;;  %s7559_s3 = inlined_call_operand.vmem [shape: bf16[24,32], index: 3, kind: input, shape index: {}]   ;;  %s7560_s4 = inlined_call_operand.vmem [shape: f32[1,32], index: 4, kind: input, shape index: {}]   ;;  %s7561_s5 = inlined_call_operand.vmem [shape: bf16[128,32], index: 5, kind: input, shape index: {}]   ;;  %s7562_s6 = inlined_call_operand.vmem [shape: f32[1,32], index: 6, kind: input, shape index: {}]   ;;  %s7563_s7 = inlined_call_operand.vmem [shape: bf16[3,160,160], index: 7, kind: input, shape index: {}]   ;;  %s7564_s8 = inlined_call_operand.vmem [shape: f32[3,1,160], index: 8, kind: input, shape index: {}]   ;;  %s7565_s9 = inlined_call_operand.vmem [shape: bf16[3,160,160], index: 9, kind: input, shape index: {}]   ;;  %s7566_s10 = inlined_call_operand.vmem [shape: f32[3,1,160], index: 10, kind: input, shape index: {}]   ;;  %s7567_s11 = inlined_call_operand.vmem [shape: bf16[160,4], index: 11, kind: input, shape index: {}]   ;;  %s7568_s12 = inlined_call_operand.vmem [shape: f32[4,1], index: 12, kind: input, shape index: {}]   ;;  %s7569_s13 = inlined_call_operand.vmem [shape: f32[128,1], index: 13, kind: input, shape index: {}]   ;;  %s7570_s14 = inlined_call_operand.vmem [shape: f32[128,1], index: 14, kind: input, shape index: {}]   ;;  %s7571_s15 = inlined_call_operand.vmem [shape: bf16[8,128], index: 15, kind: input, shape index: {}]   ;;  %s7572_s16 = inlined_call_operand.<no memory space> [shape: f32[1,1], index: 16, kind: input, shape index: {}]   ;;  %s7573_s17 = inlined_call_operand.vmem [shape: f32[2,4,128], index: 17, kind: output, shape index: {0}]   ;;  %s7574_s18 = inlined_call_operand.hbm [shape: f32[2,8,160], index: 18, kind: output, shape index: {1}]  }
   0x1   :  { %7619 = sst [smem:[#allocation48_spill]] %s7556_s0  ;;  %v24_v0 = vstv %s7572_s16 }
   0x2   :  { %7620 = sst [smem:[#allocation49_spill]] %s7557_s1  ;;  %25 = vst [vmem:[#allocation2] sm:$0x1] %v24_v0 }
   0x3   :  { %7621 = sst [smem:[#allocation50_spill]] %s7558_s2 }
   0x4   :  { %7622 = sst [smem:[#allocation51_spill]] %s7559_s3 }
   0x5   :  { %26 = vsyncpa [#allocation4], 0 }
   0x6   :  { %28 = vsyncpa [#allocation4 + $0x1], 0  ;;  %s5204_s29 = smov 0   ;;  %s5206_s30 = smov 0  }
   0x7   :  { %s5208_s0 = smov 0   ;;  %s5210_s19 = smov 0  }
   0x8 LB: > { %7623 = sst [smem:[#allocation6_spill]] %s5088_s29  ;;  %s5225_s16 = sadd.s32 4294967295, %s5100_s19   ;;  %s5100_s19 = sphi %s5210_s19, %s7738_s19   ;;  %s5096_s0 = sphi %s5208_s0, %s7740_s0   ;;  %s5092_s30 = sphi %s5206_s30, %s7742_s30   ;;  %s5088_s29 = sphi %s5204_s29, %s7741_s29  }
   0x9   : > { %7624 = sst [smem:[#allocation7_spill]] %s5096_s0  ;;  %s4070_s1 = sadd.s32 4294967294, %s5100_s19  }
   0xa   : > { %s5229_s20 = sadd.s32 1, %s5100_s19   ;;  %s439_s21 = sadd.s32 1, %s5096_s0 }
   0xb   : > { %7625 = sst [smem:[#allocation8_spill]] %s5229_s20  ;;  %s436_s22 = ssub.s32 %s5100_s19, %s5229_s20 }
   0xc   : > { %p449_p0 = scmp.ne.s32.totalorder %s5096_s0, %s5092_s30  ;;  %p437_p1 = scmp.eq.s32.totalorder %s436_s22, 0 }
   0xd   : > { %p450_p2 = scmp.eq.s32.totalorder %s5225_s16, 1  ;;  %p455_p3 = scmp.ne.s32.totalorder %s5092_s30, %s5088_s29 }
   0xe   : > { %p456_p4 = scmp.eq.s32.totalorder %s4070_s1, 1  ;;  %p4073_p7 = scmp.ge.s32.totalorder %s5100_s19, 1 }
   0xf   : > { %s5240_s2 = scalar_select %p437_p1, %s5096_s0, %s439_s21  }
  0x10   : > { %p5242_p5 = por %p450_p2, %p449_p0  ;;  %p5246_p6 = por %p456_p4, %p455_p3 }
  0x11   : > { %7626 = sst [smem:[#allocation9_spill]] %s5240_s2  ;;  %p543_p8 = scmp.lt.s32.totalorder %s5100_s19, 3 }
  0x12   : > { %s7628_s24 = scalar_select %p5246_p6, 1, 0 }
  0x13   : > { %p544_p9 = pnand %p4073_p7, %p543_p8 }
  0x14   : > { %7629 = sst [smem:[#allocation10_spill]] %s7628_s24 }
  0x15   : > { %547 = sbr.rel (%p544_p9) target bundleno = 1682 (0x692), region = 88 }
  0x1a   : > { %s7630_s3 = sld [smem:[#allocation51_spill]]  ;;  %s5256_s27 = sshll.u32 %s5225_s16, 4  ;;  %vm723_vm0 = vcmask 1043456   ;;  %vm698_vm1 = vcmask 195584   ;;  %v4840_v9 = vld [vmem:[%s7561_s5 + $0x38] sm:$0xff]  ;;  %v4839_v10 = vld [vmem:[%s7561_s5 + $0x30] sm:$0xff] }
  0x1b   : > { %p612_p10 = scmp.lt.s32.totalorder %s5256_s27, 31  ;;  %s7631_s2 = sld [smem:[#allocation48_spill]]  ;;  %v4838_v11 = vld [vmem:[%s7561_s5 + $0x28] sm:$0xff]  ;;  %v4837_v12 = vld [vmem:[%s7561_s5 + $0x20] sm:$0xff]  ;;  %v4836_v16 = vld [vmem:[%s7561_s5 + $0x18] sm:$0xff]  ;;  %vm1037_vm2 = vcmask 261120  }
  0x1c   : > { %v4835_v17 = vld [vmem:[%s7561_s5 + $0x10] sm:$0xff]  ;;  %v4834_v18 = vld [vmem:[%s7561_s5 + $0x8] sm:$0xff]  ;;  %s7632_s24 = sld [smem:[#allocation49_spill]]  ;;  %v4833_v19 = vld [vmem:[%s7561_s5] sm:$0xff]  ;;  %s5102_s25 = smov 64   ;;  %vm1054_vm3 = vcmask 523264  }
  0x1d   : > { %s613_s28 = scalar_select %p612_p10, %s5256_s27, 31 }
  0x1e   : > { %s7633_s21 = sld [smem:[#allocation50_spill]]  ;;  %p629_p11 = scmp.lt.s32.totalorder %s5225_s16, 1 }
  0x1f   : > { %s5260_s1 = sshll.u32 %s613_s28, 3 }
  0x20   : > { %v684_v1 = vld [vmem:[%s7630_s3 + $0x8] sm:$0xf]  ;;  %v4832_v5 = vld [vmem:[%s7630_s3] sm:$0xff]  ;;  %s7744_s16 = smov (!%p629_p11, %s5225_s16), 1 }
  0x21   : > { %v694_v2 = vunpack.c.l.b16 %v684_v1  ;;  %s5269_s0 = scalar_lea.vmem %s7631_s2, %s5260_s1  ;;  %s4081_s28 = sshll.u32 %s7744_s16, 2 }
  0x22   : > { %v646_v6 = vld [vmem:[%s5269_s0 + $0x60] sm:$0xff]  ;;  %v647_v7 = vld [vmem:[%s5269_s0 + $0x68] sm:$0xff]  ;;  %v648_v13 = vld [vmem:[%s5269_s0 + $0x70] sm:$0xff]  ;;  %s5302_s29 = scalar_lea.vmem %s7632_s24, %s5260_s1 }
  0x23   : > { %v696_v3 = vpack.c.b16 %v694_v2, %v694_v2  ;;  %v656_v8 = vpack.c.bf16 %v647_v7, %v646_v6  ;;  %v649_v14 = vld [vmem:[%s5269_s0 + $0x78] sm:$0xff]  ;;  %v658_v20 = vld [vmem:[%s5302_s29] sm:$0xff]  ;;  %v659_v21 = vld [vmem:[%s5302_s29 + $0x8] sm:$0xff] }
  0x24   : > { %v657_v15 = vpack.c.bf16 %v649_v14, %v648_v13  ;;  %v674_v22 = vpack.c.bf16 %v659_v21, %v658_v20  ;;  %v660_v23 = vld [vmem:[%s5302_s29 + $0x10] sm:$0xff]  ;;  %v661_v24 = vld [vmem:[%s5302_s29 + $0x18] sm:$0xff]  ;;  %v662_v26 = vld [vmem:[%s5302_s29 + $0x20] sm:$0xff]  ;;  %s5329_s22 = scalar_lea.vmem %s7633_s21, %s5260_s1  ;;  %s632_s21 = scalar_lea.vmem %s7573_s17, %s4081_s28 }
  0x25   : > { %v725_v4 = vsel %vm723_vm0, %v696_v3, 0  ;;  %v675_v25 = vpack.c.bf16 %v661_v24, %v660_v23  ;;  %v663_v27 = vld [vmem:[%s5302_s29 + $0x28] sm:$0xff]  ;;  %v664_v29 = vld [vmem:[%s5302_s29 + $0x30] sm:$0xff]  ;;  %v665_v30 = vld [vmem:[%s5302_s29 + $0x38] sm:$0xff]  ;;  %s608_s1 = sand.u32 1, %s5092_s30  }
  0x26   : > { %4972 = vmatpush.bf16.msra.mxu1 %v725_v4  ;;  %733 = vmatpush.bf16.msra.mxu0 %v725_v4  ;;  %v676_v28 = vpack.c.bf16 %v663_v27, %v662_v26  ;;  %v677_v31 = vpack.c.bf16 %v665_v30, %v664_v29  ;;  %v634_v32 = vld [vmem:[%s5269_s0] sm:$0xff]  ;;  %v635_v33 = vld [vmem:[%s5269_s0 + $0x8] sm:$0xff]  ;;  %v636_v38 = vld [vmem:[%s5269_s0 + $0x10] sm:$0xff]  ;;  %s4074_s3 = sshll.u32 %s608_s1, 4  ;;  %s3944_s20 = scalar_lea.sflag [#allocation4], %s608_s1 }
  0x27   : > { %v650_v34 = vpack.c.bf16 %v635_v33, %v634_v32  ;;  %v666_v35 = vld [vmem:[%s5302_s29 + $0x40] sm:$0xff]  ;;  %v667_v36 = vld [vmem:[%s5302_s29 + $0x48] sm:$0xff]  ;;  %v637_v39 = vld [vmem:[%s5269_s0 + $0x18] sm:$0xff] }
  0x28   : > { %v678_v37 = vpack.c.bf16 %v667_v36, %v666_v35  ;;  %v651_v40 = vpack.c.bf16 %v637_v39, %v636_v38  ;;  %v668_v41 = vld [vmem:[%s5302_s29 + $0x50] sm:$0xff]  ;;  %v669_v42 = vld [vmem:[%s5302_s29 + $0x58] sm:$0xff]  ;;  %v893_v44 = vld [vmem:[%s5329_s22] sm:$0xff] }
  0x29   : > { %v679_v43 = vpack.c.bf16 %v669_v42, %v668_v41  ;;  %989 = vrot.lane.b32.xlu1 %v893_v44, %s5102_s25  ;;  %v894_v45 = vld [vmem:[%s5329_s22 + $0x8] sm:$0xff]  ;;  %v638_v46 = vld [vmem:[%s5269_s0 + $0x20] sm:$0xff]  ;;  %v896_v53 = vld [vmem:[%s5329_s22 + $0x18] sm:$0xff] }
  0x2a   : > { %4973 = vmatpush.bf16.msra.mxu1 %v4832_v5  ;;  %734 = vmatpush.bf16.msra.mxu0 %v4832_v5  ;;  %v639_v47 = vld [vmem:[%s5269_s0 + $0x28] sm:$0xff]  ;;  %v670_v49 = vld [vmem:[%s5302_s29 + $0x60] sm:$0xff]  ;;  %v640_v55 = vld [vmem:[%s5269_s0 + $0x30] sm:$0xff] }
  0x2b   : > { %v652_v48 = vpack.c.bf16 %v639_v47, %v638_v46  ;;  %v671_v50 = vld [vmem:[%s5302_s29 + $0x68] sm:$0xff]  ;;  %v641_v56 = vld [vmem:[%s5269_s0 + $0x38] sm:$0xff]  ;;  %v672_v57 = vld [vmem:[%s5302_s29 + $0x70] sm:$0xff] }
  0x2c   : > { %v680_v51 = vpack.c.bf16 %v671_v50, %v670_v49  ;;  %v673_v58 = vld [vmem:[%s5302_s29 + $0x78] sm:$0xff]  ;;  %v653_v59 = vpack.c.bf16 %v641_v56, %v640_v55  ;;  %v642_v63 = vld [vmem:[%s5269_s0 + $0x40] sm:$0xff]  ;;  %v643_v0 = vld [vmem:[%s5269_s0 + $0x48] sm:$0xff]  ;;  %s5103_s29 = smov 32  }
  0x2d   : > { %4092 = vmatmul.msk.bf16.vlgmr.msra.gmra.mxu1 %vm698_vm1, %v656_v8  ;;  %4086 = vmatmul.msk.bf16.vlgmr.msra.gmra.mxu0 %vm698_vm1, %v650_v34  ;;  %v681_v60 = vpack.c.bf16 %v673_v58, %v672_v57  ;;  %v654_v1 = vpack.c.bf16 %v643_v0, %v642_v63  ;;  %v5360_v2 = vld [vmem:[%s7562_s6] ss:$0 sm:$0xff]  ;;  %v644_v7 = vld [vmem:[%s5269_s0 + $0x50] sm:$0xff]  ;;  %v645_v8 = vld [vmem:[%s5269_s0 + $0x58] sm:$0xff] }
  0x2e   : > { %844 = vmatpush.bf16.msra.mxu1 %v4840_v9  ;;  %v655_v9 = vpack.c.bf16 %v645_v8, %v644_v7  ;;  %v898_v14 = vld [vmem:[%s5329_s22 + $0x28] sm:$0xff]  ;;  %v900_v21 = vld [vmem:[%s5329_s22 + $0x38] sm:$0xff]  ;;  %v901_v24 = vld [vmem:[%s5329_s22 + $0x40] sm:$0xff] }
  0x2f   : > { %v902_v27 = vld [vmem:[%s5329_s22 + $0x48] sm:$0xff]  ;;  %v903_v30 = vld [vmem:[%s5329_s22 + $0x50] sm:$0xff]  ;;  %v4856_v33 = vld [vmem:[%s7563_s7 + $0x74] sm:$0xf0] }
  0x30   : > { %v4184_v32 = vld [vmem:[%s7563_s7 + $0x70] sm:$0xf]  ;;  %v4855_v34 = vld [vmem:[%s7563_s7 + $0x74] sm:$0xf]  ;;  %v4186_v36 = vld [vmem:[%s7563_s7 + $0x78] sm:$0xf0] }
  0x31   : > { %991 = vrot.lane.b32.xlu1 %v894_v45, %s5102_s25  ;;  %v4185_v35 = vor.u32 %v4856_v33, %v4184_v32  ;;  %v4176_v38 = vld [vmem:[%s7563_s7 + $0x60] sm:$0xf]  ;;  %v4854_v39 = vld [vmem:[%s7563_s7 + $0x64] sm:$0xf0]  ;;  %v4853_v41 = vld [vmem:[%s7563_s7 + $0x64] sm:$0xf] }
  0x32   : > { %845 = vmatpush.bf16.msra.mxu1 %v4839_v10  ;;  %v4178_v42 = vld [vmem:[%s7563_s7 + $0x68] sm:$0xf0]  ;;  %v904_v45 = vld [vmem:[%s5329_s22 + $0x58] sm:$0xff]  ;;  %v4168_v47 = vld [vmem:[%s7563_s7 + $0x50] sm:$0xf] }
  0x33   : > { %1237 = vmatpush.bf16.msra.mxu2 %v4185_v35  ;;  %v4851_v49 = vld [vmem:[%s7563_s7 + $0x54] sm:$0xf]  ;;  %v4160_v55 = vld [vmem:[%s7563_s7 + $0x40] sm:$0xf]  ;;  %v4850_v56 = vld [vmem:[%s7563_s7 + $0x44] sm:$0xf0] }
  0x34   : > { %v4849_v57 = vld [vmem:[%s7563_s7 + $0x44] sm:$0xf]  ;;  %v4161_v58 = vor.u32 %v4850_v56, %v4160_v55  ;;  %v4154_v7 = vld [vmem:[%s7563_s7 + $0x38] sm:$0xf0]  ;;  %v907_v32 = vld [vmem:[%s5329_s22 + $0x70] sm:$0xff] }
  0x35   : > { %v905_v0 = vld [vmem:[%s5329_s22 + $0x60] sm:$0xff]  ;;  %v4200_v35 = vld [vmem:[%s7563_s7 + $0x90] sm:$0xf] }
  0x36   : > { %846 = vmatpush.bf16.msra.mxu1 %v4838_v11  ;;  %v895_v11 = vld [vmem:[%s5329_s22 + $0x10] sm:$0xff] }
  0x39   : > { %995 = vrot.lane.b32.xlu1 %v896_v53, %s5102_s25 }
  0x3a   : > { %847 = vmatpush.bf16.msra.mxu1 %v4837_v12 }
  0x3d   : > { %4093 = vmatmul.msk.bf16.gmra.mxu1 %vm698_vm1, %v657_v15  ;;  %4087 = vmatmul.msk.bf16.gmra.mxu0 %vm698_vm1, %v651_v40  ;;  %v4177_v40 = vor.u32 %v4854_v39, %v4176_v38  ;;  %v4858_v39 = vld [vmem:[%s7563_s7 + $0x84] sm:$0xf0] }
  0x3e   : > { %848 = vmatpush.bf16.msra.mxu1 %v4836_v16 }
  0x3f   : > { %1238 = vmatpush.bf16.msra.mxu2 %v4177_v40 }
  0x42   : > { %849 = vmatpush.bf16.msra.mxu1 %v4835_v17  ;;  %v897_v17 = vld [vmem:[%s5329_s22 + $0x20] sm:$0xff] }
  0x46   : > { %850 = vmatpush.bf16.msra.mxu1 %v4834_v18 }
  0x4a   : > { %851 = vmatpush.bf16.msra.mxu1 %v4833_v19  ;;  %v899_v19 = vld [vmem:[%s5329_s22 + $0x30] sm:$0xff] }
  0x4d   : > { %852 = vmatmul.bf16.vlgmr.msra.gmra.mxu1 %v674_v22  ;;  %4088 = vmatmul.msk.bf16.gmra.mxu0 %vm698_vm1, %v652_v48  ;;  %v4852_v48 = vld [vmem:[%s7563_s7 + $0x54] sm:$0xf0] }
  0x4e   : > { %v4169_v50 = vor.u32 %v4852_v48, %v4168_v47 }
  0x50   : > { %1239 = vmatpush.bf16.msra.mxu2 %v4169_v50 }
  0x54   : > { %1240 = vmatpush.bf16.msra.mxu2 %v4161_v58 }
  0x5d   : > { %857 = vmatmul.bf16.gmra.mxu1 %v675_v25  ;;  %4089 = vmatmul.msk.bf16.gmra.mxu0 %vm698_vm1, %v653_v59  ;;  %v4162_v59 = vld [vmem:[%s7563_s7 + $0x48] sm:$0xf0] }
  0x6d   : > { %862 = vmatmul.bf16.gmra.mxu1 %v676_v28  ;;  %4090 = vmatmul.msk.bf16.gmra.mxu0 %vm698_vm1, %v654_v1 }
  0x7d   : > { %867 = vmatmul.bf16.gmra.mxu1 %v677_v31  ;;  %4091 = vmatmul.msk.bf16.gmra.mxu0 %vm698_vm1, %v655_v9  ;;  %v4144_v9 = vld [vmem:[%s7563_s7 + $0x20] sm:$0xf] }
  0x8d   : > { %872 = vmatmul.bf16.gmra.mxu1 %v678_v37  ;;  %v4189_v37 = vor.u32 %v4855_v34, %v4186_v36  ;;  %v4860_v36 = vld [vmem:[%s7563_s7 + $0x94] sm:$0xf0] }
  0x8e   : > { %v4201_v38 = vor.u32 %v4860_v36, %v4200_v35 }
  0x8f   : > { %1335 = vmatpush.bf16.msrb.mxu0 %v4189_v37  ;;  %v4192_v37 = vld [vmem:[%s7563_s7 + $0x80] sm:$0xf] }
  0x90   : > { %4974 = vmatpush.bf16.msra.mxu3 %v4201_v38 }
  0x9b   : > { %v5530_v47 = vpop.permute.xlu1 %989 }
  0x9d   : > { %877 = vmatmul.bf16.gmra.mxu1 %v679_v43  ;;  %v4181_v43 = vor.u32 %v4853_v41, %v4178_v42  ;;  %v908_v41 = vld [vmem:[%s5329_s22 + $0x78] sm:$0xff] }
  0x9f   : > { %1336 = vmatpush.bf16.msrb.mxu0 %v4181_v43  ;;  %v4193_v43 = vor.u32 %v4858_v39, %v4192_v37 }
  0xa1   : > { %4975 = vmatpush.bf16.msra.mxu3 %v4193_v43 }
  0xaa   : > { %v5340_v52 = vpop.f32.mrf.mxu1 }
  0xad   : > { %882 = vmatmul.bf16.gmra.mxu1 %v680_v51  ;;  %v4170_v51 = vld [vmem:[%s7563_s7 + $0x58] sm:$0xf0] }
  0xae   : > { %v4173_v53 = vor.u32 %v4851_v49, %v4170_v51  ;;  %v5535_v49 = vld [vmem:[%s7560_s4] ss:$0 sm:$0xff] }
  0xb0   : > { %1337 = vmatpush.bf16.msrb.mxu0 %v4173_v53 }
  0xb2   : > { %v5344_v54 = vpop.f32.mrf.mxu1 }
  0xba   : > { %v5351_v61 = vpop.f32.mrf.mxu1 }
  0xbd   : > { %887 = vmatmul.bf16.gmra.mxu1 %v681_v60  ;;  %v4165_v60 = vor.u32 %v4849_v57, %v4162_v59 }
  0xbf   : > { %1338 = vmatpush.bf16.msrb.mxu0 %v4165_v60  ;;  %v5542_v60 = vpop.permute.xlu1 %991 }
  0xc2   : > { %v5353_v62 = vpop.f32.mrf.mxu1 }
  0xca   : > { %v853_v3 = vpop.f32.mrf.mxu1 }
  0xcb   : > { %v854_v4 = vadd.f32 %v5360_v2, %v853_v3  ;;  %v4152_v3 = vld [vmem:[%s7563_s7 + $0x30] sm:$0xf] }
  0xcd   : > { %925 = vrot.lane.b32.xlu0 %v854_v4, %s5103_s29  ;;  %v4848_v4 = vld [vmem:[%s7563_s7 + $0x34] sm:$0xf0] }
  0xd2   : > { %v855_v5 = vpop.f32.mrf.mxu1 }
  0xd3   : > { %v856_v6 = vadd.f32 %v5360_v2, %v855_v5  ;;  %v4847_v5 = vld [vmem:[%s7563_s7 + $0x34] sm:$0xf] }
  0xd4   : > { %v4157_v8 = vor.u32 %v4847_v5, %v4154_v7 }
  0xd5   : > { %927 = vrot.lane.b32.xlu0 %v856_v6, %s5103_s29  ;;  %v4153_v6 = vor.u32 %v4848_v4, %v4152_v3 }
  0xd6   : > { %1339 = vmatpush.bf16.msrb.mxu0 %v4157_v8 }
  0xd7   : > { %1241 = vmatpush.bf16.msra.mxu2 %v4153_v6 }
  0xda   : > { %v858_v10 = vpop.f32.mrf.mxu1 }
  0xdb   : > { %v859_v12 = vadd.f32 %v5360_v2, %v858_v10  ;;  %v4846_v10 = vld [vmem:[%s7563_s7 + $0x24] sm:$0xf0] }
  0xdd   : > { %929 = vrot.lane.b32.xlu2 %v859_v12, %s5103_s29  ;;  %993 = vrot.lane.b32.xlu0 %v895_v11, %s5102_s25  ;;  %v4845_v11 = vld [vmem:[%s7563_s7 + $0x24] sm:$0xf]  ;;  %v4145_v12 = vor.u32 %v4846_v10, %v4144_v9 }
  0xdf   : > { %1242 = vmatpush.bf16.msra.mxu2 %v4145_v12 }
  0xe2   : > { %v860_v13 = vpop.f32.mrf.mxu1 }
  0xe3   : > { %v861_v15 = vadd.f32 %v5360_v2, %v860_v13  ;;  %v4146_v13 = vld [vmem:[%s7563_s7 + $0x28] sm:$0xf0] }
  0xe5   : > { %931 = vrot.lane.b32.xlu2 %v861_v15, %s5103_s29  ;;  %999 = vrot.lane.b32.xlu0 %v898_v14, %s5102_s25  ;;  %v4149_v14 = vor.u32 %v4845_v11, %v4146_v13  ;;  %v5561_v11 = vpop.permute.xlu1 %995 }
  0xe7   : > { %1340 = vmatpush.bf16.msrb.mxu0 %v4149_v14 }
  0xea   : > { %v863_v16 = vpop.f32.mrf.mxu1 }
  0xeb   : > { %v864_v18 = vadd.f32 %v5360_v2, %v863_v16  ;;  %v906_v16 = vld [vmem:[%s5329_s22 + $0x68] sm:$0xff] }
  0xed   : > { %933 = vrot.lane.b32.xlu1 %v864_v18, %s5103_s29  ;;  %997 = vrot.lane.b32.xlu2 %v897_v17, %s5102_s25  ;;  %v736_v18 = vpop.f32.mrf.mxu0 }
  0xee   : > { %1001 = vrot.lane.b32.xlu0 %v899_v19, %s5102_s25  ;;  %v4136_v19 = vld [vmem:[%s7563_s7 + $0x10] sm:$0xf]  ;;  %v737_v51 = vadd.f32 %v5535_v49, %v736_v18 }
  0xf2   : > { %v865_v20 = vpop.f32.mrf.mxu1 }
  0xf3   : > { %v866_v22 = vadd.f32 %v5360_v2, %v865_v20  ;;  %v4844_v20 = vld [vmem:[%s7563_s7 + $0x14] sm:$0xf0] }
  0xf5   : > { %1003 = vrot.lane.b32.xlu1 %v900_v21, %s5102_s25  ;;  %935 = vrot.lane.b32.xlu2 %v866_v22, %s5103_s29  ;;  %v4843_v21 = vld [vmem:[%s7563_s7 + $0x14] sm:$0xf]  ;;  %v4137_v22 = vor.u32 %v4844_v20, %v4136_v19  ;;  %v738_v34 = vpop.f32.mrf.mxu0 }
  0xf6   : > { %v739_v57 = vadd.f32 %v5535_v49, %v738_v34 }
  0xf7   : > { %1243 = vmatpush.bf16.msra.mxu2 %v4137_v22 }
  0xfa   : > { %v868_v23 = vpop.f32.mrf.mxu1 }
  0xfb   : > { %v869_v25 = vadd.f32 %v5360_v2, %v868_v23  ;;  %v4138_v23 = vld [vmem:[%s7563_s7 + $0x18] sm:$0xf0] }
  0xfd   : > { %937 = vrot.lane.b32.xlu2 %v869_v25, %s5103_s29  ;;  %1005 = vrot.lane.b32.xlu1 %v901_v24, %s5102_s25  ;;  %v4141_v24 = vor.u32 %v4843_v21, %v4138_v23  ;;  %v4128_v25 = vld [vmem:[%s7563_s7] sm:$0xf] }
  0xff   : > { %1341 = vmatpush.bf16.msrb.mxu0 %v4141_v24 }
 0x102   : > { %v870_v26 = vpop.f32.mrf.mxu1 }
 0x103   : > { %v871_v28 = vadd.f32 %v5360_v2, %v870_v26  ;;  %v4842_v26 = vld [vmem:[%s7563_s7 + $0x4] sm:$0xf0] }
 0x105   : > { %939 = vrot.lane.b32.xlu0 %v871_v28, %s5103_s29  ;;  %1007 = vrot.lane.b32.xlu2 %v902_v27, %s5102_s25  ;;  %v4841_v27 = vld [vmem:[%s7563_s7 + $0x4] sm:$0xf]  ;;  %v4129_v28 = vor.u32 %v4842_v26, %v4128_v25 }
 0x107   : > { %1244 = vmatpush.bf16.msra.mxu2 %v4129_v28 }
 0x10a   : > { %v873_v29 = vpop.f32.mrf.mxu1 }
 0x10b   : > { %v874_v31 = vadd.f32 %v5360_v2, %v873_v29  ;;  %v4130_v29 = vld [vmem:[%s7563_s7 + $0x8] sm:$0xf0]  ;;  %1292 = vmatpush.bf16.msrb.mxu2 %v4201_v38 }
 0x10d   : > { %941 = vrot.lane.b32.xlu0 %v874_v31, %s5103_s29  ;;  %1009 = vrot.lane.b32.xlu2 %v903_v30, %s5102_s25  ;;  %v4133_v30 = vor.u32 %v4841_v27, %v4130_v29 }
 0x10f   : > { %1342 = vmatpush.bf16.msrb.mxu0 %v4133_v30  ;;  %1293 = vmatpush.bf16.msrb.mxu2 %v4193_v43 }
 0x112   : > { %v875_v44 = vpop.f32.mrf.mxu1 }
 0x113   : > { %v876_v46 = vadd.f32 %v5360_v2, %v875_v44  ;;  %v741_v44 = vpop.f32.mrf.mxu0 }
 0x114   : > { %v742_v6 = vadd.f32 %v5535_v49, %v741_v44 }
 0x115   : > { %943 = vrot.lane.b32.xlu1 %v876_v46, %s5103_s29  ;;  %1011 = vrot.lane.b32.xlu0 %v904_v45, %s5102_s25 }
 0x11a   : > { %v878_v63 = vpop.f32.mrf.mxu1 }
 0x11b   : > { %v879_v1 = vadd.f32 %v5360_v2, %v878_v63  ;;  %v743_v50 = vpop.f32.mrf.mxu0 }
 0x11c   : > { %v744_v7 = vadd.f32 %v5535_v49, %v743_v50 }
 0x11d   : > { %945 = vrot.lane.b32.xlu1 %v879_v1, %s5103_s29  ;;  %1013 = vrot.lane.b32.xlu0 %v905_v0, %s5102_s25 }
 0x122   : > { %v880_v15 = vpop.f32.mrf.mxu1 }
 0x123   : > { %v881_v17 = vadd.f32 %v5360_v2, %v880_v15  ;;  %v746_v3 = vpop.f32.mrf.mxu0 }
 0x124   : > { %v747_v20 = vadd.f32 %v5535_v49, %v746_v3 }
 0x125   : > { %1015 = vrot.lane.b32.xlu1 %v906_v16, %s5102_s25  ;;  %947 = vrot.lane.b32.xlu2 %v881_v17, %s5103_s29 }
 0x12a   : > { %v883_v31 = vpop.f32.mrf.mxu1 }
 0x12b   : > { %v884_v33 = vadd.f32 %v5360_v2, %v883_v31  ;;  %v748_v8 = vpop.f32.mrf.mxu0 }
 0x12c   : > { %v749_v22 = vadd.f32 %v5535_v49, %v748_v8 }
 0x12d   : > { %949 = vrot.lane.b32.xlu2 %v884_v33, %s5103_s29  ;;  %1017 = vrot.lane.b32.xlu1 %v907_v32, %s5102_s25 }
 0x132   : > { %v885_v40 = vpop.f32.mrf.mxu1 }
 0x133   : > { %v886_v42 = vadd.f32 %v5360_v2, %v885_v40  ;;  %v751_v18 = vpop.f32.mrf.mxu0 }
 0x134   : > { %v752_v35 = vadd.f32 %v5535_v49, %v751_v18 }
 0x135   : > { %951 = vrot.lane.b32.xlu0 %v886_v42, %s5103_s29  ;;  %1019 = vrot.lane.b32.xlu2 %v908_v41, %s5102_s25  ;;  %s3958_s25 = scalar_lea.hbm %s7574_s18, %s5256_s27 }
 0x136   : > { %s3962_s26 = sshll.u32 %s3958_s25, 4  ;;  %s3963_s26 = int_to_ptr.hbm [resolvable:$true] %s3962_s26 }
 0x137   : > { %v930_v55 = vpop.permute.xlu2 %929  ;;  %s5052_s28 = sshra.s32 %s3963_s26, 4  ;;  %s5053_s28 = int_to_ptr.hbm [resolvable:$true] %s5052_s28 }
 0x138   : > { %v1040_v9 = vsel %vm1037_vm2, %v742_v6, %v930_v55  ;;  %s5054_s24 = scalar_lea.hbm %s5053_s28, 16  ;;  %p5059_p1 = scmp.lt.s32.totalorder %s5053_s28, %s7574_s18 }
 0x139   : > { %p5055_p12 = scmp.ne.s32.totalorder %s5053_s28, %s5054_s24 }
 0x13a   : > { %v888_v45 = vpop.f32.mrf.mxu1 }
 0x13b   : > { %v889_v46 = vadd.f32 %v5360_v2, %v888_v45  ;;  %v753_v29 = vpop.f32.mrf.mxu0  ;;  %p5056_p13 = pnand %p5055_p12, %p5242_p5 }
 0x13c   : > { %v754_v37 = vadd.f32 %v5535_v49, %v753_v29 }
 0x13d   : > { %953 = vrot.lane.b32.xlu0 %v889_v46, %s5103_s29  ;;  %p5057_p0 = pneg %p5056_p13 }
 0x13f   : > { %v926_v48 = vpop.permute.xlu0 %925  ;;  %v932_v4 = vpop.permute.xlu2 %931 }
 0x140   : > { %v1038_v58 = vsel %vm1037_vm2, %v737_v51, %v926_v48  ;;  %v1041_v10 = vsel %vm1037_vm2, %v744_v7, %v932_v4 }
 0x141   : > { %v5547_v0 = vsel %vm1054_vm3, %v1038_v58, %v5530_v47  ;;  %v5577_v16 = vsel %vm1054_vm3, %v1041_v10, %v5561_v11  ;;  %v4857_v10 = vld [vmem:[%s7563_s7 + $0x84] sm:$0xf] }
 0x142   : > { %v890_v53 = vpop.f32.mrf.mxu1 }
 0x143   : > { %v891_v56 = vadd.f32 %v5360_v2, %v890_v53  ;;  %v756_v33 = vpop.f32.mrf.mxu0 }
 0x144   : > { %v757_v48 = vadd.f32 %v5535_v49, %v756_v33 }
 0x145   : > { %955 = vrot.lane.b32.xlu1 %v891_v56, %s5103_s29  ;;  %s610_s29 = scalar_lea.vmem [#allocation3], %s4074_s3 }
 0x146   : > { %s3960_s16 = sshll.u32 %s610_s29, 4  ;;  %s3961_s16 = int_to_ptr.vmem [resolvable:$true] %s3960_s16 }
 0x147   : > { %v928_v59 = vpop.permute.xlu0 %927  ;;  %v5563_v12 = vpop.permute.xlu2 %997 }
 0x148   : > { %v1039_v63 = vsel %vm1037_vm2, %v739_v57, %v928_v59  ;;  %v4859_v59 = vld [vmem:[%s7563_s7 + $0x94] sm:$0xf] }
 0x149   : > { %v5551_v2 = vsel %vm1054_vm3, %v1039_v63, %v5542_v60  ;;  %v4202_v63 = vld [vmem:[%s7563_s7 + $0x98] sm:$0xf0] }
 0x14a   : > { %v1071_v1 = vpack.c.bf16 %v5551_v2, %v5547_v0  ;;  %v4205_v6 = vor.u32 %v4859_v59, %v4202_v63 }
 0x14b   : > { %v758_v45 = vpop.f32.mrf.mxu0 }
 0x14c   : > { %1245 = vmatmul.bf16.vlgmr.msra.gmra.mxu2 %v1071_v1  ;;  %1343 = vmatmul.bf16.vlgmr.msrb.gmra.mxu0 %v1071_v1  ;;  %v759_v50 = vadd.f32 %v5535_v49, %v758_v45 }
 0x14d   : > { %1390 = vmatpush.bf16.msrb.mxu3 %v4205_v6 }
 0x14f   : > { %v5555_v5 = vpop.permute.xlu0 %993  ;;  %v936_v21 = vpop.permute.xlu2 %935 }
 0x150   : > { %v5569_v14 = vsel %vm1054_vm3, %v1040_v9, %v5555_v5  ;;  %v1043_v27 = vsel %vm1037_vm2, %v749_v22, %v936_v21 }
 0x151   : > { %v1073_v17 = vpack.c.bf16 %v5577_v16, %v5569_v14 }
 0x153   : > { %v761_v53 = vpop.f32.mrf.mxu0 }
 0x154   : > { %v762_v9 = vadd.f32 %v5535_v49, %v761_v53 }
 0x157   : > { %v5565_v13 = vpop.permute.xlu0 %999  ;;  %v938_v32 = vpop.permute.xlu2 %937 }
 0x158   : > { %v5573_v15 = vpack.c.bf16 %v5565_v13, %v5563_v12  ;;  %v5601_v30 = vsel %vm1054_vm3, %v1043_v27, %v5565_v13  ;;  %v1044_v40 = vsel %vm1037_vm2, %v752_v35, %v938_v32 }
 0x15a   : > { %4208 = vmatmul.msk.bf16.vlgmr.msra.gmra.mxu3 %vm1037_vm2, %v5573_v15 }
 0x15b   : > { %v763_v18 = vpop.f32.mrf.mxu0 }
 0x15c   : > { %1250 = vmatmul.bf16.gmra.mxu2 %v1073_v17  ;;  %1348 = vmatmul.bf16.gmra.mxu0 %v1073_v17  ;;  %v4194_v17 = vld [vmem:[%s7563_s7 + $0x88] sm:$0xf0]  ;;  %v764_v21 = vadd.f32 %v5535_v49, %v763_v18 }
 0x15f   : > { %v934_v19 = vpop.permute.xlu1 %933  ;;  %v5610_v36 = vpop.permute.xlu2 %1007 }
 0x160   : > { %v1042_v23 = vsel %vm1037_vm2, %v747_v20, %v934_v19  ;;  %v5586_v24 = vpop.permute.xlu0 %1001  ;;  %v4197_v19 = vor.u32 %v4857_v10, %v4194_v17 }
 0x161   : > { %v5592_v26 = vsel %vm1054_vm3, %v1042_v23, %v5563_v12  ;;  %v5621_v42 = vsel %vm1054_vm3, %v1044_v40, %v5586_v24 }
 0x162   : > { %v1075_v31 = vpack.c.bf16 %v5601_v30, %v5592_v26  ;;  %1391 = vmatpush.bf16.msrb.mxu3 %v4197_v19 }
 0x167   : > { %v5588_v25 = vpop.permute.xlu1 %1003  ;;  %v5634_v56 = vpop.permute.xlu2 %1009 }
 0x168   : > { %v5597_v28 = vpack.c.bf16 %v5588_v25, %v5586_v24 }
 0x16a   : > { %4209 = vmatmul.msk.bf16.gmra.mxu3 %vm1037_vm2, %v5597_v28 }
 0x16c   : > { %1255 = vmatmul.bf16.gmra.mxu2 %v1075_v31  ;;  %1353 = vmatmul.bf16.gmra.mxu0 %v1075_v31 }
 0x16f   : > { %v5607_v34 = vpop.permute.xlu1 %1005 }
 0x170   : > { %v5615_v38 = vpack.c.bf16 %v5610_v36, %v5607_v34 }
 0x177   : > { %v940_v39 = vpop.permute.xlu0 %939 }
 0x178   : > { %v1045_v41 = vsel %vm1037_vm2, %v754_v37, %v940_v39 }
 0x179   : > { %v5625_v43 = vsel %vm1054_vm3, %v1045_v41, %v5588_v25  ;;  %v767_v41 = vadd.f32 %v5535_v49, %v5340_v52 }
 0x17a   : > { %4210 = vmatmul.msk.bf16.gmra.mxu3 %vm1037_vm2, %v5615_v38  ;;  %v1077_v44 = vpack.c.bf16 %v5625_v43, %v5621_v42 }
 0x17c   : > { %1260 = vmatmul.bf16.gmra.mxu2 %v1077_v44  ;;  %1358 = vmatmul.bf16.gmra.mxu0 %v1077_v44  ;;  %v769_v44 = vadd.f32 %v5535_v49, %v5344_v54 }
 0x17f   : > { %v942_v46 = vpop.permute.xlu0 %941  ;;  %v948_v20 = vpop.permute.xlu2 %947 }
 0x180   : > { %v1046_v51 = vsel %vm1037_vm2, %v757_v48, %v942_v46  ;;  %v1049_v31 = vsel %vm1037_vm2, %v764_v21, %v948_v20  ;;  %v5756_v21 = vld [vmem:[%s7564_s8] sm:$0x3] }
 0x181   : > { %v5651_v3 = vsel %vm1054_vm3, %v1046_v51, %v5607_v34 }
 0x187   : > { %v944_v55 = vpop.permute.xlu1 %943  ;;  %v5637_v58 = vpop.permute.xlu0 %1011 }
 0x188   : > { %v1047_v57 = vsel %vm1037_vm2, %v759_v50, %v944_v55  ;;  %v5647_v1 = vpack.c.bf16 %v5637_v58, %v5634_v56  ;;  %v5685_v33 = vsel %vm1054_vm3, %v1049_v31, %v5637_v58  ;;  %v950_v37 = vpop.permute.xlu2 %949  ;;  %v772_v55 = vadd.f32 %v5535_v49, %v5351_v61 }
 0x189   : > { %v5655_v4 = vsel %vm1054_vm3, %v1047_v57, %v5610_v36  ;;  %v1050_v48 = vsel %vm1037_vm2, %v767_v41, %v950_v37  ;;  %v774_v57 = vadd.f32 %v5535_v49, %v5353_v62  ;;  %v1074_v62 = vpack.c.bf16 %v5561_v11, %v5555_v5 }
 0x18a   : > { %v1079_v7 = vpack.c.bf16 %v5655_v4, %v5651_v3  ;;  %4211 = vmatmul.msk.bf16.gmra.mxu3 %vm1037_vm2, %v5647_v1  ;;  %v5759_v31 = vperm.slane %v5756_v21, 0 }
 0x18c   : > { %1265 = vmatmul.bf16.gmra.mxu2 %v1079_v7  ;;  %1363 = vmatmul.bf16.gmra.mxu0 %v1079_v7  ;;  %v1072_v7 = vpack.c.bf16 %v5542_v60, %v5530_v47 }
 0x18f   : > { %v946_v8 = vpop.permute.xlu1 %945  ;;  %v5670_v23 = vpop.permute.xlu0 %1013 }
 0x190   : > { %v1048_v22 = vsel %vm1037_vm2, %v762_v9, %v946_v8  ;;  %v5693_v40 = vpop.permute.xlu2 %1019  ;;  %v5707_v51 = vsel %vm1054_vm3, %v1050_v48, %v5670_v23 }
 0x191   : > { %v5676_v29 = vsel %vm1054_vm3, %v1048_v22, %v5634_v56  ;;  %7634 = vst [vmem:[#allocation11_spill] sm:$0xff] %v5693_v40 }
 0x192   : > { %v1081_v35 = vpack.c.bf16 %v5685_v33, %v5676_v29 }
 0x197   : > { %v5672_v27 = vpop.permute.xlu1 %1015 }
 0x198   : > { %v5681_v32 = vpack.c.bf16 %v5672_v27, %v5670_v23 }
 0x19a   : > { %4212 = vmatmul.msk.bf16.gmra.mxu3 %vm1037_vm2, %v5681_v32 }
 0x19c   : > { %1270 = vmatmul.bf16.gmra.mxu2 %v1081_v35  ;;  %1368 = vmatmul.bf16.gmra.mxu0 %v1081_v35 }
 0x19f   : > { %v5691_v39 = vpop.permute.xlu1 %1017 }
 0x1a0   : > { %v5701_v45 = vpack.c.bf16 %v5693_v40, %v5691_v39 }
 0x1a7   : > { %v952_v46 = vpop.permute.xlu0 %951 }
 0x1a8   : > { %v1051_v50 = vsel %vm1037_vm2, %v769_v44, %v952_v46 }
 0x1a9   : > { %v5711_v53 = vsel %vm1054_vm3, %v1051_v50, %v5672_v27 }
 0x1aa   : > { %v1083_v52 = vpack.c.bf16 %v5711_v53, %v5707_v51  ;;  %4213 = vmatmul.msk.bf16.gmra.mxu3 %vm1037_vm2, %v5701_v45 }
 0x1ac   : > { %1275 = vmatmul.bf16.gmra.mxu2 %v1083_v52  ;;  %1373 = vmatmul.bf16.gmra.mxu0 %v1083_v52  ;;  %v4879_v52 = vld [vmem:[%s7565_s9 + $0x94] sm:$0xf] }
 0x1af   : > { %v954_v54 = vpop.permute.xlu0 %953 }
 0x1b0   : > { %v1052_v59 = vsel %vm1037_vm2, %v772_v55, %v954_v54  ;;  %v4298_v54 = vld [vmem:[%s7565_s9 + $0x98] sm:$0xf0] }
 0x1b1   : > { %v5727_v8 = vsel %vm1054_vm3, %v1052_v59, %v5691_v39  ;;  %v4875_v59 = vld [vmem:[%s7565_s9 + $0x74] sm:$0xf] }
 0x1b7   : > { %v956_v63 = vpop.permute.xlu1 %955 }
 0x1b8   : > { %v1053_v6 = vsel %vm1037_vm2, %v774_v57, %v956_v63  ;;  %v4301_v57 = vor.u32 %v4879_v52, %v4298_v54  ;;  %v4274_v52 = vld [vmem:[%s7565_s9 + $0x68] sm:$0xf0] }
 0x1b9   : > { %v5731_v9 = vsel %vm1054_vm3, %v1053_v6, %v5693_v40 }
 0x1ba   : > { %7635 = vst [vmem:[#allocation12_spill] sm:$0xff] %v5731_v9  ;;  %v1085_v61 = vpack.c.bf16 %v5731_v9, %v5727_v8  ;;  %4214 = vmatmul.msk.bf16.vlgmr.msrb.gmra.mxu3 %vm1037_vm2, %v1072_v7 }
 0x1bb   : > { %1784 = vmatpush.bf16.msra.mxu3 %v4301_v57 }
 0x1bc   : > { %1280 = vmatmul.bf16.gmra.mxu2 %v1085_v61  ;;  %1378 = vmatmul.bf16.gmra.mxu0 %v1085_v61 }
 0x1ca   : > { %4215 = vmatmul.msk.bf16.gmra.mxu3 %vm1037_vm2, %v1074_v62 }
 0x1cc   : > { %4206 = vmatmul.msk.bf16.vlgmr.msrb.gmra.mxu2 %vm1037_vm2, %v1072_v7 }
 0x1cf   : > { %v5740_v49 = vpop.f32.mrf.mxu2 }
 0x1d7   : > { %v5742_v10 = vpop.f32.mrf.mxu2 }
 0x1da   : > { %4216 = vmatmul.msk.bf16.gmra.mxu3 %vm1037_vm2, %v5573_v15 }
 0x1dc   : > { %4207 = vmatmul.msk.bf16.gmra.mxu2 %vm1037_vm2, %v1074_v62 }
 0x1dd   : > { %v1305_v17 = vpop.f32.mrf.mxu3 }
 0x1df   : > { %v5747_v18 = vpop.f32.mrf.mxu2 }
 0x1e5   : > { %v1307_v19 = vpop.f32.mrf.mxu3 }
 0x1e7   : > { %v5749_v20 = vpop.f32.mrf.mxu2 }
 0x1ea   : > { %4217 = vmatmul.msk.bf16.gmra.mxu3 %vm1037_vm2, %v5597_v28 }
 0x1ed   : > { %v1310_v22 = vpop.f32.mrf.mxu3 }
 0x1ef   : > { %v1256_v15 = vpop.f32.mrf.mxu2 }
 0x1f0   : > { %v1257_v35 = vadd.f32 %v1256_v15, %v5759_v31 }
 0x1f2   : > { %v1306_v37 = vadd.f32 %v1305_v17, %v1257_v35  ;;  %v4280_v17 = vld [vmem:[%s7565_s9 + $0x70] sm:$0xf] }
 0x1f4   : > { %v1441_v28 = vmax.f32 %v1306_v37, 0.0 }
 0x1f5   : > { %v1312_v41 = vpop.f32.mrf.mxu3 }
 0x1f7   : > { %v1258_v44 = vpop.f32.mrf.mxu2 }
 0x1f8   : > { %v1259_v46 = vadd.f32 %v1258_v44, %v5759_v31 }
 0x1fa   : > { %v1308_v48 = vadd.f32 %v1307_v19, %v1259_v46  ;;  %4218 = vmatmul.msk.bf16.gmra.mxu3 %vm1037_vm2, %v5615_v38  ;;  %v4282_v38 = vld [vmem:[%s7565_s9 + $0x78] sm:$0xf0]  ;;  %v4876_v19 = vld [vmem:[%s7565_s9 + $0x74] sm:$0xf0] }
 0x1fb   : > { %v4285_v7 = vor.u32 %v4875_v59, %v4282_v38  ;;  %v4281_v35 = vor.u32 %v4876_v19, %v4280_v17 }
 0x1fc   : > { %v1443_v50 = vmax.f32 %v1308_v48, 0.0 }
 0x1fd   : > { %v1315_v55 = vpop.f32.mrf.mxu3  ;;  %1729 = vmatpush.bf16.msra.mxu0 %v4285_v7  ;;  %1631 = vmatpush.bf16.msra.mxu1 %v4281_v35  ;;  %v5807_v35 = vpop.f32.mrf.mxu0 }
 0x1fe   : > { %v5777_v63 = vpack.c.bf16 %v1443_v50, %v1441_v28  ;;  %v4873_v50 = vld [vmem:[%s7565_s9 + $0x64] sm:$0xf] }
 0x1ff   : > { %v1261_v6 = vpop.f32.mrf.mxu2  ;;  %v4277_v59 = vor.u32 %v4873_v50, %v4274_v52  ;;  %v4871_v50 = vld [vmem:[%s7565_s9 + $0x54] sm:$0xf] }
 0x200   : > { %v1262_v61 = vadd.f32 %v1261_v6, %v5759_v31  ;;  %v4874_v6 = vld [vmem:[%s7565_s9 + $0x64] sm:$0xf0] }
 0x201   : > { %1730 = vmatpush.bf16.msra.mxu0 %v4277_v59  ;;  %v4880_v59 = vld [vmem:[%s7565_s9 + $0x94] sm:$0xf0] }
 0x202   : > { %v1311_v62 = vadd.f32 %v1310_v22, %v1262_v61 }
 0x204   : > { %v1445_v48 = vmax.f32 %v1311_v62, 0.0 }
 0x205   : > { %v1317_v15 = vpop.f32.mrf.mxu3 }
 0x207   : > { %v1263_v37 = vpop.f32.mrf.mxu2 }
 0x208   : > { %v1264_v44 = vadd.f32 %v1263_v37, %v5759_v31 }
 0x20a   : > { %v1313_v46 = vadd.f32 %v1312_v41, %v1264_v44  ;;  %4219 = vmatmul.msk.bf16.gmra.mxu3 %vm1037_vm2, %v5647_v1  ;;  %v4272_v1 = vld [vmem:[%s7565_s9 + $0x60] sm:$0xf] }
 0x20b   : > { %v4273_v7 = vor.u32 %v4874_v6, %v4272_v1  ;;  %v5830_v6 = vpop.f32.mrf.mxu0 }
 0x20c   : > { %v1447_v22 = vmax.f32 %v1313_v46, 0.0 }
 0x20d   : > { %v1320_v28 = vpop.f32.mrf.mxu3  ;;  %1632 = vmatpush.bf16.msra.mxu1 %v4273_v7 }
 0x20e   : > { %v5795_v54 = vpack.c.bf16 %v1447_v22, %v1445_v48 }
 0x20f   : > { %v1266_v57 = vpop.f32.mrf.mxu2 }
 0x210   : > { %v1267_v41 = vadd.f32 %v1266_v57, %v5759_v31  ;;  %v4296_v57 = vld [vmem:[%s7565_s9 + $0x90] sm:$0xf] }
 0x211   : > { %v4297_v1 = vor.u32 %v4880_v59, %v4296_v57  ;;  %v4869_v57 = vld [vmem:[%s7565_s9 + $0x44] sm:$0xf] }
 0x212   : > { %v1316_v38 = vadd.f32 %v1315_v55, %v1267_v41  ;;  %v4264_v41 = vld [vmem:[%s7565_s9 + $0x50] sm:$0xf] }
 0x213   : > { %1686 = vmatpush.bf16.msra.mxu2 %v4297_v1 }
 0x214   : > { %v1449_v55 = vmax.f32 %v1316_v38, 0.0  ;;  %v4872_v38 = vld [vmem:[%s7565_s9 + $0x54] sm:$0xf0] }
 0x215   : > { %v1322_v61 = vpop.f32.mrf.mxu3 }
 0x217   : > { %v1268_v62 = vpop.f32.mrf.mxu2 }
 0x218   : > { %v1269_v17 = vadd.f32 %v1268_v62, %v5759_v31 }
 0x21a   : > { %v1318_v19 = vadd.f32 %v1317_v15, %v1269_v17  ;;  %4220 = vmatmul.msk.bf16.gmra.mxu3 %vm1037_vm2, %v5681_v32  ;;  %v4266_v15 = vld [vmem:[%s7565_s9 + $0x58] sm:$0xf0]  ;;  %v4288_v17 = vld [vmem:[%s7565_s9 + $0x80] sm:$0xf] }
 0x21b   : > { %v4269_v32 = vor.u32 %v4871_v50, %v4266_v15  ;;  %v4256_v15 = vld [vmem:[%s7565_s9 + $0x40] sm:$0xf] }
 0x21c   : > { %v1451_v37 = vmax.f32 %v1318_v19, 0.0  ;;  %v4878_v19 = vld [vmem:[%s7565_s9 + $0x84] sm:$0xf0] }
 0x21d   : > { %v1325_v44 = vpop.f32.mrf.mxu3  ;;  %1731 = vmatpush.bf16.msra.mxu0 %v4269_v32  ;;  %v4870_v32 = vld [vmem:[%s7565_s9 + $0x44] sm:$0xf0] }
 0x21e   : > { %v5809_v46 = vpack.c.bf16 %v1451_v37, %v1449_v55  ;;  %v4877_v55 = vld [vmem:[%s7565_s9 + $0x84] sm:$0xf] }
 0x21f   : > { %v1271_v48 = vpop.f32.mrf.mxu2 }
 0x220   : > { %v1272_v22 = vadd.f32 %v1271_v48, %v5759_v31  ;;  %v4289_v48 = vor.u32 %v4878_v19, %v4288_v17  ;;  %v4248_v17 = vld [vmem:[%s7565_s9 + $0x30] sm:$0xf]  ;;  %v4867_v19 = vld [vmem:[%s7565_s9 + $0x34] sm:$0xf] }
 0x222   : > { %v1321_v52 = vadd.f32 %v1320_v28, %v1272_v22  ;;  %v4265_v28 = vor.u32 %v4872_v38, %v4264_v41  ;;  %v4290_v22 = vld [vmem:[%s7565_s9 + $0x88] sm:$0xf0]  ;;  %1687 = vmatpush.bf16.msra.mxu2 %v4289_v48  ;;  %v4257_v41 = vor.u32 %v4870_v32, %v4256_v15  ;;  %v4240_v32 = vld [vmem:[%s7565_s9 + $0x20] sm:$0xf] }
 0x223   : > { %v4293_v50 = vor.u32 %v4877_v55, %v4290_v22  ;;  %v4258_v38 = vld [vmem:[%s7565_s9 + $0x48] sm:$0xf0] }
 0x224   : > { %1633 = vmatpush.bf16.msra.mxu1 %v4265_v28  ;;  %v4261_v1 = vor.u32 %v4869_v57, %v4258_v38  ;;  %v1453_v28 = vmax.f32 %v1321_v52, 0.0  ;;  %v4250_v52 = vld [vmem:[%s7565_s9 + $0x38] sm:$0xf0]  ;;  %v4866_v57 = vld [vmem:[%s7565_s9 + $0x24] sm:$0xf0] }
 0x225   : > { %v1327_v7 = vpop.f32.mrf.mxu3  ;;  %1785 = vmatpush.bf16.msra.mxu3 %v4293_v50  ;;  %v4253_v22 = vor.u32 %v4867_v19, %v4250_v52  ;;  %v1349_v50 = vpop.f32.mrf.mxu0  ;;  %v4241_v38 = vor.u32 %v4866_v57, %v4240_v32  ;;  %v4862_v32 = vld [vmem:[%s7565_s9 + $0x4] sm:$0xf0]  ;;  %v4861_v57 = vld [vmem:[%s7565_s9 + $0x4] sm:$0xf] }
 0x226   : > { %1732 = vmatpush.bf16.msra.mxu0 %v4261_v1  ;;  %v4242_v1 = vld [vmem:[%s7565_s9 + $0x28] sm:$0xf0] }
 0x227   : > { %v1273_v62 = vpop.f32.mrf.mxu2 }
 0x228   : > { %v1274_v37 = vadd.f32 %v1273_v62, %v5759_v31  ;;  %1634 = vmatpush.bf16.msra.mxu1 %v4257_v41 }
 0x22a   : > { %v1323_v59 = vadd.f32 %v1322_v61, %v1274_v37  ;;  %4221 = vmatmul.msk.bf16.gmra.mxu3 %vm1037_vm2, %v5701_v45  ;;  %v4868_v61 = vld [vmem:[%s7565_s9 + $0x34] sm:$0xf0]  ;;  %1733 = vmatpush.bf16.msra.mxu0 %v4253_v22 }
 0x22b   : > { %v4249_v45 = vor.u32 %v4868_v61, %v4248_v17  ;;  %v4864_v17 = vld [vmem:[%s7565_s9 + $0x14] sm:$0xf0] }
 0x22c   : > { %v1455_v62 = vmax.f32 %v1323_v59, 0.0  ;;  %v4865_v59 = vld [vmem:[%s7565_s9 + $0x24] sm:$0xf] }
 0x22d   : > { %v1330_v55 = vpop.f32.mrf.mxu3  ;;  %1635 = vmatpush.bf16.msra.mxu1 %v4249_v45  ;;  %v4234_v45 = vld [vmem:[%s7565_s9 + $0x18] sm:$0xf0] }
 0x22e   : > { %v5871_v37 = vpack.c.bf16 %v1455_v62, %v1453_v28  ;;  %v4245_v28 = vor.u32 %v4865_v59, %v4242_v1  ;;  %v4232_v62 = vld [vmem:[%s7565_s9 + $0x10] sm:$0xf]  ;;  %v1351_v59 = vpop.f32.mrf.mxu0 }
 0x22f   : > { %v1276_v48 = vpop.f32.mrf.mxu2  ;;  %v4233_v19 = vor.u32 %v4864_v17, %v4232_v62 }
 0x230   : > { %v1277_v15 = vadd.f32 %v1276_v48, %v5759_v31  ;;  %1734 = vmatpush.bf16.msra.mxu0 %v4245_v28  ;;  %v4226_v28 = vld [vmem:[%s7565_s9 + $0x8] sm:$0xf0] }
 0x231   : > { %1636 = vmatpush.bf16.msra.mxu1 %v4241_v38  ;;  %v4229_v62 = vor.u32 %v4861_v57, %v4226_v28 }
 0x232   : > { %v1326_v41 = vadd.f32 %v1325_v44, %v1277_v15  ;;  %v4863_v44 = vld [vmem:[%s7565_s9 + $0x14] sm:$0xf]  ;;  %v4224_v15 = vld [vmem:[%s7565_s9] sm:$0xf] }
 0x233   : > { %v4237_v48 = vor.u32 %v4863_v44, %v4234_v45  ;;  %v4225_v1 = vor.u32 %v4862_v32, %v4224_v15 }
 0x234   : > { %v1457_v17 = vmax.f32 %v1326_v41, 0.0 }
 0x235   : > { %v1332_v61 = vpop.f32.mrf.mxu3  ;;  %1637 = vmatpush.bf16.msra.mxu1 %v4233_v19  ;;  %1735 = vmatpush.bf16.msra.mxu0 %v4237_v48 }
 0x236   : > { %v1354_v15 = vpop.f32.mrf.mxu0 }
 0x237   : > { %v1278_v52 = vpop.f32.mrf.mxu2 }
 0x238   : > { %v1279_v22 = vadd.f32 %v1278_v52, %v5759_v31  ;;  %v5914_v52 = vperm.slane %v5756_v21, 1 }
 0x239   : > { %1638 = vmatpush.bf16.msra.mxu1 %v4225_v1  ;;  %1736 = vmatpush.bf16.msra.mxu0 %v4229_v62 }
 0x23a   : > { %v1328_v38 = vadd.f32 %v1327_v7, %v1279_v22  ;;  %v1345_v22 = vadd.f32 %v5807_v35, %v5914_v52  ;;  %v1347_v41 = vadd.f32 %v5830_v6, %v5914_v52 }
 0x23c   : > { %v1459_v44 = vmax.f32 %v1328_v38, 0.0 }
 0x23d   : > { %v1393_v19 = vpop.f32.mrf.mxu3 }
 0x23e   : > { %v5911_v45 = vpack.c.bf16 %v1459_v44, %v1457_v17  ;;  %v1394_v32 = vadd.f32 %v1393_v19, %v1345_v22  ;;  %v1350_v19 = vadd.f32 %v1349_v50, %v5914_v52  ;;  %v1247_v22 = vadd.f32 %v5740_v49, %v5759_v31 }
 0x23f   : > { %v1281_v48 = vpop.f32.mrf.mxu2 }
 0x240   : > { %v1282_v40 = vadd.f32 %v1281_v48, %v5759_v31  ;;  %v1434_v62 = vmax.f32 %v1394_v32, 0.0 }
 0x242   : > { %v1331_v7 = vadd.f32 %v1330_v55, %v1282_v40  ;;  %v1356_v40 = vpop.f32.mrf.mxu0 }
 0x244   : > { %v1461_v9 = vmax.f32 %v1331_v7, 0.0  ;;  %v1249_v7 = vadd.f32 %v5742_v10, %v5759_v31 }
 0x245   : > { %v1395_v57 = vpop.f32.mrf.mxu3 }
 0x246   : > { %v1396_v38 = vadd.f32 %v1395_v57, %v1347_v41  ;;  %v1352_v41 = vadd.f32 %v1351_v59, %v5914_v52 }
 0x247   : > { %v1283_v1 = vpop.f32.mrf.mxu2 }
 0x248   : > { %v1284_v28 = vadd.f32 %v1283_v1, %v5759_v31  ;;  %v1436_v21 = vmax.f32 %v1396_v38, 0.0 }
 0x24a   : > { %v1333_v17 = vadd.f32 %v1332_v61, %v1284_v28  ;;  %v1466_v44 = vpack.c.bf16 %v1436_v21, %v1434_v62  ;;  %v1359_v28 = vpop.f32.mrf.mxu0 }
 0x24c   : > { %v1463_v48 = vmax.f32 %v1333_v17, 0.0  ;;  %4302 = vmatmul.msk.bf16.vlgmr.msra.gmra.mxu2 %vm1037_vm2, %v1466_v44  ;;  %4310 = vmatmul.msk.bf16.vlgmr.msra.gmra.mxu3 %vm1037_vm2, %v1466_v44 }
 0x24d   : > { %v1398_v35 = vpop.f32.mrf.mxu3 }
 0x24e   : > { %v5924_v55 = vpack.c.bf16 %v1463_v48, %v1461_v9  ;;  %v1399_v61 = vadd.f32 %v1398_v35, %v1350_v19  ;;  %v1355_v35 = vadd.f32 %v1354_v15, %v5914_v52  ;;  %v1357_v19 = vadd.f32 %v1356_v40, %v5914_v52 }
 0x24f   : > { %v1295_v6 = vpop.f32.mrf.mxu2 }
 0x250   : > { %v1296_v32 = vadd.f32 %v1295_v6, %v1247_v22  ;;  %v1438_v9 = vmax.f32 %v1399_v61, 0.0  ;;  %v1252_v6 = vadd.f32 %v5747_v18, %v5759_v31 }
 0x252   : > { %v1433_v17 = vmax.f32 %v1296_v32, 0.0  ;;  %v1361_v59 = vpop.f32.mrf.mxu0 }
 0x255   : > { %v1400_v57 = vpop.f32.mrf.mxu3 }
 0x256   : > { %v1401_v38 = vadd.f32 %v1400_v57, %v1352_v41  ;;  %v1254_v41 = vadd.f32 %v5749_v20, %v5759_v31  ;;  %v1360_v20 = vadd.f32 %v1359_v28, %v5914_v52  ;;  %v1362_v31 = vadd.f32 %v1361_v59, %v5914_v52 }
 0x257   : > { %v1297_v1 = vpop.f32.mrf.mxu2 }
 0x258   : > { %v1298_v62 = vadd.f32 %v1297_v1, %v1249_v7  ;;  %v1440_v21 = vmax.f32 %v1401_v38, 0.0 }
 0x25a   : > { %v1435_v44 = vmax.f32 %v1298_v62, 0.0  ;;  %v1468_v50 = vpack.c.bf16 %v1440_v21, %v1438_v9  ;;  %v1364_v15 = vpop.f32.mrf.mxu0 }
 0x25b   : > { %v1365_v28 = vadd.f32 %v1364_v15, %v5914_v52  ;;  %v4900_v15 = vld [vmem:[%s7563_s7 + $0x134] sm:$0xf0] }
 0x25c   : > { %v1465_v48 = vpack.c.bf16 %v1435_v44, %v1433_v17  ;;  %4303 = vmatmul.msk.bf16.gmra.mxu2 %vm1037_vm2, %v1468_v50  ;;  %4311 = vmatmul.msk.bf16.gmra.mxu3 %vm1037_vm2, %v1468_v50 }
 0x25d   : > { %v1403_v49 = vpop.f32.mrf.mxu3 }
 0x25e   : > { %1639 = vmatmul.bf16.vlgmr.msra.gmra.mxu1 %v1465_v48  ;;  %1737 = vmatmul.bf16.vlgmr.msra.gmra.mxu0 %v1465_v48  ;;  %v1404_v22 = vadd.f32 %v1403_v49, %v1355_v35 }
 0x25f   : > { %v1300_v10 = vpop.f32.mrf.mxu2 }
 0x260   : > { %v1301_v61 = vadd.f32 %v1300_v10, %v1252_v6  ;;  %v1442_v1 = vmax.f32 %v1404_v22, 0.0 }
 0x262   : > { %v1437_v9 = vmax.f32 %v1301_v61, 0.0  ;;  %v1366_v50 = vpop.f32.mrf.mxu0 }
 0x263   : > { %v1367_v59 = vadd.f32 %v1366_v50, %v5914_v52  ;;  %v4896_v50 = vld [vmem:[%s7563_s7 + $0x114] sm:$0xf0] }
 0x265   : > { %v1405_v7 = vpop.f32.mrf.mxu3 }
 0x266   : > { %v1406_v32 = vadd.f32 %v1405_v7, %v1357_v19 }
 0x267   : > { %v1302_v57 = vpop.f32.mrf.mxu2 }
 0x268   : > { %v1303_v38 = vadd.f32 %v1302_v57, %v1254_v41  ;;  %v1444_v62 = vmax.f32 %v1406_v32, 0.0 }
 0x26a   : > { %v1439_v21 = vmax.f32 %v1303_v38, 0.0  ;;  %v1470_v17 = vpack.c.bf16 %v1444_v62, %v1442_v1  ;;  %v1369_v22 = vpop.f32.mrf.mxu0  ;;  %v4415_v62 = vld [vmem:[%s7563_s7 + $0x138] sm:$0xf0] }
 0x26c   : > { %v1467_v44 = vpack.c.bf16 %v1439_v21, %v1437_v9  ;;  %4304 = vmatmul.msk.bf16.gmra.mxu2 %vm1037_vm2, %v1470_v17  ;;  %4312 = vmatmul.msk.bf16.gmra.mxu3 %vm1037_vm2, %v1470_v17  ;;  %v4413_v17 = vld [vmem:[%s7563_s7 + $0x130] sm:$0xf] }
 0x26d   : > { %v1408_v18 = vpop.f32.mrf.mxu3 }
 0x26e   : > { %1644 = vmatmul.bf16.gmra.mxu1 %v1467_v44  ;;  %1742 = vmatmul.bf16.gmra.mxu0 %v1467_v44  ;;  %v1409_v40 = vadd.f32 %v1408_v18, %v1360_v20  ;;  %v4414_v44 = vor.u32 %v4900_v15, %v4413_v17  ;;  %v4895_v18 = vld [vmem:[%s7563_s7 + $0x114] sm:$0xf]  ;;  %v4399_v20 = vld [vmem:[%s7563_s7 + $0x118] sm:$0xf0] }
 0x270   : > { %v1446_v10 = vmax.f32 %v1409_v40, 0.0  ;;  %v4402_v40 = vor.u32 %v4895_v18, %v4399_v20  ;;  %2082 = vmatpush.bf16.msrb.mxu2 %v4414_v44 }
 0x272   : > { %v1371_v38 = vpop.f32.mrf.mxu0  ;;  %2125 = vmatpush.bf16.msrb.mxu0 %v4402_v40  ;;  %v4383_v40 = vld [vmem:[%s7563_s7 + $0xf8] sm:$0xf0] }
 0x275   : > { %v1410_v48 = vpop.f32.mrf.mxu3 }
 0x276   : > { %v1411_v49 = vadd.f32 %v1410_v48, %v1362_v31  ;;  %v1370_v31 = vadd.f32 %v1369_v22, %v5914_v52 }
 0x278   : > { %v1448_v35 = vmax.f32 %v1411_v49, 0.0 }
 0x27a   : > { %v1472_v6 = vpack.c.bf16 %v1448_v35, %v1446_v10  ;;  %v1374_v48 = vpop.f32.mrf.mxu0  ;;  %v1372_v10 = vadd.f32 %v1371_v38, %v5914_v52 }
 0x27c   : > { %4305 = vmatmul.msk.bf16.gmra.mxu2 %vm1037_vm2, %v1472_v6  ;;  %4313 = vmatmul.msk.bf16.gmra.mxu3 %vm1037_vm2, %v1472_v6 }
 0x27d   : > { %v1413_v19 = vpop.f32.mrf.mxu3 }
 0x27e   : > { %1649 = vmatmul.bf16.gmra.mxu1 %v5777_v63  ;;  %1747 = vmatmul.bf16.gmra.mxu0 %v5777_v63  ;;  %v1414_v41 = vadd.f32 %v1413_v19, %v1365_v28  ;;  %v4899_v63 = vld [vmem:[%s7563_s7 + $0x134] sm:$0xf] }
 0x27f   : > { %v4418_v21 = vor.u32 %v4899_v63, %v4415_v62 }
 0x280   : > { %v1450_v32 = vmax.f32 %v1414_v41, 0.0 }
 0x281   : > { %2180 = vmatpush.bf16.msrb.mxu3 %v4418_v21 }
 0x282   : > { %v1376_v22 = vpop.f32.mrf.mxu0 }
 0x283   : > { %v1377_v62 = vadd.f32 %v1376_v22, %v5914_v52  ;;  %v4890_v22 = vld [vmem:[%s7563_s7 + $0xe4] sm:$0xf0] }
 0x285   : > { %v1415_v61 = vpop.f32.mrf.mxu3 }
 0x286   : > { %v1416_v7 = vadd.f32 %v1415_v61, %v1367_v59 }
 0x288   : > { %v1452_v57 = vmax.f32 %v1416_v7, 0.0  ;;  %v4893_v7 = vld [vmem:[%s7563_s7 + $0x104] sm:$0xf] }
 0x28a   : > { %v1474_v1 = vpack.c.bf16 %v1452_v57, %v1450_v32  ;;  %v4391_v32 = vld [vmem:[%s7563_s7 + $0x108] sm:$0xf0]  ;;  %v4389_v57 = vld [vmem:[%s7563_s7 + $0x100] sm:$0xf]  ;;  %v1379_v15 = vpop.f32.mrf.mxu0 }
 0x28b   : > { %v4394_v38 = vor.u32 %v4893_v7, %v4391_v32 }
 0x28c   : > { %4306 = vmatmul.msk.bf16.gmra.mxu2 %vm1037_vm2, %v1474_v1  ;;  %4314 = vmatmul.msk.bf16.gmra.mxu3 %vm1037_vm2, %v1474_v1  ;;  %v4894_v1 = vld [vmem:[%s7563_s7 + $0x104] sm:$0xf0] }
 0x28d   : > { %v1418_v9 = vpop.f32.mrf.mxu3  ;;  %v4390_v63 = vor.u32 %v4894_v1, %v4389_v57  ;;  %2126 = vmatpush.bf16.msrb.mxu0 %v4394_v38 }
 0x28e   : > { %1654 = vmatmul.bf16.gmra.mxu1 %v5795_v54  ;;  %1752 = vmatmul.bf16.gmra.mxu0 %v5795_v54  ;;  %v4397_v54 = vld [vmem:[%s7563_s7 + $0x110] sm:$0xf]  ;;  %v1419_v35 = vadd.f32 %v1418_v9, %v1370_v31  ;;  %v4891_v31 = vld [vmem:[%s7563_s7 + $0xf4] sm:$0xf] }
 0x28f   : > { %v4398_v49 = vor.u32 %v4896_v50, %v4397_v54  ;;  %v4381_v50 = vld [vmem:[%s7563_s7 + $0xf0] sm:$0xf] }
 0x290   : > { %v1454_v28 = vmax.f32 %v1419_v35, 0.0 }
 0x291   : > { %2027 = vmatpush.bf16.msra.mxu1 %v4398_v49  ;;  %v4892_v49 = vld [vmem:[%s7563_s7 + $0xf4] sm:$0xf0] }
 0x292   : > { %v4382_v35 = vor.u32 %v4892_v49, %v4381_v50  ;;  %v4883_v50 = vld [vmem:[%s7563_s7 + $0xb4] sm:$0xf]  ;;  %v4351_v49 = vld [vmem:[%s7563_s7 + $0xb8] sm:$0xf0] }
 0x295   : > { %v1420_v6 = vpop.f32.mrf.mxu3  ;;  %2028 = vmatpush.bf16.msra.mxu1 %v4390_v63  ;;  %v4365_v63 = vld [vmem:[%s7563_s7 + $0xd0] sm:$0xf] }
 0x296   : > { %v1421_v19 = vadd.f32 %v1420_v6, %v1372_v10  ;;  %v1381_v10 = vpop.f32.mrf.mxu0 }
 0x297   : > { %v1382_v6 = vadd.f32 %v1381_v10, %v5914_v52  ;;  %v4354_v10 = vor.u32 %v4883_v50, %v4351_v49 }
 0x298   : > { %v1456_v59 = vmax.f32 %v1421_v19, 0.0 }
 0x299   : > { %2029 = vmatpush.bf16.msra.mxu1 %v4382_v35  ;;  %v4341_v35 = vld [vmem:[%s7563_s7 + $0xa0] sm:$0xf] }
 0x29a   : > { %v1476_v41 = vpack.c.bf16 %v1456_v59, %v1454_v28 }
 0x29c   : > { %4307 = vmatmul.msk.bf16.gmra.mxu2 %vm1037_vm2, %v1476_v41  ;;  %4315 = vmatmul.msk.bf16.gmra.mxu3 %vm1037_vm2, %v1476_v41  ;;  %v4373_v41 = vld [vmem:[%s7563_s7 + $0xe0] sm:$0xf] }
 0x29d   : > { %v1423_v61 = vpop.f32.mrf.mxu3  ;;  %v4374_v7 = vor.u32 %v4890_v22, %v4373_v41  ;;  %v4343_v41 = vld [vmem:[%s7563_s7 + $0xa8] sm:$0xf0] }
 0x29e   : > { %1659 = vmatmul.bf16.gmra.mxu1 %v5809_v46  ;;  %1757 = vmatmul.bf16.gmra.mxu0 %v5809_v46  ;;  %v1375_v46 = vadd.f32 %v1374_v48, %v5914_v52  ;;  %v4386_v48 = vor.u32 %v4891_v31, %v4383_v40  ;;  %v4349_v31 = vld [vmem:[%s7563_s7 + $0xb0] sm:$0xf]  ;;  %v4884_v40 = vld [vmem:[%s7563_s7 + $0xb4] sm:$0xf0] }
 0x29f   : > { %2030 = vmatpush.bf16.msra.mxu1 %v4374_v7  ;;  %v4897_v7 = vld [vmem:[%s7563_s7 + $0x124] sm:$0xf] }
 0x2a0   : > { %v1424_v9 = vadd.f32 %v1423_v61, %v1375_v46  ;;  %2127 = vmatpush.bf16.msrb.mxu0 %v4386_v48  ;;  %v4889_v61 = vld [vmem:[%s7563_s7 + $0xe4] sm:$0xf]  ;;  %v4888_v46 = vld [vmem:[%s7563_s7 + $0xd4] sm:$0xf0]  ;;  %v4350_v48 = vor.u32 %v4884_v40, %v4349_v31 }
 0x2a2   : > { %v1458_v44 = vmax.f32 %v1424_v9, 0.0  ;;  %v4887_v9 = vld [vmem:[%s7563_s7 + $0xd4] sm:$0xf] }
 0x2a5   : > { %v1425_v21 = vpop.f32.mrf.mxu3 }
 0x2a6   : > { %v1426_v17 = vadd.f32 %v1425_v21, %v1377_v62  ;;  %v4366_v62 = vor.u32 %v4888_v46, %v4365_v63  ;;  %v4367_v21 = vld [vmem:[%s7563_s7 + $0xd8] sm:$0xf0]  ;;  %v1501_v46 = vld [vmem:[%s7566_s10] sm:$0x3] }
 0x2a8   : > { %v1460_v18 = vmax.f32 %v1426_v17, 0.0  ;;  %v4370_v17 = vor.u32 %v4887_v9, %v4367_v21  ;;  %2031 = vmatpush.bf16.msra.mxu1 %v4366_v62  ;;  %v6097_v21 = vperm.slane %v1501_v46, 0 }
 0x2aa   : > { %v1478_v20 = vpack.c.bf16 %v1460_v18, %v1458_v44  ;;  %v4886_v44 = vld [vmem:[%s7563_s7 + $0xc4] sm:$0xf0]  ;;  %v4885_v18 = vld [vmem:[%s7563_s7 + $0xc4] sm:$0xf] }
 0x2ac   : > { %4308 = vmatmul.msk.bf16.gmra.mxu2 %vm1037_vm2, %v1478_v20  ;;  %4316 = vmatmul.msk.bf16.gmra.mxu3 %vm1037_vm2, %v1478_v20 }
 0x2ad   : > { %v1428_v54 = vpop.f32.mrf.mxu3 }
 0x2ae   : > { %1664 = vmatmul.bf16.gmra.mxu1 %v5871_v37  ;;  %1762 = vmatmul.bf16.gmra.mxu0 %v5871_v37  ;;  %v1380_v37 = vadd.f32 %v1379_v15, %v5914_v52  ;;  %v4375_v52 = vld [vmem:[%s7563_s7 + $0xe8] sm:$0xf0]  ;;  %v4357_v15 = vld [vmem:[%s7563_s7 + $0xc0] sm:$0xf] }
 0x2af   : > { %v4378_v38 = vor.u32 %v4889_v61, %v4375_v52  ;;  %v4358_v20 = vor.u32 %v4886_v44, %v4357_v15  ;;  %v4407_v52 = vld [vmem:[%s7563_s7 + $0x128] sm:$0xf0] }
 0x2b0   : > { %v1429_v19 = vadd.f32 %v1428_v54, %v1380_v37  ;;  %v4359_v54 = vld [vmem:[%s7563_s7 + $0xc8] sm:$0xf0]  ;;  %v4882_v37 = vld [vmem:[%s7563_s7 + $0xa4] sm:$0xf0] }
 0x2b1   : > { %2128 = vmatpush.bf16.msrb.mxu0 %v4378_v38  ;;  %2032 = vmatpush.bf16.msra.mxu1 %v4358_v20 }
 0x2b2   : > { %v1462_v32 = vmax.f32 %v1429_v19, 0.0  ;;  %v4342_v19 = vor.u32 %v4882_v37, %v4341_v35 }
 0x2b5   : > { %v1430_v28 = vpop.f32.mrf.mxu3  ;;  %2129 = vmatpush.bf16.msrb.mxu0 %v4370_v17  ;;  %2033 = vmatpush.bf16.msra.mxu1 %v4350_v48  ;;  %v6099_v17 = vperm.slane %v1501_v46, 1 }
 0x2b6   : > { %v1431_v59 = vadd.f32 %v1430_v28, %v1382_v6  ;;  %v4405_v6 = vld [vmem:[%s7563_s7 + $0x120] sm:$0xf]  ;;  %v4898_v28 = vld [vmem:[%s7563_s7 + $0x124] sm:$0xf0] }
 0x2b7   : > { %v4406_v22 = vor.u32 %v4898_v28, %v4405_v6 }
 0x2b8   : > { %v1464_v57 = vmax.f32 %v1431_v59, 0.0  ;;  %v4881_v59 = vld [vmem:[%s7563_s7 + $0xa4] sm:$0xf] }
 0x2b9   : > { %v4346_v61 = vor.u32 %v4881_v59, %v4343_v41  ;;  %2034 = vmatpush.bf16.msra.mxu1 %v4342_v19  ;;  %2083 = vmatpush.bf16.msrb.mxu2 %v4406_v22 }
 0x2ba   : > { %v1480_v1 = vpack.c.bf16 %v1464_v57, %v1462_v32  ;;  %v4410_v32 = vor.u32 %v4897_v7, %v4407_v52 }
 0x2bc   : > { %4309 = vmatmul.msk.bf16.gmra.mxu2 %vm1037_vm2, %v1480_v1  ;;  %4317 = vmatmul.msk.bf16.gmra.mxu3 %vm1037_vm2, %v1480_v1 }
 0x2bd   : > { %2181 = vmatpush.bf16.msrb.mxu3 %v4410_v32 }
 0x2be   : > { %1669 = vmatmul.bf16.gmra.mxu1 %v5911_v45  ;;  %1767 = vmatmul.bf16.gmra.mxu0 %v5911_v45  ;;  %v4362_v45 = vor.u32 %v4885_v18, %v4359_v54 }
 0x2c0   : > { %2130 = vmatpush.bf16.msrb.mxu0 %v4362_v45 }
 0x2c4   : > { %2131 = vmatpush.bf16.msrb.mxu0 %v4354_v10 }
 0x2c8   : > { %2132 = vmatpush.bf16.msrb.mxu0 %v4346_v61 }
 0x2ce   : > { %1674 = vmatmul.bf16.gmra.mxu1 %v5924_v55  ;;  %1772 = vmatmul.bf16.gmra.mxu0 %v5924_v55 }
 0x2cf   : > { %v1689_v57 = vpop.f32.mrf.mxu2  ;;  %v1787_v38 = vpop.f32.mrf.mxu3 }
 0x2d7   : > { %v1691_v1 = vpop.f32.mrf.mxu2  ;;  %v1789_v63 = vpop.f32.mrf.mxu3 }
 0x2db   : > { %v1640_v62 = vpop.f32.mrf.mxu1  ;;  %v1738_v9 = vpop.f32.mrf.mxu0 }
 0x2dc   : > { %v1641_v15 = vadd.f32 %v1640_v62, %v6097_v21  ;;  %v1739_v44 = vadd.f32 %v1738_v9, %v6099_v17 }
 0x2de   : > { %v1690_v45 = vadd.f32 %v1689_v57, %v1641_v15  ;;  %v1788_v31 = vadd.f32 %v1787_v38, %v1739_v44 }
 0x2df   : > { %v1694_v18 = vpop.f32.mrf.mxu2  ;;  %v1792_v55 = vpop.f32.mrf.mxu3 }
 0x2e0   : > { %v6106_v10 = vadd.f32 %v1690_v45, %v5547_v0  ;;  %v6109_v35 = vadd.f32 %v1788_v31, %v5530_v47 }
 0x2e3   : > { %v1642_v20 = vpop.f32.mrf.mxu1  ;;  %v1740_v54 = vpop.f32.mrf.mxu0 }
 0x2e4   : > { %v1643_v40 = vadd.f32 %v1642_v20, %v6097_v21  ;;  %v1741_v50 = vadd.f32 %v1740_v54, %v6099_v17 }
 0x2e6   : > { %v1692_v48 = vadd.f32 %v1691_v1, %v1643_v40  ;;  %v1790_v49 = vadd.f32 %v1789_v63, %v1741_v50 }
 0x2e7   : > { %v1696_v19 = vpop.f32.mrf.mxu2  ;;  %v1794_v28 = vpop.f32.mrf.mxu3 }
 0x2e8   : > { %v6112_v37 = vadd.f32 %v1692_v48, %v5551_v2  ;;  %v6115_v6 = vadd.f32 %v1790_v49, %v5542_v60 }
 0x2ea   : > { %v1859_v59 = vpack.c.bf16 %v6112_v37, %v6106_v10  ;;  %v1860_v41 = vpack.c.bf16 %v6115_v6, %v6109_v35 }
 0x2eb   : > { %v1645_v22 = vpop.f32.mrf.mxu1  ;;  %v1743_v0 = vpop.f32.mrf.mxu0 }
 0x2ec   : > { %2035 = vmatmul.bf16.vlgmr.msra.gmra.mxu1 %v1859_v59  ;;  %4419 = vmatmul.msk.bf16.vlgmr.msrb.gmra.mxu2 %vm1037_vm2, %v1860_v41  ;;  %v1646_v47 = vadd.f32 %v1645_v22, %v6097_v21  ;;  %v1744_v60 = vadd.f32 %v1743_v0, %v6099_v17 }
 0x2ed   : > { %2133 = vmatmul.bf16.vlgmr.msrb.gmra.mxu0 %v1859_v59  ;;  %4427 = vmatmul.msk.bf16.vlgmr.msrb.gmra.mxu3 %vm1037_vm2, %v1860_v41 }
 0x2ee   : > { %v1695_v32 = vadd.f32 %v1694_v18, %v1646_v47  ;;  %v1793_v57 = vadd.f32 %v1792_v55, %v1744_v60 }
 0x2ef   : > { %v1699_v2 = vpop.f32.mrf.mxu2  ;;  %v1797_v61 = vpop.f32.mrf.mxu3 }
 0x2f0   : > { %v6128_v62 = vadd.f32 %v1695_v32, %v5569_v14  ;;  %v6131_v9 = vadd.f32 %v1793_v57, %v5555_v5 }
 0x2f3   : > { %v1647_v7 = vpop.f32.mrf.mxu1  ;;  %v1745_v52 = vpop.f32.mrf.mxu0 }
 0x2f4   : > { %v1648_v38 = vadd.f32 %v1647_v7, %v6097_v21  ;;  %v1746_v1 = vadd.f32 %v1745_v52, %v6099_v17 }
 0x2f6   : > { %v1697_v63 = vadd.f32 %v1696_v19, %v1648_v38  ;;  %v1795_v46 = vadd.f32 %v1794_v28, %v1746_v1 }
 0x2f7   : > { %v1701_v18 = vpop.f32.mrf.mxu2  ;;  %v1799_v55 = vpop.f32.mrf.mxu3 }
 0x2f8   : > { %v6134_v15 = vadd.f32 %v1697_v63, %v5577_v16  ;;  %v6137_v44 = vadd.f32 %v1795_v46, %v5561_v11 }
 0x2fa   : > { %v1861_v20 = vpack.c.bf16 %v6134_v15, %v6128_v62  ;;  %v1862_v54 = vpack.c.bf16 %v6137_v44, %v6131_v9 }
 0x2fb   : > { %v1650_v45 = vpop.f32.mrf.mxu1  ;;  %v1748_v14 = vpop.f32.mrf.mxu0 }
 0x2fc   : > { %2040 = vmatmul.bf16.gmra.mxu1 %v1861_v20  ;;  %4420 = vmatmul.msk.bf16.gmra.mxu2 %vm1037_vm2, %v1862_v54  ;;  %v1651_v5 = vadd.f32 %v1650_v45, %v6097_v21  ;;  %v1749_v11 = vadd.f32 %v1748_v14, %v6099_v17 }
 0x2fd   : > { %2138 = vmatmul.bf16.gmra.mxu0 %v1861_v20  ;;  %4428 = vmatmul.msk.bf16.gmra.mxu3 %vm1037_vm2, %v1862_v54 }
 0x2fe   : > { %v1700_v48 = vadd.f32 %v1699_v2, %v1651_v5  ;;  %v1798_v49 = vadd.f32 %v1797_v61, %v1749_v11 }
 0x2ff   : > { %v1704_v16 = vpop.f32.mrf.mxu2  ;;  %v1802_v31 = vpop.f32.mrf.mxu3 }
 0x300   : > { %v6150_v22 = vadd.f32 %v1700_v48, %v5592_v26  ;;  %v6153_v0 = vadd.f32 %v1798_v49, %v5563_v12  ;;  %v4532_v49 = vld [vmem:[%s7565_s9 + $0x138] sm:$0xf0] }
 0x303   : > { %v1652_v40 = vpop.f32.mrf.mxu1  ;;  %v1750_v50 = vpop.f32.mrf.mxu0 }
 0x304   : > { %v1653_v19 = vadd.f32 %v1652_v40, %v6097_v21  ;;  %v1751_v28 = vadd.f32 %v1750_v50, %v6099_v17 }
 0x306   : > { %v1702_v59 = vadd.f32 %v1701_v18, %v1653_v19  ;;  %v1800_v41 = vadd.f32 %v1799_v55, %v1751_v28  ;;  %v4530_v19 = vld [vmem:[%s7565_s9 + $0x130] sm:$0xf] }
 0x307   : > { %v1706_v2 = vpop.f32.mrf.mxu2  ;;  %v1804_v61 = vpop.f32.mrf.mxu3 }
 0x308   : > { %v6156_v47 = vadd.f32 %v1702_v59, %v5601_v30  ;;  %v6159_v60 = vadd.f32 %v1800_v41, %v5565_v13  ;;  %v4920_v59 = vld [vmem:[%s7565_s9 + $0x134] sm:$0xf0]  ;;  %v4915_v41 = vld [vmem:[%s7565_s9 + $0x114] sm:$0xf] }
 0x30a   : > { %v1863_v7 = vpack.c.bf16 %v6156_v47, %v6150_v22  ;;  %v1864_v52 = vpack.c.bf16 %v6159_v60, %v6153_v0 }
 0x30b   : > { %v1655_v32 = vpop.f32.mrf.mxu1  ;;  %v1753_v26 = vpop.f32.mrf.mxu0 }
 0x30c   : > { %2045 = vmatmul.bf16.gmra.mxu1 %v1863_v7  ;;  %4421 = vmatmul.msk.bf16.gmra.mxu2 %vm1037_vm2, %v1864_v52  ;;  %v1656_v12 = vadd.f32 %v1655_v32, %v6097_v21  ;;  %v1754_v13 = vadd.f32 %v1753_v26, %v6099_v17 }
 0x30d   : > { %2143 = vmatmul.bf16.gmra.mxu0 %v1863_v7  ;;  %4429 = vmatmul.msk.bf16.gmra.mxu3 %vm1037_vm2, %v1864_v52  ;;  %v4531_v52 = vor.u32 %v4920_v59, %v4530_v19 }
 0x30e   : > { %v1705_v63 = vadd.f32 %v1704_v16, %v1656_v12  ;;  %v1803_v46 = vadd.f32 %v1802_v31, %v1754_v13 }
 0x30f   : > { %v1709_v30 = vpop.f32.mrf.mxu2  ;;  %v1807_v57 = vpop.f32.mrf.mxu3  ;;  %2478 = vmatpush.bf16.msra.mxu2 %v4531_v52 }
 0x310   : > { %v6172_v45 = vadd.f32 %v1705_v63, %v5621_v42  ;;  %v6175_v14 = vadd.f32 %v1803_v46, %v5586_v24 }
 0x313   : > { %v1657_v38 = vpop.f32.mrf.mxu1  ;;  %v1755_v1 = vpop.f32.mrf.mxu0 }
 0x314   : > { %v1658_v18 = vadd.f32 %v1657_v38, %v6097_v21  ;;  %v1756_v55 = vadd.f32 %v1755_v1, %v6099_v17 }
 0x316   : > { %v1707_v20 = vadd.f32 %v1706_v2, %v1658_v18  ;;  %v1805_v54 = vadd.f32 %v1804_v61, %v1756_v55  ;;  %v4516_v2 = vld [vmem:[%s7565_s9 + $0x118] sm:$0xf0] }
 0x317   : > { %v1711_v16 = vpop.f32.mrf.mxu2  ;;  %v1809_v31 = vpop.f32.mrf.mxu3  ;;  %v4519_v32 = vor.u32 %v4915_v41, %v4516_v2 }
 0x318   : > { %v6178_v5 = vadd.f32 %v1707_v20, %v5625_v43  ;;  %v6181_v11 = vadd.f32 %v1805_v54, %v5588_v25  ;;  %v4919_v43 = vld [vmem:[%s7565_s9 + $0x134] sm:$0xf] }
 0x319   : > { %v4535_v28 = vor.u32 %v4919_v43, %v4532_v49  ;;  %2521 = vmatpush.bf16.msra.mxu0 %v4519_v32 }
 0x31a   : > { %v1865_v40 = vpack.c.bf16 %v6178_v5, %v6172_v45  ;;  %v1866_v50 = vpack.c.bf16 %v6181_v11, %v6175_v14 }
 0x31b   : > { %v1660_v48 = vpop.f32.mrf.mxu1  ;;  %v1758_v42 = vpop.f32.mrf.mxu0  ;;  %2576 = vmatpush.bf16.msra.mxu3 %v4535_v28 }
 0x31c   : > { %2050 = vmatmul.bf16.gmra.mxu1 %v1865_v40  ;;  %4422 = vmatmul.msk.bf16.gmra.mxu2 %vm1037_vm2, %v1866_v50  ;;  %v1661_v24 = vadd.f32 %v1660_v48, %v6097_v21  ;;  %v1759_v25 = vadd.f32 %v1758_v42, %v6099_v17 }
 0x31d   : > { %2148 = vmatmul.bf16.gmra.mxu0 %v1865_v40  ;;  %4430 = vmatmul.msk.bf16.gmra.mxu3 %vm1037_vm2, %v1866_v50 }
 0x31e   : > { %v1710_v26 = vadd.f32 %v1709_v30, %v1661_v24  ;;  %v1808_v38 = vadd.f32 %v1807_v57, %v1759_v25  ;;  %v4514_v57 = vld [vmem:[%s7565_s9 + $0x110] sm:$0xf]  ;;  %v4913_v24 = vld [vmem:[%s7565_s9 + $0x104] sm:$0xf]  ;;  %v4508_v25 = vld [vmem:[%s7565_s9 + $0x108] sm:$0xf0] }
 0x31f   : > { %v1714_v61 = vpop.f32.mrf.mxu2  ;;  %v1812_v7 = vpop.f32.mrf.mxu3  ;;  %v4511_v43 = vor.u32 %v4913_v24, %v4508_v25 }
 0x320   : > { %v6212_v55 = vadd.f32 %v1710_v26, %v5651_v3  ;;  %v6215_v20 = vadd.f32 %v1808_v38, %v5607_v34 }
 0x321   : > { %2522 = vmatpush.bf16.msra.mxu0 %v4511_v43 }
 0x323   : > { %v1662_v12 = vpop.f32.mrf.mxu1  ;;  %v1760_v13 = vpop.f32.mrf.mxu0 }
 0x324   : > { %v1663_v1 = vadd.f32 %v1662_v12, %v6097_v21  ;;  %v1761_v63 = vadd.f32 %v1760_v13, %v6099_v17 }
 0x326   : > { %v1712_v46 = vadd.f32 %v1711_v16, %v1663_v1  ;;  %v1810_v18 = vadd.f32 %v1809_v31, %v1761_v63  ;;  %v4916_v16 = vld [vmem:[%s7565_s9 + $0x114] sm:$0xf0]  ;;  %v4914_v63 = vld [vmem:[%s7565_s9 + $0x104] sm:$0xf0] }
 0x327   : > { %v4515_v31 = vor.u32 %v4916_v16, %v4514_v57  ;;  %v1814_v50 = vpop.f32.mrf.mxu3  ;;  %v4500_v57 = vld [vmem:[%s7565_s9 + $0xf8] sm:$0xf0]  ;;  %v4498_v16 = vld [vmem:[%s7565_s9 + $0xf0] sm:$0xf] }
 0x328   : > { %v6218_v30 = vadd.f32 %v1712_v46, %v5655_v4  ;;  %v6221_v54 = vadd.f32 %v1810_v18, %v5610_v36  ;;  %v1716_v36 = vpop.f32.mrf.mxu2 }
 0x329   : > { %2423 = vmatpush.bf16.msra.mxu1 %v4515_v31 }
 0x32a   : > { %v1867_v3 = vpack.c.bf16 %v6218_v30, %v6212_v55  ;;  %v1868_v34 = vpack.c.bf16 %v6221_v54, %v6215_v20 }
 0x32b   : > { %v1665_v4 = vpop.f32.mrf.mxu1  ;;  %v1763_v40 = vpop.f32.mrf.mxu0 }
 0x32c   : > { %2055 = vmatmul.bf16.gmra.mxu1 %v1867_v3  ;;  %4423 = vmatmul.msk.bf16.gmra.mxu2 %vm1037_vm2, %v1868_v34  ;;  %v1666_v48 = vadd.f32 %v1665_v4, %v6097_v21  ;;  %v1764_v42 = vadd.f32 %v1763_v40, %v6099_v17 }
 0x32d   : > { %2153 = vmatmul.bf16.gmra.mxu0 %v1867_v3  ;;  %4431 = vmatmul.msk.bf16.gmra.mxu3 %vm1037_vm2, %v1868_v34  ;;  %v4912_v3 = vld [vmem:[%s7565_s9 + $0xf4] sm:$0xf0] }
 0x32e   : > { %v1715_v28 = vadd.f32 %v1714_v61, %v1666_v48  ;;  %v1813_v59 = vadd.f32 %v1812_v7, %v1764_v42  ;;  %v4506_v7 = vld [vmem:[%s7565_s9 + $0x100] sm:$0xf]  ;;  %v4499_v34 = vor.u32 %v4912_v3, %v4498_v16  ;;  %v4484_v16 = vld [vmem:[%s7565_s9 + $0xd8] sm:$0xf0] }
 0x32f   : > { %v1817_v32 = vpop.f32.mrf.mxu3  ;;  %v4507_v46 = vor.u32 %v4914_v63, %v4506_v7  ;;  %v4492_v63 = vld [vmem:[%s7565_s9 + $0xe8] sm:$0xf0] }
 0x330   : > { %v1719_v52 = vpop.f32.mrf.mxu2  ;;  %v6246_v13 = vadd.f32 %v1715_v28, %v5676_v29  ;;  %v6249_v38 = vadd.f32 %v1813_v59, %v5634_v56 }
 0x331   : > { %2424 = vmatpush.bf16.msra.mxu1 %v4507_v46 }
 0x333   : > { %v1667_v49 = vpop.f32.mrf.mxu1  ;;  %v1765_v19 = vpop.f32.mrf.mxu0 }
 0x334   : > { %v1668_v41 = vadd.f32 %v1667_v49, %v6097_v21  ;;  %v1766_v2 = vadd.f32 %v1765_v19, %v6099_v17 }
 0x335   : > { %2425 = vmatpush.bf16.msra.mxu1 %v4499_v34 }
 0x336   : > { %v1717_v26 = vadd.f32 %v1716_v36, %v1668_v41  ;;  %v1815_v12 = vadd.f32 %v1814_v50, %v1766_v2 }
 0x337   : > { %v1819_v40 = vpop.f32.mrf.mxu3 }
 0x338   : > { %v6252_v1 = vadd.f32 %v1717_v26, %v5685_v33  ;;  %v6255_v61 = vadd.f32 %v1815_v12, %v5637_v58  ;;  %v4911_v58 = vld [vmem:[%s7565_s9 + $0xf4] sm:$0xf]  ;;  %v1721_v4 = vpop.f32.mrf.mxu2 }
 0x339   : > { %v4503_v31 = vor.u32 %v4911_v58, %v4500_v57  ;;  %v4907_v58 = vld [vmem:[%s7565_s9 + $0xd4] sm:$0xf] }
 0x33a   : > { %v1869_v29 = vpack.c.bf16 %v6252_v1, %v6246_v13  ;;  %v1870_v56 = vpack.c.bf16 %v6255_v61, %v6249_v38 }
 0x33b   : > { %v1670_v33 = vpop.f32.mrf.mxu1  ;;  %v1768_v18 = vpop.f32.mrf.mxu0  ;;  %2523 = vmatpush.bf16.msra.mxu0 %v4503_v31  ;;  %v4487_v31 = vor.u32 %v4907_v58, %v4484_v16  ;;  %v4458_v58 = vld [vmem:[%s7565_s9 + $0xa0] sm:$0xf] }
 0x33c   : > { %2060 = vmatmul.bf16.gmra.mxu1 %v1869_v29  ;;  %4424 = vmatmul.msk.bf16.gmra.mxu2 %vm1037_vm2, %v1870_v56  ;;  %v1671_v36 = vadd.f32 %v1670_v33, %v6097_v21  ;;  %v1769_v50 = vadd.f32 %v1768_v18, %v6099_v17  ;;  %v4482_v33 = vld [vmem:[%s7565_s9 + $0xd0] sm:$0xf]  ;;  %v4908_v18 = vld [vmem:[%s7565_s9 + $0xd4] sm:$0xf0] }
 0x33d   : > { %2158 = vmatmul.bf16.gmra.mxu0 %v1869_v29  ;;  %4432 = vmatmul.msk.bf16.gmra.mxu3 %vm1037_vm2, %v1870_v56  ;;  %v4483_v57 = vor.u32 %v4908_v18, %v4482_v33  ;;  %v7637_v33 = vld [vmem:[#allocation11_spill] sm:$0xff] }
 0x33e   : > { %v1720_v24 = vadd.f32 %v1719_v52, %v1671_v36  ;;  %v1818_v25 = vadd.f32 %v1817_v32, %v1769_v50  ;;  %v4490_v52 = vld [vmem:[%s7565_s9 + $0xe0] sm:$0xf]  ;;  %v4910_v32 = vld [vmem:[%s7565_s9 + $0xe4] sm:$0xf0]  ;;  %v4905_v36 = vld [vmem:[%s7565_s9 + $0xc4] sm:$0xf] }
 0x33f   : > { %v4491_v7 = vor.u32 %v4910_v32, %v4490_v52 }
 0x340   : > { %v6286_v59 = vadd.f32 %v1720_v24, %v5707_v51  ;;  %v6289_v41 = vadd.f32 %v1818_v25, %v5670_v23  ;;  %v1724_v12 = vpop.f32.mrf.mxu2  ;;  %v1822_v51 = vpop.f32.mrf.mxu3 }
 0x341   : > { %2426 = vmatpush.bf16.msra.mxu1 %v4491_v7  ;;  %v4903_v7 = vld [vmem:[%s7565_s9 + $0xb4] sm:$0xf] }
 0x343   : > { %v1672_v48 = vpop.f32.mrf.mxu1  ;;  %v1770_v42 = vpop.f32.mrf.mxu0 }
 0x344   : > { %v1673_v43 = vadd.f32 %v1672_v48, %v6097_v21  ;;  %v1771_v49 = vadd.f32 %v1770_v42, %v6099_v17  ;;  %v4476_v48 = vld [vmem:[%s7565_s9 + $0xc8] sm:$0xf0] }
 0x345   : > { %2427 = vmatpush.bf16.msra.mxu1 %v4483_v57  ;;  %v4479_v25 = vor.u32 %v4905_v36, %v4476_v48  ;;  %v4902_v57 = vld [vmem:[%s7565_s9 + $0xa4] sm:$0xf0]  ;;  %v4524_v48 = vld [vmem:[%s7565_s9 + $0x128] sm:$0xf0] }
 0x346   : > { %v1722_v19 = vadd.f32 %v1721_v4, %v1673_v43  ;;  %v1820_v28 = vadd.f32 %v1819_v40, %v1771_v49  ;;  %v4474_v4 = vld [vmem:[%s7565_s9 + $0xc0] sm:$0xf]  ;;  %v4906_v40 = vld [vmem:[%s7565_s9 + $0xc4] sm:$0xf0] }
 0x347   : > { %v4475_v50 = vor.u32 %v4906_v40, %v4474_v4  ;;  %v4460_v4 = vld [vmem:[%s7565_s9 + $0xa8] sm:$0xf0] }
 0x348   : > { %v6292_v2 = vadd.f32 %v1722_v19, %v5711_v53  ;;  %v6295_v26 = vadd.f32 %v1820_v28, %v5672_v27  ;;  %v4909_v27 = vld [vmem:[%s7565_s9 + $0xe4] sm:$0xf]  ;;  %v1726_v52 = vpop.f32.mrf.mxu2  ;;  %v1824_v32 = vpop.f32.mrf.mxu3 }
 0x349   : > { %v4495_v56 = vor.u32 %v4909_v27, %v4492_v63  ;;  %2428 = vmatpush.bf16.msra.mxu1 %v4475_v50  ;;  %v4917_v50 = vld [vmem:[%s7565_s9 + $0x124] sm:$0xf] }
 0x34a   : > { %v1871_v23 = vpack.c.bf16 %v6292_v2, %v6286_v59  ;;  %v1872_v53 = vpack.c.bf16 %v6295_v26, %v6289_v41 }
 0x34b   : > { %v1675_v46 = vpop.f32.mrf.mxu1  ;;  %v1773_v29 = vpop.f32.mrf.mxu0  ;;  %2524 = vmatpush.bf16.msra.mxu0 %v4495_v56 }
 0x34c   : > { %2065 = vmatmul.bf16.gmra.mxu1 %v1871_v23  ;;  %4425 = vmatmul.msk.bf16.gmra.mxu2 %vm1037_vm2, %v1872_v53  ;;  %v1676_v3 = vadd.f32 %v1675_v46, %v6097_v21  ;;  %v1774_v34 = vadd.f32 %v1773_v29, %v6099_v17  ;;  %v7636_v29 = vld [vmem:[#allocation12_spill] sm:$0xff] }
 0x34d   : > { %2163 = vmatmul.bf16.gmra.mxu0 %v1871_v23  ;;  %4433 = vmatmul.msk.bf16.gmra.mxu3 %vm1037_vm2, %v1872_v53  ;;  %v4466_v23 = vld [vmem:[%s7565_s9 + $0xb0] sm:$0xf]  ;;  %v4904_v53 = vld [vmem:[%s7565_s9 + $0xb4] sm:$0xf0] }
 0x34e   : > { %v1725_v43 = vadd.f32 %v1724_v12, %v1676_v3  ;;  %v1823_v49 = vadd.f32 %v1822_v51, %v1774_v34  ;;  %v4918_v3 = vld [vmem:[%s7565_s9 + $0x124] sm:$0xf0]  ;;  %v4901_v34 = vld [vmem:[%s7565_s9 + $0xa4] sm:$0xf] }
 0x34f   : > { %2525 = vmatpush.bf16.msra.mxu0 %v4487_v31  ;;  %v4459_v31 = vor.u32 %v4902_v57, %v4458_v58  ;;  %v4463_v36 = vor.u32 %v4901_v34, %v4460_v4 }
 0x350   : > { %v6356_v63 = vadd.f32 %v1725_v43, %v5727_v8  ;;  %v6359_v46 = vadd.f32 %v1823_v49, %v5691_v39  ;;  %v4522_v8 = vld [vmem:[%s7565_s9 + $0x120] sm:$0xf] }
 0x351   : > { %v4523_v40 = vor.u32 %v4918_v3, %v4522_v8  ;;  %v4338_v43 = vld [vmem:[%s7564_s8 + $0x2] sm:$0x3] }
 0x353   : > { %v1677_v42 = vpop.f32.mrf.mxu1  ;;  %v1775_v24 = vpop.f32.mrf.mxu0  ;;  %2526 = vmatpush.bf16.msra.mxu0 %v4479_v25  ;;  %2479 = vmatpush.bf16.msra.mxu2 %v4523_v40 }
 0x354   : > { %v1678_v19 = vadd.f32 %v1677_v42, %v6097_v21  ;;  %v1776_v28 = vadd.f32 %v1775_v24, %v6099_v17  ;;  %v4467_v21 = vor.u32 %v4904_v53, %v4466_v23  ;;  %v4468_v17 = vld [vmem:[%s7565_s9 + $0xb8] sm:$0xf0]  ;;  %v4527_v42 = vor.u32 %v4917_v50, %v4524_v48 }
 0x355   : > { %v4471_v27 = vor.u32 %v4903_v7, %v4468_v17 }
 0x356   : > { %v1727_v12 = vadd.f32 %v1726_v52, %v1678_v19  ;;  %v1825_v51 = vadd.f32 %v1824_v32, %v1776_v28  ;;  %2429 = vmatpush.bf16.msra.mxu1 %v4467_v21  ;;  %2577 = vmatpush.bf16.msra.mxu3 %v4527_v42  ;;  %v6400_v19 = vperm.slane %v4338_v43, 0  ;;  %v6402_v52 = vperm.slane %v4338_v43, 1 }
 0x357   : > { %2527 = vmatpush.bf16.msra.mxu0 %v4471_v27 }
 0x358   : > { %v6362_v56 = vadd.f32 %v1727_v12, %v7636_v29  ;;  %v6365_v18 = vadd.f32 %v1825_v51, %v7637_v33 }
 0x35a   : > { %v1873_v39 = vpack.c.bf16 %v6362_v56, %v6356_v63  ;;  %v1874_v16 = vpack.c.bf16 %v6365_v18, %v6359_v46  ;;  %2430 = vmatpush.bf16.msra.mxu1 %v4459_v31 }
 0x35b   : > { %2528 = vmatpush.bf16.msra.mxu0 %v4463_v36 }
 0x35c   : > { %2070 = vmatmul.bf16.gmra.mxu1 %v1873_v39  ;;  %4426 = vmatmul.msk.bf16.gmra.mxu2 %vm1037_vm2, %v1874_v16 }
 0x35d   : > { %2168 = vmatmul.bf16.gmra.mxu0 %v1873_v39  ;;  %4434 = vmatmul.msk.bf16.gmra.mxu3 %vm1037_vm2, %v1874_v16 }
 0x369   : > { %v2036_v24 = vpop.f32.mrf.mxu1 }
 0x36a   : > { %v2134_v25 = vpop.f32.mrf.mxu0  ;;  %v2037_v53 = vadd.f32 %v2036_v24, %v6400_v19 }
 0x36b   : > { %v2135_v7 = vadd.f32 %v2134_v25, %v6402_v52 }
 0x36f   : > { %v2085_v49 = vpop.f32.mrf.mxu2 }
 0x370   : > { %v2183_v28 = vpop.f32.mrf.mxu3  ;;  %v2086_v12 = vadd.f32 %v2085_v49, %v2037_v53 }
 0x371   : > { %v2038_v32 = vpop.f32.mrf.mxu1  ;;  %v2184_v21 = vadd.f32 %v2183_v28, %v2135_v7 }
 0x372   : > { %v2136_v23 = vpop.f32.mrf.mxu0  ;;  %v2039_v51 = vadd.f32 %v2038_v32, %v6400_v19  ;;  %v2223_v8 = vmax.f32 %v2086_v12, 0.0 }
 0x373   : > { %v2137_v17 = vadd.f32 %v2136_v23, %v6402_v52  ;;  %v2224_v31 = vmax.f32 %v2184_v21, 0.0 }
 0x377   : > { %v2087_v27 = vpop.f32.mrf.mxu2 }
 0x378   : > { %v2088_v29 = vadd.f32 %v2087_v27, %v2039_v51  ;;  %v2185_v33 = vpop.f32.mrf.mxu3 }
 0x379   : > { %v2186_v58 = vadd.f32 %v2185_v33, %v2137_v17  ;;  %v2041_v57 = vpop.f32.mrf.mxu1 }
 0x37a   : > { %v2225_v39 = vmax.f32 %v2088_v29, 0.0  ;;  %v2139_v16 = vpop.f32.mrf.mxu0  ;;  %v2042_v42 = vadd.f32 %v2041_v57, %v6400_v19 }
 0x37b   : > { %v2226_v3 = vmax.f32 %v2186_v58, 0.0  ;;  %v2140_v24 = vadd.f32 %v2139_v16, %v6402_v52 }
 0x37c   : > { %v2255_v34 = vpack.c.bf16 %v2225_v39, %v2223_v8 }
 0x37d   : > { %v2256_v4 = vpack.c.bf16 %v2226_v3, %v2224_v31 }
 0x37e   : > { %2431 = vmatmul.bf16.vlgmr.msra.gmra.mxu1 %v2255_v34  ;;  %2529 = vmatmul.bf16.vlgmr.msra.gmra.mxu0 %v2255_v34 }
 0x37f   : > { %4536 = vmatmul.msk.bf16.vlgmr.msra.gmra.mxu2 %vm1037_vm2, %v2256_v4  ;;  %4544 = vmatmul.msk.bf16.vlgmr.msra.gmra.mxu3 %vm1037_vm2, %v2256_v4  ;;  %v2090_v40 = vpop.f32.mrf.mxu2 }
 0x380   : > { %v2188_v36 = vpop.f32.mrf.mxu3  ;;  %v2091_v25 = vadd.f32 %v2090_v40, %v2042_v42 }
 0x381   : > { %v2043_v50 = vpop.f32.mrf.mxu1  ;;  %v2189_v49 = vadd.f32 %v2188_v36, %v2140_v24 }
 0x382   : > { %v2141_v48 = vpop.f32.mrf.mxu0  ;;  %v2044_v43 = vadd.f32 %v2043_v50, %v6400_v19  ;;  %v2227_v51 = vmax.f32 %v2091_v25, 0.0 }
 0x383   : > { %v2142_v28 = vadd.f32 %v2141_v48, %v6402_v52  ;;  %v2228_v27 = vmax.f32 %v2189_v49, 0.0 }
 0x387   : > { %v2092_v32 = vpop.f32.mrf.mxu2 }
 0x388   : > { %v2093_v23 = vadd.f32 %v2092_v32, %v2044_v43  ;;  %v2190_v53 = vpop.f32.mrf.mxu3 }
 0x389   : > { %v2191_v7 = vadd.f32 %v2190_v53, %v2142_v28  ;;  %v2046_v12 = vpop.f32.mrf.mxu1 }
 0x38a   : > { %v2229_v21 = vmax.f32 %v2093_v23, 0.0  ;;  %v2144_v17 = vpop.f32.mrf.mxu0  ;;  %v2047_v31 = vadd.f32 %v2046_v12, %v6400_v19 }
 0x38b   : > { %v2230_v29 = vmax.f32 %v2191_v7, 0.0  ;;  %v2145_v3 = vadd.f32 %v2144_v17, %v6402_v52 }
 0x38c   : > { %v2257_v33 = vpack.c.bf16 %v2229_v21, %v2227_v51 }
 0x38d   : > { %v2258_v58 = vpack.c.bf16 %v2230_v29, %v2228_v27 }
 0x38e   : > { %2436 = vmatmul.bf16.gmra.mxu1 %v2257_v33  ;;  %2534 = vmatmul.bf16.gmra.mxu0 %v2257_v33 }
 0x38f   : > { %4537 = vmatmul.msk.bf16.gmra.mxu2 %vm1037_vm2, %v2258_v58  ;;  %4545 = vmatmul.msk.bf16.gmra.mxu3 %vm1037_vm2, %v2258_v58  ;;  %v2095_v57 = vpop.f32.mrf.mxu2 }
 0x390   : > { %v2193_v8 = vpop.f32.mrf.mxu3  ;;  %v2096_v34 = vadd.f32 %v2095_v57, %v2047_v31 }
 0x391   : > { %v2048_v39 = vpop.f32.mrf.mxu1  ;;  %v2194_v40 = vadd.f32 %v2193_v8, %v2145_v3 }
 0x392   : > { %v2146_v16 = vpop.f32.mrf.mxu0  ;;  %v2049_v4 = vadd.f32 %v2048_v39, %v6400_v19  ;;  %v2231_v43 = vmax.f32 %v2096_v34, 0.0 }
 0x393   : > { %v2147_v36 = vadd.f32 %v2146_v16, %v6402_v52  ;;  %v2232_v32 = vmax.f32 %v2194_v40, 0.0 }
 0x397   : > { %v2097_v50 = vpop.f32.mrf.mxu2 }
 0x398   : > { %v2098_v48 = vadd.f32 %v2097_v50, %v2049_v4  ;;  %v2195_v42 = vpop.f32.mrf.mxu3 }
 0x399   : > { %v2196_v24 = vadd.f32 %v2195_v42, %v2147_v36  ;;  %v2051_v25 = vpop.f32.mrf.mxu1 }
 0x39a   : > { %v2233_v49 = vmax.f32 %v2098_v48, 0.0  ;;  %v2149_v28 = vpop.f32.mrf.mxu0  ;;  %v2052_v27 = vadd.f32 %v2051_v25, %v6400_v19 }
 0x39b   : > { %v2234_v23 = vmax.f32 %v2196_v24, 0.0  ;;  %v2150_v29 = vadd.f32 %v2149_v28, %v6402_v52 }
 0x39c   : > { %v2259_v53 = vpack.c.bf16 %v2233_v49, %v2231_v43 }
 0x39d   : > { %v2260_v7 = vpack.c.bf16 %v2234_v23, %v2232_v32  ;;  %v4939_v32 = vld [vmem:[%s7563_s7 + $0x1d4] sm:$0xf]  ;;  %v4649_v23 = vld [vmem:[%s7563_s7 + $0x1d8] sm:$0xf0] }
 0x39e   : > { %2441 = vmatmul.bf16.gmra.mxu1 %v2259_v53  ;;  %2539 = vmatmul.bf16.gmra.mxu0 %v2259_v53 }
 0x39f   : > { %4538 = vmatmul.msk.bf16.gmra.mxu2 %vm1037_vm2, %v2260_v7  ;;  %4546 = vmatmul.msk.bf16.gmra.mxu3 %vm1037_vm2, %v2260_v7  ;;  %v2100_v12 = vpop.f32.mrf.mxu2  ;;  %v4652_v7 = vor.u32 %v4939_v32, %v4649_v23 }
 0x3a0   : > { %v2198_v51 = vpop.f32.mrf.mxu3  ;;  %v2101_v33 = vadd.f32 %v2100_v12, %v2052_v27  ;;  %v4647_v12 = vld [vmem:[%s7563_s7 + $0x1d0] sm:$0xf] }
 0x3a1   : > { %v2053_v21 = vpop.f32.mrf.mxu1  ;;  %v2199_v57 = vadd.f32 %v2198_v51, %v2150_v29  ;;  %v4940_v51 = vld [vmem:[%s7563_s7 + $0x1d4] sm:$0xf0]  ;;  %v4633_v29 = vld [vmem:[%s7563_s7 + $0x1b8] sm:$0xf0]  ;;  %2972 = vmatpush.bf16.msrb.mxu3 %v4652_v7 }
 0x3a2   : > { %v2151_v17 = vpop.f32.mrf.mxu0  ;;  %v2054_v58 = vadd.f32 %v2053_v21, %v6400_v19  ;;  %v2235_v4 = vmax.f32 %v2101_v33, 0.0  ;;  %v4935_v21 = vld [vmem:[%s7563_s7 + $0x1b4] sm:$0xf]  ;;  %v4648_v27 = vor.u32 %v4940_v51, %v4647_v12  ;;  %v4933_v12 = vld [vmem:[%s7563_s7 + $0x1a4] sm:$0xf] }
 0x3a3   : > { %v2152_v8 = vadd.f32 %v2151_v17, %v6402_v52  ;;  %v2236_v50 = vmax.f32 %v2199_v57, 0.0  ;;  %v4636_v57 = vor.u32 %v4935_v21, %v4633_v29  ;;  %v4625_v51 = vld [vmem:[%s7563_s7 + $0x1a8] sm:$0xf0] }
 0x3a4   : > { %2874 = vmatpush.bf16.msrb.mxu2 %v4648_v27 }
 0x3a5   : > { %2917 = vmatpush.bf16.msrb.mxu0 %v4636_v57 }
 0x3a7   : > { %v2102_v39 = vpop.f32.mrf.mxu2 }
 0x3a8   : > { %v2103_v16 = vadd.f32 %v2102_v39, %v2054_v58  ;;  %v2200_v31 = vpop.f32.mrf.mxu3 }
 0x3a9   : > { %v2201_v3 = vadd.f32 %v2200_v31, %v2152_v8  ;;  %v2056_v34 = vpop.f32.mrf.mxu1 }
 0x3aa   : > { %v2237_v40 = vmax.f32 %v2103_v16, 0.0  ;;  %v2154_v36 = vpop.f32.mrf.mxu0  ;;  %v2057_v53 = vadd.f32 %v2056_v34, %v6400_v19 }
 0x3ab   : > { %v2238_v48 = vmax.f32 %v2201_v3, 0.0  ;;  %v2155_v17 = vadd.f32 %v2154_v36, %v6402_v52 }
 0x3ac   : > { %v2261_v42 = vpack.c.bf16 %v2237_v40, %v2235_v4 }
 0x3ad   : > { %v2262_v24 = vpack.c.bf16 %v2238_v48, %v2236_v50 }
 0x3ae   : > { %2446 = vmatmul.bf16.gmra.mxu1 %v2261_v42  ;;  %2544 = vmatmul.bf16.gmra.mxu0 %v2261_v42 }
 0x3af   : > { %4539 = vmatmul.msk.bf16.gmra.mxu2 %vm1037_vm2, %v2262_v24  ;;  %4547 = vmatmul.msk.bf16.gmra.mxu3 %vm1037_vm2, %v2262_v24  ;;  %v2105_v25 = vpop.f32.mrf.mxu2 }
 0x3b0   : > { %v2203_v43 = vpop.f32.mrf.mxu3  ;;  %v2106_v33 = vadd.f32 %v2105_v25, %v2057_v53 }
 0x3b1   : > { %v2058_v49 = vpop.f32.mrf.mxu1  ;;  %v2204_v8 = vadd.f32 %v2203_v43, %v2155_v17  ;;  %v4631_v43 = vld [vmem:[%s7563_s7 + $0x1b0] sm:$0xf]  ;;  %v4628_v17 = vor.u32 %v4933_v12, %v4625_v51  ;;  %v4932_v12 = vld [vmem:[%s7563_s7 + $0x194] sm:$0xf0] }
 0x3b2   : > { %v2156_v28 = vpop.f32.mrf.mxu0  ;;  %v2059_v58 = vadd.f32 %v2058_v49, %v6400_v19  ;;  %v2239_v40 = vmax.f32 %v2106_v33, 0.0  ;;  %v4936_v49 = vld [vmem:[%s7563_s7 + $0x1b4] sm:$0xf0] }
 0x3b3   : > { %v2157_v39 = vadd.f32 %v2156_v28, %v6402_v52  ;;  %v2240_v48 = vmax.f32 %v2204_v8, 0.0  ;;  %v4632_v28 = vor.u32 %v4936_v49, %v4631_v43  ;;  %2918 = vmatpush.bf16.msrb.mxu0 %v4628_v17 }
 0x3b5   : > { %2819 = vmatpush.bf16.msra.mxu1 %v4632_v28  ;;  %v4931_v28 = vld [vmem:[%s7563_s7 + $0x194] sm:$0xf] }
 0x3b7   : > { %v2107_v16 = vpop.f32.mrf.mxu2 }
 0x3b8   : > { %v2108_v31 = vadd.f32 %v2107_v16, %v2059_v58  ;;  %v2205_v3 = vpop.f32.mrf.mxu3 }
 0x3b9   : > { %v2206_v34 = vadd.f32 %v2205_v3, %v2157_v39  ;;  %v2061_v4 = vpop.f32.mrf.mxu1 }
 0x3ba   : > { %v2241_v36 = vmax.f32 %v2108_v31, 0.0  ;;  %v2159_v50 = vpop.f32.mrf.mxu0  ;;  %v2062_v21 = vadd.f32 %v2061_v4, %v6400_v19 }
 0x3bb   : > { %v2242_v42 = vmax.f32 %v2206_v34, 0.0  ;;  %v2160_v27 = vadd.f32 %v2159_v50, %v6402_v52  ;;  %v4623_v50 = vld [vmem:[%s7563_s7 + $0x1a0] sm:$0xf] }
 0x3bc   : > { %v2263_v24 = vpack.c.bf16 %v2241_v36, %v2239_v40 }
 0x3bd   : > { %v2264_v25 = vpack.c.bf16 %v2242_v42, %v2240_v48 }
 0x3be   : > { %2451 = vmatmul.bf16.gmra.mxu1 %v2263_v24  ;;  %2549 = vmatmul.bf16.gmra.mxu0 %v2263_v24 }
 0x3bf   : > { %4540 = vmatmul.msk.bf16.gmra.mxu2 %vm1037_vm2, %v2264_v25  ;;  %4548 = vmatmul.msk.bf16.gmra.mxu3 %vm1037_vm2, %v2264_v25  ;;  %v2110_v32 = vpop.f32.mrf.mxu2  ;;  %v4934_v25 = vld [vmem:[%s7563_s7 + $0x1a4] sm:$0xf0] }
 0x3c0   : > { %v2208_v23 = vpop.f32.mrf.mxu3  ;;  %v2111_v29 = vadd.f32 %v2110_v32, %v2062_v21  ;;  %v4624_v43 = vor.u32 %v4934_v25, %v4623_v50  ;;  %v4617_v32 = vld [vmem:[%s7563_s7 + $0x198] sm:$0xf0] }
 0x3c1   : > { %v2063_v53 = vpop.f32.mrf.mxu1  ;;  %v2209_v58 = vadd.f32 %v2208_v23, %v2160_v27  ;;  %v4615_v23 = vld [vmem:[%s7563_s7 + $0x190] sm:$0xf] }
 0x3c2   : > { %v2161_v7 = vpop.f32.mrf.mxu0  ;;  %v2064_v33 = vadd.f32 %v2063_v53, %v6400_v19  ;;  %v2243_v34 = vmax.f32 %v2111_v29, 0.0  ;;  %2820 = vmatpush.bf16.msra.mxu1 %v4624_v43  ;;  %v4616_v21 = vor.u32 %v4932_v12, %v4615_v23  ;;  %v4928_v12 = vld [vmem:[%s7563_s7 + $0x174] sm:$0xf0] }
 0x3c3   : > { %v2162_v57 = vadd.f32 %v2161_v7, %v6402_v52  ;;  %v2244_v48 = vmax.f32 %v2209_v58, 0.0  ;;  %v4620_v7 = vor.u32 %v4931_v28, %v4617_v32  ;;  %v4609_v28 = vld [vmem:[%s7563_s7 + $0x188] sm:$0xf0] }
 0x3c5   : > { %2919 = vmatpush.bf16.msrb.mxu0 %v4620_v7  ;;  %v4599_v7 = vld [vmem:[%s7563_s7 + $0x170] sm:$0xf] }
 0x3c6   : > { %2821 = vmatpush.bf16.msra.mxu1 %v4616_v21 }
 0x3c7   : > { %v2112_v8 = vpop.f32.mrf.mxu2 }
 0x3c8   : > { %v2113_v39 = vadd.f32 %v2112_v8, %v2064_v33  ;;  %v2210_v16 = vpop.f32.mrf.mxu3 }
 0x3c9   : > { %v2211_v31 = vadd.f32 %v2210_v16, %v2162_v57  ;;  %v2066_v3 = vpop.f32.mrf.mxu1 }
 0x3ca   : > { %v2245_v40 = vmax.f32 %v2113_v39, 0.0  ;;  %v2164_v36 = vpop.f32.mrf.mxu0  ;;  %v2067_v27 = vadd.f32 %v2066_v3, %v6400_v19  ;;  %v4607_v3 = vld [vmem:[%s7563_s7 + $0x180] sm:$0xf] }
 0x3cb   : > { %v2246_v4 = vmax.f32 %v2211_v31, 0.0  ;;  %v2165_v29 = vadd.f32 %v2164_v36, %v6402_v52  ;;  %v4930_v36 = vld [vmem:[%s7563_s7 + $0x184] sm:$0xf0] }
 0x3cc   : > { %v2265_v42 = vpack.c.bf16 %v2245_v40, %v2243_v34  ;;  %v4608_v43 = vor.u32 %v4930_v36, %v4607_v3 }
 0x3cd   : > { %v2266_v24 = vpack.c.bf16 %v2246_v4, %v2244_v48 }
 0x3ce   : > { %2456 = vmatmul.bf16.gmra.mxu1 %v2265_v42  ;;  %2554 = vmatmul.bf16.gmra.mxu0 %v2265_v42 }
 0x3cf   : > { %4541 = vmatmul.msk.bf16.gmra.mxu2 %vm1037_vm2, %v2266_v24  ;;  %4549 = vmatmul.msk.bf16.gmra.mxu3 %vm1037_vm2, %v2266_v24  ;;  %v2115_v49 = vpop.f32.mrf.mxu2 }
 0x3d0   : > { %v2213_v53 = vpop.f32.mrf.mxu3  ;;  %v2116_v33 = vadd.f32 %v2115_v49, %v2067_v27  ;;  %v4929_v49 = vld [vmem:[%s7563_s7 + $0x184] sm:$0xf]  ;;  %2822 = vmatpush.bf16.msra.mxu1 %v4608_v43  ;;  %v4601_v27 = vld [vmem:[%s7563_s7 + $0x178] sm:$0xf0]  ;;  %v4924_v43 = vld [vmem:[%s7563_s7 + $0x154] sm:$0xf0] }
 0x3d1   : > { %v2068_v51 = vpop.f32.mrf.mxu1  ;;  %v2214_v57 = vadd.f32 %v2213_v53, %v2165_v29  ;;  %v4612_v23 = vor.u32 %v4929_v49, %v4609_v28 }
 0x3d2   : > { %v2166_v17 = vpop.f32.mrf.mxu0  ;;  %v2069_v58 = vadd.f32 %v2068_v51, %v6400_v19  ;;  %v2247_v48 = vmax.f32 %v2116_v33, 0.0  ;;  %v4927_v51 = vld [vmem:[%s7563_s7 + $0x174] sm:$0xf] }
 0x3d3   : > { %v2167_v8 = vadd.f32 %v2166_v17, %v6402_v52  ;;  %v2248_v24 = vmax.f32 %v2214_v57, 0.0  ;;  %2920 = vmatpush.bf16.msrb.mxu0 %v4612_v23  ;;  %v4600_v17 = vor.u32 %v4928_v12, %v4599_v7  ;;  %v4604_v29 = vor.u32 %v4927_v51, %v4601_v27  ;;  %v4926_v57 = vld [vmem:[%s7563_s7 + $0x164] sm:$0xf0] }
 0x3d5   : > { %2823 = vmatpush.bf16.msra.mxu1 %v4600_v17  ;;  %v4922_v17 = vld [vmem:[%s7563_s7 + $0x144] sm:$0xf0] }
 0x3d7   : > { %v2117_v39 = vpop.f32.mrf.mxu2  ;;  %2921 = vmatpush.bf16.msrb.mxu0 %v4604_v29 }
 0x3d8   : > { %v2118_v16 = vadd.f32 %v2117_v39, %v2069_v58  ;;  %v2215_v31 = vpop.f32.mrf.mxu3  ;;  %v4591_v58 = vld [vmem:[%s7563_s7 + $0x160] sm:$0xf] }
 0x3d9   : > { %v2216_v34 = vadd.f32 %v2215_v31, %v2167_v8  ;;  %v2071_v40 = vpop.f32.mrf.mxu1  ;;  %v4925_v31 = vld [vmem:[%s7563_s7 + $0x164] sm:$0xf] }
 0x3da   : > { %v2249_v4 = vmax.f32 %v2118_v16, 0.0  ;;  %v2169_v42 = vpop.f32.mrf.mxu0  ;;  %v2072_v8 = vadd.f32 %v2071_v40, %v6400_v19  ;;  %v4592_v16 = vor.u32 %v4926_v57, %v4591_v58  ;;  %v4938_v58 = vld [vmem:[%s7563_s7 + $0x1c4] sm:$0xf0]  ;;  %v4921_v57 = vld [vmem:[%s7563_s7 + $0x144] sm:$0xf] }
 0x3db   : > { %v2250_v50 = vmax.f32 %v2216_v34, 0.0  ;;  %v4593_v34 = vld [vmem:[%s7563_s7 + $0x168] sm:$0xf0] }
 0x3dc   : > { %v2267_v25 = vpack.c.bf16 %v2249_v4, %v2247_v48  ;;  %v2170_v48 = vadd.f32 %v2169_v42, %v6402_v52  ;;  %v4596_v4 = vor.u32 %v4925_v31, %v4593_v34  ;;  %v4923_v42 = vld [vmem:[%s7563_s7 + $0x154] sm:$0xf]  ;;  %2824 = vmatpush.bf16.msra.mxu1 %v4592_v16  ;;  %v4577_v16 = vld [vmem:[%s7563_s7 + $0x148] sm:$0xf0]  ;;  %v4937_v31 = vld [vmem:[%s7563_s7 + $0x1c4] sm:$0xf] }
 0x3dd   : > { %v2268_v32 = vpack.c.bf16 %v2250_v50, %v2248_v24  ;;  %v4641_v34 = vld [vmem:[%s7563_s7 + $0x1c8] sm:$0xf0] }
 0x3de   : > { %2461 = vmatmul.bf16.gmra.mxu1 %v2267_v25  ;;  %2559 = vmatmul.bf16.gmra.mxu0 %v2267_v25  ;;  %v4583_v25 = vld [vmem:[%s7563_s7 + $0x150] sm:$0xf] }
 0x3df   : > { %4542 = vmatmul.msk.bf16.gmra.mxu2 %vm1037_vm2, %v2268_v32  ;;  %4550 = vmatmul.msk.bf16.gmra.mxu3 %vm1037_vm2, %v2268_v32  ;;  %v2120_v53 = vpop.f32.mrf.mxu2 }
 0x3e0   : > { %v2218_v21 = vpop.f32.mrf.mxu3  ;;  %v2121_v24 = vadd.f32 %v2120_v53, %v2072_v8  ;;  %2922 = vmatpush.bf16.msrb.mxu0 %v4596_v4  ;;  %v4644_v4 = vor.u32 %v4937_v31, %v4641_v34 }
 0x3e1   : > { %v2073_v33 = vpop.f32.mrf.mxu1  ;;  %v2219_v3 = vadd.f32 %v2218_v21, %v2170_v48  ;;  %v4575_v21 = vld [vmem:[%s7563_s7 + $0x140] sm:$0xf]  ;;  %v4580_v48 = vor.u32 %v4921_v57, %v4577_v16 }
 0x3e2   : > { %v2171_v39 = vpop.f32.mrf.mxu0  ;;  %v2074_v50 = vadd.f32 %v2073_v33, %v6400_v19  ;;  %v4584_v19 = vor.u32 %v4924_v43, %v4583_v25  ;;  %v2251_v53 = vmax.f32 %v2121_v24, 0.0  ;;  %v4576_v29 = vor.u32 %v4922_v17, %v4575_v21  ;;  %v4639_v33 = vld [vmem:[%s7563_s7 + $0x1c0] sm:$0xf]  ;;  %2973 = vmatpush.bf16.msrb.mxu3 %v4644_v4 }
 0x3e3   : > { %v2172_v40 = vadd.f32 %v2171_v39, %v6402_v52  ;;  %v4585_v52 = vld [vmem:[%s7563_s7 + $0x158] sm:$0xf0]  ;;  %v2252_v12 = vmax.f32 %v2219_v3, 0.0  ;;  %v4640_v39 = vor.u32 %v4938_v58, %v4639_v33  ;;  %v4455_v3 = vld [vmem:[%s7566_s10 + $0x2] sm:$0x3] }
 0x3e4   : > { %v4588_v23 = vor.u32 %v4923_v42, %v4585_v52  ;;  %2825 = vmatpush.bf16.msra.mxu1 %v4584_v19  ;;  %v6575_v25 = vperm.slane %v4455_v3, 0  ;;  %v6577_v43 = vperm.slane %v4455_v3, 1 }
 0x3e5   : > { %2875 = vmatpush.bf16.msrb.mxu2 %v4640_v39 }
 0x3e6   : > { %2923 = vmatpush.bf16.msrb.mxu0 %v4588_v23 }
 0x3e7   : > { %v2122_v36 = vpop.f32.mrf.mxu2 }
 0x3e8   : > { %v2123_v49 = vadd.f32 %v2122_v36, %v2074_v50  ;;  %v2220_v28 = vpop.f32.mrf.mxu3  ;;  %2826 = vmatpush.bf16.msra.mxu1 %v4576_v29 }
 0x3e9   : > { %v2221_v32 = vadd.f32 %v2220_v28, %v2172_v40 }
 0x3ea   : > { %v2253_v7 = vmax.f32 %v2123_v49, 0.0  ;;  %2924 = vmatpush.bf16.msrb.mxu0 %v4580_v48 }
 0x3eb   : > { %v2254_v51 = vmax.f32 %v2221_v32, 0.0 }
 0x3ec   : > { %v2269_v27 = vpack.c.bf16 %v2253_v7, %v2251_v53 }
 0x3ed   : > { %v2270_v8 = vpack.c.bf16 %v2254_v51, %v2252_v12 }
 0x3ee   : > { %2466 = vmatmul.bf16.gmra.mxu1 %v2269_v27  ;;  %2564 = vmatmul.bf16.gmra.mxu0 %v2269_v27 }
 0x3ef   : > { %4543 = vmatmul.msk.bf16.gmra.mxu2 %vm1037_vm2, %v2270_v8  ;;  %4551 = vmatmul.msk.bf16.gmra.mxu3 %vm1037_vm2, %v2270_v8 }
 0x3fb   : > { %v2432_v24 = vpop.f32.mrf.mxu1  ;;  %v2530_v50 = vpop.f32.mrf.mxu0 }
 0x3fc   : > { %v2433_v28 = vadd.f32 %v2432_v24, %v6575_v25  ;;  %v2531_v19 = vadd.f32 %v2530_v50, %v6577_v43 }
 0x402   : > { %v2481_v40 = vpop.f32.mrf.mxu2  ;;  %v2579_v36 = vpop.f32.mrf.mxu3 }
 0x403   : > { %v2434_v42 = vpop.f32.mrf.mxu1  ;;  %v2532_v49 = vpop.f32.mrf.mxu0  ;;  %v2482_v52 = vadd.f32 %v2481_v40, %v2433_v28  ;;  %v2580_v32 = vadd.f32 %v2579_v36, %v2531_v19 }
 0x404   : > { %v2435_v23 = vadd.f32 %v2434_v42, %v6575_v25  ;;  %v2533_v53 = vadd.f32 %v2532_v49, %v6577_v43 }
 0x405   : > { %v6584_v29 = vadd.f32 %v2482_v52, %v6106_v10  ;;  %v6587_v33 = vadd.f32 %v2580_v32, %v6109_v35 }
 0x40a   : > { %v2483_v7 = vpop.f32.mrf.mxu2  ;;  %v2581_v12 = vpop.f32.mrf.mxu3 }
 0x40b   : > { %v2484_v51 = vadd.f32 %v2483_v7, %v2435_v23  ;;  %v2582_v21 = vadd.f32 %v2581_v12, %v2533_v53  ;;  %v2437_v17 = vpop.f32.mrf.mxu1  ;;  %v2535_v27 = vpop.f32.mrf.mxu0  ;;  %v7582_v12 = vmov 0  }
 0x40c   : > { %v2438_v31 = vadd.f32 %v2437_v17, %v6575_v25  ;;  %5033 = vset.pattern.permute.xlu1 %v7582_v12  ;;  %5032 = vset.pattern.permute.xlu2 %v7582_v12 }
 0x40d   : > { %v6590_v58 = vadd.f32 %v2484_v51, %v6112_v37  ;;  %v6593_v57 = vadd.f32 %v2582_v21, %v6115_v6  ;;  %v2536_v6 = vadd.f32 %v2535_v27, %v6577_v43 }
 0x40f   : > { %v2651_v8 = vpack.c.bf16 %v6590_v58, %v6584_v29  ;;  %v2652_v39 = vpack.c.bf16 %v6593_v57, %v6587_v33 }
 0x411   : > { %2827 = vmatmul.bf16.vlgmr.msra.gmra.mxu1 %v2651_v8  ;;  %4653 = vmatmul.msk.bf16.vlgmr.msrb.gmra.mxu2 %vm1037_vm2, %v2652_v39 }
 0x412   : > { %2925 = vmatmul.bf16.vlgmr.msrb.gmra.mxu0 %v2651_v8  ;;  %4661 = vmatmul.msk.bf16.vlgmr.msrb.gmra.mxu3 %vm1037_vm2, %v2652_v39  ;;  %v2486_v10 = vpop.f32.mrf.mxu2  ;;  %v2584_v35 = vpop.f32.mrf.mxu3 }
 0x413   : > { %v2439_v16 = vpop.f32.mrf.mxu1  ;;  %v2537_v37 = vpop.f32.mrf.mxu0  ;;  %v2487_v34 = vadd.f32 %v2486_v10, %v2438_v31  ;;  %v2585_v48 = vadd.f32 %v2584_v35, %v2536_v6 }
 0x414   : > { %v2440_v4 = vadd.f32 %v2439_v16, %v6575_v25  ;;  %v2538_v24 = vadd.f32 %v2537_v37, %v6577_v43 }
 0x415   : > { %v6606_v28 = vadd.f32 %v2487_v34, %v6128_v62  ;;  %v6609_v19 = vadd.f32 %v2585_v48, %v6131_v9 }
 0x41a   : > { %v2488_v50 = vpop.f32.mrf.mxu2  ;;  %v2586_v3 = vpop.f32.mrf.mxu3 }
 0x41b   : > { %v2489_v40 = vadd.f32 %v2488_v50, %v2440_v4  ;;  %v2587_v36 = vadd.f32 %v2586_v3, %v2538_v24  ;;  %v2442_v42 = vpop.f32.mrf.mxu1  ;;  %v2540_v49 = vpop.f32.mrf.mxu0 }
 0x41c   : > { %v2443_v51 = vadd.f32 %v2442_v42, %v6575_v25  ;;  %v2541_v21 = vadd.f32 %v2540_v49, %v6577_v43 }
 0x41d   : > { %v6612_v52 = vadd.f32 %v2489_v40, %v6134_v15  ;;  %v6615_v32 = vadd.f32 %v2587_v36, %v6137_v44  ;;  %v3631_v44 = vld [vmem:[%s7569_s13] sm:$0xff] }
 0x41e   : > { %3649 = vperm.xlu1 %5033, %v3631_v44   ;;  %v3479_v36 = vld [vmem:[%s7568_s12] sm:$0xf] }
 0x41f   : > { %v2654_v23 = vpack.c.bf16 %v6615_v32, %v6609_v19  ;;  %v2653_v53 = vpack.c.bf16 %v6612_v52, %v6606_v28  ;;  %3482 = vperm.xlu2 %5032, %v3479_v36  }
 0x421   : > { %2832 = vmatmul.bf16.gmra.mxu1 %v2653_v53  ;;  %4654 = vmatmul.msk.bf16.gmra.mxu2 %vm1037_vm2, %v2654_v23 }
 0x422   : > { %2930 = vmatmul.bf16.gmra.mxu0 %v2653_v53  ;;  %4662 = vmatmul.msk.bf16.gmra.mxu3 %vm1037_vm2, %v2654_v23  ;;  %v2491_v62 = vpop.f32.mrf.mxu2  ;;  %v2589_v9 = vpop.f32.mrf.mxu3  ;;  %v3774_v23 = vld [vmem:[%s7570_s14 + $0x78] sm:$0xff] }
 0x423   : > { %v2444_v7 = vpop.f32.mrf.mxu1  ;;  %v2542_v15 = vpop.f32.mrf.mxu0  ;;  %v2492_v17 = vadd.f32 %v2491_v62, %v2443_v51  ;;  %v2590_v27 = vadd.f32 %v2589_v9, %v2541_v21 }
 0x424   : > { %v2445_v8 = vadd.f32 %v2444_v7, %v6575_v25  ;;  %v2543_v39 = vadd.f32 %v2542_v15, %v6577_v43 }
 0x425   : > { %v6633_v34 = vadd.f32 %v2492_v17, %v6150_v22  ;;  %v6636_v48 = vadd.f32 %v2590_v27, %v6153_v0 }
 0x42a   : > { %v2493_v10 = vpop.f32.mrf.mxu2  ;;  %v2591_v35 = vpop.f32.mrf.mxu3 }
 0x42b   : > { %v2494_v16 = vadd.f32 %v2493_v10, %v2445_v8  ;;  %v2592_v37 = vadd.f32 %v2591_v35, %v2543_v39  ;;  %v2447_v31 = vpop.f32.mrf.mxu1  ;;  %v2545_v6 = vpop.f32.mrf.mxu0 }
 0x42c   : > { %v2448_v42 = vadd.f32 %v2447_v31, %v6575_v25  ;;  %v2546_v49 = vadd.f32 %v2545_v6, %v6577_v43 }
 0x42d   : > { %v6639_v4 = vadd.f32 %v2494_v16, %v6156_v47  ;;  %v6642_v24 = vadd.f32 %v2592_v37, %v6159_v60  ;;  %v3646_v47 = vld [vmem:[%s7569_s13 + $0x78] sm:$0xff] }
 0x42e   : > { %3724 = vperm.xlu1 %5033, %v3646_v47   ;;  %v4956_v47 = vld [vmem:[%s7565_s9 + $0x1b4] sm:$0xf0] }
 0x42f   : > { %v2656_v50 = vpack.c.bf16 %v6642_v24, %v6636_v48  ;;  %v2655_v3 = vpack.c.bf16 %v6639_v4, %v6633_v34 }
 0x431   : > { %2837 = vmatmul.bf16.gmra.mxu1 %v2655_v3  ;;  %4655 = vmatmul.msk.bf16.gmra.mxu2 %vm1037_vm2, %v2656_v50 }
 0x432   : > { %2935 = vmatmul.bf16.gmra.mxu0 %v2655_v3  ;;  %4663 = vmatmul.msk.bf16.gmra.mxu3 %vm1037_vm2, %v2656_v50  ;;  %v2496_v22 = vpop.f32.mrf.mxu2  ;;  %v2594_v0 = vpop.f32.mrf.mxu3  ;;  %v4764_v50 = vld [vmem:[%s7565_s9 + $0x1d0] sm:$0xf]  ;;  %v4960_v3 = vld [vmem:[%s7565_s9 + $0x1d4] sm:$0xf0] }
 0x433   : > { %v2449_v60 = vpop.f32.mrf.mxu1  ;;  %v2547_v40 = vpop.f32.mrf.mxu0  ;;  %v2497_v53 = vadd.f32 %v2496_v22, %v2448_v42  ;;  %v2595_v62 = vadd.f32 %v2594_v0, %v2546_v49  ;;  %v4748_v22 = vld [vmem:[%s7565_s9 + $0x1b0] sm:$0xf]  ;;  %v4765_v0 = vor.u32 %v4960_v3, %v4764_v50  ;;  %v3772_v42 = vld [vmem:[%s7570_s14 + $0x68] sm:$0xff]  ;;  %v3642_v3 = vld [vmem:[%s7569_s13 + $0x58] sm:$0xff] }
 0x434   : > { %v2450_v9 = vadd.f32 %v2449_v60, %v6575_v25  ;;  %v2548_v7 = vadd.f32 %v2547_v40, %v6577_v43  ;;  %v4749_v36 = vor.u32 %v4956_v47, %v4748_v22  ;;  %v3773_v49 = vld [vmem:[%s7570_s14 + $0x70] sm:$0xff]  ;;  %v3643_v22 = vld [vmem:[%s7569_s13 + $0x60] sm:$0xff] }
 0x435   : > { %v6664_v8 = vadd.f32 %v2497_v53, %v6172_v45  ;;  %v6667_v39 = vadd.f32 %v2595_v62, %v6175_v14  ;;  %3270 = vmatpush.bf16.msra.mxu2 %v4765_v0 }
 0x436   : > { %3852 = vperm.xlu1 %5033, %v3774_v23   ;;  %3215 = vmatpush.bf16.msra.mxu1 %v4749_v36 }
 0x43a   : > { %v2498_v15 = vpop.f32.mrf.mxu2  ;;  %v2596_v44 = vpop.f32.mrf.mxu3 }
 0x43b   : > { %v2499_v51 = vadd.f32 %v2498_v15, %v2450_v9  ;;  %v2597_v21 = vadd.f32 %v2596_v44, %v2548_v7  ;;  %v2452_v17 = vpop.f32.mrf.mxu1  ;;  %v2550_v27 = vpop.f32.mrf.mxu0 }
 0x43c   : > { %v2453_v60 = vadd.f32 %v2452_v17, %v6575_v25  ;;  %v2551_v40 = vadd.f32 %v2550_v27, %v6577_v43 }
 0x43d   : > { %v6670_v10 = vadd.f32 %v2499_v51, %v6178_v5  ;;  %v6673_v35 = vadd.f32 %v2597_v21, %v6181_v11  ;;  %v3644_v5 = vld [vmem:[%s7569_s13 + $0x68] sm:$0xff]  ;;  %v3645_v11 = vld [vmem:[%s7569_s13 + $0x70] sm:$0xff] }
 0x43e   : > { %3714 = vperm.xlu1 %5033, %v3644_v5   ;;  %3719 = vperm.xlu2 %5032, %v3645_v11   ;;  %v4750_v11 = vld [vmem:[%s7565_s9 + $0x1b8] sm:$0xf0] }
 0x43f   : > { %v2658_v16 = vpack.c.bf16 %v6673_v35, %v6667_v39  ;;  %v2657_v37 = vpack.c.bf16 %v6670_v10, %v6664_v8 }
 0x441   : > { %2842 = vmatmul.bf16.gmra.mxu1 %v2657_v37  ;;  %4656 = vmatmul.msk.bf16.gmra.mxu2 %vm1037_vm2, %v2658_v16 }
 0x442   : > { %2940 = vmatmul.bf16.gmra.mxu0 %v2657_v37  ;;  %4664 = vmatmul.msk.bf16.gmra.mxu3 %vm1037_vm2, %v2658_v16  ;;  %v2501_v45 = vpop.f32.mrf.mxu2  ;;  %v2599_v14 = vpop.f32.mrf.mxu3 }
 0x443   : > { %v2454_v31 = vpop.f32.mrf.mxu1  ;;  %v2552_v6 = vpop.f32.mrf.mxu0  ;;  %v2502_v23 = vadd.f32 %v2501_v45, %v2453_v60  ;;  %v2600_v53 = vadd.f32 %v2599_v14, %v2551_v40  ;;  %v4740_v60 = vld [vmem:[%s7565_s9 + $0x1a0] sm:$0xf]  ;;  %v4954_v40 = vld [vmem:[%s7565_s9 + $0x1a4] sm:$0xf0] }
 0x444   : > { %v2455_v62 = vadd.f32 %v2454_v31, %v6575_v25  ;;  %v2553_v9 = vadd.f32 %v2552_v6, %v6577_v43  ;;  %v4741_v36 = vor.u32 %v4954_v40, %v4740_v60  ;;  %v4952_v40 = vld [vmem:[%s7565_s9 + $0x194] sm:$0xf0] }
 0x445   : > { %v6710_v27 = vadd.f32 %v2502_v23, %v6212_v55  ;;  %v6713_v16 = vadd.f32 %v2600_v53, %v6215_v20  ;;  %v4959_v55 = vld [vmem:[%s7565_s9 + $0x1d4] sm:$0xf]  ;;  %v4766_v20 = vld [vmem:[%s7565_s9 + $0x1d8] sm:$0xf0] }
 0x446   : > { %3842 = vperm.xlu1 %5033, %v3772_v42   ;;  %3847 = vperm.xlu2 %5032, %v3773_v49  }
 0x447   : > { %3216 = vmatpush.bf16.msra.mxu1 %v4741_v36 }
 0x44a   : > { %v2503_v7 = vpop.f32.mrf.mxu2  ;;  %v2601_v15 = vpop.f32.mrf.mxu3 }
 0x44b   : > { %v2504_v44 = vadd.f32 %v2503_v7, %v2455_v62  ;;  %v2602_v51 = vadd.f32 %v2601_v15, %v2553_v9  ;;  %v2457_v21 = vpop.f32.mrf.mxu1  ;;  %v2555_v17 = vpop.f32.mrf.mxu0  ;;  %v3770_v7 = vld [vmem:[%s7570_s14 + $0x58] sm:$0xff]  ;;  %v3771_v15 = vld [vmem:[%s7570_s14 + $0x60] sm:$0xff] }
 0x44c   : > { %v2458_v42 = vadd.f32 %v2457_v21, %v6575_v25  ;;  %v2556_v49 = vadd.f32 %v2555_v17, %v6577_v43 }
 0x44d   : > { %v6716_v37 = vadd.f32 %v2504_v44, %v6218_v30  ;;  %v6719_v45 = vadd.f32 %v2602_v51, %v6221_v54  ;;  %v4955_v30 = vld [vmem:[%s7565_s9 + $0x1b4] sm:$0xf]  ;;  %v4769_v54 = vor.u32 %v4959_v55, %v4766_v20 }
 0x44e   : > { %v4753_v31 = vor.u32 %v4955_v30, %v4750_v11  ;;  %3704 = vperm.xlu1 %5033, %v3642_v3   ;;  %3709 = vperm.xlu2 %5032, %v3643_v22   ;;  %v3767_v3 = vld [vmem:[%s7570_s14 + $0x40] sm:$0xff]  ;;  %v3641_v22 = vld [vmem:[%s7569_s13 + $0x50] sm:$0xff] }
 0x44f   : > { %v2660_v14 = vpack.c.bf16 %v6719_v45, %v6713_v16  ;;  %v2659_v5 = vpack.c.bf16 %v6716_v37, %v6710_v27  ;;  %3368 = vmatpush.bf16.msra.mxu3 %v4769_v54 }
 0x450   : > { %3313 = vmatpush.bf16.msra.mxu0 %v4753_v31 }
 0x451   : > { %2847 = vmatmul.bf16.gmra.mxu1 %v2659_v5  ;;  %4657 = vmatmul.msk.bf16.gmra.mxu2 %vm1037_vm2, %v2660_v14 }
 0x452   : > { %2945 = vmatmul.bf16.gmra.mxu0 %v2659_v5  ;;  %4665 = vmatmul.msk.bf16.gmra.mxu3 %vm1037_vm2, %v2660_v14  ;;  %v2506_v6 = vpop.f32.mrf.mxu2  ;;  %v2604_v50 = vpop.f32.mrf.mxu3 }
 0x453   : > { %v2459_v0 = vpop.f32.mrf.mxu1  ;;  %v2557_v47 = vpop.f32.mrf.mxu0  ;;  %v2507_v23 = vadd.f32 %v2506_v6, %v2458_v42  ;;  %v2605_v53 = vadd.f32 %v2604_v50, %v2556_v49  ;;  %v4951_v42 = vld [vmem:[%s7565_s9 + $0x194] sm:$0xf]  ;;  %v4734_v49 = vld [vmem:[%s7565_s9 + $0x198] sm:$0xf0] }
 0x454   : > { %v2460_v62 = vadd.f32 %v2459_v0, %v6575_v25  ;;  %v2558_v9 = vadd.f32 %v2557_v47, %v6577_v43  ;;  %v4732_v0 = vld [vmem:[%s7565_s9 + $0x190] sm:$0xf] }
 0x455   : > { %v6762_v55 = vadd.f32 %v2507_v23, %v6246_v13  ;;  %v6765_v20 = vadd.f32 %v2605_v53, %v6249_v38  ;;  %v4953_v13 = vld [vmem:[%s7565_s9 + $0x1a4] sm:$0xf]  ;;  %v4742_v38 = vld [vmem:[%s7565_s9 + $0x1a8] sm:$0xf0]  ;;  %v4733_v36 = vor.u32 %v4952_v40, %v4732_v0  ;;  %v4737_v23 = vor.u32 %v4951_v42, %v4734_v49  ;;  %v4716_v49 = vld [vmem:[%s7565_s9 + $0x170] sm:$0xf] }
 0x456   : > { %3832 = vperm.xlu1 %5033, %v3770_v7   ;;  %3837 = vperm.xlu2 %5032, %v3771_v15   ;;  %v4745_v6 = vor.u32 %v4953_v13, %v4742_v38  ;;  %v4970_v40 = vld [vmem:[%s7567_s11 + $0x48] sm:$0xff] }
 0x457   : > { %7638 = vst [vmem:[#allocation12_spill] sm:$0xff] %v6765_v20  ;;  %3217 = vmatpush.bf16.msra.mxu1 %v4733_v36 }
 0x458   : > { %3314 = vmatpush.bf16.msra.mxu0 %v4745_v6 }
 0x45a   : > { %v2508_v44 = vpop.f32.mrf.mxu2  ;;  %v2606_v51 = vpop.f32.mrf.mxu3 }
 0x45b   : > { %v2509_v21 = vadd.f32 %v2508_v44, %v2460_v62  ;;  %v2607_v14 = vadd.f32 %v2606_v51, %v2558_v9  ;;  %v2462_v17 = vpop.f32.mrf.mxu1  ;;  %v2560_v5 = vpop.f32.mrf.mxu0  ;;  %v3637_v51 = vld [vmem:[%s7569_s13 + $0x30] sm:$0xff] }
 0x45c   : > { %v2463_v53 = vadd.f32 %v2462_v17, %v6575_v25  ;;  %v2561_v62 = vadd.f32 %v2560_v5, %v6577_v43  ;;  %3315 = vmatpush.bf16.msra.mxu0 %v4737_v23  ;;  %v4948_v23 = vld [vmem:[%s7565_s9 + $0x174] sm:$0xf0] }
 0x45d   : > { %v6768_v30 = vadd.f32 %v2509_v21, %v6252_v1  ;;  %v6771_v54 = vadd.f32 %v2607_v14, %v6255_v61  ;;  %v4969_v1 = vld [vmem:[%s7567_s11 + $0x40] sm:$0xff]  ;;  %v3769_v21 = vld [vmem:[%s7570_s14 + $0x50] sm:$0xff] }
 0x45e   : > { %3561 = vxpose.xlu0.c.b16.start [1/2] (short) (narrow) %v4969_v1, 16  ;;  %3817 = vperm.xlu1 %5033, %v3767_v3   ;;  %v4950_v3 = vld [vmem:[%s7565_s9 + $0x184] sm:$0xf0] }
 0x45f   : > { %7639 = vst [vmem:[#allocation11_spill] sm:$0xff] %v6771_v54  ;;  %v2662_v11 = vpack.c.bf16 %v6771_v54, %v6765_v20  ;;  %v2661_v31 = vpack.c.bf16 %v6768_v30, %v6762_v55  ;;  %3699 = vperm.xlu2 %5032, %v3641_v22  }
 0x461   : > { %2852 = vmatmul.bf16.gmra.mxu1 %v2661_v31  ;;  %4658 = vmatmul.msk.bf16.gmra.mxu2 %vm1037_vm2, %v2662_v11 }
 0x462   : > { %2950 = vmatmul.bf16.gmra.mxu0 %v2661_v31  ;;  %4666 = vmatmul.msk.bf16.gmra.mxu3 %vm1037_vm2, %v2662_v11  ;;  %v2511_v61 = vpop.f32.mrf.mxu2  ;;  %v2609_v50 = vpop.f32.mrf.mxu3 }
 0x463   : > { %v2464_v47 = vpop.f32.mrf.mxu1  ;;  %v2562_v60 = vpop.f32.mrf.mxu0  ;;  %v2512_v9 = vadd.f32 %v2511_v61, %v2463_v53  ;;  %v2610_v7 = vadd.f32 %v2609_v50, %v2561_v62  ;;  %v4724_v50 = vld [vmem:[%s7565_s9 + $0x180] sm:$0xf]  ;;  %v4947_v53 = vld [vmem:[%s7565_s9 + $0x174] sm:$0xf]  ;;  %v4717_v62 = vor.u32 %v4948_v23, %v4716_v49 }
 0x464   : > { %v2465_v15 = vadd.f32 %v2464_v47, %v6575_v25  ;;  %v2563_v44 = vadd.f32 %v2562_v60, %v6577_v43  ;;  %v4725_v22 = vor.u32 %v4950_v3, %v4724_v50  ;;  %v3765_v47 = vld [vmem:[%s7570_s14 + $0x30] sm:$0xff]  ;;  %v3639_v60 = vld [vmem:[%s7569_s13 + $0x40] sm:$0xff]  ;;  %v4710_v50 = vld [vmem:[%s7565_s9 + $0x168] sm:$0xf0] }
 0x465   : > { %v6817_v38 = vadd.f32 %v2512_v9, %v6286_v59  ;;  %v6820_v6 = vadd.f32 %v2610_v7, %v6289_v41  ;;  %v4718_v9 = vld [vmem:[%s7565_s9 + $0x178] sm:$0xf0] }
 0x466   : > { %3679 = vperm.xlu1 %5033, %v3637_v51   ;;  %3218 = vmatpush.bf16.msra.mxu1 %v4725_v22  ;;  %v4721_v7 = vor.u32 %v4947_v53, %v4718_v9  ;;  %v4708_v51 = vld [vmem:[%s7565_s9 + $0x160] sm:$0xf] }
 0x467   : > { %3827 = vperm.xlu2 %5032, %v3769_v21   ;;  %v4946_v21 = vld [vmem:[%s7565_s9 + $0x164] sm:$0xf0] }
 0x46a   : > { %v2513_v14 = vpop.f32.mrf.mxu2  ;;  %v2611_v11 = vpop.f32.mrf.mxu3  ;;  %3219 = vmatpush.bf16.msra.mxu1 %v4717_v62 }
 0x46b   : > { %v2514_v17 = vadd.f32 %v2513_v14, %v2465_v15  ;;  %v2612_v31 = vadd.f32 %v2611_v11, %v2563_v44  ;;  %v2467_v5 = vpop.f32.mrf.mxu1  ;;  %v2565_v13 = vpop.f32.mrf.mxu0  ;;  %v4945_v14 = vld [vmem:[%s7565_s9 + $0x164] sm:$0xf] }
 0x46c   : > { %v2468_v11 = vadd.f32 %v2467_v5, %v6575_v25  ;;  %v4713_v3 = vor.u32 %v4945_v14, %v4710_v50  ;;  %v3635_v5 = vld [vmem:[%s7569_s13 + $0x20] sm:$0xff] }
 0x46d   : > { %v6823_v1 = vadd.f32 %v2514_v17, %v6292_v2  ;;  %v6826_v61 = vadd.f32 %v2612_v31, %v6295_v26  ;;  %v4949_v2 = vld [vmem:[%s7565_s9 + $0x184] sm:$0xf]  ;;  %v4726_v26 = vld [vmem:[%s7565_s9 + $0x188] sm:$0xf0]  ;;  %v2566_v17 = vadd.f32 %v2565_v13, %v6577_v43  ;;  %v4709_v31 = vor.u32 %v4946_v21, %v4708_v51 }
 0x46e   : > { %v4729_v0 = vor.u32 %v4949_v2, %v4726_v26  ;;  %3807 = vperm.xlu1 %5033, %v3765_v47   ;;  %3562 = vxpose.xlu0.c.b16.end [2/2] (short) (narrow) %v4970_v40, 16  ;;  %v3768_v13 = vld [vmem:[%s7570_s14 + $0x48] sm:$0xff]  ;;  %v4700_v47 = vld [vmem:[%s7565_s9 + $0x150] sm:$0xf]  ;;  %v4941_v51 = vld [vmem:[%s7565_s9 + $0x144] sm:$0xf] }
 0x46f   : > { %7640 = vst [vmem:[#allocation13_spill] sm:$0xff] %v6823_v1  ;;  %v2664_v59 = vpack.c.bf16 %v6826_v61, %v6820_v6  ;;  %v2663_v41 = vpack.c.bf16 %v6823_v1, %v6817_v38  ;;  %3689 = vperm.xlu2 %5032, %v3639_v60   ;;  %3220 = vmatpush.bf16.msra.mxu1 %v4709_v31  ;;  %v4694_v21 = vld [vmem:[%s7565_s9 + $0x148] sm:$0xf0] }
 0x470   : > { %7641 = vst [vmem:[#allocation14_spill] sm:$0xff] %v6826_v61  ;;  %3316 = vmatpush.bf16.msra.mxu0 %v4729_v0  ;;  %v4758_v31 = vld [vmem:[%s7565_s9 + $0x1c8] sm:$0xf0] }
 0x471   : > { %2857 = vmatmul.bf16.gmra.mxu1 %v2663_v41  ;;  %4659 = vmatmul.msk.bf16.gmra.mxu2 %vm1037_vm2, %v2664_v59 }
 0x472   : > { %2955 = vmatmul.bf16.gmra.mxu0 %v2663_v41  ;;  %4667 = vmatmul.msk.bf16.gmra.mxu3 %vm1037_vm2, %v2664_v59  ;;  %v2516_v36 = vpop.f32.mrf.mxu2  ;;  %v2614_v42 = vpop.f32.mrf.mxu3 }
 0x473   : > { %v2469_v15 = vpop.f32.mrf.mxu1  ;;  %v2567_v44 = vpop.f32.mrf.mxu0  ;;  %v2517_v59 = vadd.f32 %v2516_v36, %v2468_v11  ;;  %v2615_v41 = vadd.f32 %v2614_v42, %v2566_v17  ;;  %v4702_v42 = vld [vmem:[%s7565_s9 + $0x158] sm:$0xf0]  ;;  %v4697_v11 = vor.u32 %v4941_v51, %v4694_v21  ;;  %v4957_v17 = vld [vmem:[%s7565_s9 + $0x1c4] sm:$0xf] }
 0x474   : > { %3317 = vmatpush.bf16.msra.mxu0 %v4721_v7  ;;  %v2470_v22 = vadd.f32 %v2469_v15, %v6575_v25  ;;  %v2568_v2 = vadd.f32 %v2567_v44, %v6577_v43  ;;  %v4944_v25 = vld [vmem:[%s7565_s9 + $0x154] sm:$0xf0]  ;;  %v4943_v43 = vld [vmem:[%s7565_s9 + $0x154] sm:$0xf]  ;;  %v4692_v7 = vld [vmem:[%s7565_s9 + $0x140] sm:$0xf]  ;;  %v4761_v50 = vor.u32 %v4957_v17, %v4758_v31 }
 0x475   : > { %v4701_v36 = vor.u32 %v4944_v25, %v4700_v47  ;;  %v4705_v49 = vor.u32 %v4943_v43, %v4702_v42  ;;  %v6902_v23 = vadd.f32 %v2517_v59, %v6356_v63  ;;  %v6905_v53 = vadd.f32 %v2615_v41, %v6359_v46  ;;  %v4942_v15 = vld [vmem:[%s7565_s9 + $0x144] sm:$0xf0]  ;;  %v4756_v63 = vld [vmem:[%s7565_s9 + $0x1c0] sm:$0xf]  ;;  %v3638_v59 = vld [vmem:[%s7569_s13 + $0x38] sm:$0xff] }
 0x476   : > { %3669 = vperm.xlu1 %5033, %v3635_v5   ;;  %v4958_v44 = vld [vmem:[%s7565_s9 + $0x1c4] sm:$0xf0]  ;;  %3369 = vmatpush.bf16.msra.mxu3 %v4761_v50  ;;  %v3633_v41 = vld [vmem:[%s7569_s13 + $0x10] sm:$0xff] }
 0x477   : > { %3822 = vperm.xlu2 %5032, %v3768_v13   ;;  %7642 = vst [vmem:[#allocation15_spill] sm:$0xff] %v6902_v23  ;;  %3221 = vmatpush.bf16.msra.mxu1 %v4701_v36  ;;  %v4757_v14 = vor.u32 %v4958_v44, %v4756_v63  ;;  %v4572_v13 = vld [vmem:[%s7564_s8 + $0x4] sm:$0x3]  ;;  %v3764_v63 = vld [vmem:[%s7570_s14 + $0x28] sm:$0xff] }
 0x478   : > { %3318 = vmatpush.bf16.msra.mxu0 %v4713_v3  ;;  %7643 = vst [vmem:[#allocation16_spill] sm:$0xff] %v6905_v53  ;;  %v3763_v3 = vld [vmem:[%s7570_s14 + $0x20] sm:$0xff]  ;;  %v6964_v25 = vperm.slane %v4572_v13, 0 }
 0x479   : > { %3271 = vmatpush.bf16.msra.mxu2 %v4757_v14 }
 0x47a   : > { %v2518_v26 = vpop.f32.mrf.mxu2  ;;  %v2616_v0 = vpop.f32.mrf.mxu3 }
 0x47b   : > { %v2519_v60 = vadd.f32 %v2518_v26, %v2470_v22  ;;  %v2617_v40 = vadd.f32 %v2616_v0, %v2568_v2  ;;  %v3766_v22 = vld [vmem:[%s7570_s14 + $0x38] sm:$0xff]  ;;  %v3761_v26 = vld [vmem:[%s7570_s14 + $0x10] sm:$0xff]  ;;  %v3636_v0 = vld [vmem:[%s7569_s13 + $0x28] sm:$0xff] }
 0x47c   : > { %3319 = vmatpush.bf16.msra.mxu0 %v4705_v49 }
 0x47d   : > { %v6908_v62 = vadd.f32 %v2519_v60, %v6362_v56  ;;  %v6911_v9 = vadd.f32 %v2617_v40, %v6365_v18  ;;  %v4693_v18 = vor.u32 %v4942_v15, %v4692_v7  ;;  %v6966_v60 = vperm.slane %v4572_v13, 1  ;;  %v6970_v7 = vpop.permute.xlu2 %3482  ;;  %v3632_v15 = vld [vmem:[%s7569_s13 + $0x8] sm:$0xff] }
 0x47e   : > { %3797 = vperm.xlu1 %5033, %v3763_v3   ;;  %7646 = vst [vmem:[#allocation19_spill] sm:$0xff] %v6970_v7  ;;  %v3760_v13 = vld [vmem:[%s7570_s14 + $0x8] sm:$0xff] }
 0x47f   : > { %7644 = vst [vmem:[#allocation17_spill] sm:$0xff] %v6908_v62  ;;  %v2666_v46 = vpack.c.bf16 %v6911_v9, %v6905_v53  ;;  %v2665_v56 = vpack.c.bf16 %v6908_v62, %v6902_v23  ;;  %3222 = vmatpush.bf16.msra.mxu1 %v4693_v18  ;;  %3684 = vperm.xlu2 %5032, %v3638_v59  }
 0x480   : > { %7645 = vst [vmem:[#allocation18_spill] sm:$0xff] %v6911_v9  ;;  %3320 = vmatpush.bf16.msra.mxu0 %v4697_v11 }
 0x481   : > { %2862 = vmatmul.bf16.gmra.mxu1 %v2665_v56  ;;  %4660 = vmatmul.msk.bf16.gmra.mxu2 %vm1037_vm2, %v2666_v46 }
 0x482   : > { %2960 = vmatmul.bf16.gmra.mxu0 %v2665_v56  ;;  %4668 = vmatmul.msk.bf16.gmra.mxu3 %vm1037_vm2, %v2666_v46 }
 0x486   : > { %3659 = vperm.xlu1 %5033, %v3633_v41  }
 0x487   : > { %3812 = vperm.xlu2 %5032, %v3766_v22  }
 0x48e   : > { %v2828_v2 = vpop.f32.mrf.mxu1  ;;  %3787 = vperm.xlu1 %5033, %v3761_v26   ;;  %v3634_v26 = vld [vmem:[%s7569_s13 + $0x18] sm:$0xff] }
 0x48f   : > { %v2926_v5 = vpop.f32.mrf.mxu0  ;;  %3674 = vperm.xlu2 %5032, %v3636_v0   ;;  %v2829_v42 = vadd.f32 %v2828_v2, %v6964_v25 }
 0x490   : > { %v2927_v49 = vadd.f32 %v2926_v5, %v6966_v60  ;;  %v6980_v11 = vpop.permute.xlu1 %3649 }
 0x494   : > { %v2877_v47 = vpop.f32.mrf.mxu2 }
 0x495   : > { %v2975_v43 = vpop.f32.mrf.mxu3  ;;  %v2878_v46 = vadd.f32 %v2877_v47, %v2829_v42 }
 0x496   : > { %v2830_v40 = vpop.f32.mrf.mxu1  ;;  %v2976_v18 = vadd.f32 %v2975_v43, %v2927_v49  ;;  %3654 = vperm.xlu1 %5033, %v3632_v15  }
 0x497   : > { %v2928_v36 = vpop.f32.mrf.mxu0  ;;  %v2831_v56 = vadd.f32 %v2830_v40, %v6964_v25  ;;  %3802 = vperm.xlu2 %5032, %v3764_v63   ;;  %v3015_v50 = vmax.f32 %v2878_v46, 0.0  ;;  %v3762_v63 = vld [vmem:[%s7570_s14 + $0x18] sm:$0xff] }
 0x498   : > { %v2929_v44 = vadd.f32 %v2928_v36, %v6966_v60  ;;  %v3016_v41 = vmax.f32 %v2976_v18, 0.0  ;;  %v6990_v47 = vpop.permute.xlu2 %3719 }
 0x499   : > { %7647 = vst [vmem:[#allocation20_spill] sm:$0xff] %v6990_v47 }
 0x49c   : > { %v2879_v51 = vpop.f32.mrf.mxu2 }
 0x49d   : > { %v2880_v21 = vadd.f32 %v2879_v51, %v2831_v56  ;;  %v2977_v14 = vpop.f32.mrf.mxu3 }
 0x49e   : > { %v2978_v17 = vadd.f32 %v2977_v14, %v2929_v44  ;;  %v2833_v31 = vpop.f32.mrf.mxu1  ;;  %3782 = vperm.xlu1 %5033, %v3760_v13  }
 0x49f   : > { %v3017_v3 = vmax.f32 %v2880_v21, 0.0  ;;  %v2931_v59 = vpop.f32.mrf.mxu0  ;;  %3664 = vperm.xlu2 %5032, %v3634_v26   ;;  %v2834_v49 = vadd.f32 %v2833_v31, %v6964_v25 }
 0x4a0   : > { %v3018_v22 = vmax.f32 %v2978_v17, 0.0  ;;  %v6992_v42 = vpop.permute.xlu1 %3724  ;;  %v2932_v15 = vadd.f32 %v2931_v59, %v6966_v60 }
 0x4a1   : > { %v3047_v2 = vpack.c.bf16 %v3017_v3, %v3015_v50  ;;  %7648 = vst [vmem:[#allocation21_spill] sm:$0xff] %v6992_v42  ;;  %v7001_v3 = vpop.permute.xlu2 %3847 }
 0x4a2   : > { %v3048_v5 = vpack.c.bf16 %v3018_v22, %v3016_v41  ;;  %7649 = vst [vmem:[#allocation22_spill] sm:$0xff] %v7001_v3 }
 0x4a3   : > { %3223 = vmatmul.bf16.vlgmr.msra.gmra.mxu1 %v3047_v2  ;;  %3321 = vmatmul.bf16.vlgmr.msra.gmra.mxu0 %v3047_v2 }
 0x4a4   : > { %4770 = vmatmul.msk.bf16.vlgmr.msra.gmra.mxu2 %vm1037_vm2, %v3048_v5  ;;  %4778 = vmatmul.msk.bf16.vlgmr.msra.gmra.mxu3 %vm1037_vm2, %v3048_v5  ;;  %v2882_v0 = vpop.f32.mrf.mxu2 }
 0x4a5   : > { %v2980_v43 = vpop.f32.mrf.mxu3  ;;  %v2883_v46 = vadd.f32 %v2882_v0, %v2834_v49  ;;  %v3759_v0 = vld [vmem:[%s7570_s14] sm:$0xff] }
 0x4a6   : > { %v2835_v40 = vpop.f32.mrf.mxu1  ;;  %v2981_v18 = vadd.f32 %v2980_v43, %v2932_v15 }
 0x4a7   : > { %v2933_v36 = vpop.f32.mrf.mxu0  ;;  %v2836_v56 = vadd.f32 %v2835_v40, %v6964_v25  ;;  %3792 = vperm.xlu2 %5032, %v3762_v63   ;;  %v3019_v31 = vmax.f32 %v2883_v46, 0.0 }
 0x4a8   : > { %v2934_v44 = vadd.f32 %v2933_v36, %v6966_v60  ;;  %v3020_v22 = vmax.f32 %v2981_v18, 0.0  ;;  %v7003_v13 = vpop.permute.xlu1 %3852 }
 0x4a9   : > { %7650 = vst [vmem:[#allocation23_spill] sm:$0xff] %v7003_v13  ;;  %v7010_v15 = vpop.permute.xlu2 %3709 }
 0x4aa   : > { %7651 = vst [vmem:[#allocation24_spill] sm:$0xff] %v7010_v15 }
 0x4ac   : > { %v2884_v51 = vpop.f32.mrf.mxu2 }
 0x4ad   : > { %v2885_v21 = vadd.f32 %v2884_v51, %v2836_v56  ;;  %v2982_v14 = vpop.f32.mrf.mxu3 }
 0x4ae   : > { %v2983_v17 = vadd.f32 %v2982_v14, %v2934_v44  ;;  %v2838_v50 = vpop.f32.mrf.mxu1 }
 0x4af   : > { %v3021_v59 = vmax.f32 %v2885_v21, 0.0  ;;  %v2936_v41 = vpop.f32.mrf.mxu0  ;;  %3777 = vperm.xlu2 %5032, %v3759_v0   ;;  %v2839_v63 = vadd.f32 %v2838_v50, %v6964_v25 }
 0x4b0   : > { %v3022_v2 = vmax.f32 %v2983_v17, 0.0  ;;  %v2937_v46 = vadd.f32 %v2936_v41, %v6966_v60  ;;  %v7015_v44 = vpop.permute.xlu1 %3714 }
 0x4b1   : > { %v3049_v5 = vpack.c.bf16 %v3021_v59, %v3019_v31  ;;  %7652 = vst [vmem:[#allocation25_spill] sm:$0xff] %v7015_v44 }
 0x4b2   : > { %v3050_v26 = vpack.c.bf16 %v3022_v2, %v3020_v22 }
 0x4b3   : > { %3228 = vmatmul.bf16.gmra.mxu1 %v3049_v5  ;;  %3326 = vmatmul.bf16.gmra.mxu0 %v3049_v5 }
 0x4b4   : > { %4771 = vmatmul.msk.bf16.gmra.mxu2 %vm1037_vm2, %v3050_v26  ;;  %4779 = vmatmul.msk.bf16.gmra.mxu3 %vm1037_vm2, %v3050_v26  ;;  %v2887_v43 = vpop.f32.mrf.mxu2 }
 0x4b5   : > { %v2985_v40 = vpop.f32.mrf.mxu3  ;;  %v2888_v56 = vadd.f32 %v2887_v43, %v2839_v63  ;;  %v7018_v43 = vpop.permute.xlu2 %3837 }
 0x4b6   : > { %v2840_v36 = vpop.f32.mrf.mxu1  ;;  %v2986_v51 = vadd.f32 %v2985_v40, %v2937_v46  ;;  %7653 = vst [vmem:[#allocation26_spill] sm:$0xff] %v7018_v43 }
 0x4b7   : > { %v2938_v49 = vpop.f32.mrf.mxu0  ;;  %v2841_v18 = vadd.f32 %v2840_v36, %v6964_v25  ;;  %v3023_v2 = vmax.f32 %v2888_v56, 0.0 }
 0x4b8   : > { %v2939_v21 = vadd.f32 %v2938_v49, %v6966_v60  ;;  %v3024_v0 = vmax.f32 %v2986_v51, 0.0  ;;  %v7022_v49 = vpop.permute.xlu1 %3842 }
 0x4b9   : > { %7654 = vst [vmem:[#allocation27_spill] sm:$0xff] %v7022_v49 }
 0x4bc   : > { %v2889_v14 = vpop.f32.mrf.mxu2 }
 0x4bd   : > { %v2890_v17 = vadd.f32 %v2889_v14, %v2841_v18  ;;  %v2987_v31 = vpop.f32.mrf.mxu3 }
 0x4be   : > { %v2988_v59 = vadd.f32 %v2987_v31, %v2939_v21  ;;  %v2843_v22 = vpop.f32.mrf.mxu1  ;;  %v7028_v31 = vpop.permute.xlu2 %3699 }
 0x4bf   : > { %v3025_v5 = vmax.f32 %v2890_v17, 0.0  ;;  %v2941_v26 = vpop.f32.mrf.mxu0  ;;  %v2844_v56 = vadd.f32 %v2843_v22, %v6964_v25 }
 0x4c0   : > { %v3026_v50 = vmax.f32 %v2988_v59, 0.0  ;;  %v2942_v18 = vadd.f32 %v2941_v26, %v6966_v60  ;;  %v7030_v3 = vpop.permute.xlu1 %3704 }
 0x4c1   : > { %v3051_v12 = vpack.c.bf16 %v3025_v5, %v3023_v2 }
 0x4c2   : > { %v3052_v41 = vpack.c.bf16 %v3026_v50, %v3024_v0 }
 0x4c3   : > { %3233 = vmatmul.bf16.gmra.mxu1 %v3051_v12  ;;  %3331 = vmatmul.bf16.gmra.mxu0 %v3051_v12 }
 0x4c4   : > { %4772 = vmatmul.msk.bf16.gmra.mxu2 %vm1037_vm2, %v3052_v41  ;;  %4780 = vmatmul.msk.bf16.gmra.mxu3 %vm1037_vm2, %v3052_v41  ;;  %v2892_v40 = vpop.f32.mrf.mxu2 }
 0x4c5   : > { %v2990_v36 = vpop.f32.mrf.mxu3  ;;  %v2893_v51 = vadd.f32 %v2892_v40, %v2844_v56 }
 0x4c6   : > { %v2845_v63 = vpop.f32.mrf.mxu1  ;;  %v2991_v14 = vadd.f32 %v2990_v36, %v2942_v18  ;;  %v7034_v18 = vpop.permute.xlu2 %3827 }
 0x4c7   : > { %v2943_v46 = vpop.f32.mrf.mxu0  ;;  %v2846_v21 = vadd.f32 %v2845_v63, %v6964_v25  ;;  %v3027_v50 = vmax.f32 %v2893_v51, 0.0 }
 0x4c8   : > { %v2944_v12 = vadd.f32 %v2943_v46, %v6966_v60  ;;  %v3028_v22 = vmax.f32 %v2991_v14, 0.0 }
 0x4cc   : > { %v2894_v17 = vpop.f32.mrf.mxu2 }
 0x4cd   : > { %v2895_v59 = vadd.f32 %v2894_v17, %v2846_v21  ;;  %v2992_v2 = vpop.f32.mrf.mxu3 }
 0x4ce   : > { %v2993_v5 = vadd.f32 %v2992_v2, %v2944_v12  ;;  %v2848_v0 = vpop.f32.mrf.mxu1  ;;  %v7037_v12 = vpop.permute.xlu1 %3832 }
 0x4cf   : > { %v3029_v41 = vmax.f32 %v2895_v59, 0.0  ;;  %v2946_v7 = vpop.f32.mrf.mxu0  ;;  %v2849_v21 = vadd.f32 %v2848_v0, %v6964_v25  ;;  %v7043_v54 = vpop.permute.xlu2 %3689 }
 0x4d0   : > { %v3030_v26 = vmax.f32 %v2993_v5, 0.0  ;;  %v2947_v14 = vadd.f32 %v2946_v7, %v6966_v60 }
 0x4d1   : > { %v3053_v40 = vpack.c.bf16 %v3029_v41, %v3027_v50  ;;  %v7655_v41 = vmov 0  }
 0x4d2   : > { %v3054_v56 = vpack.c.bf16 %v3030_v26, %v3028_v22 }
 0x4d3   : > { %3238 = vmatmul.bf16.gmra.mxu1 %v3053_v40  ;;  %3336 = vmatmul.bf16.gmra.mxu0 %v3053_v40 }
 0x4d4   : > { %4773 = vmatmul.msk.bf16.gmra.mxu2 %vm1037_vm2, %v3054_v56  ;;  %4781 = vmatmul.msk.bf16.gmra.mxu3 %vm1037_vm2, %v3054_v56  ;;  %v2897_v36 = vpop.f32.mrf.mxu2 }
 0x4d5   : > { %v2995_v63 = vpop.f32.mrf.mxu3  ;;  %v2898_v17 = vadd.f32 %v2897_v36, %v2849_v21  ;;  %5034 = vset.pattern.permute.xlu0 %v7655_v41 }
 0x4d6   : > { %v2850_v46 = vpop.f32.mrf.mxu1  ;;  %v2996_v2 = vadd.f32 %v2995_v63, %v2947_v14  ;;  %v3640_v63 = vld [vmem:[%s7569_s13 + $0x48] sm:$0xff] }
 0x4d7   : > { %v2948_v51 = vpop.f32.mrf.mxu0  ;;  %v2851_v59 = vadd.f32 %v2850_v46, %v6964_v25  ;;  %v3031_v13 = vmax.f32 %v2898_v17, 0.0  ;;  %v7048_v46 = vpop.permute.xlu1 %3817 }
 0x4d8   : > { %v2949_v5 = vadd.f32 %v2948_v51, %v6966_v60  ;;  %v3032_v42 = vmax.f32 %v2996_v2, 0.0 }
 0x4dc   : > { %v2899_v50 = vpop.f32.mrf.mxu2  ;;  %3694 = vperm.xlu0 %5034, %v3640_v63  }
 0x4dd   : > { %v2900_v22 = vadd.f32 %v2899_v50, %v2851_v59  ;;  %v2997_v26 = vpop.f32.mrf.mxu3 }
 0x4de   : > { %v2998_v40 = vadd.f32 %v2997_v26, %v2949_v5  ;;  %v2853_v56 = vpop.f32.mrf.mxu1 }
 0x4df   : > { %v3033_v47 = vmax.f32 %v2900_v22, 0.0  ;;  %v2951_v0 = vpop.f32.mrf.mxu0  ;;  %v7058_v26 = vpop.permute.xlu1 %3679 }
 0x4e0   : > { %v3034_v20 = vmax.f32 %v2998_v40, 0.0 }
 0x4e1   : > { %v3055_v7 = vpack.c.bf16 %v3033_v47, %v3031_v13  ;;  %v2854_v47 = vadd.f32 %v2853_v56, %v6964_v25 }
 0x4e2   : > { %v3056_v36 = vpack.c.bf16 %v3034_v20, %v3032_v42  ;;  %v2952_v20 = vadd.f32 %v2951_v0, %v6966_v60  ;;  %v7054_v42 = vpop.permute.xlu2 %3822 }
 0x4e3   : > { %3243 = vmatmul.bf16.gmra.mxu1 %v3055_v7  ;;  %3341 = vmatmul.bf16.gmra.mxu0 %v3055_v7 }
 0x4e4   : > { %4774 = vmatmul.msk.bf16.gmra.mxu2 %vm1037_vm2, %v3056_v36  ;;  %4782 = vmatmul.msk.bf16.gmra.mxu3 %vm1037_vm2, %v3056_v36  ;;  %v2902_v51 = vpop.f32.mrf.mxu2 }
 0x4e5   : > { %v3000_v21 = vpop.f32.mrf.mxu3  ;;  %v2903_v13 = vadd.f32 %v2902_v51, %v2854_v47 }
 0x4e6   : > { %v2855_v14 = vpop.f32.mrf.mxu1  ;;  %v3001_v2 = vadd.f32 %v3000_v21, %v2952_v20 }
 0x4e7   : > { %v2953_v17 = vpop.f32.mrf.mxu0  ;;  %v2856_v59 = vadd.f32 %v2855_v14, %v6964_v25  ;;  %v3035_v36 = vmax.f32 %v2903_v13, 0.0  ;;  %v7064_v20 = vpop.permute.xlu1 %3807 }
 0x4e8   : > { %v2954_v5 = vadd.f32 %v2953_v17, %v6966_v60  ;;  %v3036_v9 = vmax.f32 %v3001_v2, 0.0 }
 0x4ea   : > { %v7062_v21 = vpop.permute.xlu2 %3684 }
 0x4ec   : > { %v2904_v50 = vpop.f32.mrf.mxu2 }
 0x4ed   : > { %v2905_v41 = vadd.f32 %v2904_v50, %v2856_v59  ;;  %v3002_v22 = vpop.f32.mrf.mxu3 }
 0x4ee   : > { %v3003_v40 = vadd.f32 %v3002_v22, %v2954_v5  ;;  %v2858_v7 = vpop.f32.mrf.mxu1 }
 0x4ef   : > { %v3037_v63 = vmax.f32 %v2905_v41, 0.0  ;;  %v2956_v56 = vpop.f32.mrf.mxu0  ;;  %v2859_v13 = vadd.f32 %v2858_v7, %v6964_v25 }
 0x4f0   : > { %v3038_v0 = vmax.f32 %v3003_v40, 0.0  ;;  %v2957_v59 = vadd.f32 %v2956_v56, %v6966_v60  ;;  %v7072_v56 = vpop.permute.xlu1 %3669 }
 0x4f1   : > { %v3057_v62 = vpack.c.bf16 %v3037_v63, %v3035_v36 }
 0x4f2   : > { %v3058_v53 = vpack.c.bf16 %v3038_v0, %v3036_v9  ;;  %v7070_v36 = vpop.permute.xlu2 %3812 }
 0x4f3   : > { %3248 = vmatmul.bf16.gmra.mxu1 %v3057_v62  ;;  %3346 = vmatmul.bf16.gmra.mxu0 %v3057_v62 }
 0x4f4   : > { %4775 = vmatmul.msk.bf16.gmra.mxu2 %vm1037_vm2, %v3058_v53  ;;  %4783 = vmatmul.msk.bf16.gmra.mxu3 %vm1037_vm2, %v3058_v53  ;;  %v2907_v51 = vpop.f32.mrf.mxu2 }
 0x4f5   : > { %v3005_v14 = vpop.f32.mrf.mxu3  ;;  %v2908_v2 = vadd.f32 %v2907_v51, %v2859_v13 }
 0x4f6   : > { %v2860_v17 = vpop.f32.mrf.mxu1  ;;  %v3006_v62 = vadd.f32 %v3005_v14, %v2957_v59  ;;  %v5037_v14 = vld [vmem:[#allocation2] ss:$0 sm:$0xff] }
 0x4f7   : > { %v2958_v47 = vpop.f32.mrf.mxu0  ;;  %v2861_v9 = vadd.f32 %v2860_v17, %v6964_v25  ;;  %v3039_v63 = vmax.f32 %v2908_v2, 0.0  ;;  %3908 = vperm.xlu2 %5032, %v5037_v14  }
 0x4f8   : > { %v2959_v5 = vadd.f32 %v2958_v47, %v6966_v60  ;;  %v3040_v49 = vmax.f32 %v3006_v62, 0.0 }
 0x4fa   : > { %v7076_v59 = vpop.permute.xlu2 %3674 }
 0x4fc   : > { %v2909_v50 = vpop.f32.mrf.mxu2 }
 0x4fd   : > { %v2910_v53 = vadd.f32 %v2909_v50, %v2861_v9  ;;  %v3007_v41 = vpop.f32.mrf.mxu3 }
 0x4fe   : > { %v3008_v22 = vadd.f32 %v3007_v41, %v2959_v5  ;;  %v2863_v40 = vpop.f32.mrf.mxu1 }
 0x4ff   : > { %v3041_v0 = vmax.f32 %v2910_v53, 0.0  ;;  %v2961_v23 = vpop.f32.mrf.mxu0  ;;  %v2864_v2 = vadd.f32 %v2863_v40, %v6964_v25 }
 0x500   : > { %v3042_v7 = vmax.f32 %v3008_v22, 0.0  ;;  %v2962_v62 = vadd.f32 %v2961_v23, %v6966_v60 }
 0x501   : > { %v3059_v43 = vpack.c.bf16 %v3041_v0, %v3039_v63 }
 0x502   : > { %v3060_v51 = vpack.c.bf16 %v3042_v7, %v3040_v49  ;;  %v7084_v1 = vpop.permute.xlu2 %3802 }
 0x503   : > { %3253 = vmatmul.bf16.gmra.mxu1 %v3059_v43  ;;  %3351 = vmatmul.bf16.gmra.mxu0 %v3059_v43  ;;  %v7081_v43 = vpop.permute.xlu1 %3797 }
 0x504   : > { %4776 = vmatmul.msk.bf16.gmra.mxu2 %vm1037_vm2, %v3060_v51  ;;  %4784 = vmatmul.msk.bf16.gmra.mxu3 %vm1037_vm2, %v3060_v51  ;;  %v2912_v17 = vpop.f32.mrf.mxu2 }
 0x505   : > { %v3010_v47 = vpop.f32.mrf.mxu3  ;;  %v2913_v5 = vadd.f32 %v2912_v17, %v2864_v2 }
 0x506   : > { %v2865_v13 = vpop.f32.mrf.mxu1  ;;  %v3011_v50 = vadd.f32 %v3010_v47, %v2962_v62 }
 0x507   : > { %v2963_v9 = vpop.f32.mrf.mxu0  ;;  %v2866_v49 = vadd.f32 %v2865_v13, %v6964_v25  ;;  %v3043_v7 = vmax.f32 %v2913_v5, 0.0 }
 0x508   : > { %v2964_v53 = vadd.f32 %v2963_v9, %v6966_v60  ;;  %v3044_v14 = vmax.f32 %v3011_v50, 0.0  ;;  %v4689_v60 = vld [vmem:[%s7566_s10 + $0x4] sm:$0x3] }
 0x509   : > { %v7097_v13 = vperm.slane %v4689_v60, 0  ;;  %v7099_v2 = vperm.slane %v4689_v60, 1 }
 0x50a   : > { %v7090_v25 = vpop.permute.xlu2 %3664 }
 0x50b   : > { %v7088_v23 = vpop.permute.xlu1 %3659 }
 0x50c   : > { %v2914_v41 = vpop.f32.mrf.mxu2 }
 0x50d   : > { %v2915_v22 = vadd.f32 %v2914_v41, %v2866_v49  ;;  %v3012_v63 = vpop.f32.mrf.mxu3 }
 0x50e   : > { %v3013_v0 = vadd.f32 %v3012_v63, %v2964_v53 }
 0x50f   : > { %v3045_v51 = vmax.f32 %v2915_v22, 0.0 }
 0x510   : > { %v3046_v44 = vmax.f32 %v3013_v0, 0.0 }
 0x511   : > { %v3061_v40 = vpack.c.bf16 %v3045_v51, %v3043_v7 }
 0x512   : > { %v3062_v61 = vpack.c.bf16 %v3046_v44, %v3044_v14  ;;  %v7103_v62 = vpop.permute.xlu2 %3792 }
 0x513   : > { %3258 = vmatmul.bf16.gmra.mxu1 %v3061_v40  ;;  %3356 = vmatmul.bf16.gmra.mxu0 %v3061_v40  ;;  %v7095_v17 = vpop.permute.xlu1 %3787 }
 0x514   : > { %4777 = vmatmul.msk.bf16.gmra.mxu2 %vm1037_vm2, %v3062_v61  ;;  %4785 = vmatmul.msk.bf16.gmra.mxu3 %vm1037_vm2, %v3062_v61 }
 0x51b   : > { %v3655_v63 = vpop.permute.xlu1 %3654 }
 0x520   : > { %v3224_v47 = vpop.f32.mrf.mxu1  ;;  %v3322_v44 = vpop.f32.mrf.mxu0 }
 0x521   : > { %v3225_v9 = vadd.f32 %v3224_v47, %v7097_v13  ;;  %v3323_v61 = vadd.f32 %v3322_v44, %v7099_v2 }
 0x527   : > { %v3273_v5 = vpop.f32.mrf.mxu2  ;;  %v3371_v49 = vpop.f32.mrf.mxu3 }
 0x528   : > { %v3274_v50 = vadd.f32 %v3273_v5, %v3225_v9  ;;  %v3372_v53 = vadd.f32 %v3371_v49, %v3323_v61  ;;  %v3226_v41 = vpop.f32.mrf.mxu1  ;;  %v3324_v22 = vpop.f32.mrf.mxu0 }
 0x529   : > { %v3227_v51 = vadd.f32 %v3226_v41, %v7097_v13  ;;  %v3325_v14 = vadd.f32 %v3324_v22, %v7099_v2  ;;  %v3778_v5 = vpop.permute.xlu2 %3777 }
 0x52a   : > { %v7106_v0 = vadd.f32 %v3274_v50, %v6584_v29  ;;  %v7109_v7 = vadd.f32 %v3372_v53, %v6587_v33  ;;  %v3783_v50 = vpop.permute.xlu1 %3782 }
 0x52c   : > { %7656 = vst [vmem:[#allocation28_spill] sm:$0xff] %v7109_v7  ;;  %v3727_v61 = vmul.f32 %v6980_v11, %v7106_v0  ;;  %v3728_v29 = vmul.f32 %v6980_v11, %v7109_v7 }
 0x52e   : > { %v7131_v11 = vadd.f32 %v3778_v5, %v3728_v29 }
 0x52f   : > { %v3275_v40 = vpop.f32.mrf.mxu2  ;;  %v3373_v60 = vpop.f32.mrf.mxu3 }
 0x530   : > { %v3276_v47 = vadd.f32 %v3275_v40, %v3227_v51  ;;  %v3374_v44 = vadd.f32 %v3373_v60, %v3325_v14  ;;  %v3229_v15 = vpop.f32.mrf.mxu1  ;;  %v3327_v9 = vpop.f32.mrf.mxu0  ;;  %v7129_v14 = vadd.f32 %v3778_v5, %v3727_v61  ;;  %7658 = vst [vmem:[#allocation30_spill] sm:$0xff] %v7131_v11 }
 0x532   : > { %v7118_v33 = vadd.f32 %v3276_v47, %v6590_v58  ;;  %v7121_v49 = vadd.f32 %v3374_v44, %v6593_v57  ;;  %7657 = vst [vmem:[#allocation29_spill] sm:$0xff] %v7129_v14  ;;  %v3230_v58 = vadd.f32 %v3229_v15, %v7097_v13  ;;  %v3328_v57 = vadd.f32 %v3327_v9, %v7099_v2 }
 0x534   : > { %v3729_v53 = vmul.f32 %v3655_v63, %v7118_v33  ;;  %v3730_v41 = vmul.f32 %v3655_v63, %v7121_v49 }
 0x536   : > { %v7135_v40 = vadd.f32 %v3783_v50, %v3729_v53  ;;  %v7137_v60 = vadd.f32 %v3783_v50, %v3730_v41 }
 0x537   : > { %v3278_v47 = vpop.f32.mrf.mxu2  ;;  %v3376_v63 = vpop.f32.mrf.mxu3 }
 0x538   : > { %7659 = vst [vmem:[#allocation31_spill] sm:$0xff] %v7135_v40  ;;  %v3279_v61 = vadd.f32 %v3278_v47, %v3230_v58  ;;  %v3377_v22 = vadd.f32 %v3376_v63, %v3328_v57  ;;  %v3231_v29 = vpop.f32.mrf.mxu1  ;;  %v3329_v5 = vpop.f32.mrf.mxu0 }
 0x539   : > { %7660 = vst [vmem:[#allocation32_spill] sm:$0xff] %v7137_v60  ;;  %v3232_v50 = vadd.f32 %v3231_v29, %v7097_v13  ;;  %v3330_v53 = vadd.f32 %v3329_v5, %v7099_v2 }
 0x53a   : > { %v7144_v15 = vadd.f32 %v3279_v61, %v6606_v28  ;;  %v7147_v9 = vadd.f32 %v3377_v22, %v6609_v19 }
 0x53c   : > { %v3731_v58 = vmul.f32 %v7088_v23, %v7144_v15  ;;  %v3732_v28 = vmul.f32 %v7088_v23, %v7147_v9 }
 0x53e   : > { %v7170_v23 = vadd.f32 %v7095_v17, %v3732_v28 }
 0x53f   : > { %v3280_v41 = vpop.f32.mrf.mxu2  ;;  %v3378_v7 = vpop.f32.mrf.mxu3 }
 0x540   : > { %v3281_v44 = vadd.f32 %v3280_v41, %v3232_v50  ;;  %v3379_v14 = vadd.f32 %v3378_v7, %v3330_v53  ;;  %v3234_v40 = vpop.f32.mrf.mxu1  ;;  %v3332_v51 = vpop.f32.mrf.mxu0  ;;  %7661 = vst [vmem:[#allocation33_spill] sm:$0xff] %v7170_v23  ;;  %v7679_v23 = vld [vmem:[#allocation25_spill] sm:$0xff] }
 0x542   : > { %v7156_v57 = vadd.f32 %v3281_v44, %v6612_v52  ;;  %v7159_v19 = vadd.f32 %v3379_v14, %v6615_v32  ;;  %v7173_v52 = vadd.f32 %v7095_v17, %v3731_v58  ;;  %v3235_v32 = vadd.f32 %v3234_v40, %v7097_v13 }
 0x543   : > { %v3333_v14 = vadd.f32 %v3332_v51, %v7099_v2 }
 0x544   : > { %v3733_v22 = vmul.f32 %v7090_v25, %v7156_v57  ;;  %v3734_v7 = vmul.f32 %v7090_v25, %v7159_v19  ;;  %7662 = vst [vmem:[#allocation34_spill] sm:$0xff] %v7173_v52 }
 0x546   : > { %v7178_v44 = vadd.f32 %v7103_v62, %v3734_v7  ;;  %v7181_v25 = vadd.f32 %v7103_v62, %v3733_v22 }
 0x547   : > { %v3283_v61 = vpop.f32.mrf.mxu2  ;;  %v3381_v29 = vpop.f32.mrf.mxu3 }
 0x548   : > { %7663 = vst [vmem:[#allocation35_spill] sm:$0xff] %v7178_v44  ;;  %v3284_v5 = vadd.f32 %v3283_v61, %v3235_v32  ;;  %v3382_v50 = vadd.f32 %v3381_v29, %v3333_v14  ;;  %v3236_v53 = vpop.f32.mrf.mxu1  ;;  %v3334_v41 = vpop.f32.mrf.mxu0 }
 0x549   : > { %7664 = vst [vmem:[#allocation36_spill] sm:$0xff] %v7181_v25  ;;  %v3237_v62 = vadd.f32 %v3236_v53, %v7097_v13  ;;  %v3335_v28 = vadd.f32 %v3334_v41, %v7099_v2 }
 0x54a   : > { %v7188_v51 = vadd.f32 %v3284_v5, %v6633_v34  ;;  %v7191_v58 = vadd.f32 %v3382_v50, %v6636_v48 }
 0x54c   : > { %v3735_v17 = vmul.f32 %v7072_v56, %v7188_v51  ;;  %v3736_v34 = vmul.f32 %v7072_v56, %v7191_v58 }
 0x54e   : > { %v7214_v56 = vadd.f32 %v7081_v43, %v3736_v34 }
 0x54f   : > { %v3285_v22 = vpop.f32.mrf.mxu2  ;;  %v3383_v7 = vpop.f32.mrf.mxu3 }
 0x550   : > { %v3286_v32 = vadd.f32 %v3285_v22, %v3237_v62  ;;  %v3384_v14 = vadd.f32 %v3383_v7, %v3335_v28  ;;  %v3239_v61 = vpop.f32.mrf.mxu1  ;;  %v3337_v29 = vpop.f32.mrf.mxu0  ;;  %7665 = vst [vmem:[#allocation37_spill] sm:$0xff] %v7214_v56 }
 0x551   : > { %v3338_v28 = vadd.f32 %v3337_v29, %v7099_v2 }
 0x552   : > { %v7200_v5 = vadd.f32 %v3286_v32, %v6639_v4  ;;  %v7203_v48 = vadd.f32 %v3384_v14, %v6642_v24  ;;  %v7217_v4 = vadd.f32 %v7081_v43, %v3735_v17  ;;  %v3240_v24 = vadd.f32 %v3239_v61, %v7097_v13 }
 0x554   : > { %v3737_v50 = vmul.f32 %v7076_v59, %v7200_v5  ;;  %v3738_v53 = vmul.f32 %v7076_v59, %v7203_v48  ;;  %7666 = vst [vmem:[#allocation38_spill] sm:$0xff] %v7217_v4 }
 0x556   : > { %v7222_v22 = vadd.f32 %v7084_v1, %v3738_v53  ;;  %v7225_v59 = vadd.f32 %v7084_v1, %v3737_v50 }
 0x557   : > { %v3288_v7 = vpop.f32.mrf.mxu2  ;;  %v3386_v32 = vpop.f32.mrf.mxu3 }
 0x558   : > { %7667 = vst [vmem:[#allocation39_spill] sm:$0xff] %v7222_v22  ;;  %v3289_v14 = vadd.f32 %v3288_v7, %v3240_v24  ;;  %v3387_v40 = vadd.f32 %v3386_v32, %v3338_v28  ;;  %v3241_v63 = vpop.f32.mrf.mxu1  ;;  %v3339_v34 = vpop.f32.mrf.mxu0 }
 0x559   : > { %7668 = vst [vmem:[#allocation40_spill] sm:$0xff] %v7225_v59  ;;  %v3242_v1 = vadd.f32 %v3241_v63, %v7097_v13  ;;  %v3340_v50 = vadd.f32 %v3339_v34, %v7099_v2 }
 0x55a   : > { %v7232_v61 = vadd.f32 %v3289_v14, %v6664_v8  ;;  %v7235_v29 = vadd.f32 %v3387_v40, %v6667_v39 }
 0x55c   : > { %v3739_v43 = vmul.f32 %v7058_v26, %v7232_v61  ;;  %v3740_v8 = vmul.f32 %v7058_v26, %v7235_v29 }
 0x55e   : > { %v7258_v26 = vadd.f32 %v7064_v20, %v3740_v8 }
 0x55f   : > { %v3290_v53 = vpop.f32.mrf.mxu2  ;;  %v3388_v24 = vpop.f32.mrf.mxu3 }
 0x560   : > { %v3291_v28 = vadd.f32 %v3290_v53, %v3242_v1  ;;  %v3389_v7 = vadd.f32 %v3388_v24, %v3340_v50  ;;  %v3244_v32 = vpop.f32.mrf.mxu1  ;;  %v3342_v47 = vpop.f32.mrf.mxu0  ;;  %7669 = vst [vmem:[#allocation41_spill] sm:$0xff] %v7258_v26  ;;  %v7683_v26 = vld [vmem:[#allocation16_spill] sm:$0xff] }
 0x561   : > { %v3343_v50 = vadd.f32 %v3342_v47, %v7099_v2  ;;  %v7265_v53 = vpop.trf.xlu0 }
 0x562   : > { %v7244_v14 = vadd.f32 %v3291_v28, %v6670_v10  ;;  %v7247_v39 = vadd.f32 %v3389_v7, %v6673_v35  ;;  %v7261_v10 = vadd.f32 %v7064_v20, %v3739_v43  ;;  %v3245_v35 = vadd.f32 %v3244_v32, %v7097_v13 }
 0x564   : > { %v3741_v63 = vmul.f32 %v7062_v21, %v7244_v14  ;;  %v3742_v40 = vmul.f32 %v7062_v21, %v7247_v39  ;;  %7670 = vst [vmem:[#allocation42_spill] sm:$0xff] %v7261_v10 }
 0x566   : > { %v7268_v21 = vadd.f32 %v7070_v36, %v3742_v40  ;;  %v7271_v24 = vadd.f32 %v7070_v36, %v3741_v63 }
 0x567   : > { %v3293_v28 = vpop.f32.mrf.mxu2  ;;  %v3391_v7 = vpop.f32.mrf.mxu3 }
 0x568   : > { %7671 = vst [vmem:[#allocation43_spill] sm:$0xff] %v7268_v21  ;;  %v3294_v17 = vadd.f32 %v3293_v28, %v3245_v35  ;;  %v3392_v8 = vadd.f32 %v3391_v7, %v3343_v50  ;;  %v3246_v62 = vpop.f32.mrf.mxu1  ;;  %v3344_v41 = vpop.f32.mrf.mxu0 }
 0x569   : > { %7672 = vst [vmem:[#allocation44_spill] sm:$0xff] %v7271_v24  ;;  %v3247_v36 = vadd.f32 %v3246_v62, %v7097_v13  ;;  %v3345_v63 = vadd.f32 %v3344_v41, %v7099_v2  ;;  %v3695_v20 = vpop.permute.xlu0 %3694 }
 0x56a   : > { %v7278_v43 = vadd.f32 %v3294_v17, %v6710_v27  ;;  %v7281_v32 = vadd.f32 %v3392_v8, %v6713_v16 }
 0x56c   : > { %v3743_v47 = vmul.f32 %v7043_v54, %v7278_v43  ;;  %v3744_v27 = vmul.f32 %v7043_v54, %v7281_v32 }
 0x56f   : > { %v3295_v40 = vpop.f32.mrf.mxu2  ;;  %v3393_v35 = vpop.f32.mrf.mxu3 }
 0x570   : > { %v3296_v50 = vadd.f32 %v3295_v40, %v3247_v36  ;;  %v3394_v28 = vadd.f32 %v3393_v35, %v3345_v63  ;;  %v3249_v7 = vpop.f32.mrf.mxu1  ;;  %v7285_v1 = vpop.f32.mrf.mxu0 }
 0x571   : > { %v3250_v35 = vadd.f32 %v3249_v7, %v7097_v13 }
 0x572   : > { %v7292_v16 = vadd.f32 %v3296_v50, %v6716_v37  ;;  %v7295_v62 = vadd.f32 %v3394_v28, %v6719_v45  ;;  %v7310_v37 = vadd.f32 %v7048_v46, %v3744_v27  ;;  %v7313_v45 = vadd.f32 %v7048_v46, %v3743_v47 }
 0x574   : > { %v3745_v41 = vmul.f32 %v3695_v20, %v7292_v16  ;;  %v3746_v17 = vmul.f32 %v3695_v20, %v7295_v62  ;;  %7674 = vst [vmem:[#allocation46_spill] sm:$0xff] %v7313_v45 }
 0x576   : > { %v7304_v63 = vadd.f32 %v7054_v42, %v3745_v41  ;;  %v7307_v54 = vadd.f32 %v7054_v42, %v3746_v17 }
 0x577   : > { %v3298_v40 = vpop.f32.mrf.mxu2  ;;  %v7315_v20 = vpop.f32.mrf.mxu3 }
 0x578   : > { %7673 = vst [vmem:[#allocation45_spill] sm:$0xff] %v7304_v63  ;;  %v3251_v50 = vpop.f32.mrf.mxu1  ;;  %v7318_v28 = vpop.f32.mrf.mxu0  ;;  %v3299_v17 = vadd.f32 %v3298_v40, %v3250_v35 }
 0x579   : > { %v3252_v46 = vadd.f32 %v3251_v50, %v7097_v13 }
 0x57a   : > { %v7325_v27 = vadd.f32 %v3299_v17, %v6762_v55  ;;  %v4968_v55 = vld [vmem:[%s7567_s11 + $0x38] sm:$0xff] }
 0x57b   : > { %4979 = vmatpush.lsf.bf16.msrb.mxu1 %v4968_v55 }
 0x57c   : > { %v3747_v52 = vmul.f32 %v7028_v31, %v7325_v27 }
 0x57e   : > { %v7341_v35 = vadd.f32 %v7034_v18, %v3747_v52 }
 0x57f   : > { %v3300_v47 = vpop.f32.mrf.mxu2  ;;  %v7328_v34 = vpop.f32.mrf.mxu3 }
 0x580   : > { %v3301_v36 = vadd.f32 %v3300_v47, %v3252_v46  ;;  %v3254_v7 = vpop.f32.mrf.mxu1  ;;  %v3352_v8 = vpop.f32.mrf.mxu0  ;;  %7675 = vst [vmem:[#allocation47_spill] sm:$0xff] %v7341_v35  ;;  %v7684_v35 = vld [vmem:[#allocation17_spill] sm:$0xff] }
 0x581   : > { %v3353_v47 = vadd.f32 %v3352_v8, %v7099_v2 }
 0x582   : > { %v7333_v41 = vadd.f32 %v3301_v36, %v6768_v30  ;;  %v4967_v30 = vld [vmem:[%s7567_s11 + $0x30] sm:$0xff]  ;;  %v3255_v36 = vadd.f32 %v3254_v7, %v7097_v13 }
 0x583   : > { %4980 = vmatpush.lsf.bf16.msrb.mxu1 %v4967_v30 }
 0x584   : > { %v3749_v40 = vmul.f32 %v7030_v3, %v7333_v41 }
 0x586   : > { %v7344_v50 = vadd.f32 %v7037_v12, %v3749_v40  ;;  %v4966_v40 = vld [vmem:[%s7567_s11 + $0x28] sm:$0xff] }
 0x587   : > { %v3303_v17 = vpop.f32.mrf.mxu2  ;;  %v3401_v46 = vpop.f32.mrf.mxu3  ;;  %4981 = vmatpush.lsf.bf16.msrb.mxu1 %v4966_v40 }
 0x588   : > { %v3256_v42 = vpop.f32.mrf.mxu1  ;;  %v3354_v25 = vpop.f32.mrf.mxu0  ;;  %v3304_v52 = vadd.f32 %v3303_v17, %v3255_v36  ;;  %v3402_v11 = vadd.f32 %v3401_v46, %v3353_v47  ;;  %v4965_v17 = vld [vmem:[%s7567_s11 + $0x20] sm:$0xff] }
 0x589   : > { %v3257_v8 = vadd.f32 %v3256_v42, %v7097_v13  ;;  %v3355_v7 = vadd.f32 %v3354_v25, %v7099_v2  ;;  %v7678_v25 = vld [vmem:[#allocation14_spill] sm:$0xff] }
 0x58a   : > { %v7357_v60 = vadd.f32 %v3304_v52, %v6817_v38  ;;  %v7360_v4 = vadd.f32 %v3402_v11, %v6820_v6  ;;  %v7676_v38 = vld [vmem:[#allocation24_spill] sm:$0xff]  ;;  %v7677_v11 = vld [vmem:[#allocation13_spill] sm:$0xff] }
 0x58b   : > { %4982 = vmatpush.lsf.bf16.msrb.mxu1 %v4965_v17 }
 0x58c   : > { %v3751_v52 = vmul.f32 %v7676_v38, %v7357_v60  ;;  %v3752_v6 = vmul.f32 %v7676_v38, %v7360_v4 }
 0x58f   : > { %v3305_v59 = vpop.f32.mrf.mxu2  ;;  %v3403_v55 = vpop.f32.mrf.mxu3 }
 0x590   : > { %v3306_v46 = vadd.f32 %v3305_v59, %v3257_v8  ;;  %v3404_v30 = vadd.f32 %v3403_v55, %v3355_v7  ;;  %v3259_v36 = vpop.f32.mrf.mxu1  ;;  %v3357_v47 = vpop.f32.mrf.mxu0  ;;  %v4964_v59 = vld [vmem:[%s7567_s11 + $0x18] sm:$0xff]  ;;  %v7681_v7 = vld [vmem:[#allocation27_spill] sm:$0xff] }
 0x591   : > { %4983 = vmatpush.lsf.bf16.msrb.mxu1 %v4964_v59  ;;  %v7680_v55 = vld [vmem:[#allocation26_spill] sm:$0xff]  ;;  %v4962_v59 = vld [vmem:[%s7567_s11 + $0x8] sm:$0xff] }
 0x592   : > { %v3437_v42 = vadd.f32 %v3306_v46, %v7677_v11  ;;  %v3438_v40 = vadd.f32 %v3404_v30, %v7678_v25  ;;  %v7379_v8 = vadd.f32 %v7680_v55, %v3752_v6  ;;  %v7385_v46 = vadd.f32 %v7680_v55, %v3751_v52 }
 0x593   : > { %v3260_v52 = vadd.f32 %v3259_v36, %v7097_v13 }
 0x594   : > { %v3753_v44 = vmul.f32 %v7679_v23, %v3437_v42  ;;  %v3754_v10 = vmul.f32 %v7679_v23, %v3438_v40  ;;  %v4963_v23 = vld [vmem:[%s7567_s11 + $0x10] sm:$0xff] }
 0x595   : > { %4984 = vmatpush.lsf.bf16.msrb.mxu1 %v4963_v23  ;;  %v4961_v23 = vld [vmem:[%s7567_s11] sm:$0xff] }
 0x596   : > { %v7382_v24 = vadd.f32 %v7681_v7, %v3754_v10  ;;  %v7388_v17 = vadd.f32 %v7681_v7, %v3753_v44  ;;  %v3358_v44 = vadd.f32 %v3357_v47, %v7099_v2  ;;  %v7682_v47 = vld [vmem:[#allocation15_spill] sm:$0xff] }
 0x597   : > { %v3308_v30 = vpop.f32.mrf.mxu2  ;;  %v3406_v38 = vpop.f32.mrf.mxu3 }
 0x598   : > { %v3261_v10 = vpop.f32.mrf.mxu1  ;;  %v3359_v25 = vpop.f32.mrf.mxu0  ;;  %v3309_v55 = vadd.f32 %v3308_v30, %v3260_v52  ;;  %v3407_v7 = vadd.f32 %v3406_v38, %v3358_v44  ;;  %v7685_v38 = vld [vmem:[#allocation18_spill] sm:$0xff] }
 0x599   : > { %v3262_v56 = vadd.f32 %v3261_v10, %v7097_v13  ;;  %v3360_v11 = vadd.f32 %v3359_v25, %v7099_v2  ;;  %4985 = vmatpush.lsf.bf16.msrb.mxu1 %v4962_v59 }
 0x59a   : > { %v3439_v63 = vadd.f32 %v3309_v55, %v7682_v47  ;;  %v3440_v21 = vadd.f32 %v3407_v7, %v7683_v26  ;;  %v7687_v55 = vld [vmem:[#allocation12_spill] sm:$0xff] }
 0x59d   : > { %4986 = vmatpush.lsf.bf16.msrb.mxu1 %v4961_v23 }
 0x59f   : > { %v3310_v22 = vpop.f32.mrf.mxu2  ;;  %v3408_v6 = vpop.f32.mrf.mxu3  ;;  %4987 = vllmr.2.mxu1 }
 0x5a0   : > { %v3311_v36 = vadd.f32 %v3310_v22, %v3262_v56  ;;  %v3409_v45 = vadd.f32 %v3408_v6, %v3360_v11  ;;  %v3350_v56 = vadd.f32 %v7318_v28, %v7099_v2  ;;  %v3348_v22 = vadd.f32 %v7285_v1, %v7099_v2  ;;  %v7686_v6 = vld [vmem:[#allocation11_spill] sm:$0xff] }
 0x5a1   : > { %v3475_v11 = vpack.c.bf16 %v3437_v42, %v7357_v60  ;;  %v3473_v2 = vpack.c.bf16 %v7333_v41, %v7325_v27  ;;  %v7689_v60 = vpack.c.bf16 %v7295_v62, %v7281_v32  ;;  %v7691_v41 = vpack.c.bf16 %v7247_v39, %v7235_v29  ;;  %v7694_v62 = vld [vmem:[#allocation21_spill] sm:$0xff]  ;;  %v7698_v39 = vld [vmem:[#allocation23_spill] sm:$0xff] }
 0x5a2   : > { %v3441_v30 = vadd.f32 %v3311_v36, %v7684_v35  ;;  %v3442_v52 = vadd.f32 %v3409_v45, %v7685_v38  ;;  %v3399_v26 = vadd.f32 %v7328_v34, %v3350_v56  ;;  %v3476_v35 = vpack.c.bf16 %v3438_v40, %v7360_v4 }
 0x5a3   : > { %v3397_v45 = vadd.f32 %v7315_v20, %v3348_v22  ;;  %v7688_v4 = vpack.c.bf16 %v7292_v16, %v7278_v43  ;;  %v3593_v1 = vsel %vm1037_vm2, %v7689_v60, 0  ;;  %v7690_v20 = vpack.c.bf16 %v7244_v14, %v7232_v61  ;;  %v7732_v60 = vld [vmem:[#allocation31_spill] sm:$0xff] }
 0x5a4   : > { %v3478_v13 = vpack.c.bf16 %v3442_v52, %v3440_v21  ;;  %v3477_v10 = vpack.c.bf16 %v3441_v30, %v3439_v63  ;;  %v3434_v44 = vadd.f32 %v3399_v26, %v7686_v6  ;;  %v3599_v59 = vsel %vm1037_vm2, %v3476_v35, 0  ;;  %v7720_v35 = vld [vmem:[#allocation35_spill] sm:$0xff]  ;;  %v7724_v6 = vld [vmem:[#allocation38_spill] sm:$0xff] }
 0x5a5   : > { %v3432_v7 = vadd.f32 %v3397_v45, %v7687_v55  ;;  %v3590_v27 = vsel %vm1037_vm2, %v7691_v41, 0  ;;  %v7692_v43 = vpack.c.bf16 %v7200_v5, %v7188_v51  ;;  %v7693_v32 = vpack.c.bf16 %v7203_v48, %v7191_v58  ;;  %v7697_v51 = vld [vmem:[#allocation20_spill] sm:$0xff]  ;;  %v7699_v58 = vld [vmem:[#allocation22_spill] sm:$0xff] }
 0x5a6   : > { %3604 = vmatpush.bf16.xpose.msra.mxu1 %v3477_v10  ;;  %v3602_v25 = vsel %vm1037_vm2, %v3478_v13, 0  ;;  %v3758_v42 = vmul.f32 %v7694_v62, %v3442_v52  ;;  %v7695_v61 = vpack.c.bf16 %v7156_v57, %v7144_v15  ;;  %v7696_v29 = vpack.c.bf16 %v7159_v19, %v7147_v9  ;;  %v7701_v9 = vld [vmem:[#allocation28_spill] sm:$0xff]  ;;  %v7711_v10 = vld [vmem:[#allocation45_spill] sm:$0xff]  ;;  %v7727_v55 = vld [vmem:[#allocation30_spill] sm:$0xff] }
 0x5a7   : > { %3617 = vmatpush.bf16.xpose.msrb.mxu2 %v3602_v25  ;;  %v3474_v28 = vpack.c.bf16 %v3434_v44, %v3432_v7  ;;  %v3587_v16 = vsel %vm1037_vm2, %v7693_v32, 0  ;;  %v3756_v5 = vmul.f32 %v7697_v51, %v3440_v21  ;;  %v3757_v23 = vmul.f32 %v7694_v62, %v3441_v30  ;;  %v7712_v25 = vld [vmem:[#allocation46_spill] sm:$0xff] }
 0x5a8   : > { %v3584_v14 = vsel %vm1037_vm2, %v7696_v29, 0  ;;  %v3886_v40 = vadd.f32 %v7698_v39, %v3758_v42  ;;  %v3750_v36 = vmul.f32 %v7030_v3, %v3434_v44  ;;  %v3755_v47 = vmul.f32 %v7697_v51, %v3439_v63 }
 0x5a9   : > { %v3596_v34 = vsel %vm1037_vm2, %v3474_v28, 0  ;;  %v3884_v48 = vadd.f32 %v7699_v58, %v3756_v5  ;;  %v7700_v15 = vpack.c.bf16 %v7118_v33, %v7106_v0  ;;  %v7702_v57 = vpack.c.bf16 %v7121_v49, %v7701_v9  ;;  %v3887_v28 = vld [vmem:[%s7571_s15] sm:$0xf] }
 0x5aa   : > { %v3748_v38 = vmul.f32 %v7028_v31, %v3432_v7  ;;  %v3885_v30 = vadd.f32 %v7698_v39, %v3757_v23  ;;  %v3883_v3 = vadd.f32 %v7699_v58, %v3755_v47  ;;  %v3878_v63 = vadd.f32 %v7037_v12, %v3750_v36 }
 0x5ab   : > { %v3581_v19 = vsel %vm1037_vm2, %v7702_v57, 0  ;;  %v3903_v21 = vpack.c.bf16 %v3886_v40, %v3884_v48  ;;  %v7703_v0 = vpack.c.bf16 %v7382_v24, %v7379_v8  ;;  %v7704_v52 = vpack.c.bf16 %v7388_v17, %v7385_v46  ;;  %v7706_v24 = vld [vmem:[#allocation47_spill] sm:$0xff]  ;;  %v7715_v17 = vld [vmem:[#allocation37_spill] sm:$0xff] }
 0x5ac   : > { %v3902_v33 = vpack.c.bf16 %v3885_v30, %v3883_v3  ;;  %v3876_v49 = vadd.f32 %v7034_v18, %v3748_v38  ;;  %v7705_v12 = vpack.c.bf16 %v7307_v54, %v7310_v37  ;;  %v7707_v18 = vpack.c.bf16 %v7344_v50, %v7706_v24  ;;  %v7708_v8 = vld [vmem:[#allocation43_spill] sm:$0xff]  ;;  %v7717_v54 = vld [vmem:[#allocation44_spill] sm:$0xff]  ;;  %v7718_v37 = vld [vmem:[#allocation42_spill] sm:$0xff] }
 0x5ad   : > { %v7713_v56 = vpack.c.bf16 %v7711_v10, %v7712_v25  ;;  %v7714_v46 = vld [vmem:[#allocation39_spill] sm:$0xff]  ;;  %v7719_v26 = vpack.c.bf16 %v7717_v54, %v7718_v37  ;;  %v7721_v50 = vld [vmem:[#allocation33_spill] sm:$0xff] }
 0x5ae   : > { %3605 = vmatpush.bf16.xpose.msra.mxu1 %v3475_v11  ;;  %v3899_v31 = vpack.c.bf16 %v3878_v63, %v3876_v49  ;;  %v7716_v22 = vpack.c.bf16 %v7714_v46, %v7715_v17  ;;  %v7722_v45 = vpack.c.bf16 %v7720_v35, %v7721_v50  ;;  %v7723_v11 = vld [vmem:[#allocation40_spill] sm:$0xff] }
 0x5af   : > { %3618 = vmatpush.bf16.xpose.msrb.mxu2 %v3599_v59  ;;  %v7725_v44 = vpack.c.bf16 %v7723_v11, %v7724_v6  ;;  %v7726_v59 = vld [vmem:[#allocation32_spill] sm:$0xff] }
 0x5b0   : > { %v7728_v7 = vpack.c.bf16 %v7726_v59, %v7727_v55 }
 0x5b6   : > { %3606 = vmatpush.bf16.xpose.msra.mxu1 %v3473_v2  ;;  %v7729_v2 = vld [vmem:[#allocation36_spill] sm:$0xff] }
 0x5b7   : > { %3619 = vmatpush.bf16.xpose.msrb.mxu2 %v3596_v34  ;;  %v7730_v34 = vld [vmem:[#allocation34_spill] sm:$0xff] }
 0x5be   : > { %3607 = vmatpush.bf16.xpose.msra.mxu1 %v7688_v4  ;;  %v7731_v4 = vpack.c.bf16 %v7729_v2, %v7730_v34 }
 0x5bf   : > { %3620 = vmatpush.bf16.xpose.msrb.mxu2 %v3593_v1  ;;  %v7733_v1 = vld [vmem:[#allocation29_spill] sm:$0xff] }
 0x5c6   : > { %3608 = vmatpush.bf16.xpose.msra.mxu1 %v7690_v20  ;;  %v7734_v20 = vpack.c.bf16 %v7732_v60, %v7733_v1 }
 0x5c7   : > { %3621 = vmatpush.bf16.xpose.msrb.mxu2 %v3590_v27  ;;  %v7735_v27 = vld [vmem:[#allocation19_spill] sm:$0xff] }
 0x5ce   : > { %3609 = vmatpush.bf16.xpose.msra.mxu1 %v7692_v43 }
 0x5cf   : > { %3622 = vmatpush.bf16.xpose.msrb.mxu2 %v3587_v16 }
 0x5d6   : > { %3610 = vmatpush.bf16.xpose.msra.mxu1 %v7695_v61  ;;  %v3909_v61 = vpop.permute.xlu2 %3908 }
 0x5d7   : > { %3623 = vmatpush.bf16.xpose.msrb.mxu2 %v3584_v14 }
 0x5de   : > { %3611 = vmatpush.bf16.xpose.msra.mxu1 %v7700_v15 }
 0x5df   : > { %3624 = vmatpush.bf16.xpose.msrb.mxu2 %v3581_v19 }
 0x5e5   : > { %4988 = vmatmul.lmr.bf16.vlgmr.msra.gmra.2.mxu1 }
 0x5e6   : > { %4826 = vmatmul.msk.bf16.vlgmr.msrb.gmra.mxu2 %vm1037_vm2, %v7265_v53  ;;  %3911 = vmatpush.bf16.msra.mxu1 %v3902_v33  ;;  %v7709_v53 = vld [vmem:[#allocation41_spill] sm:$0xff] }
 0x5e7   : > { %3924 = vmatpush.bf16.msra.mxu2 %v3903_v21  ;;  %v7710_v13 = vpack.c.bf16 %v7708_v8, %v7709_v53 }
 0x5ea   : > { %3912 = vmatpush.bf16.msra.mxu1 %v7704_v52 }
 0x5eb   : > { %3925 = vmatpush.bf16.msra.mxu2 %v7703_v0 }
 0x5ed   : > { %4989 = vmatmul.lmr.bf16.gmra.2.mxu1 }
 0x5ee   : > { %3913 = vmatpush.bf16.msra.mxu1 %v7707_v18 }
 0x5ef   : > { %3926 = vmatpush.bf16.msra.mxu2 %v3899_v31 }
 0x5f2   : > { %3914 = vmatpush.bf16.msra.mxu1 %v7713_v56 }
 0x5f3   : > { %3927 = vmatpush.bf16.msra.mxu2 %v7705_v12 }
 0x5f6   : > { %3915 = vmatpush.bf16.msra.mxu1 %v7719_v26 }
 0x5f7   : > { %3928 = vmatpush.bf16.msra.mxu2 %v7710_v13 }
 0x5fa   : > { %3916 = vmatpush.bf16.msra.mxu1 %v7725_v44 }
 0x5fb   : > { %3929 = vmatpush.bf16.msra.mxu2 %v7716_v22 }
 0x5fe   : > { %3917 = vmatpush.bf16.msra.mxu1 %v7731_v4 }
 0x5ff   : > { %3930 = vmatpush.bf16.msra.mxu2 %v7722_v45 }
 0x602   : > { %3918 = vmatpush.bf16.msra.mxu1 %v7734_v20 }
 0x603   : > { %3931 = vmatpush.bf16.msra.mxu2 %v7728_v7 }
 0x605   : > { %3919 = vmatmul.bf16.vlgmr.msra.gmra.mxu1 %v3887_v28 }
 0x606   : > { %3932 = vmatmul.bf16.vlgmr.msra.gmra.mxu2 %v3887_v28 }
 0x662   : > { %v3613_v41 = vpop.f32.mrf.mxu1 }
 0x663   : > { %v3614_v43 = vadd.f32 %v3613_v41, %v7735_v27 }
 0x669   : > { %v3626_v32 = vpop.f32.mrf.mxu2 }
 0x66a   : > { %v3627_v16 = vadd.f32 %v3626_v32, %v3614_v43  ;;  %v3615_v62 = vpop.f32.mrf.mxu1 }
 0x66c   : > { %3630 = vst [vmem:[%s632_s21] sm:$0xf] %v3627_v16  ;;  %s5058_s21 = scalar_lea.hbm %s7574_s18, 32 }
 0x66d   : > { %p5060_p2 = scmp.lt.s32.totalorder %s5058_s21, %s5054_s24 }
 0x66f   : > { %p5061_p3 = por %p5060_p2, %p5059_p1 }
 0x671   : > { %v3628_v42 = vpop.f32.mrf.mxu2  ;;  %p5062_p4 = pnand %p5061_p3, %p5057_p0 }
 0x682   : > { %v3920_v29 = vpop.f32.mrf.mxu1 }
 0x683   : > { %v3921_v51 = vadd.f32 %v3920_v29, %v3909_v61 }
 0x685   : > { %3937 = vst [vmem:[%s610_s29] sm:$0xff] %v3921_v51 }
 0x689   : > { %v3933_v14 = vpop.f32.mrf.mxu2 }
 0x68a   : > { %v3934_v5 = vadd.f32 %v3933_v14, %v3909_v61 }
 0x68c   : > { %3938 = vst.msk [vmem:[%s610_s29 + $0x8] sm:$0xff] %vm1037_vm2, %v3934_v5 }
 0x68d   : > { %5065 = shalt.err (!%p5062_p4)
}
 0x68e   : > { %4990 = dma.vmem_to_hbm [thread:$0]  (%p5242_p5), %s3961_s16, 256, %s3963_s26, %s3944_s20   ;;  %v3922_v39 = vpop.f32.mrf.mxu1 }
 0x691   : > { %v3935_v40 = vpop.f32.mrf.mxu2 }
 0x692 PF: > { %s7736_s1 = sld [smem:[#allocation6_spill]]  ;;  %p4996_p7 = scmp.ge.s32.totalorder %s5100_s19, 2 }
 0x694   : > { %p4993_p8 = pnand %p4996_p7, %p5246_p6 }
 0x696   : > { %p4994_p9 = pneg %p4993_p8 }
 0x698   : > { %s3981_s25 = sand.u32 1, %s7736_s1  }
 0x699   : > { %s3982_s29 = scalar_lea.sflag [#allocation4], %s3981_s25 }
 0x69a   : > { %5083 = dma.done.wait (%p4994_p9), %s3982_s29, 256  }
 0x69b   : > { %5085 = vsyncadd (%p4994_p9), %s3982_s29, 4294967040  ;;  %s7738_s19 = sld [smem:[#allocation8_spill]]  ;;  %s7741_s29 = smov %s5092_s30 }
 0x69c   : > { %s7739_s28 = sld [smem:[#allocation7_spill]] }
 0x69d   : > { %s7740_s0 = sld [smem:[#allocation9_spill]] }
 0x6a1   : > { %p31_p5 = scmp.ge.s32.totalorder %s7738_s19, 4  }
 0x6a2   : > { %s7742_s30 = smov %s7739_s28 }
 0x6a3   :  { %33 = sbr.rel (!%p31_p5) target bundleno = 8 (0x8), region = 149 }
 0x6a8   :  { %3988 = vsyncpa [#allocation4], 1 }
 0x6a9   :  { %3990 = vsyncpa [#allocation4 + $0x1], 1 }

</bundles_post_ra>
